<compile_context>
chip_gen: v6e
topology: v6e:2x2x1
jax: 0.10.0
libtpu: 0.0.40
codegen_flags: <defaults>
</compile_context>

<pallas_src>
import functools

import jax
import jax.numpy as jnp
from jax.experimental import pallas as pl
from jax.experimental.pallas import tpu as pltpu


# ---------------- LayerNorm + input projection (layer 0) --------------------
def _ln_proj_kernel(x_ref, g_ref, b_ref, w_ref, bias_ref, o_ref):
    # x_ref: (TSP, B, D) time-major block; w_ref: (D, 8H) bf16; o_ref: (TSP, B, 8H)
    x = x_ref[...]
    mean = jnp.mean(x, axis=-1, keepdims=True)
    var = jnp.mean((x - mean) ** 2, axis=-1, keepdims=True)
    xn = (x - mean) * jax.lax.rsqrt(var + 1e-5) * g_ref[...] + b_ref[...]
    ts, b, d = x.shape
    g8 = o_ref.shape[-1]
    y = jnp.dot(xn.reshape(ts * b, d).astype(jnp.bfloat16), w_ref[...],
                preferred_element_type=jnp.float32) + bias_ref[...]
    o_ref[...] = y.reshape(ts, b, g8)


def _proj_kernel(x_ref, w_ref, bias_ref, o_ref):
    # Same as above but without LayerNorm (LSTM layers >= 1).
    ts, b, d = x_ref.shape
    g8 = o_ref.shape[-1]
    y = jnp.dot(x_ref[...].reshape(ts * b, d).astype(jnp.bfloat16), w_ref[...],
                preferred_element_type=jnp.float32) + bias_ref[...]
    o_ref[...] = y.reshape(ts, b, g8)


def ln_project(x_tm, ln_g, ln_b, w_ih, bias, *, tsp):
    """x_tm: (T, B, D) time-major -> pre-gates (T, B, 8H) = LN(x) @ W_ih + b."""
    T, B, D = x_tm.shape
    G8 = w_ih.shape[1]
    assert T % tsp == 0
    return pl.pallas_call(
        _ln_proj_kernel,
        out_shape=jax.ShapeDtypeStruct((T, B, G8), jnp.float32),
        grid_spec=pltpu.PrefetchScalarGridSpec(
            num_scalar_prefetch=0,
            grid=(T // tsp,),
            in_specs=[
                pl.BlockSpec((tsp, B, D), lambda i: (i, 0, 0)),
                pl.BlockSpec((1, 1, D), lambda i: (0, 0, 0)),
                pl.BlockSpec((1, 1, D), lambda i: (0, 0, 0)),
                pl.BlockSpec((D, G8), lambda i: (0, 0)),
                pl.BlockSpec((1, G8), lambda i: (0, 0)),
            ],
            out_specs=pl.BlockSpec((tsp, B, G8), lambda i: (i, 0, 0)),
        ),
        compiler_params=pltpu.CompilerParams(
            dimension_semantics=("parallel",)),
    )(x_tm, ln_g.reshape(1, 1, D), ln_b.reshape(1, 1, D), w_ih, bias)


def project(x_tm, w_ih, bias, *, tsp):
    """x_tm: (T, B, Din) -> pre-gates (T, B, 8H) = x @ W_ih + b."""
    T, B, D = x_tm.shape
    G8 = w_ih.shape[1]
    assert T % tsp == 0
    return pl.pallas_call(
        _proj_kernel,
        out_shape=jax.ShapeDtypeStruct((T, B, G8), jnp.float32),
        grid_spec=pltpu.PrefetchScalarGridSpec(
            num_scalar_prefetch=0,
            grid=(T // tsp,),
            in_specs=[
                pl.BlockSpec((tsp, B, D), lambda i: (i, 0, 0)),
                pl.BlockSpec((D, G8), lambda i: (0, 0)),
                pl.BlockSpec((1, G8), lambda i: (0, 0)),
            ],
            out_specs=pl.BlockSpec((tsp, B, G8), lambda i: (i, 0, 0)),
        ),
        compiler_params=pltpu.CompilerParams(
            dimension_semantics=("parallel",)),
    )(x_tm, w_ih, bias)


# --------------- Fused bidirectional recurrent LSTM layer -------------------
def _bilstm_layer_kernel(g_ref, whh_ref, seq_ref, hfin_ref, h_sc, c_sc,
                         *, ts, hdim):
    # Grid = (direction d in {0 fwd, 1 bwd}, time-chunk i).
    # g_ref:    (ts, B, 4H) precomputed x-gates for this direction & chunk
    #           (the backward direction's index_map already picks the mirrored
    #            chunk; within-chunk reversal is done via `row` below).
    # whh_ref:  (1, H, 4H) bf16 recurrent weights for this direction
    # seq_ref:  (ts, B, H) slice of the (T, B, 2H) output (column block = d)
    # hfin_ref: (B, H) slice of the (B, 2H) final-hidden output
    d = pl.program_id(0)
    i = pl.program_id(1)
    nc = pl.num_programs(1)

    @pl.when(i == 0)
    def _():
        h_sc[...] = jnp.zeros_like(h_sc)
        c_sc[...] = jnp.zeros_like(c_sc)

    whh = whh_ref[0]  # (H, 4H) bf16, loop-invariant

    def step(s, carry):
        h, c = carry
        # forward: row = s ; backward: row = ts - 1 - s (process chunk reversed)
        row = (1 - d) * s + d * (ts - 1 - s)
        pre = g_ref[row]                                   # (B, 4H) f32
        rec = jnp.dot(h.astype(jnp.bfloat16), whh,
                      preferred_element_type=jnp.float32)  # (B, 4H) f32 acc
        gates = pre + rec
        i_g = jax.nn.sigmoid(gates[:, 0 * hdim:1 * hdim])
        f_g = jax.nn.sigmoid(gates[:, 1 * hdim:2 * hdim])
        g_g = jnp.tanh(gates[:, 2 * hdim:3 * hdim])
        o_g = jax.nn.sigmoid(gates[:, 3 * hdim:4 * hdim])
        c = f_g * c + i_g * g_g
        h = o_g * jnp.tanh(c)
        seq_ref[row] = h.astype(seq_ref.dtype)
        return h, c

    h, c = jax.lax.fori_loop(0, ts, step, (h_sc[...], c_sc[...]), unroll=True)
    h_sc[...] = h
    c_sc[...] = c

    @pl.when(i == nc - 1)
    def _():
        hfin_ref[...] = h.astype(hfin_ref.dtype)


def bilstm_layer(gates_tm, w_hh_stacked, *, ts):
    """gates_tm: (T, B, 8H) precomputed x-gates [fwd | bwd].
       w_hh_stacked: (2, H, 4H) bf16.
       Returns seq (T, B, 2H) = [h_fwd | h_bwd] and hfin (B, 2H)."""
    T, B, G8 = gates_tm.shape
    H4 = G8 // 2
    H = H4 // 4
    assert T % ts == 0
    nc = T // ts

    def g_map(d, i):
        # chunk i for fwd, mirrored chunk for bwd; column block = direction
        return ((1 - d) * i + d * (nc - 1 - i), 0, d)

    def seq_map(d, i):
        return ((1 - d) * i + d * (nc - 1 - i), 0, d)

    seq, hfin = pl.pallas_call(
        functools.partial(_bilstm_layer_kernel, ts=ts, hdim=H),
        out_shape=(jax.ShapeDtypeStruct((T, B, 2 * H), jnp.float32),
                   jax.ShapeDtypeStruct((B, 2 * H), jnp.float32)),
        grid_spec=pltpu.PrefetchScalarGridSpec(
            num_scalar_prefetch=0,
            grid=(2, nc),
            in_specs=[
                pl.BlockSpec((ts, B, H4), g_map),
                pl.BlockSpec((1, H, H4), lambda d, i: (d, 0, 0)),
            ],
            out_specs=[
                pl.BlockSpec((ts, B, H), seq_map),
                pl.BlockSpec((B, H), lambda d, i: (0, d)),
            ],
            scratch_shapes=[pltpu.VMEM((B, H), jnp.float32),
                            pltpu.VMEM((B, H), jnp.float32)]),
        compiler_params=pltpu.CompilerParams(
            # direction axis is independent -> megacore-parallel on v7x;
            # time-chunk axis is the sequential recurrence.
            dimension_semantics=("parallel", "arbitrary")),
    )(gates_tm, w_hh_stacked)
    return seq, hfin


# ------------------------------- Classifier ---------------------------------
def classifier_xla(h, p):
    # Tiny matmuls: plain XLA (a pallas_call here is pure launch overhead).
    z = jnp.maximum(jnp.dot(h, p["w1"]) + p["b1"], 0.0)
    z = ((z - p["bn_m"]) * jax.lax.rsqrt(p["bn_v"] + 1e-5)
         * p["bn_g"] + p["bn_b"])
    return jnp.dot(z, p["w2"]) + p["b2"]


# ------------------------------ Full forward --------------------------------
def foundation_lstm_forward(x, params, *, ts=8, tsp=8):
    B, T, D = x.shape
    # One small layout change to time-major up front; everything downstream
    # (reversal, direction-concat, final-hidden concat) is done in index_maps.
    x_tm = jnp.transpose(x, (1, 0, 2))  # (T, B, D)

    inp = x_tm
    hfin = None
    for li, lp in enumerate(params["lstm"]):
        w_ih = jnp.concatenate([lp["w_ih_f"], lp["w_ih_b"]],
                               axis=1).astype(jnp.bfloat16)      # (Din, 8H)
        bias = jnp.concatenate([lp["b_f"], lp["b_b"]], axis=1)    # (1, 8H) f32
        w_hh = jnp.stack([lp["w_hh_f"], lp["w_hh_b"]],
                         axis=0).astype(jnp.bfloat16)             # (2, H, 4H)
        if li == 0:
            gates = ln_project(inp, params["ln_g"], params["ln_b"],
                               w_ih, bias, tsp=tsp)
        else:
            gates = project(inp, w_ih, bias, tsp=tsp)
        seq, hfin = bilstm_layer(gates, w_hh, ts=ts)
        inp = seq  # (T, B, 2H) already [fwd | bwd] concatenated

    # hfin is already concat(h_fwd_last, h_bwd_last) of the last layer.
    return classifier_xla(hfin, params["cls"])


# --------------------------- Pure-JAX reference ------------------------------
def _lstm_ref(x_tbd, w_ih, w_hh, bias):
    T, B, _ = x_tbd.shape
    H = w_hh.shape[0]
    w_ih = w_ih.astype(jnp.bfloat16)
    w_hh = w_hh.astype(jnp.bfloat16)
    h = jnp.zeros((B, H), jnp.float32)
    c = jnp.zeros((B, H), jnp.float32)
    outs = []
    for t in range(T):
        gates = (jnp.dot(x_tbd[t].astype(jnp.bfloat16), w_ih,
                         preferred_element_type=jnp.float32)
                 + jnp.dot(h.astype(jnp.bfloat16), w_hh,
                           preferred_element_type=jnp.float32)
                 + bias[0])
        i = jax.nn.sigmoid(gates[:, :H])
        f = jax.nn.sigmoid(gates[:, H:2 * H])
        g = jnp.tanh(gates[:, 2 * H:3 * H])
        o = jax.nn.sigmoid(gates[:, 3 * H:])
        c = f * c + i * g
        h = o * jnp.tanh(c)
        outs.append(h)
    return jnp.stack(outs), h


def _forward_ref(x, params):
    B, T, D = x.shape
    x2 = x.reshape(B * T, D)
    mean = jnp.mean(x2, -1, keepdims=True)
    var = jnp.mean((x2 - mean) ** 2, -1, keepdims=True)
    xn = (x2 - mean) * jax.lax.rsqrt(var + 1e-5) * params["ln_g"] + params["ln_b"]
    h = jnp.transpose(xn.reshape(B, T, D), (1, 0, 2))
    for lp in params["lstm"]:
        fseq, fh = _lstm_ref(h, lp["w_ih_f"], lp["w_hh_f"], lp["b_f"])
        bseq, bh = _lstm_ref(h[::-1], lp["w_ih_b"], lp["w_hh_b"], lp["b_b"])
        h = jnp.concatenate([fseq, bseq[::-1]], axis=-1)
    fin = jnp.concatenate([fh, bh], axis=-1)
    return classifier_xla(fin, params["cls"])


# ------------------------------ Param init -----------------------------------
def init_params(key, D, H, C, num_layers=2):
    k = 1.0 / jnp.sqrt(H)
    keys = iter(jax.random.split(key, 8 * num_layers + 8))

    def u(shape):
        return jax.random.uniform(next(keys), shape, jnp.float32, -k, k)

    lstm_layers = []
    in_dim = D
    for _ in range(num_layers):
        lstm_layers.append(dict(
            w_ih_f=u((in_dim, 4 * H)), w_hh_f=u((H, 4 * H)), b_f=u((1, 4 * H)),
            w_ih_b=u((in_dim, 4 * H)), w_hh_b=u((H, 4 * H)), b_b=u((1, 4 * H)),
        ))
        in_dim = 2 * H

    cls = dict(
        w1=u((2 * H, H)), b1=u((1, H)),
        bn_g=jnp.ones((1, H), jnp.float32), bn_b=jnp.zeros((1, H), jnp.float32),
        bn_m=jnp.zeros((1, H), jnp.float32), bn_v=jnp.ones((1, H), jnp.float32),
        w2=u((H, C)), b2=u((1, C)),
    )
    return dict(
        ln_g=jnp.ones((D,), jnp.float32),
        ln_b=jnp.zeros((D,), jnp.float32),
        lstm=lstm_layers,
        cls=cls,
    )


if __name__ == "__main__":
    # (8,128)-aligned small shapes: B mult of 8, H mult of 128.
    B, T, D, H, C = 8, 16, 256, 128, 2
    key = jax.random.PRNGKey(0)
    kx, kp = jax.random.split(key)
    x = jax.random.normal(kx, (B, T, D), jnp.float32)
    params = init_params(kp, D, H, C, num_layers=2)

    fwd = jax.jit(functools.partial(foundation_lstm_forward, ts=8, tsp=8))
    logits = fwd(x, params)
    jax.block_until_ready(logits)

    ref = _forward_ref(x, params)
    assert logits.shape == (B, C)
    max_err = float(jnp.max(jnp.abs(logits - ref)))
    assert jnp.allclose(logits, ref, atol=1e-2, rtol=1e-2), (logits, ref, max_err)
    print("KERNEL_OK")
</pallas_src>

<mosaic_0001>
module attributes {stable_mosaic.version = 11 : i64} {
  func.func @_ln_proj_kernel(%arg0: i32, %arg1: memref<8x8x256xf32, #tpu.memory_space<vmem>>, %arg2: memref<1x1x256xf32, #tpu.memory_space<vmem>>, %arg3: memref<1x1x256xf32, #tpu.memory_space<vmem>>, %arg4: memref<256x1024xbf16, #tpu.memory_space<vmem>>, %arg5: memref<1x1024xf32, #tpu.memory_space<vmem>>, %arg6: memref<8x8x1024xf32, #tpu.memory_space<vmem>>) attributes {dimension_semantics = [#tpu.dimension_semantics<parallel>], iteration_bounds = array<i64: 2>, scalar_prefetch = 0 : i64, scratch_operands = 0 : i64, tpu.core_type = #tpu.core_type<tc>, window_params = [{transform_indices = @transform_0, window_bounds = array<i64: 8, 8, 256>}, {pipeline_mode = #tpu.pipeline_mode<synchronous>, transform_indices = @transform_1, window_bounds = array<i64: 1, 1, 256>}, {pipeline_mode = #tpu.pipeline_mode<synchronous>, transform_indices = @transform_2, window_bounds = array<i64: 1, 1, 256>}, {pipeline_mode = #tpu.pipeline_mode<synchronous>, transform_indices = @transform_3, window_bounds = array<i64: 256, 1024>}, {pipeline_mode = #tpu.pipeline_mode<synchronous>, transform_indices = @transform_4, window_bounds = array<i64: 1, 1024>}, {transform_indices = @transform_5, window_bounds = array<i64: 8, 8, 1024>}]} {
    %c0 = arith.constant 0 : index
    %c0_0 = arith.constant 0 : index
    %c0_1 = arith.constant 0 : index
    %0 = vector.load %arg1[%c0, %c0_0, %c0_1] : memref<8x8x256xf32, #tpu.memory_space<vmem>>, vector<8x8x256xf32>
    %cst = arith.constant dense<0.000000e+00> : vector<8x8xf32>
    %1 = vector.multi_reduction <add>, %0, %cst [2] : vector<8x8x256xf32> to vector<8x8xf32>
    %2 = vector.shape_cast %1 : vector<8x8xf32> to vector<8x8x1xf32>
    %cst_2 = arith.constant 2.560000e+02 : f32
    %3 = vector.broadcast %cst_2 : f32 to vector<8x8x1xf32>
    %4 = arith.divf %2, %3 : vector<8x8x1xf32>
    %5 = vector.broadcast %4 : vector<8x8x1xf32> to vector<8x8x256xf32>
    %6 = arith.subf %0, %5 : vector<8x8x256xf32>
    %7 = arith.mulf %6, %6 : vector<8x8x256xf32>
    %cst_3 = arith.constant dense<0.000000e+00> : vector<8x8xf32>
    %8 = vector.multi_reduction <add>, %7, %cst_3 [2] : vector<8x8x256xf32> to vector<8x8xf32>
    %9 = vector.shape_cast %8 : vector<8x8xf32> to vector<8x8x1xf32>
    %cst_4 = arith.constant 2.560000e+02 : f32
    %10 = vector.broadcast %cst_4 : f32 to vector<8x8x1xf32>
    %11 = arith.divf %9, %10 : vector<8x8x1xf32>
    %12 = vector.broadcast %4 : vector<8x8x1xf32> to vector<8x8x256xf32>
    %13 = arith.subf %0, %12 : vector<8x8x256xf32>
    %cst_5 = arith.constant 9.99999974E-6 : f32
    %14 = vector.broadcast %cst_5 : f32 to vector<8x8x1xf32>
    %15 = arith.addf %11, %14 : vector<8x8x1xf32>
    %16 = math.rsqrt %15 : vector<8x8x1xf32>
    %17 = vector.broadcast %16 : vector<8x8x1xf32> to vector<8x8x256xf32>
    %18 = arith.mulf %13, %17 : vector<8x8x256xf32>
    %c0_6 = arith.constant 0 : index
    %c0_7 = arith.constant 0 : index
    %c0_8 = arith.constant 0 : index
    %19 = vector.load %arg2[%c0_6, %c0_7, %c0_8] : memref<1x1x256xf32, #tpu.memory_space<vmem>>, vector<1x1x256xf32>
    %20 = vector.broadcast %19 : vector<1x1x256xf32> to vector<8x8x256xf32>
    %21 = arith.mulf %18, %20 : vector<8x8x256xf32>
    %c0_9 = arith.constant 0 : index
    %c0_10 = arith.constant 0 : index
    %c0_11 = arith.constant 0 : index
    %22 = vector.load %arg3[%c0_9, %c0_10, %c0_11] : memref<1x1x256xf32, #tpu.memory_space<vmem>>, vector<1x1x256xf32>
    %23 = vector.broadcast %22 : vector<1x1x256xf32> to vector<8x8x256xf32>
    %24 = arith.addf %21, %23 : vector<8x8x256xf32>
    %25 = vector.shape_cast %24 : vector<8x8x256xf32> to vector<64x256xf32>
    %26 = arith.truncf %25 : vector<64x256xf32> to vector<64x256xbf16>
    %c0_12 = arith.constant 0 : index
    %c0_13 = arith.constant 0 : index
    %27 = vector.load %arg4[%c0_12, %c0_13] : memref<256x1024xbf16, #tpu.memory_space<vmem>>, vector<256x1024xbf16>
    %cst_14 = arith.constant dense<0.000000e+00> : vector<64x1024xf32>
    %28 = tpu.matmul %26, %27, %cst_14 {dimension_numbers = #tpu.dot_dimension_numbers<[1], [0], [0], [1], [0, 0, 1, 1], [], []>} : vector<64x256xbf16>, vector<256x1024xbf16>, vector<64x1024xf32> -> vector<64x1024xf32>
    %c0_15 = arith.constant 0 : index
    %c0_16 = arith.constant 0 : index
    %29 = vector.load %arg5[%c0_15, %c0_16] : memref<1x1024xf32, #tpu.memory_space<vmem>>, vector<1x1024xf32>
    %30 = vector.broadcast %29 : vector<1x1024xf32> to vector<64x1024xf32>
    %31 = arith.addf %28, %30 : vector<64x1024xf32>
    %32 = vector.shape_cast %31 : vector<64x1024xf32> to vector<8x8x1024xf32>
    %c0_17 = arith.constant 0 : index
    %c0_18 = arith.constant 0 : index
    %c0_19 = arith.constant 0 : index
    %33 = vector.load %arg6[%c0_17, %c0_18, %c0_19] : memref<8x8x1024xf32, #tpu.memory_space<vmem>>, vector<8x8x1024xf32>
    tpu.vector_store %arg6[%c0_17, %c0_18, %c0_19], %32 {strides = array<i32>} : memref<8x8x1024xf32, #tpu.memory_space<vmem>>, vector<8x8x1024xf32>,
    return
  }
  func.func @transform_0(%arg0: i32) -> (i32, i32, i32) {
    %c0_i32 = arith.constant 0 : i32
    %c0_i32_0 = arith.constant 0 : i32
    %c0_i32_1 = arith.constant 0 : i32
    return %arg0, %c0_i32, %c0_i32_0 : i32, i32, i32
  }
  func.func @transform_1(%arg0: i32) -> (i32, i32, i32) {
    %c0_i32 = arith.constant 0 : i32
    %c0_i32_0 = arith.constant 0 : i32
    %c0_i32_1 = arith.constant 0 : i32
    %c0_i32_2 = arith.constant 0 : i32
    return %c0_i32, %c0_i32_0, %c0_i32_1 : i32, i32, i32
  }
  func.func @transform_2(%arg0: i32) -> (i32, i32, i32) {
    %c0_i32 = arith.constant 0 : i32
    %c0_i32_0 = arith.constant 0 : i32
    %c0_i32_1 = arith.constant 0 : i32
    %c0_i32_2 = arith.constant 0 : i32
    return %c0_i32, %c0_i32_0, %c0_i32_1 : i32, i32, i32
  }
  func.func @transform_3(%arg0: i32) -> (i32, i32) {
    %c0_i32 = arith.constant 0 : i32
    %c0_i32_0 = arith.constant 0 : i32
    %c0_i32_1 = arith.constant 0 : i32
    return %c0_i32, %c0_i32_0 : i32, i32
  }
  func.func @transform_4(%arg0: i32) -> (i32, i32) {
    %c0_i32 = arith.constant 0 : i32
    %c0_i32_0 = arith.constant 0 : i32
    %c0_i32_1 = arith.constant 0 : i32
    return %c0_i32, %c0_i32_0 : i32, i32
  }
  func.func @transform_5(%arg0: i32) -> (i32, i32, i32) {
    %c0_i32 = arith.constant 0 : i32
    %c0_i32_0 = arith.constant 0 : i32
    %c0_i32_1 = arith.constant 0 : i32
    return %arg0, %c0_i32, %c0_i32_0 : i32, i32, i32
  }
}

module attributes {stable_mosaic.version = 11 : i64} {
  func.func @_bilstm_layer_kernel(%arg0: i32, %arg1: i32, %arg2: memref<8x8x512xf32, #tpu.memory_space<vmem>>, %arg3: memref<1x128x512xbf16, #tpu.memory_space<vmem>>, %arg4: memref<8x8x128xf32, #tpu.memory_space<vmem>>, %arg5: memref<8x128xf32, #tpu.memory_space<vmem>>, %arg6: memref<8x128xf32, #tpu.memory_space<vmem>>, %arg7: memref<8x128xf32, #tpu.memory_space<vmem>>) attributes {dimension_semantics = [#tpu.dimension_semantics<parallel>, #tpu.dimension_semantics<arbitrary>], iteration_bounds = array<i64: 2, 2>, scalar_prefetch = 0 : i64, scratch_operands = 2 : i64, tpu.core_type = #tpu.core_type<tc>, window_params = [{transform_indices = @transform_0, window_bounds = array<i64: 8, 8, 512>}, {transform_indices = @transform_1, window_bounds = array<i64: 1, 128, 512>}, {transform_indices = @transform_2, window_bounds = array<i64: 8, 8, 128>}, {transform_indices = @transform_3, window_bounds = array<i64: 8, 128>}]} {
    %c0_i32 = arith.constant 0 : i32
    %0 = arith.cmpi eq, %arg1, %c0_i32 : i32
    %1 = arith.extui %0 : i1 to i32
    %c0_i32_0 = arith.constant 0 : i32
    %2 = arith.cmpi ne, %1, %c0_i32_0 : i32
    scf.if %2 {
      %cst_93 = arith.constant 0.000000e+00 : f32
      %332 = vector.broadcast %cst_93 : f32 to vector<8x128xf32>
      %c0_94 = arith.constant 0 : index
      %c0_95 = arith.constant 0 : index
      %333 = vector.load %arg6[%c0_94, %c0_95] : memref<8x128xf32, #tpu.memory_space<vmem>>, vector<8x128xf32>
      tpu.vector_store %arg6[%c0_94, %c0_95], %332 {strides = array<i32>} : memref<8x128xf32, #tpu.memory_space<vmem>>, vector<8x128xf32>,
      %cst_96 = arith.constant 0.000000e+00 : f32
      %334 = vector.broadcast %cst_96 : f32 to vector<8x128xf32>
      %c0_97 = arith.constant 0 : index
      %c0_98 = arith.constant 0 : index
      %335 = vector.load %arg7[%c0_97, %c0_98] : memref<8x128xf32, #tpu.memory_space<vmem>>, vector<8x128xf32>
      tpu.vector_store %arg7[%c0_97, %c0_98], %334 {strides = array<i32>} : memref<8x128xf32, #tpu.memory_space<vmem>>, vector<8x128xf32>,
    } else {
    }
    %c0 = arith.constant 0 : index
    %c0_1 = arith.constant 0 : index
    %c0_2 = arith.constant 0 : index
    %3 = vector.load %arg3[%c0, %c0_1, %c0_2] : memref<1x128x512xbf16, #tpu.memory_space<vmem>>, vector<1x128x512xbf16>
    %4 = vector.shape_cast %3 : vector<1x128x512xbf16> to vector<128x512xbf16>
    %c0_3 = arith.constant 0 : index
    %c0_4 = arith.constant 0 : index
    %5 = vector.load %arg6[%c0_3, %c0_4] : memref<8x128xf32, #tpu.memory_space<vmem>>, vector<8x128xf32>
    %c0_5 = arith.constant 0 : index
    %c0_6 = arith.constant 0 : index
    %6 = vector.load %arg7[%c0_5, %c0_6] : memref<8x128xf32, #tpu.memory_space<vmem>>, vector<8x128xf32>
    %c0_i32_7 = arith.constant 0 : i32
    %c1_i32 = arith.constant 1 : i32
    %7 = arith.subi %c1_i32, %arg0 : i32
    %8 = arith.muli %7, %c0_i32_7 : i32
    %c7_i32 = arith.constant 7 : i32
    %9 = arith.subi %c7_i32, %c0_i32_7 : i32
    %10 = arith.muli %arg0, %9 : i32
    %11 = arith.addi %8, %10 : i32
    %12 = arith.index_cast %11 : i32 to index
    %c0_8 = arith.constant 0 : index
    %c0_9 = arith.constant 0 : index
    %13 = vector.load %arg2[%12, %c0_8, %c0_9] : memref<8x8x512xf32, #tpu.memory_space<vmem>>, vector<1x8x512xf32>
    %14 = vector.shape_cast %13 : vector<1x8x512xf32> to vector<8x512xf32>
    %15 = arith.truncf %5 : vector<8x128xf32> to vector<8x128xbf16>
    %cst = arith.constant dense<0.000000e+00> : vector<8x512xf32>
    %16 = tpu.matmul %15, %4, %cst {dimension_numbers = #tpu.dot_dimension_numbers<[1], [0], [0], [1], [0, 0, 1, 1], [], []>} : vector<8x128xbf16>, vector<128x512xbf16>, vector<8x512xf32> -> vector<8x512xf32>
    %17 = arith.addf %14, %16 : vector<8x512xf32>
    %18 = vector.extract_strided_slice %17 {offsets = [0, 0], sizes = [8, 128], strides = [1, 1]} : vector<8x512xf32> to vector<8x128xf32>
    %19 = arith.negf %18 : vector<8x128xf32>
    %20 = math.exp %19 : vector<8x128xf32>
    %cst_10 = arith.constant 1.000000e+00 : f32
    %21 = vector.broadcast %cst_10 : f32 to vector<8x128xf32>
    %22 = arith.addf %21, %20 : vector<8x128xf32>
    %23 = arith.divf %21, %22 : vector<8x128xf32>
    %24 = vector.extract_strided_slice %17 {offsets = [0, 128], sizes = [8, 128], strides = [1, 1]} : vector<8x512xf32> to vector<8x128xf32>
    %25 = arith.negf %24 : vector<8x128xf32>
    %26 = math.exp %25 : vector<8x128xf32>
    %cst_11 = arith.constant 1.000000e+00 : f32
    %27 = vector.broadcast %cst_11 : f32 to vector<8x128xf32>
    %28 = arith.addf %27, %26 : vector<8x128xf32>
    %29 = arith.divf %27, %28 : vector<8x128xf32>
    %30 = vector.extract_strided_slice %17 {offsets = [0, 256], sizes = [8, 128], strides = [1, 1]} : vector<8x512xf32> to vector<8x128xf32>
    %31 = math.tanh %30 : vector<8x128xf32>
    %32 = vector.extract_strided_slice %17 {offsets = [0, 384], sizes = [8, 128], strides = [1, 1]} : vector<8x512xf32> to vector<8x128xf32>
    %33 = arith.negf %32 : vector<8x128xf32>
    %34 = math.exp %33 : vector<8x128xf32>
    %cst_12 = arith.constant 1.000000e+00 : f32
    %35 = vector.broadcast %cst_12 : f32 to vector<8x128xf32>
    %36 = arith.addf %35, %34 : vector<8x128xf32>
    %37 = arith.divf %35, %36 : vector<8x128xf32>
    %38 = arith.mulf %29, %6 : vector<8x128xf32>
    %39 = arith.mulf %23, %31 : vector<8x128xf32>
    %40 = arith.addf %38, %39 : vector<8x128xf32>
    %41 = math.tanh %40 : vector<8x128xf32>
    %42 = arith.mulf %37, %41 : vector<8x128xf32>
    %43 = arith.index_cast %11 : i32 to index
    %c0_13 = arith.constant 0 : index
    %c0_14 = arith.constant 0 : index
    %44 = vector.load %arg4[%43, %c0_13, %c0_14] : memref<8x8x128xf32, #tpu.memory_space<vmem>>, vector<1x8x128xf32>
    %45 = vector.shape_cast %44 : vector<1x8x128xf32> to vector<8x128xf32>
    %46 = vector.shape_cast %42 : vector<8x128xf32> to vector<1x8x128xf32>
    tpu.vector_store %arg4[%43, %c0_13, %c0_14], %46 {strides = array<i32>} : memref<8x8x128xf32, #tpu.memory_space<vmem>>, vector<1x8x128xf32>,
    %c1_i32_15 = arith.constant 1 : i32
    %c1_i32_16 = arith.constant 1 : i32
    %47 = arith.subi %c1_i32_16, %arg0 : i32
    %48 = arith.muli %47, %c1_i32_15 : i32
    %c7_i32_17 = arith.constant 7 : i32
    %49 = arith.subi %c7_i32_17, %c1_i32_15 : i32
    %50 = arith.muli %arg0, %49 : i32
    %51 = arith.addi %48, %50 : i32
    %52 = arith.index_cast %51 : i32 to index
    %c0_18 = arith.constant 0 : index
    %c0_19 = arith.constant 0 : index
    %53 = vector.load %arg2[%52, %c0_18, %c0_19] : memref<8x8x512xf32, #tpu.memory_space<vmem>>, vector<1x8x512xf32>
    %54 = vector.shape_cast %53 : vector<1x8x512xf32> to vector<8x512xf32>
    %55 = arith.truncf %42 : vector<8x128xf32> to vector<8x128xbf16>
    %cst_20 = arith.constant dense<0.000000e+00> : vector<8x512xf32>
    %56 = tpu.matmul %55, %4, %cst_20 {dimension_numbers = #tpu.dot_dimension_numbers<[1], [0], [0], [1], [0, 0, 1, 1], [], []>} : vector<8x128xbf16>, vector<128x512xbf16>, vector<8x512xf32> -> vector<8x512xf32>
    %57 = arith.addf %54, %56 : vector<8x512xf32>
    %58 = vector.extract_strided_slice %57 {offsets = [0, 0], sizes = [8, 128], strides = [1, 1]} : vector<8x512xf32> to vector<8x128xf32>
    %59 = arith.negf %58 : vector<8x128xf32>
    %60 = math.exp %59 : vector<8x128xf32>
    %cst_21 = arith.constant 1.000000e+00 : f32
    %61 = vector.broadcast %cst_21 : f32 to vector<8x128xf32>
    %62 = arith.addf %61, %60 : vector<8x128xf32>
    %63 = arith.divf %61, %62 : vector<8x128xf32>
    %64 = vector.extract_strided_slice %57 {offsets = [0, 128], sizes = [8, 128], strides = [1, 1]} : vector<8x512xf32> to vector<8x128xf32>
    %65 = arith.negf %64 : vector<8x128xf32>
    %66 = math.exp %65 : vector<8x128xf32>
    %cst_22 = arith.constant 1.000000e+00 : f32
    %67 = vector.broadcast %cst_22 : f32 to vector<8x128xf32>
    %68 = arith.addf %67, %66 : vector<8x128xf32>
    %69 = arith.divf %67, %68 : vector<8x128xf32>
    %70 = vector.extract_strided_slice %57 {offsets = [0, 256], sizes = [8, 128], strides = [1, 1]} : vector<8x512xf32> to vector<8x128xf32>
    %71 = math.tanh %70 : vector<8x128xf32>
    %72 = vector.extract_strided_slice %57 {offsets = [0, 384], sizes = [8, 128], strides = [1, 1]} : vector<8x512xf32> to vector<8x128xf32>
    %73 = arith.negf %72 : vector<8x128xf32>
    %74 = math.exp %73 : vector<8x128xf32>
    %cst_23 = arith.constant 1.000000e+00 : f32
    %75 = vector.broadcast %cst_23 : f32 to vector<8x128xf32>
    %76 = arith.addf %75, %74 : vector<8x128xf32>
    %77 = arith.divf %75, %76 : vector<8x128xf32>
    %78 = arith.mulf %69, %40 : vector<8x128xf32>
    %79 = arith.mulf %63, %71 : vector<8x128xf32>
    %80 = arith.addf %78, %79 : vector<8x128xf32>
    %81 = math.tanh %80 : vector<8x128xf32>
    %82 = arith.mulf %77, %81 : vector<8x128xf32>
    %83 = arith.index_cast %51 : i32 to index
    %c0_24 = arith.constant 0 : index
    %c0_25 = arith.constant 0 : index
    %84 = vector.load %arg4[%83, %c0_24, %c0_25] : memref<8x8x128xf32, #tpu.memory_space<vmem>>, vector<1x8x128xf32>
    %85 = vector.shape_cast %84 : vector<1x8x128xf32> to vector<8x128xf32>
    %86 = vector.shape_cast %82 : vector<8x128xf32> to vector<1x8x128xf32>
    tpu.vector_store %arg4[%83, %c0_24, %c0_25], %86 {strides = array<i32>} : memref<8x8x128xf32, #tpu.memory_space<vmem>>, vector<1x8x128xf32>,
    %c2_i32 = arith.constant 2 : i32
    %c1_i32_26 = arith.constant 1 : i32
    %87 = arith.subi %c1_i32_26, %arg0 : i32
    %88 = arith.muli %87, %c2_i32 : i32
    %c7_i32_27 = arith.constant 7 : i32
    %89 = arith.subi %c7_i32_27, %c2_i32 : i32
    %90 = arith.muli %arg0, %89 : i32
    %91 = arith.addi %88, %90 : i32
    %92 = arith.index_cast %91 : i32 to index
    %c0_28 = arith.constant 0 : index
    %c0_29 = arith.constant 0 : index
    %93 = vector.load %arg2[%92, %c0_28, %c0_29] : memref<8x8x512xf32, #tpu.memory_space<vmem>>, vector<1x8x512xf32>
    %94 = vector.shape_cast %93 : vector<1x8x512xf32> to vector<8x512xf32>
    %95 = arith.truncf %82 : vector<8x128xf32> to vector<8x128xbf16>
    %cst_30 = arith.constant dense<0.000000e+00> : vector<8x512xf32>
    %96 = tpu.matmul %95, %4, %cst_30 {dimension_numbers = #tpu.dot_dimension_numbers<[1], [0], [0], [1], [0, 0, 1, 1], [], []>} : vector<8x128xbf16>, vector<128x512xbf16>, vector<8x512xf32> -> vector<8x512xf32>
    %97 = arith.addf %94, %96 : vector<8x512xf32>
    %98 = vector.extract_strided_slice %97 {offsets = [0, 0], sizes = [8, 128], strides = [1, 1]} : vector<8x512xf32> to vector<8x128xf32>
    %99 = arith.negf %98 : vector<8x128xf32>
    %100 = math.exp %99 : vector<8x128xf32>
    %cst_31 = arith.constant 1.000000e+00 : f32
    %101 = vector.broadcast %cst_31 : f32 to vector<8x128xf32>
    %102 = arith.addf %101, %100 : vector<8x128xf32>
    %103 = arith.divf %101, %102 : vector<8x128xf32>
    %104 = vector.extract_strided_slice %97 {offsets = [0, 128], sizes = [8, 128], strides = [1, 1]} : vector<8x512xf32> to vector<8x128xf32>
    %105 = arith.negf %104 : vector<8x128xf32>
    %106 = math.exp %105 : vector<8x128xf32>
    %cst_32 = arith.constant 1.000000e+00 : f32
    %107 = vector.broadcast %cst_32 : f32 to vector<8x128xf32>
    %108 = arith.addf %107, %106 : vector<8x128xf32>
    %109 = arith.divf %107, %108 : vector<8x128xf32>
    %110 = vector.extract_strided_slice %97 {offsets = [0, 256], sizes = [8, 128], strides = [1, 1]} : vector<8x512xf32> to vector<8x128xf32>
    %111 = math.tanh %110 : vector<8x128xf32>
    %112 = vector.extract_strided_slice %97 {offsets = [0, 384], sizes = [8, 128], strides = [1, 1]} : vector<8x512xf32> to vector<8x128xf32>
    %113 = arith.negf %112 : vector<8x128xf32>
    %114 = math.exp %113 : vector<8x128xf32>
    %cst_33 = arith.constant 1.000000e+00 : f32
    %115 = vector.broadcast %cst_33 : f32 to vector<8x128xf32>
    %116 = arith.addf %115, %114 : vector<8x128xf32>
    %117 = arith.divf %115, %116 : vector<8x128xf32>
    %118 = arith.mulf %109, %80 : vector<8x128xf32>
    %119 = arith.mulf %103, %111 : vector<8x128xf32>
    %120 = arith.addf %118, %119 : vector<8x128xf32>
    %121 = math.tanh %120 : vector<8x128xf32>
    %122 = arith.mulf %117, %121 : vector<8x128xf32>
    %123 = arith.index_cast %91 : i32 to index
    %c0_34 = arith.constant 0 : index
    %c0_35 = arith.constant 0 : index
    %124 = vector.load %arg4[%123, %c0_34, %c0_35] : memref<8x8x128xf32, #tpu.memory_space<vmem>>, vector<1x8x128xf32>
    %125 = vector.shape_cast %124 : vector<1x8x128xf32> to vector<8x128xf32>
    %126 = vector.shape_cast %122 : vector<8x128xf32> to vector<1x8x128xf32>
    tpu.vector_store %arg4[%123, %c0_34, %c0_35], %126 {strides = array<i32>} : memref<8x8x128xf32, #tpu.memory_space<vmem>>, vector<1x8x128xf32>,
    %c3_i32 = arith.constant 3 : i32
    %c1_i32_36 = arith.constant 1 : i32
    %127 = arith.subi %c1_i32_36, %arg0 : i32
    %128 = arith.muli %127, %c3_i32 : i32
    %c7_i32_37 = arith.constant 7 : i32
    %129 = arith.subi %c7_i32_37, %c3_i32 : i32
    %130 = arith.muli %arg0, %129 : i32
    %131 = arith.addi %128, %130 : i32
    %132 = arith.index_cast %131 : i32 to index
    %c0_38 = arith.constant 0 : index
    %c0_39 = arith.constant 0 : index
    %133 = vector.load %arg2[%132, %c0_38, %c0_39] : memref<8x8x512xf32, #tpu.memory_space<vmem>>, vector<1x8x512xf32>
    %134 = vector.shape_cast %133 : vector<1x8x512xf32> to vector<8x512xf32>
    %135 = arith.truncf %122 : vector<8x128xf32> to vector<8x128xbf16>
    %cst_40 = arith.constant dense<0.000000e+00> : vector<8x512xf32>
    %136 = tpu.matmul %135, %4, %cst_40 {dimension_numbers = #tpu.dot_dimension_numbers<[1], [0], [0], [1], [0, 0, 1, 1], [], []>} : vector<8x128xbf16>, vector<128x512xbf16>, vector<8x512xf32> -> vector<8x512xf32>
    %137 = arith.addf %134, %136 : vector<8x512xf32>
    %138 = vector.extract_strided_slice %137 {offsets = [0, 0], sizes = [8, 128], strides = [1, 1]} : vector<8x512xf32> to vector<8x128xf32>
    %139 = arith.negf %138 : vector<8x128xf32>
    %140 = math.exp %139 : vector<8x128xf32>
    %cst_41 = arith.constant 1.000000e+00 : f32
    %141 = vector.broadcast %cst_41 : f32 to vector<8x128xf32>
    %142 = arith.addf %141, %140 : vector<8x128xf32>
    %143 = arith.divf %141, %142 : vector<8x128xf32>
    %144 = vector.extract_strided_slice %137 {offsets = [0, 128], sizes = [8, 128], strides = [1, 1]} : vector<8x512xf32> to vector<8x128xf32>
    %145 = arith.negf %144 : vector<8x128xf32>
    %146 = math.exp %145 : vector<8x128xf32>
    %cst_42 = arith.constant 1.000000e+00 : f32
    %147 = vector.broadcast %cst_42 : f32 to vector<8x128xf32>
    %148 = arith.addf %147, %146 : vector<8x128xf32>
    %149 = arith.divf %147, %148 : vector<8x128xf32>
    %150 = vector.extract_strided_slice %137 {offsets = [0, 256], sizes = [8, 128], strides = [1, 1]} : vector<8x512xf32> to vector<8x128xf32>
    %151 = math.tanh %150 : vector<8x128xf32>
    %152 = vector.extract_strided_slice %137 {offsets = [0, 384], sizes = [8, 128], strides = [1, 1]} : vector<8x512xf32> to vector<8x128xf32>
    %153 = arith.negf %152 : vector<8x128xf32>
    %154 = math.exp %153 : vector<8x128xf32>
    %cst_43 = arith.constant 1.000000e+00 : f32
    %155 = vector.broadcast %cst_43 : f32 to vector<8x128xf32>
    %156 = arith.addf %155, %154 : vector<8x128xf32>
    %157 = arith.divf %155, %156 : vector<8x128xf32>
    %158 = arith.mulf %149, %120 : vector<8x128xf32>
    %159 = arith.mulf %143, %151 : vector<8x128xf32>
    %160 = arith.addf %158, %159 : vector<8x128xf32>
    %161 = math.tanh %160 : vector<8x128xf32>
    %162 = arith.mulf %157, %161 : vector<8x128xf32>
    %163 = arith.index_cast %131 : i32 to index
    %c0_44 = arith.constant 0 : index
    %c0_45 = arith.constant 0 : index
    %164 = vector.load %arg4[%163, %c0_44, %c0_45] : memref<8x8x128xf32, #tpu.memory_space<vmem>>, vector<1x8x128xf32>
    %165 = vector.shape_cast %164 : vector<1x8x128xf32> to vector<8x128xf32>
    %166 = vector.shape_cast %162 : vector<8x128xf32> to vector<1x8x128xf32>
    tpu.vector_store %arg4[%163, %c0_44, %c0_45], %166 {strides = array<i32>} : memref<8x8x128xf32, #tpu.memory_space<vmem>>, vector<1x8x128xf32>,
    %c4_i32 = arith.constant 4 : i32
    %c1_i32_46 = arith.constant 1 : i32
    %167 = arith.subi %c1_i32_46, %arg0 : i32
    %168 = arith.muli %167, %c4_i32 : i32
    %c7_i32_47 = arith.constant 7 : i32
    %169 = arith.subi %c7_i32_47, %c4_i32 : i32
    %170 = arith.muli %arg0, %169 : i32
    %171 = arith.addi %168, %170 : i32
    %172 = arith.index_cast %171 : i32 to index
    %c0_48 = arith.constant 0 : index
    %c0_49 = arith.constant 0 : index
    %173 = vector.load %arg2[%172, %c0_48, %c0_49] : memref<8x8x512xf32, #tpu.memory_space<vmem>>, vector<1x8x512xf32>
    %174 = vector.shape_cast %173 : vector<1x8x512xf32> to vector<8x512xf32>
    %175 = arith.truncf %162 : vector<8x128xf32> to vector<8x128xbf16>
    %cst_50 = arith.constant dense<0.000000e+00> : vector<8x512xf32>
    %176 = tpu.matmul %175, %4, %cst_50 {dimension_numbers = #tpu.dot_dimension_numbers<[1], [0], [0], [1], [0, 0, 1, 1], [], []>} : vector<8x128xbf16>, vector<128x512xbf16>, vector<8x512xf32> -> vector<8x512xf32>
    %177 = arith.addf %174, %176 : vector<8x512xf32>
    %178 = vector.extract_strided_slice %177 {offsets = [0, 0], sizes = [8, 128], strides = [1, 1]} : vector<8x512xf32> to vector<8x128xf32>
    %179 = arith.negf %178 : vector<8x128xf32>
    %180 = math.exp %179 : vector<8x128xf32>
    %cst_51 = arith.constant 1.000000e+00 : f32
    %181 = vector.broadcast %cst_51 : f32 to vector<8x128xf32>
    %182 = arith.addf %181, %180 : vector<8x128xf32>
    %183 = arith.divf %181, %182 : vector<8x128xf32>
    %184 = vector.extract_strided_slice %177 {offsets = [0, 128], sizes = [8, 128], strides = [1, 1]} : vector<8x512xf32> to vector<8x128xf32>
    %185 = arith.negf %184 : vector<8x128xf32>
    %186 = math.exp %185 : vector<8x128xf32>
    %cst_52 = arith.constant 1.000000e+00 : f32
    %187 = vector.broadcast %cst_52 : f32 to vector<8x128xf32>
    %188 = arith.addf %187, %186 : vector<8x128xf32>
    %189 = arith.divf %187, %188 : vector<8x128xf32>
    %190 = vector.extract_strided_slice %177 {offsets = [0, 256], sizes = [8, 128], strides = [1, 1]} : vector<8x512xf32> to vector<8x128xf32>
    %191 = math.tanh %190 : vector<8x128xf32>
    %192 = vector.extract_strided_slice %177 {offsets = [0, 384], sizes = [8, 128], strides = [1, 1]} : vector<8x512xf32> to vector<8x128xf32>
    %193 = arith.negf %192 : vector<8x128xf32>
    %194 = math.exp %193 : vector<8x128xf32>
    %cst_53 = arith.constant 1.000000e+00 : f32
    %195 = vector.broadcast %cst_53 : f32 to vector<8x128xf32>
    %196 = arith.addf %195, %194 : vector<8x128xf32>
    %197 = arith.divf %195, %196 : vector<8x128xf32>
    %198 = arith.mulf %189, %160 : vector<8x128xf32>
    %199 = arith.mulf %183, %191 : vector<8x128xf32>
    %200 = arith.addf %198, %199 : vector<8x128xf32>
    %201 = math.tanh %200 : vector<8x128xf32>
    %202 = arith.mulf %197, %201 : vector<8x128xf32>
    %203 = arith.index_cast %171 : i32 to index
    %c0_54 = arith.constant 0 : index
    %c0_55 = arith.constant 0 : index
    %204 = vector.load %arg4[%203, %c0_54, %c0_55] : memref<8x8x128xf32, #tpu.memory_space<vmem>>, vector<1x8x128xf32>
    %205 = vector.shape_cast %204 : vector<1x8x128xf32> to vector<8x128xf32>
    %206 = vector.shape_cast %202 : vector<8x128xf32> to vector<1x8x128xf32>
    tpu.vector_store %arg4[%203, %c0_54, %c0_55], %206 {strides = array<i32>} : memref<8x8x128xf32, #tpu.memory_space<vmem>>, vector<1x8x128xf32>,
    %c5_i32 = arith.constant 5 : i32
    %c1_i32_56 = arith.constant 1 : i32
    %207 = arith.subi %c1_i32_56, %arg0 : i32
    %208 = arith.muli %207, %c5_i32 : i32
    %c7_i32_57 = arith.constant 7 : i32
    %209 = arith.subi %c7_i32_57, %c5_i32 : i32
    %210 = arith.muli %arg0, %209 : i32
    %211 = arith.addi %208, %210 : i32
    %212 = arith.index_cast %211 : i32 to index
    %c0_58 = arith.constant 0 : index
    %c0_59 = arith.constant 0 : index
    %213 = vector.load %arg2[%212, %c0_58, %c0_59] : memref<8x8x512xf32, #tpu.memory_space<vmem>>, vector<1x8x512xf32>
    %214 = vector.shape_cast %213 : vector<1x8x512xf32> to vector<8x512xf32>
    %215 = arith.truncf %202 : vector<8x128xf32> to vector<8x128xbf16>
    %cst_60 = arith.constant dense<0.000000e+00> : vector<8x512xf32>
    %216 = tpu.matmul %215, %4, %cst_60 {dimension_numbers = #tpu.dot_dimension_numbers<[1], [0], [0], [1], [0, 0, 1, 1], [], []>} : vector<8x128xbf16>, vector<128x512xbf16>, vector<8x512xf32> -> vector<8x512xf32>
    %217 = arith.addf %214, %216 : vector<8x512xf32>
    %218 = vector.extract_strided_slice %217 {offsets = [0, 0], sizes = [8, 128], strides = [1, 1]} : vector<8x512xf32> to vector<8x128xf32>
    %219 = arith.negf %218 : vector<8x128xf32>
    %220 = math.exp %219 : vector<8x128xf32>
    %cst_61 = arith.constant 1.000000e+00 : f32
    %221 = vector.broadcast %cst_61 : f32 to vector<8x128xf32>
    %222 = arith.addf %221, %220 : vector<8x128xf32>
    %223 = arith.divf %221, %222 : vector<8x128xf32>
    %224 = vector.extract_strided_slice %217 {offsets = [0, 128], sizes = [8, 128], strides = [1, 1]} : vector<8x512xf32> to vector<8x128xf32>
    %225 = arith.negf %224 : vector<8x128xf32>
    %226 = math.exp %225 : vector<8x128xf32>
    %cst_62 = arith.constant 1.000000e+00 : f32
    %227 = vector.broadcast %cst_62 : f32 to vector<8x128xf32>
    %228 = arith.addf %227, %226 : vector<8x128xf32>
    %229 = arith.divf %227, %228 : vector<8x128xf32>
    %230 = vector.extract_strided_slice %217 {offsets = [0, 256], sizes = [8, 128], strides = [1, 1]} : vector<8x512xf32> to vector<8x128xf32>
    %231 = math.tanh %230 : vector<8x128xf32>
    %232 = vector.extract_strided_slice %217 {offsets = [0, 384], sizes = [8, 128], strides = [1, 1]} : vector<8x512xf32> to vector<8x128xf32>
    %233 = arith.negf %232 : vector<8x128xf32>
    %234 = math.exp %233 : vector<8x128xf32>
    %cst_63 = arith.constant 1.000000e+00 : f32
    %235 = vector.broadcast %cst_63 : f32 to vector<8x128xf32>
    %236 = arith.addf %235, %234 : vector<8x128xf32>
    %237 = arith.divf %235, %236 : vector<8x128xf32>
    %238 = arith.mulf %229, %200 : vector<8x128xf32>
    %239 = arith.mulf %223, %231 : vector<8x128xf32>
    %240 = arith.addf %238, %239 : vector<8x128xf32>
    %241 = math.tanh %240 : vector<8x128xf32>
    %242 = arith.mulf %237, %241 : vector<8x128xf32>
    %243 = arith.index_cast %211 : i32 to index
    %c0_64 = arith.constant 0 : index
    %c0_65 = arith.constant 0 : index
    %244 = vector.load %arg4[%243, %c0_64, %c0_65] : memref<8x8x128xf32, #tpu.memory_space<vmem>>, vector<1x8x128xf32>
    %245 = vector.shape_cast %244 : vector<1x8x128xf32> to vector<8x128xf32>
    %246 = vector.shape_cast %242 : vector<8x128xf32> to vector<1x8x128xf32>
    tpu.vector_store %arg4[%243, %c0_64, %c0_65], %246 {strides = array<i32>} : memref<8x8x128xf32, #tpu.memory_space<vmem>>, vector<1x8x128xf32>,
    %c6_i32 = arith.constant 6 : i32
    %c1_i32_66 = arith.constant 1 : i32
    %247 = arith.subi %c1_i32_66, %arg0 : i32
    %248 = arith.muli %247, %c6_i32 : i32
    %c7_i32_67 = arith.constant 7 : i32
    %249 = arith.subi %c7_i32_67, %c6_i32 : i32
    %250 = arith.muli %arg0, %249 : i32
    %251 = arith.addi %248, %250 : i32
    %252 = arith.index_cast %251 : i32 to index
    %c0_68 = arith.constant 0 : index
    %c0_69 = arith.constant 0 : index
    %253 = vector.load %arg2[%252, %c0_68, %c0_69] : memref<8x8x512xf32, #tpu.memory_space<vmem>>, vector<1x8x512xf32>
    %254 = vector.shape_cast %253 : vector<1x8x512xf32> to vector<8x512xf32>
    %255 = arith.truncf %242 : vector<8x128xf32> to vector<8x128xbf16>
    %cst_70 = arith.constant dense<0.000000e+00> : vector<8x512xf32>
    %256 = tpu.matmul %255, %4, %cst_70 {dimension_numbers = #tpu.dot_dimension_numbers<[1], [0], [0], [1], [0, 0, 1, 1], [], []>} : vector<8x128xbf16>, vector<128x512xbf16>, vector<8x512xf32> -> vector<8x512xf32>
    %257 = arith.addf %254, %256 : vector<8x512xf32>
    %258 = vector.extract_strided_slice %257 {offsets = [0, 0], sizes = [8, 128], strides = [1, 1]} : vector<8x512xf32> to vector<8x128xf32>
    %259 = arith.negf %258 : vector<8x128xf32>
    %260 = math.exp %259 : vector<8x128xf32>
    %cst_71 = arith.constant 1.000000e+00 : f32
    %261 = vector.broadcast %cst_71 : f32 to vector<8x128xf32>
    %262 = arith.addf %261, %260 : vector<8x128xf32>
    %263 = arith.divf %261, %262 : vector<8x128xf32>
    %264 = vector.extract_strided_slice %257 {offsets = [0, 128], sizes = [8, 128], strides = [1, 1]} : vector<8x512xf32> to vector<8x128xf32>
    %265 = arith.negf %264 : vector<8x128xf32>
    %266 = math.exp %265 : vector<8x128xf32>
    %cst_72 = arith.constant 1.000000e+00 : f32
    %267 = vector.broadcast %cst_72 : f32 to vector<8x128xf32>
    %268 = arith.addf %267, %266 : vector<8x128xf32>
    %269 = arith.divf %267, %268 : vector<8x128xf32>
    %270 = vector.extract_strided_slice %257 {offsets = [0, 256], sizes = [8, 128], strides = [1, 1]} : vector<8x512xf32> to vector<8x128xf32>
    %271 = math.tanh %270 : vector<8x128xf32>
    %272 = vector.extract_strided_slice %257 {offsets = [0, 384], sizes = [8, 128], strides = [1, 1]} : vector<8x512xf32> to vector<8x128xf32>
    %273 = arith.negf %272 : vector<8x128xf32>
    %274 = math.exp %273 : vector<8x128xf32>
    %cst_73 = arith.constant 1.000000e+00 : f32
    %275 = vector.broadcast %cst_73 : f32 to vector<8x128xf32>
    %276 = arith.addf %275, %274 : vector<8x128xf32>
    %277 = arith.divf %275, %276 : vector<8x128xf32>
    %278 = arith.mulf %269, %240 : vector<8x128xf32>
    %279 = arith.mulf %263, %271 : vector<8x128xf32>
    %280 = arith.addf %278, %279 : vector<8x128xf32>
    %281 = math.tanh %280 : vector<8x128xf32>
    %282 = arith.mulf %277, %281 : vector<8x128xf32>
    %283 = arith.index_cast %251 : i32 to index
    %c0_74 = arith.constant 0 : index
    %c0_75 = arith.constant 0 : index
    %284 = vector.load %arg4[%283, %c0_74, %c0_75] : memref<8x8x128xf32, #tpu.memory_space<vmem>>, vector<1x8x128xf32>
    %285 = vector.shape_cast %284 : vector<1x8x128xf32> to vector<8x128xf32>
    %286 = vector.shape_cast %282 : vector<8x128xf32> to vector<1x8x128xf32>
    tpu.vector_store %arg4[%283, %c0_74, %c0_75], %286 {strides = array<i32>} : memref<8x8x128xf32, #tpu.memory_space<vmem>>, vector<1x8x128xf32>,
    %c7_i32_76 = arith.constant 7 : i32
    %c1_i32_77 = arith.constant 1 : i32
    %287 = arith.subi %c1_i32_77, %arg0 : i32
    %288 = arith.muli %287, %c7_i32_76 : i32
    %c7_i32_78 = arith.constant 7 : i32
    %289 = arith.subi %c7_i32_78, %c7_i32_76 : i32
    %290 = arith.muli %arg0, %289 : i32
    %291 = arith.addi %288, %290 : i32
    %292 = arith.index_cast %291 : i32 to index
    %c0_79 = arith.constant 0 : index
    %c0_80 = arith.constant 0 : index
    %293 = vector.load %arg2[%292, %c0_79, %c0_80] : memref<8x8x512xf32, #tpu.memory_space<vmem>>, vector<1x8x512xf32>
    %294 = vector.shape_cast %293 : vector<1x8x512xf32> to vector<8x512xf32>
    %295 = arith.truncf %282 : vector<8x128xf32> to vector<8x128xbf16>
    %cst_81 = arith.constant dense<0.000000e+00> : vector<8x512xf32>
    %296 = tpu.matmul %295, %4, %cst_81 {dimension_numbers = #tpu.dot_dimension_numbers<[1], [0], [0], [1], [0, 0, 1, 1], [], []>} : vector<8x128xbf16>, vector<128x512xbf16>, vector<8x512xf32> -> vector<8x512xf32>
    %297 = arith.addf %294, %296 : vector<8x512xf32>
    %298 = vector.extract_strided_slice %297 {offsets = [0, 0], sizes = [8, 128], strides = [1, 1]} : vector<8x512xf32> to vector<8x128xf32>
    %299 = arith.negf %298 : vector<8x128xf32>
    %300 = math.exp %299 : vector<8x128xf32>
    %cst_82 = arith.constant 1.000000e+00 : f32
    %301 = vector.broadcast %cst_82 : f32 to vector<8x128xf32>
    %302 = arith.addf %301, %300 : vector<8x128xf32>
    %303 = arith.divf %301, %302 : vector<8x128xf32>
    %304 = vector.extract_strided_slice %297 {offsets = [0, 128], sizes = [8, 128], strides = [1, 1]} : vector<8x512xf32> to vector<8x128xf32>
    %305 = arith.negf %304 : vector<8x128xf32>
    %306 = math.exp %305 : vector<8x128xf32>
    %cst_83 = arith.constant 1.000000e+00 : f32
    %307 = vector.broadcast %cst_83 : f32 to vector<8x128xf32>
    %308 = arith.addf %307, %306 : vector<8x128xf32>
    %309 = arith.divf %307, %308 : vector<8x128xf32>
    %310 = vector.extract_strided_slice %297 {offsets = [0, 256], sizes = [8, 128], strides = [1, 1]} : vector<8x512xf32> to vector<8x128xf32>
    %311 = math.tanh %310 : vector<8x128xf32>
    %312 = vector.extract_strided_slice %297 {offsets = [0, 384], sizes = [8, 128], strides = [1, 1]} : vector<8x512xf32> to vector<8x128xf32>
    %313 = arith.negf %312 : vector<8x128xf32>
    %314 = math.exp %313 : vector<8x128xf32>
    %cst_84 = arith.constant 1.000000e+00 : f32
    %315 = vector.broadcast %cst_84 : f32 to vector<8x128xf32>
    %316 = arith.addf %315, %314 : vector<8x128xf32>
    %317 = arith.divf %315, %316 : vector<8x128xf32>
    %318 = arith.mulf %309, %280 : vector<8x128xf32>
    %319 = arith.mulf %303, %311 : vector<8x128xf32>
    %320 = arith.addf %318, %319 : vector<8x128xf32>
    %321 = math.tanh %320 : vector<8x128xf32>
    %322 = arith.mulf %317, %321 : vector<8x128xf32>
    %323 = arith.index_cast %291 : i32 to index
    %c0_85 = arith.constant 0 : index
    %c0_86 = arith.constant 0 : index
    %324 = vector.load %arg4[%323, %c0_85, %c0_86] : memref<8x8x128xf32, #tpu.memory_space<vmem>>, vector<1x8x128xf32>
    %325 = vector.shape_cast %324 : vector<1x8x128xf32> to vector<8x128xf32>
    %326 = vector.shape_cast %322 : vector<8x128xf32> to vector<1x8x128xf32>
    tpu.vector_store %arg4[%323, %c0_85, %c0_86], %326 {strides = array<i32>} : memref<8x8x128xf32, #tpu.memory_space<vmem>>, vector<1x8x128xf32>,
    %c8_i32 = arith.constant 8 : i32
    %c0_87 = arith.constant 0 : index
    %c0_88 = arith.constant 0 : index
    %327 = vector.load %arg6[%c0_87, %c0_88] : memref<8x128xf32, #tpu.memory_space<vmem>>, vector<8x128xf32>
    tpu.vector_store %arg6[%c0_87, %c0_88], %322 {strides = array<i32>} : memref<8x128xf32, #tpu.memory_space<vmem>>, vector<8x128xf32>,
    %c0_89 = arith.constant 0 : index
    %c0_90 = arith.constant 0 : index
    %328 = vector.load %arg7[%c0_89, %c0_90] : memref<8x128xf32, #tpu.memory_space<vmem>>, vector<8x128xf32>
    tpu.vector_store %arg7[%c0_89, %c0_90], %320 {strides = array<i32>} : memref<8x128xf32, #tpu.memory_space<vmem>>, vector<8x128xf32>,
    %c1_i32_91 = arith.constant 1 : i32
    %329 = arith.cmpi eq, %arg1, %c1_i32_91 : i32
    %330 = arith.extui %329 : i1 to i32
    %c0_i32_92 = arith.constant 0 : i32
    %331 = arith.cmpi ne, %330, %c0_i32_92 : i32
    scf.if %331 {
      %c0_93 = arith.constant 0 : index
      %c0_94 = arith.constant 0 : index
      %332 = vector.load %arg5[%c0_93, %c0_94] : memref<8x128xf32, #tpu.memory_space<vmem>>, vector<8x128xf32>
      tpu.vector_store %arg5[%c0_93, %c0_94], %322 {strides = array<i32>} : memref<8x128xf32, #tpu.memory_space<vmem>>, vector<8x128xf32>,
    } else {
    }
    return
  }
  func.func @transform_0(%arg0: i32, %arg1: i32) -> (i32, i32, i32) {
    %c1_i32 = arith.constant 1 : i32
    %0 = arith.subi %c1_i32, %arg0 : i32
    %1 = arith.muli %0, %arg1 : i32
    %c1_i32_0 = arith.constant 1 : i32
    %2 = arith.subi %c1_i32_0, %arg1 : i32
    %3 = arith.muli %arg0, %2 : i32
    %4 = arith.addi %1, %3 : i32
    %c0_i32 = arith.constant 0 : i32
    %c0_i32_1 = arith.constant 0 : i32
    return %4, %c0_i32, %arg0 : i32, i32, i32
  }
  func.func @transform_1(%arg0: i32, %arg1: i32) -> (i32, i32, i32) {
    %c0_i32 = arith.constant 0 : i32
    %c0_i32_0 = arith.constant 0 : i32
    %c0_i32_1 = arith.constant 0 : i32
    return %arg0, %c0_i32, %c0_i32_0 : i32, i32, i32
  }
  func.func @transform_2(%arg0: i32, %arg1: i32) -> (i32, i32, i32) {
    %c1_i32 = arith.constant 1 : i32
    %0 = arith.subi %c1_i32, %arg0 : i32
    %1 = arith.muli %0, %arg1 : i32
    %c1_i32_0 = arith.constant 1 : i32
    %2 = arith.subi %c1_i32_0, %arg1 : i32
    %3 = arith.muli %arg0, %2 : i32
    %4 = arith.addi %1, %3 : i32
    %c0_i32 = arith.constant 0 : i32
    %c0_i32_1 = arith.constant 0 : i32
    return %4, %c0_i32, %arg0 : i32, i32, i32
  }
  func.func @transform_3(%arg0: i32, %arg1: i32) -> (i32, i32) {
    %c0_i32 = arith.constant 0 : i32
    %c0_i32_0 = arith.constant 0 : i32
    return %c0_i32, %arg0 : i32, i32
  }
}

module attributes {stable_mosaic.version = 11 : i64} {
  func.func @_proj_kernel(%arg0: i32, %arg1: memref<8x8x256xf32, #tpu.memory_space<vmem>>, %arg2: memref<256x1024xbf16, #tpu.memory_space<vmem>>, %arg3: memref<1x1024xf32, #tpu.memory_space<vmem>>, %arg4: memref<8x8x1024xf32, #tpu.memory_space<vmem>>) attributes {dimension_semantics = [#tpu.dimension_semantics<parallel>], iteration_bounds = array<i64: 2>, scalar_prefetch = 0 : i64, scratch_operands = 0 : i64, tpu.core_type = #tpu.core_type<tc>, window_params = [{transform_indices = @transform_0, window_bounds = array<i64: 8, 8, 256>}, {pipeline_mode = #tpu.pipeline_mode<synchronous>, transform_indices = @transform_1, window_bounds = array<i64: 256, 1024>}, {pipeline_mode = #tpu.pipeline_mode<synchronous>, transform_indices = @transform_2, window_bounds = array<i64: 1, 1024>}, {transform_indices = @transform_3, window_bounds = array<i64: 8, 8, 1024>}]} {
    %c0 = arith.constant 0 : index
    %c0_0 = arith.constant 0 : index
    %c0_1 = arith.constant 0 : index
    %0 = vector.load %arg1[%c0, %c0_0, %c0_1] : memref<8x8x256xf32, #tpu.memory_space<vmem>>, vector<8x8x256xf32>
    %1 = vector.shape_cast %0 : vector<8x8x256xf32> to vector<64x256xf32>
    %2 = arith.truncf %1 : vector<64x256xf32> to vector<64x256xbf16>
    %c0_2 = arith.constant 0 : index
    %c0_3 = arith.constant 0 : index
    %3 = vector.load %arg2[%c0_2, %c0_3] : memref<256x1024xbf16, #tpu.memory_space<vmem>>, vector<256x1024xbf16>
    %cst = arith.constant dense<0.000000e+00> : vector<64x1024xf32>
    %4 = tpu.matmul %2, %3, %cst {dimension_numbers = #tpu.dot_dimension_numbers<[1], [0], [0], [1], [0, 0, 1, 1], [], []>} : vector<64x256xbf16>, vector<256x1024xbf16>, vector<64x1024xf32> -> vector<64x1024xf32>
    %c0_4 = arith.constant 0 : index
    %c0_5 = arith.constant 0 : index
    %5 = vector.load %arg3[%c0_4, %c0_5] : memref<1x1024xf32, #tpu.memory_space<vmem>>, vector<1x1024xf32>
    %6 = vector.broadcast %5 : vector<1x1024xf32> to vector<64x1024xf32>
    %7 = arith.addf %4, %6 : vector<64x1024xf32>
    %8 = vector.shape_cast %7 : vector<64x1024xf32> to vector<8x8x1024xf32>
    %c0_6 = arith.constant 0 : index
    %c0_7 = arith.constant 0 : index
    %c0_8 = arith.constant 0 : index
    %9 = vector.load %arg4[%c0_6, %c0_7, %c0_8] : memref<8x8x1024xf32, #tpu.memory_space<vmem>>, vector<8x8x1024xf32>
    tpu.vector_store %arg4[%c0_6, %c0_7, %c0_8], %8 {strides = array<i32>} : memref<8x8x1024xf32, #tpu.memory_space<vmem>>, vector<8x8x1024xf32>,
    return
  }
  func.func @transform_0(%arg0: i32) -> (i32, i32, i32) {
    %c0_i32 = arith.constant 0 : i32
    %c0_i32_0 = arith.constant 0 : i32
    %c0_i32_1 = arith.constant 0 : i32
    return %arg0, %c0_i32, %c0_i32_0 : i32, i32, i32
  }
  func.func @transform_1(%arg0: i32) -> (i32, i32) {
    %c0_i32 = arith.constant 0 : i32
    %c0_i32_0 = arith.constant 0 : i32
    %c0_i32_1 = arith.constant 0 : i32
    return %c0_i32, %c0_i32_0 : i32, i32
  }
  func.func @transform_2(%arg0: i32) -> (i32, i32) {
    %c0_i32 = arith.constant 0 : i32
    %c0_i32_0 = arith.constant 0 : i32
    %c0_i32_1 = arith.constant 0 : i32
    return %c0_i32, %c0_i32_0 : i32, i32
  }
  func.func @transform_3(%arg0: i32) -> (i32, i32, i32) {
    %c0_i32 = arith.constant 0 : i32
    %c0_i32_0 = arith.constant 0 : i32
    %c0_i32_1 = arith.constant 0 : i32
    return %arg0, %c0_i32, %c0_i32_0 : i32, i32, i32
  }
}

module attributes {stable_mosaic.version = 11 : i64} {
  func.func @_bilstm_layer_kernel(%arg0: i32, %arg1: i32, %arg2: memref<8x8x512xf32, #tpu.memory_space<vmem>>, %arg3: memref<1x128x512xbf16, #tpu.memory_space<vmem>>, %arg4: memref<8x8x128xf32, #tpu.memory_space<vmem>>, %arg5: memref<8x128xf32, #tpu.memory_space<vmem>>, %arg6: memref<8x128xf32, #tpu.memory_space<vmem>>, %arg7: memref<8x128xf32, #tpu.memory_space<vmem>>) attributes {dimension_semantics = [#tpu.dimension_semantics<parallel>, #tpu.dimension_semantics<arbitrary>], iteration_bounds = array<i64: 2, 2>, scalar_prefetch = 0 : i64, scratch_operands = 2 : i64, tpu.core_type = #tpu.core_type<tc>, window_params = [{transform_indices = @transform_0, window_bounds = array<i64: 8, 8, 512>}, {transform_indices = @transform_1, window_bounds = array<i64: 1, 128, 512>}, {transform_indices = @transform_2, window_bounds = array<i64: 8, 8, 128>}, {transform_indices = @transform_3, window_bounds = array<i64: 8, 128>}]} {
    %c0_i32 = arith.constant 0 : i32
    %0 = arith.cmpi eq, %arg1, %c0_i32 : i32
    %1 = arith.extui %0 : i1 to i32
    %c0_i32_0 = arith.constant 0 : i32
    %2 = arith.cmpi ne, %1, %c0_i32_0 : i32
    scf.if %2 {
      %cst_93 = arith.constant 0.000000e+00 : f32
      %332 = vector.broadcast %cst_93 : f32 to vector<8x128xf32>
      %c0_94 = arith.constant 0 : index
      %c0_95 = arith.constant 0 : index
      %333 = vector.load %arg6[%c0_94, %c0_95] : memref<8x128xf32, #tpu.memory_space<vmem>>, vector<8x128xf32>
      tpu.vector_store %arg6[%c0_94, %c0_95], %332 {strides = array<i32>} : memref<8x128xf32, #tpu.memory_space<vmem>>, vector<8x128xf32>,
      %cst_96 = arith.constant 0.000000e+00 : f32
      %334 = vector.broadcast %cst_96 : f32 to vector<8x128xf32>
      %c0_97 = arith.constant 0 : index
      %c0_98 = arith.constant 0 : index
      %335 = vector.load %arg7[%c0_97, %c0_98] : memref<8x128xf32, #tpu.memory_space<vmem>>, vector<8x128xf32>
      tpu.vector_store %arg7[%c0_97, %c0_98], %334 {strides = array<i32>} : memref<8x128xf32, #tpu.memory_space<vmem>>, vector<8x128xf32>,
    } else {
    }
    %c0 = arith.constant 0 : index
    %c0_1 = arith.constant 0 : index
    %c0_2 = arith.constant 0 : index
    %3 = vector.load %arg3[%c0, %c0_1, %c0_2] : memref<1x128x512xbf16, #tpu.memory_space<vmem>>, vector<1x128x512xbf16>
    %4 = vector.shape_cast %3 : vector<1x128x512xbf16> to vector<128x512xbf16>
    %c0_3 = arith.constant 0 : index
    %c0_4 = arith.constant 0 : index
    %5 = vector.load %arg6[%c0_3, %c0_4] : memref<8x128xf32, #tpu.memory_space<vmem>>, vector<8x128xf32>
    %c0_5 = arith.constant 0 : index
    %c0_6 = arith.constant 0 : index
    %6 = vector.load %arg7[%c0_5, %c0_6] : memref<8x128xf32, #tpu.memory_space<vmem>>, vector<8x128xf32>
    %c0_i32_7 = arith.constant 0 : i32
    %c1_i32 = arith.constant 1 : i32
    %7 = arith.subi %c1_i32, %arg0 : i32
    %8 = arith.muli %7, %c0_i32_7 : i32
    %c7_i32 = arith.constant 7 : i32
    %9 = arith.subi %c7_i32, %c0_i32_7 : i32
    %10 = arith.muli %arg0, %9 : i32
    %11 = arith.addi %8, %10 : i32
    %12 = arith.index_cast %11 : i32 to index
    %c0_8 = arith.constant 0 : index
    %c0_9 = arith.constant 0 : index
    %13 = vector.load %arg2[%12, %c0_8, %c0_9] : memref<8x8x512xf32, #tpu.memory_space<vmem>>, vector<1x8x512xf32>
    %14 = vector.shape_cast %13 : vector<1x8x512xf32> to vector<8x512xf32>
    %15 = arith.truncf %5 : vector<8x128xf32> to vector<8x128xbf16>
    %cst = arith.constant dense<0.000000e+00> : vector<8x512xf32>
    %16 = tpu.matmul %15, %4, %cst {dimension_numbers = #tpu.dot_dimension_numbers<[1], [0], [0], [1], [0, 0, 1, 1], [], []>} : vector<8x128xbf16>, vector<128x512xbf16>, vector<8x512xf32> -> vector<8x512xf32>
    %17 = arith.addf %14, %16 : vector<8x512xf32>
    %18 = vector.extract_strided_slice %17 {offsets = [0, 0], sizes = [8, 128], strides = [1, 1]} : vector<8x512xf32> to vector<8x128xf32>
    %19 = arith.negf %18 : vector<8x128xf32>
    %20 = math.exp %19 : vector<8x128xf32>
    %cst_10 = arith.constant 1.000000e+00 : f32
    %21 = vector.broadcast %cst_10 : f32 to vector<8x128xf32>
    %22 = arith.addf %21, %20 : vector<8x128xf32>
    %23 = arith.divf %21, %22 : vector<8x128xf32>
    %24 = vector.extract_strided_slice %17 {offsets = [0, 128], sizes = [8, 128], strides = [1, 1]} : vector<8x512xf32> to vector<8x128xf32>
    %25 = arith.negf %24 : vector<8x128xf32>
    %26 = math.exp %25 : vector<8x128xf32>
    %cst_11 = arith.constant 1.000000e+00 : f32
    %27 = vector.broadcast %cst_11 : f32 to vector<8x128xf32>
    %28 = arith.addf %27, %26 : vector<8x128xf32>
    %29 = arith.divf %27, %28 : vector<8x128xf32>
    %30 = vector.extract_strided_slice %17 {offsets = [0, 256], sizes = [8, 128], strides = [1, 1]} : vector<8x512xf32> to vector<8x128xf32>
    %31 = math.tanh %30 : vector<8x128xf32>
    %32 = vector.extract_strided_slice %17 {offsets = [0, 384], sizes = [8, 128], strides = [1, 1]} : vector<8x512xf32> to vector<8x128xf32>
    %33 = arith.negf %32 : vector<8x128xf32>
    %34 = math.exp %33 : vector<8x128xf32>
    %cst_12 = arith.constant 1.000000e+00 : f32
    %35 = vector.broadcast %cst_12 : f32 to vector<8x128xf32>
    %36 = arith.addf %35, %34 : vector<8x128xf32>
    %37 = arith.divf %35, %36 : vector<8x128xf32>
    %38 = arith.mulf %29, %6 : vector<8x128xf32>
    %39 = arith.mulf %23, %31 : vector<8x128xf32>
    %40 = arith.addf %38, %39 : vector<8x128xf32>
    %41 = math.tanh %40 : vector<8x128xf32>
    %42 = arith.mulf %37, %41 : vector<8x128xf32>
    %43 = arith.index_cast %11 : i32 to index
    %c0_13 = arith.constant 0 : index
    %c0_14 = arith.constant 0 : index
    %44 = vector.load %arg4[%43, %c0_13, %c0_14] : memref<8x8x128xf32, #tpu.memory_space<vmem>>, vector<1x8x128xf32>
    %45 = vector.shape_cast %44 : vector<1x8x128xf32> to vector<8x128xf32>
    %46 = vector.shape_cast %42 : vector<8x128xf32> to vector<1x8x128xf32>
    tpu.vector_store %arg4[%43, %c0_13, %c0_14], %46 {strides = array<i32>} : memref<8x8x128xf32, #tpu.memory_space<vmem>>, vector<1x8x128xf32>,
    %c1_i32_15 = arith.constant 1 : i32
    %c1_i32_16 = arith.constant 1 : i32
    %47 = arith.subi %c1_i32_16, %arg0 : i32
    %48 = arith.muli %47, %c1_i32_15 : i32
    %c7_i32_17 = arith.constant 7 : i32
    %49 = arith.subi %c7_i32_17, %c1_i32_15 : i32
    %50 = arith.muli %arg0, %49 : i32
    %51 = arith.addi %48, %50 : i32
    %52 = arith.index_cast %51 : i32 to index
    %c0_18 = arith.constant 0 : index
    %c0_19 = arith.constant 0 : index
    %53 = vector.load %arg2[%52, %c0_18, %c0_19] : memref<8x8x512xf32, #tpu.memory_space<vmem>>, vector<1x8x512xf32>
    %54 = vector.shape_cast %53 : vector<1x8x512xf32> to vector<8x512xf32>
    %55 = arith.truncf %42 : vector<8x128xf32> to vector<8x128xbf16>
    %cst_20 = arith.constant dense<0.000000e+00> : vector<8x512xf32>
    %56 = tpu.matmul %55, %4, %cst_20 {dimension_numbers = #tpu.dot_dimension_numbers<[1], [0], [0], [1], [0, 0, 1, 1], [], []>} : vector<8x128xbf16>, vector<128x512xbf16>, vector<8x512xf32> -> vector<8x512xf32>
    %57 = arith.addf %54, %56 : vector<8x512xf32>
    %58 = vector.extract_strided_slice %57 {offsets = [0, 0], sizes = [8, 128], strides = [1, 1]} : vector<8x512xf32> to vector<8x128xf32>
    %59 = arith.negf %58 : vector<8x128xf32>
    %60 = math.exp %59 : vector<8x128xf32>
    %cst_21 = arith.constant 1.000000e+00 : f32
    %61 = vector.broadcast %cst_21 : f32 to vector<8x128xf32>
    %62 = arith.addf %61, %60 : vector<8x128xf32>
    %63 = arith.divf %61, %62 : vector<8x128xf32>
    %64 = vector.extract_strided_slice %57 {offsets = [0, 128], sizes = [8, 128], strides = [1, 1]} : vector<8x512xf32> to vector<8x128xf32>
    %65 = arith.negf %64 : vector<8x128xf32>
    %66 = math.exp %65 : vector<8x128xf32>
    %cst_22 = arith.constant 1.000000e+00 : f32
    %67 = vector.broadcast %cst_22 : f32 to vector<8x128xf32>
    %68 = arith.addf %67, %66 : vector<8x128xf32>
    %69 = arith.divf %67, %68 : vector<8x128xf32>
    %70 = vector.extract_strided_slice %57 {offsets = [0, 256], sizes = [8, 128], strides = [1, 1]} : vector<8x512xf32> to vector<8x128xf32>
    %71 = math.tanh %70 : vector<8x128xf32>
    %72 = vector.extract_strided_slice %57 {offsets = [0, 384], sizes = [8, 128], strides = [1, 1]} : vector<8x512xf32> to vector<8x128xf32>
    %73 = arith.negf %72 : vector<8x128xf32>
    %74 = math.exp %73 : vector<8x128xf32>
    %cst_23 = arith.constant 1.000000e+00 : f32
    %75 = vector.broadcast %cst_23 : f32 to vector<8x128xf32>
    %76 = arith.addf %75, %74 : vector<8x128xf32>
    %77 = arith.divf %75, %76 : vector<8x128xf32>
    %78 = arith.mulf %69, %40 : vector<8x128xf32>
    %79 = arith.mulf %63, %71 : vector<8x128xf32>
    %80 = arith.addf %78, %79 : vector<8x128xf32>
    %81 = math.tanh %80 : vector<8x128xf32>
    %82 = arith.mulf %77, %81 : vector<8x128xf32>
    %83 = arith.index_cast %51 : i32 to index
    %c0_24 = arith.constant 0 : index
    %c0_25 = arith.constant 0 : index
    %84 = vector.load %arg4[%83, %c0_24, %c0_25] : memref<8x8x128xf32, #tpu.memory_space<vmem>>, vector<1x8x128xf32>
    %85 = vector.shape_cast %84 : vector<1x8x128xf32> to vector<8x128xf32>
    %86 = vector.shape_cast %82 : vector<8x128xf32> to vector<1x8x128xf32>
    tpu.vector_store %arg4[%83, %c0_24, %c0_25], %86 {strides = array<i32>} : memref<8x8x128xf32, #tpu.memory_space<vmem>>, vector<1x8x128xf32>,
    %c2_i32 = arith.constant 2 : i32
    %c1_i32_26 = arith.constant 1 : i32
    %87 = arith.subi %c1_i32_26, %arg0 : i32
    %88 = arith.muli %87, %c2_i32 : i32
    %c7_i32_27 = arith.constant 7 : i32
    %89 = arith.subi %c7_i32_27, %c2_i32 : i32
    %90 = arith.muli %arg0, %89 : i32
    %91 = arith.addi %88, %90 : i32
    %92 = arith.index_cast %91 : i32 to index
    %c0_28 = arith.constant 0 : index
    %c0_29 = arith.constant 0 : index
    %93 = vector.load %arg2[%92, %c0_28, %c0_29] : memref<8x8x512xf32, #tpu.memory_space<vmem>>, vector<1x8x512xf32>
    %94 = vector.shape_cast %93 : vector<1x8x512xf32> to vector<8x512xf32>
    %95 = arith.truncf %82 : vector<8x128xf32> to vector<8x128xbf16>
    %cst_30 = arith.constant dense<0.000000e+00> : vector<8x512xf32>
    %96 = tpu.matmul %95, %4, %cst_30 {dimension_numbers = #tpu.dot_dimension_numbers<[1], [0], [0], [1], [0, 0, 1, 1], [], []>} : vector<8x128xbf16>, vector<128x512xbf16>, vector<8x512xf32> -> vector<8x512xf32>
    %97 = arith.addf %94, %96 : vector<8x512xf32>
    %98 = vector.extract_strided_slice %97 {offsets = [0, 0], sizes = [8, 128], strides = [1, 1]} : vector<8x512xf32> to vector<8x128xf32>
    %99 = arith.negf %98 : vector<8x128xf32>
    %100 = math.exp %99 : vector<8x128xf32>
    %cst_31 = arith.constant 1.000000e+00 : f32
    %101 = vector.broadcast %cst_31 : f32 to vector<8x128xf32>
    %102 = arith.addf %101, %100 : vector<8x128xf32>
    %103 = arith.divf %101, %102 : vector<8x128xf32>
    %104 = vector.extract_strided_slice %97 {offsets = [0, 128], sizes = [8, 128], strides = [1, 1]} : vector<8x512xf32> to vector<8x128xf32>
    %105 = arith.negf %104 : vector<8x128xf32>
    %106 = math.exp %105 : vector<8x128xf32>
    %cst_32 = arith.constant 1.000000e+00 : f32
    %107 = vector.broadcast %cst_32 : f32 to vector<8x128xf32>
    %108 = arith.addf %107, %106 : vector<8x128xf32>
    %109 = arith.divf %107, %108 : vector<8x128xf32>
    %110 = vector.extract_strided_slice %97 {offsets = [0, 256], sizes = [8, 128], strides = [1, 1]} : vector<8x512xf32> to vector<8x128xf32>
    %111 = math.tanh %110 : vector<8x128xf32>
    %112 = vector.extract_strided_slice %97 {offsets = [0, 384], sizes = [8, 128], strides = [1, 1]} : vector<8x512xf32> to vector<8x128xf32>
    %113 = arith.negf %112 : vector<8x128xf32>
    %114 = math.exp %113 : vector<8x128xf32>
    %cst_33 = arith.constant 1.000000e+00 : f32
    %115 = vector.broadcast %cst_33 : f32 to vector<8x128xf32>
    %116 = arith.addf %115, %114 : vector<8x128xf32>
    %117 = arith.divf %115, %116 : vector<8x128xf32>
    %118 = arith.mulf %109, %80 : vector<8x128xf32>
    %119 = arith.mulf %103, %111 : vector<8x128xf32>
    %120 = arith.addf %118, %119 : vector<8x128xf32>
    %121 = math.tanh %120 : vector<8x128xf32>
    %122 = arith.mulf %117, %121 : vector<8x128xf32>
    %123 = arith.index_cast %91 : i32 to index
    %c0_34 = arith.constant 0 : index
    %c0_35 = arith.constant 0 : index
    %124 = vector.load %arg4[%123, %c0_34, %c0_35] : memref<8x8x128xf32, #tpu.memory_space<vmem>>, vector<1x8x128xf32>
    %125 = vector.shape_cast %124 : vector<1x8x128xf32> to vector<8x128xf32>
    %126 = vector.shape_cast %122 : vector<8x128xf32> to vector<1x8x128xf32>
    tpu.vector_store %arg4[%123, %c0_34, %c0_35], %126 {strides = array<i32>} : memref<8x8x128xf32, #tpu.memory_space<vmem>>, vector<1x8x128xf32>,
    %c3_i32 = arith.constant 3 : i32
    %c1_i32_36 = arith.constant 1 : i32
    %127 = arith.subi %c1_i32_36, %arg0 : i32
    %128 = arith.muli %127, %c3_i32 : i32
    %c7_i32_37 = arith.constant 7 : i32
    %129 = arith.subi %c7_i32_37, %c3_i32 : i32
    %130 = arith.muli %arg0, %129 : i32
    %131 = arith.addi %128, %130 : i32
    %132 = arith.index_cast %131 : i32 to index
    %c0_38 = arith.constant 0 : index
    %c0_39 = arith.constant 0 : index
    %133 = vector.load %arg2[%132, %c0_38, %c0_39] : memref<8x8x512xf32, #tpu.memory_space<vmem>>, vector<1x8x512xf32>
    %134 = vector.shape_cast %133 : vector<1x8x512xf32> to vector<8x512xf32>
    %135 = arith.truncf %122 : vector<8x128xf32> to vector<8x128xbf16>
    %cst_40 = arith.constant dense<0.000000e+00> : vector<8x512xf32>
    %136 = tpu.matmul %135, %4, %cst_40 {dimension_numbers = #tpu.dot_dimension_numbers<[1], [0], [0], [1], [0, 0, 1, 1], [], []>} : vector<8x128xbf16>, vector<128x512xbf16>, vector<8x512xf32> -> vector<8x512xf32>
    %137 = arith.addf %134, %136 : vector<8x512xf32>
    %138 = vector.extract_strided_slice %137 {offsets = [0, 0], sizes = [8, 128], strides = [1, 1]} : vector<8x512xf32> to vector<8x128xf32>
    %139 = arith.negf %138 : vector<8x128xf32>
    %140 = math.exp %139 : vector<8x128xf32>
    %cst_41 = arith.constant 1.000000e+00 : f32
    %141 = vector.broadcast %cst_41 : f32 to vector<8x128xf32>
    %142 = arith.addf %141, %140 : vector<8x128xf32>
    %143 = arith.divf %141, %142 : vector<8x128xf32>
    %144 = vector.extract_strided_slice %137 {offsets = [0, 128], sizes = [8, 128], strides = [1, 1]} : vector<8x512xf32> to vector<8x128xf32>
    %145 = arith.negf %144 : vector<8x128xf32>
    %146 = math.exp %145 : vector<8x128xf32>
    %cst_42 = arith.constant 1.000000e+00 : f32
    %147 = vector.broadcast %cst_42 : f32 to vector<8x128xf32>
    %148 = arith.addf %147, %146 : vector<8x128xf32>
    %149 = arith.divf %147, %148 : vector<8x128xf32>
    %150 = vector.extract_strided_slice %137 {offsets = [0, 256], sizes = [8, 128], strides = [1, 1]} : vector<8x512xf32> to vector<8x128xf32>
    %151 = math.tanh %150 : vector<8x128xf32>
    %152 = vector.extract_strided_slice %137 {offsets = [0, 384], sizes = [8, 128], strides = [1, 1]} : vector<8x512xf32> to vector<8x128xf32>
    %153 = arith.negf %152 : vector<8x128xf32>
    %154 = math.exp %153 : vector<8x128xf32>
    %cst_43 = arith.constant 1.000000e+00 : f32
    %155 = vector.broadcast %cst_43 : f32 to vector<8x128xf32>
    %156 = arith.addf %155, %154 : vector<8x128xf32>
    %157 = arith.divf %155, %156 : vector<8x128xf32>
    %158 = arith.mulf %149, %120 : vector<8x128xf32>
    %159 = arith.mulf %143, %151 : vector<8x128xf32>
    %160 = arith.addf %158, %159 : vector<8x128xf32>
    %161 = math.tanh %160 : vector<8x128xf32>
    %162 = arith.mulf %157, %161 : vector<8x128xf32>
    %163 = arith.index_cast %131 : i32 to index
    %c0_44 = arith.constant 0 : index
    %c0_45 = arith.constant 0 : index
    %164 = vector.load %arg4[%163, %c0_44, %c0_45] : memref<8x8x128xf32, #tpu.memory_space<vmem>>, vector<1x8x128xf32>
    %165 = vector.shape_cast %164 : vector<1x8x128xf32> to vector<8x128xf32>
    %166 = vector.shape_cast %162 : vector<8x128xf32> to vector<1x8x128xf32>
    tpu.vector_store %arg4[%163, %c0_44, %c0_45], %166 {strides = array<i32>} : memref<8x8x128xf32, #tpu.memory_space<vmem>>, vector<1x8x128xf32>,
    %c4_i32 = arith.constant 4 : i32
    %c1_i32_46 = arith.constant 1 : i32
    %167 = arith.subi %c1_i32_46, %arg0 : i32
    %168 = arith.muli %167, %c4_i32 : i32
    %c7_i32_47 = arith.constant 7 : i32
    %169 = arith.subi %c7_i32_47, %c4_i32 : i32
    %170 = arith.muli %arg0, %169 : i32
    %171 = arith.addi %168, %170 : i32
    %172 = arith.index_cast %171 : i32 to index
    %c0_48 = arith.constant 0 : index
    %c0_49 = arith.constant 0 : index
    %173 = vector.load %arg2[%172, %c0_48, %c0_49] : memref<8x8x512xf32, #tpu.memory_space<vmem>>, vector<1x8x512xf32>
    %174 = vector.shape_cast %173 : vector<1x8x512xf32> to vector<8x512xf32>
    %175 = arith.truncf %162 : vector<8x128xf32> to vector<8x128xbf16>
    %cst_50 = arith.constant dense<0.000000e+00> : vector<8x512xf32>
    %176 = tpu.matmul %175, %4, %cst_50 {dimension_numbers = #tpu.dot_dimension_numbers<[1], [0], [0], [1], [0, 0, 1, 1], [], []>} : vector<8x128xbf16>, vector<128x512xbf16>, vector<8x512xf32> -> vector<8x512xf32>
    %177 = arith.addf %174, %176 : vector<8x512xf32>
    %178 = vector.extract_strided_slice %177 {offsets = [0, 0], sizes = [8, 128], strides = [1, 1]} : vector<8x512xf32> to vector<8x128xf32>
    %179 = arith.negf %178 : vector<8x128xf32>
    %180 = math.exp %179 : vector<8x128xf32>
    %cst_51 = arith.constant 1.000000e+00 : f32
    %181 = vector.broadcast %cst_51 : f32 to vector<8x128xf32>
    %182 = arith.addf %181, %180 : vector<8x128xf32>
    %183 = arith.divf %181, %182 : vector<8x128xf32>
    %184 = vector.extract_strided_slice %177 {offsets = [0, 128], sizes = [8, 128], strides = [1, 1]} : vector<8x512xf32> to vector<8x128xf32>
    %185 = arith.negf %184 : vector<8x128xf32>
    %186 = math.exp %185 : vector<8x128xf32>
    %cst_52 = arith.constant 1.000000e+00 : f32
    %187 = vector.broadcast %cst_52 : f32 to vector<8x128xf32>
    %188 = arith.addf %187, %186 : vector<8x128xf32>
    %189 = arith.divf %187, %188 : vector<8x128xf32>
    %190 = vector.extract_strided_slice %177 {offsets = [0, 256], sizes = [8, 128], strides = [1, 1]} : vector<8x512xf32> to vector<8x128xf32>
    %191 = math.tanh %190 : vector<8x128xf32>
    %192 = vector.extract_strided_slice %177 {offsets = [0, 384], sizes = [8, 128], strides = [1, 1]} : vector<8x512xf32> to vector<8x128xf32>
    %193 = arith.negf %192 : vector<8x128xf32>
    %194 = math.exp %193 : vector<8x128xf32>
    %cst_53 = arith.constant 1.000000e+00 : f32
    %195 = vector.broadcast %cst_53 : f32 to vector<8x128xf32>
    %196 = arith.addf %195, %194 : vector<8x128xf32>
    %197 = arith.divf %195, %196 : vector<8x128xf32>
    %198 = arith.mulf %189, %160 : vector<8x128xf32>
    %199 = arith.mulf %183, %191 : vector<8x128xf32>
    %200 = arith.addf %198, %199 : vector<8x128xf32>
    %201 = math.tanh %200 : vector<8x128xf32>
    %202 = arith.mulf %197, %201 : vector<8x128xf32>
    %203 = arith.index_cast %171 : i32 to index
    %c0_54 = arith.constant 0 : index
    %c0_55 = arith.constant 0 : index
    %204 = vector.load %arg4[%203, %c0_54, %c0_55] : memref<8x8x128xf32, #tpu.memory_space<vmem>>, vector<1x8x128xf32>
    %205 = vector.shape_cast %204 : vector<1x8x128xf32> to vector<8x128xf32>
    %206 = vector.shape_cast %202 : vector<8x128xf32> to vector<1x8x128xf32>
    tpu.vector_store %arg4[%203, %c0_54, %c0_55], %206 {strides = array<i32>} : memref<8x8x128xf32, #tpu.memory_space<vmem>>, vector<1x8x128xf32>,
    %c5_i32 = arith.constant 5 : i32
    %c1_i32_56 = arith.constant 1 : i32
    %207 = arith.subi %c1_i32_56, %arg0 : i32
    %208 = arith.muli %207, %c5_i32 : i32
    %c7_i32_57 = arith.constant 7 : i32
    %209 = arith.subi %c7_i32_57, %c5_i32 : i32
    %210 = arith.muli %arg0, %209 : i32
    %211 = arith.addi %208, %210 : i32
    %212 = arith.index_cast %211 : i32 to index
    %c0_58 = arith.constant 0 : index
    %c0_59 = arith.constant 0 : index
    %213 = vector.load %arg2[%212, %c0_58, %c0_59] : memref<8x8x512xf32, #tpu.memory_space<vmem>>, vector<1x8x512xf32>
    %214 = vector.shape_cast %213 : vector<1x8x512xf32> to vector<8x512xf32>
    %215 = arith.truncf %202 : vector<8x128xf32> to vector<8x128xbf16>
    %cst_60 = arith.constant dense<0.000000e+00> : vector<8x512xf32>
    %216 = tpu.matmul %215, %4, %cst_60 {dimension_numbers = #tpu.dot_dimension_numbers<[1], [0], [0], [1], [0, 0, 1, 1], [], []>} : vector<8x128xbf16>, vector<128x512xbf16>, vector<8x512xf32> -> vector<8x512xf32>
    %217 = arith.addf %214, %216 : vector<8x512xf32>
    %218 = vector.extract_strided_slice %217 {offsets = [0, 0], sizes = [8, 128], strides = [1, 1]} : vector<8x512xf32> to vector<8x128xf32>
    %219 = arith.negf %218 : vector<8x128xf32>
    %220 = math.exp %219 : vector<8x128xf32>
    %cst_61 = arith.constant 1.000000e+00 : f32
    %221 = vector.broadcast %cst_61 : f32 to vector<8x128xf32>
    %222 = arith.addf %221, %220 : vector<8x128xf32>
    %223 = arith.divf %221, %222 : vector<8x128xf32>
    %224 = vector.extract_strided_slice %217 {offsets = [0, 128], sizes = [8, 128], strides = [1, 1]} : vector<8x512xf32> to vector<8x128xf32>
    %225 = arith.negf %224 : vector<8x128xf32>
    %226 = math.exp %225 : vector<8x128xf32>
    %cst_62 = arith.constant 1.000000e+00 : f32
    %227 = vector.broadcast %cst_62 : f32 to vector<8x128xf32>
    %228 = arith.addf %227, %226 : vector<8x128xf32>
    %229 = arith.divf %227, %228 : vector<8x128xf32>
    %230 = vector.extract_strided_slice %217 {offsets = [0, 256], sizes = [8, 128], strides = [1, 1]} : vector<8x512xf32> to vector<8x128xf32>
    %231 = math.tanh %230 : vector<8x128xf32>
    %232 = vector.extract_strided_slice %217 {offsets = [0, 384], sizes = [8, 128], strides = [1, 1]} : vector<8x512xf32> to vector<8x128xf32>
    %233 = arith.negf %232 : vector<8x128xf32>
    %234 = math.exp %233 : vector<8x128xf32>
    %cst_63 = arith.constant 1.000000e+00 : f32
    %235 = vector.broadcast %cst_63 : f32 to vector<8x128xf32>
    %236 = arith.addf %235, %234 : vector<8x128xf32>
    %237 = arith.divf %235, %236 : vector<8x128xf32>
    %238 = arith.mulf %229, %200 : vector<8x128xf32>
    %239 = arith.mulf %223, %231 : vector<8x128xf32>
    %240 = arith.addf %238, %239 : vector<8x128xf32>
    %241 = math.tanh %240 : vector<8x128xf32>
    %242 = arith.mulf %237, %241 : vector<8x128xf32>
    %243 = arith.index_cast %211 : i32 to index
    %c0_64 = arith.constant 0 : index
    %c0_65 = arith.constant 0 : index
    %244 = vector.load %arg4[%243, %c0_64, %c0_65] : memref<8x8x128xf32, #tpu.memory_space<vmem>>, vector<1x8x128xf32>
    %245 = vector.shape_cast %244 : vector<1x8x128xf32> to vector<8x128xf32>
    %246 = vector.shape_cast %242 : vector<8x128xf32> to vector<1x8x128xf32>
    tpu.vector_store %arg4[%243, %c0_64, %c0_65], %246 {strides = array<i32>} : memref<8x8x128xf32, #tpu.memory_space<vmem>>, vector<1x8x128xf32>,
    %c6_i32 = arith.constant 6 : i32
    %c1_i32_66 = arith.constant 1 : i32
    %247 = arith.subi %c1_i32_66, %arg0 : i32
    %248 = arith.muli %247, %c6_i32 : i32
    %c7_i32_67 = arith.constant 7 : i32
    %249 = arith.subi %c7_i32_67, %c6_i32 : i32
    %250 = arith.muli %arg0, %249 : i32
    %251 = arith.addi %248, %250 : i32
    %252 = arith.index_cast %251 : i32 to index
    %c0_68 = arith.constant 0 : index
    %c0_69 = arith.constant 0 : index
    %253 = vector.load %arg2[%252, %c0_68, %c0_69] : memref<8x8x512xf32, #tpu.memory_space<vmem>>, vector<1x8x512xf32>
    %254 = vector.shape_cast %253 : vector<1x8x512xf32> to vector<8x512xf32>
    %255 = arith.truncf %242 : vector<8x128xf32> to vector<8x128xbf16>
    %cst_70 = arith.constant dense<0.000000e+00> : vector<8x512xf32>
    %256 = tpu.matmul %255, %4, %cst_70 {dimension_numbers = #tpu.dot_dimension_numbers<[1], [0], [0], [1], [0, 0, 1, 1], [], []>} : vector<8x128xbf16>, vector<128x512xbf16>, vector<8x512xf32> -> vector<8x512xf32>
    %257 = arith.addf %254, %256 : vector<8x512xf32>
    %258 = vector.extract_strided_slice %257 {offsets = [0, 0], sizes = [8, 128], strides = [1, 1]} : vector<8x512xf32> to vector<8x128xf32>
    %259 = arith.negf %258 : vector<8x128xf32>
    %260 = math.exp %259 : vector<8x128xf32>
    %cst_71 = arith.constant 1.000000e+00 : f32
    %261 = vector.broadcast %cst_71 : f32 to vector<8x128xf32>
    %262 = arith.addf %261, %260 : vector<8x128xf32>
    %263 = arith.divf %261, %262 : vector<8x128xf32>
    %264 = vector.extract_strided_slice %257 {offsets = [0, 128], sizes = [8, 128], strides = [1, 1]} : vector<8x512xf32> to vector<8x128xf32>
    %265 = arith.negf %264 : vector<8x128xf32>
    %266 = math.exp %265 : vector<8x128xf32>
    %cst_72 = arith.constant 1.000000e+00 : f32
    %267 = vector.broadcast %cst_72 : f32 to vector<8x128xf32>
    %268 = arith.addf %267, %266 : vector<8x128xf32>
    %269 = arith.divf %267, %268 : vector<8x128xf32>
    %270 = vector.extract_strided_slice %257 {offsets = [0, 256], sizes = [8, 128], strides = [1, 1]} : vector<8x512xf32> to vector<8x128xf32>
    %271 = math.tanh %270 : vector<8x128xf32>
    %272 = vector.extract_strided_slice %257 {offsets = [0, 384], sizes = [8, 128], strides = [1, 1]} : vector<8x512xf32> to vector<8x128xf32>
    %273 = arith.negf %272 : vector<8x128xf32>
    %274 = math.exp %273 : vector<8x128xf32>
    %cst_73 = arith.constant 1.000000e+00 : f32
    %275 = vector.broadcast %cst_73 : f32 to vector<8x128xf32>
    %276 = arith.addf %275, %274 : vector<8x128xf32>
    %277 = arith.divf %275, %276 : vector<8x128xf32>
    %278 = arith.mulf %269, %240 : vector<8x128xf32>
    %279 = arith.mulf %263, %271 : vector<8x128xf32>
    %280 = arith.addf %278, %279 : vector<8x128xf32>
    %281 = math.tanh %280 : vector<8x128xf32>
    %282 = arith.mulf %277, %281 : vector<8x128xf32>
    %283 = arith.index_cast %251 : i32 to index
    %c0_74 = arith.constant 0 : index
    %c0_75 = arith.constant 0 : index
    %284 = vector.load %arg4[%283, %c0_74, %c0_75] : memref<8x8x128xf32, #tpu.memory_space<vmem>>, vector<1x8x128xf32>
    %285 = vector.shape_cast %284 : vector<1x8x128xf32> to vector<8x128xf32>
    %286 = vector.shape_cast %282 : vector<8x128xf32> to vector<1x8x128xf32>
    tpu.vector_store %arg4[%283, %c0_74, %c0_75], %286 {strides = array<i32>} : memref<8x8x128xf32, #tpu.memory_space<vmem>>, vector<1x8x128xf32>,
    %c7_i32_76 = arith.constant 7 : i32
    %c1_i32_77 = arith.constant 1 : i32
    %287 = arith.subi %c1_i32_77, %arg0 : i32
    %288 = arith.muli %287, %c7_i32_76 : i32
    %c7_i32_78 = arith.constant 7 : i32
    %289 = arith.subi %c7_i32_78, %c7_i32_76 : i32
    %290 = arith.muli %arg0, %289 : i32
    %291 = arith.addi %288, %290 : i32
    %292 = arith.index_cast %291 : i32 to index
    %c0_79 = arith.constant 0 : index
    %c0_80 = arith.constant 0 : index
    %293 = vector.load %arg2[%292, %c0_79, %c0_80] : memref<8x8x512xf32, #tpu.memory_space<vmem>>, vector<1x8x512xf32>
    %294 = vector.shape_cast %293 : vector<1x8x512xf32> to vector<8x512xf32>
    %295 = arith.truncf %282 : vector<8x128xf32> to vector<8x128xbf16>
    %cst_81 = arith.constant dense<0.000000e+00> : vector<8x512xf32>
    %296 = tpu.matmul %295, %4, %cst_81 {dimension_numbers = #tpu.dot_dimension_numbers<[1], [0], [0], [1], [0, 0, 1, 1], [], []>} : vector<8x128xbf16>, vector<128x512xbf16>, vector<8x512xf32> -> vector<8x512xf32>
    %297 = arith.addf %294, %296 : vector<8x512xf32>
    %298 = vector.extract_strided_slice %297 {offsets = [0, 0], sizes = [8, 128], strides = [1, 1]} : vector<8x512xf32> to vector<8x128xf32>
    %299 = arith.negf %298 : vector<8x128xf32>
    %300 = math.exp %299 : vector<8x128xf32>
    %cst_82 = arith.constant 1.000000e+00 : f32
    %301 = vector.broadcast %cst_82 : f32 to vector<8x128xf32>
    %302 = arith.addf %301, %300 : vector<8x128xf32>
    %303 = arith.divf %301, %302 : vector<8x128xf32>
    %304 = vector.extract_strided_slice %297 {offsets = [0, 128], sizes = [8, 128], strides = [1, 1]} : vector<8x512xf32> to vector<8x128xf32>
    %305 = arith.negf %304 : vector<8x128xf32>
    %306 = math.exp %305 : vector<8x128xf32>
    %cst_83 = arith.constant 1.000000e+00 : f32
    %307 = vector.broadcast %cst_83 : f32 to vector<8x128xf32>
    %308 = arith.addf %307, %306 : vector<8x128xf32>
    %309 = arith.divf %307, %308 : vector<8x128xf32>
    %310 = vector.extract_strided_slice %297 {offsets = [0, 256], sizes = [8, 128], strides = [1, 1]} : vector<8x512xf32> to vector<8x128xf32>
    %311 = math.tanh %310 : vector<8x128xf32>
    %312 = vector.extract_strided_slice %297 {offsets = [0, 384], sizes = [8, 128], strides = [1, 1]} : vector<8x512xf32> to vector<8x128xf32>
    %313 = arith.negf %312 : vector<8x128xf32>
    %314 = math.exp %313 : vector<8x128xf32>
    %cst_84 = arith.constant 1.000000e+00 : f32
    %315 = vector.broadcast %cst_84 : f32 to vector<8x128xf32>
    %316 = arith.addf %315, %314 : vector<8x128xf32>
    %317 = arith.divf %315, %316 : vector<8x128xf32>
    %318 = arith.mulf %309, %280 : vector<8x128xf32>
    %319 = arith.mulf %303, %311 : vector<8x128xf32>
    %320 = arith.addf %318, %319 : vector<8x128xf32>
    %321 = math.tanh %320 : vector<8x128xf32>
    %322 = arith.mulf %317, %321 : vector<8x128xf32>
    %323 = arith.index_cast %291 : i32 to index
    %c0_85 = arith.constant 0 : index
    %c0_86 = arith.constant 0 : index
    %324 = vector.load %arg4[%323, %c0_85, %c0_86] : memref<8x8x128xf32, #tpu.memory_space<vmem>>, vector<1x8x128xf32>
    %325 = vector.shape_cast %324 : vector<1x8x128xf32> to vector<8x128xf32>
    %326 = vector.shape_cast %322 : vector<8x128xf32> to vector<1x8x128xf32>
    tpu.vector_store %arg4[%323, %c0_85, %c0_86], %326 {strides = array<i32>} : memref<8x8x128xf32, #tpu.memory_space<vmem>>, vector<1x8x128xf32>,
    %c8_i32 = arith.constant 8 : i32
    %c0_87 = arith.constant 0 : index
    %c0_88 = arith.constant 0 : index
    %327 = vector.load %arg6[%c0_87, %c0_88] : memref<8x128xf32, #tpu.memory_space<vmem>>, vector<8x128xf32>
    tpu.vector_store %arg6[%c0_87, %c0_88], %322 {strides = array<i32>} : memref<8x128xf32, #tpu.memory_space<vmem>>, vector<8x128xf32>,
    %c0_89 = arith.constant 0 : index
    %c0_90 = arith.constant 0 : index
    %328 = vector.load %arg7[%c0_89, %c0_90] : memref<8x128xf32, #tpu.memory_space<vmem>>, vector<8x128xf32>
    tpu.vector_store %arg7[%c0_89, %c0_90], %320 {strides = array<i32>} : memref<8x128xf32, #tpu.memory_space<vmem>>, vector<8x128xf32>,
    %c1_i32_91 = arith.constant 1 : i32
    %329 = arith.cmpi eq, %arg1, %c1_i32_91 : i32
    %330 = arith.extui %329 : i1 to i32
    %c0_i32_92 = arith.constant 0 : i32
    %331 = arith.cmpi ne, %330, %c0_i32_92 : i32
    scf.if %331 {
      %c0_93 = arith.constant 0 : index
      %c0_94 = arith.constant 0 : index
      %332 = vector.load %arg5[%c0_93, %c0_94] : memref<8x128xf32, #tpu.memory_space<vmem>>, vector<8x128xf32>
      tpu.vector_store %arg5[%c0_93, %c0_94], %322 {strides = array<i32>} : memref<8x128xf32, #tpu.memory_space<vmem>>, vector<8x128xf32>,
    } else {
    }
    return
  }
  func.func @transform_0(%arg0: i32, %arg1: i32) -> (i32, i32, i32) {
    %c1_i32 = arith.constant 1 : i32
    %0 = arith.subi %c1_i32, %arg0 : i32
    %1 = arith.muli %0, %arg1 : i32
    %c1_i32_0 = arith.constant 1 : i32
    %2 = arith.subi %c1_i32_0, %arg1 : i32
    %3 = arith.muli %arg0, %2 : i32
    %4 = arith.addi %1, %3 : i32
    %c0_i32 = arith.constant 0 : i32
    %c0_i32_1 = arith.constant 0 : i32
    return %4, %c0_i32, %arg0 : i32, i32, i32
  }
  func.func @transform_1(%arg0: i32, %arg1: i32) -> (i32, i32, i32) {
    %c0_i32 = arith.constant 0 : i32
    %c0_i32_0 = arith.constant 0 : i32
    %c0_i32_1 = arith.constant 0 : i32
    return %arg0, %c0_i32, %c0_i32_0 : i32, i32, i32
  }
  func.func @transform_2(%arg0: i32, %arg1: i32) -> (i32, i32, i32) {
    %c1_i32 = arith.constant 1 : i32
    %0 = arith.subi %c1_i32, %arg0 : i32
    %1 = arith.muli %0, %arg1 : i32
    %c1_i32_0 = arith.constant 1 : i32
    %2 = arith.subi %c1_i32_0, %arg1 : i32
    %3 = arith.muli %arg0, %2 : i32
    %4 = arith.addi %1, %3 : i32
    %c0_i32 = arith.constant 0 : i32
    %c0_i32_1 = arith.constant 0 : i32
    return %4, %c0_i32, %arg0 : i32, i32, i32
  }
  func.func @transform_3(%arg0: i32, %arg1: i32) -> (i32, i32) {
    %c0_i32 = arith.constant 0 : i32
    %c0_i32_0 = arith.constant 0 : i32
    return %c0_i32, %arg0 : i32, i32
  }
}

</mosaic_0001>

<bundles_post_ra>
// kernel: foundation_lstm_forward.5
= control target key start
LH: loop header
LB: loop body
LE: loop exit
PB: predicated region body
PF: predicated region fallthrough
CT: control target
= control target key end

     0   :  { %s3123_s0 = inlined_call_operand.vmem [shape: f32[16,8,1024], index: 0, kind: input, shape index: {}]   ;;  %s3124_s1 = inlined_call_operand.vmem [shape: bf16[2,128,512], index: 1, kind: input, shape index: {}]   ;;  %s3125_s2 = inlined_call_operand.vmem [shape: f32[16,8,256], index: 2, kind: output, shape index: {0}]   ;;  %s3126_s3 = inlined_call_operand.hbm [shape: f32[8,256], index: 3, kind: output, shape index: {1}]  }
   0x1   :  { %3129 = sst [smem:[#allocation10_spill]] %s3123_s0 }
   0x2   :  { %9 = vsyncpa [#allocation7], 0 }
   0x3   :  { %11 = vsyncpa [#allocation7 + $0x1], 0  ;;  %s2359_s12 = smov 0   ;;  %s2361_s13 = smov 0  }
   0x4   :  { %s2363_s14 = smov 0   ;;  %s2365_s15 = smov 0  }
   0x5   :  { %s2367_s16 = smov 0   ;;  %s2369_s17 = smov 0  }
   0x6   :  { %s2371_s18 = smov 0   ;;  %s2373_s19 = smov 0  }
   0x7   :  { %s2375_s20 = smov 0   ;;  %s2377_s21 = smov 0  }
   0x8 LB: > { %s1809_s22 = sadd.s32 4294967295, %s2334_s21   ;;  %s26_s24 = sadd.s32 1, %s2326_s19  ;;  %s2334_s21 = sphi %s2377_s21, %s17_s21   ;;  %s2330_s20 = sphi %s2375_s20, %s3148_s20   ;;  %s2326_s19 = sphi %s2373_s19, %s3147_s19   ;;  %s2322_s18 = sphi %s2371_s18, %s3146_s18   ;;  %s2318_s17 = sphi %s2369_s17, %s3145_s17   ;;  %s2314_s16 = sphi %s2367_s16, %s3144_s16   ;;  %s2310_s15 = sphi %s2365_s15, %s3143_s15   ;;  %s2306_s14 = sphi %s2363_s14, %s3142_s14   ;;  %s2302_s13 = sphi %s2361_s13, %s3141_s13   ;;  %s2298_s12 = sphi %s2359_s12, %s3140_s12  }
   0x9   : > { %s29_s25 = sadd.s32 1, %s2330_s20  ;;  %p27_p0 = scmp.ge.s32.totalorder %s26_s24, 2 }
   0xa   : > { %s33_s26 = ssub.s32 1, %s2330_s20  ;;  %s35_s28 = ssub.s32 1, %s2326_s19 }
   0xb   : > { %s34_s27 = smul.u32 %s2326_s19, %s33_s26  ;;  %s3150_s24 = smov (%p27_p0, %s26_s24), 0 }
   0xc   : > { %s3152_s25 = smov (!%p27_p0, %s29_s25), %s2330_s20  ;;  %s36_s29 = smul.u32 %s2330_s20, %s35_s28 }
   0xd   : > { %s40_s30 = ssub.s32 1, %s3150_s24  ;;  %p31_p1 = scmp.ge.s32.totalorder %s3152_s25, 2 }
   0xe   : > { %s48_s4 = sadd.s32 1, %s2314_s16  ;;  %s2422_s5 = sadd.s32 %s36_s29, %s34_s27 }
   0xf   : > { %p55_p2 = scmp.ne.s32.totalorder %s2314_s16, %s2310_s15  ;;  %s3154_s25 = smov (%p31_p1, %s3152_s25), 0 }
  0x10   : > { %3130 = sst [smem:[#allocation9_spill]] %s3154_s25  ;;  %p56_p3 = scmp.eq.s32.totalorder %s2334_s21, 0 }
  0x11   : > { %p2429_p4 = scmp.eq.s32.totalorder %s1809_s22, 3  ;;  %s38_s7 = ssub.s32 1, %s3154_s25 }
  0x12   : > { %s41_s8 = smul.u32 %s40_s30, %s3154_s25  ;;  %s44_s10 = ssub.s32 %s2330_s20, %s3154_s25 }
  0x13   : > { %s39_s9 = smul.u32 %s38_s7, %s3150_s24  ;;  %p2438_p5 = por %p56_p3, %p55_p2 }
  0x14   : > { %p2444_p6 = por %p2429_p4, %p55_p2  ;;  %p136_p7 = scmp.eq.s32.totalorder %s44_s10, 0 }
  0x15   : > { %s42_s22 = sadd.s32 %s41_s8, %s39_s9  ;;  %s138_s28 = sadd.s32 1, %s2306_s14 }
  0x16   : > { %s43_s27 = ssub.s32 %s2422_s5, %s42_s22  ;;  %p148_p8 = scmp.ne.s32.totalorder %s2306_s14, %s2302_s13 }
  0x17   : > { %s45_s29 = sor.u32 %s44_s10, %s43_s27  ;;  %p154_p10 = scmp.ne.s32.totalorder %s2302_s13, %s2298_s12 }
  0x18   : > { %p46_p9 = scmp.eq.s32.totalorder %s45_s29, 0  ;;  %p2462_p11 = por %p148_p8, %p2429_p4 }
  0x19   : > { %s2455_s30 = scalar_select %p136_p7, %s2306_s14, %s138_s28  }
  0x1a   : > { %s2458_s7 = scalar_select %p46_p9, %s2314_s16, %s48_s4  }
  0x1b   : > { %s3135_s25 = sadd.s32 4294967294, %s2334_s21   ;;  %p1812_p0 = scmp.ge.s32.totalorder %s2334_s21, 4 }
  0x1c   : > { %p155_p12 = scmp.eq.s32.totalorder %s3135_s25, 3 }
  0x1d   : > { %171 = sbr.rel (%p1812_p0) target bundleno = 60 (0x3c), region = 16 }
  0x1e   : > { %p2468_p13 = por %p155_p12, %p154_p10 }
  0x22   : > { %174 = sbr.rel (!%p2438_p5) target bundleno = 60 (0x3c), region = 20  ;;  %s176_s4 = sand.u32 (%p2438_p5), 1, %s2314_s16  }
  0x23   : > { %s1815_s6 = sshll.u32 (%p2438_p5), %s2330_s20, 2  ;;  %s1813_s9 = sshll.u32 (%p2438_p5), %s176_s4, 8 }
  0x24   : > { %s1918_s10 = sshll.u32 (%p2438_p5), %s2422_s5, 6  ;;  %s3137_s0 = sld [smem:[#allocation10_spill]] (%p2438_p5) }
  0x25   : > { %s187_s22 = sadd.s32 (%p2438_p5), %s1918_s10, %s1815_s6  ;;  %s2486_s5 = scalar_lea.vmem (%p2438_p5), [#allocation4], %s1813_s9 }
  0x26   : > { %s1817_s27 = sshll.u32 (%p2438_p5), %s187_s22, 3 }
  0x2a   : > { %s2481_s29 = scalar_lea.vmem %s3137_s0, %s1817_s27 }
  0x2b   : > { %v202_v0 = vld [vmem:[%s2481_s29] sm:$0xff]  ;;  %v204_v1 = vld [vmem:[%s2481_s29 + $0x8] sm:$0xff]  ;;  %v206_v2 = vld [vmem:[%s2481_s29 + $0x10] sm:$0xff] }
  0x2c   : > { %203 = vst [vmem:[%s2486_s5] sm:$0xff] %v202_v0  ;;  %205 = vst [vmem:[%s2486_s5 + $0x8] sm:$0xff] %v204_v1  ;;  %v208_v3 = vld [vmem:[%s2481_s29 + $0x18] sm:$0xff]  ;;  %v210_v4 = vld [vmem:[%s2481_s29 + $0x40] sm:$0xff] }
  0x2d   : > { %207 = vst [vmem:[%s2486_s5 + $0x10] sm:$0xff] %v206_v2  ;;  %v212_v5 = vld [vmem:[%s2481_s29 + $0x48] sm:$0xff]  ;;  %209 = vst [vmem:[%s2486_s5 + $0x18] sm:$0xff] %v208_v3  ;;  %v214_v6 = vld [vmem:[%s2481_s29 + $0x50] sm:$0xff] }
  0x2e   : > { %211 = vst [vmem:[%s2486_s5 + $0x20] sm:$0xff] %v210_v4  ;;  %213 = vst [vmem:[%s2486_s5 + $0x28] sm:$0xff] %v212_v5  ;;  %v216_v7 = vld [vmem:[%s2481_s29 + $0x58] sm:$0xff]  ;;  %v218_v8 = vld [vmem:[%s2481_s29 + $0x80] sm:$0xff] }
  0x2f   : > { %215 = vst [vmem:[%s2486_s5 + $0x30] sm:$0xff] %v214_v6  ;;  %217 = vst [vmem:[%s2486_s5 + $0x38] sm:$0xff] %v216_v7  ;;  %v220_v9 = vld [vmem:[%s2481_s29 + $0x88] sm:$0xff]  ;;  %v222_v10 = vld [vmem:[%s2481_s29 + $0x90] sm:$0xff] }
  0x30   : > { %219 = vst [vmem:[%s2486_s5 + $0x40] sm:$0xff] %v218_v8  ;;  %v224_v11 = vld [vmem:[%s2481_s29 + $0x98] sm:$0xff]  ;;  %221 = vst [vmem:[%s2486_s5 + $0x48] sm:$0xff] %v220_v9  ;;  %v226_v12 = vld [vmem:[%s2481_s29 + $0xc0] sm:$0xff] }
  0x31   : > { %223 = vst [vmem:[%s2486_s5 + $0x50] sm:$0xff] %v222_v10  ;;  %225 = vst [vmem:[%s2486_s5 + $0x58] sm:$0xff] %v224_v11  ;;  %v228_v13 = vld [vmem:[%s2481_s29 + $0xc8] sm:$0xff]  ;;  %v230_v14 = vld [vmem:[%s2481_s29 + $0xd0] sm:$0xff] }
  0x32   : > { %227 = vst [vmem:[%s2486_s5 + $0x60] sm:$0xff] %v226_v12  ;;  %229 = vst [vmem:[%s2486_s5 + $0x68] sm:$0xff] %v228_v13  ;;  %v232_v15 = vld [vmem:[%s2481_s29 + $0xd8] sm:$0xff]  ;;  %v234_v16 = vld [vmem:[%s2481_s29 + $0x100] sm:$0xff] }
  0x33   : > { %231 = vst [vmem:[%s2486_s5 + $0x70] sm:$0xff] %v230_v14  ;;  %v236_v17 = vld [vmem:[%s2481_s29 + $0x108] sm:$0xff]  ;;  %233 = vst [vmem:[%s2486_s5 + $0x78] sm:$0xff] %v232_v15  ;;  %v238_v18 = vld [vmem:[%s2481_s29 + $0x110] sm:$0xff] }
  0x34   : > { %235 = vst [vmem:[%s2486_s5 + $0x80] sm:$0xff] %v234_v16  ;;  %237 = vst [vmem:[%s2486_s5 + $0x88] sm:$0xff] %v236_v17  ;;  %v240_v19 = vld [vmem:[%s2481_s29 + $0x118] sm:$0xff]  ;;  %v242_v20 = vld [vmem:[%s2481_s29 + $0x140] sm:$0xff] }
  0x35   : > { %239 = vst [vmem:[%s2486_s5 + $0x90] sm:$0xff] %v238_v18  ;;  %241 = vst [vmem:[%s2486_s5 + $0x98] sm:$0xff] %v240_v19  ;;  %v244_v21 = vld [vmem:[%s2481_s29 + $0x148] sm:$0xff]  ;;  %v246_v22 = vld [vmem:[%s2481_s29 + $0x150] sm:$0xff] }
  0x36   : > { %243 = vst [vmem:[%s2486_s5 + $0xa0] sm:$0xff] %v242_v20  ;;  %v248_v23 = vld [vmem:[%s2481_s29 + $0x158] sm:$0xff]  ;;  %245 = vst [vmem:[%s2486_s5 + $0xa8] sm:$0xff] %v244_v21  ;;  %v250_v24 = vld [vmem:[%s2481_s29 + $0x180] sm:$0xff] }
  0x37   : > { %247 = vst [vmem:[%s2486_s5 + $0xb0] sm:$0xff] %v246_v22  ;;  %249 = vst [vmem:[%s2486_s5 + $0xb8] sm:$0xff] %v248_v23  ;;  %v252_v25 = vld [vmem:[%s2481_s29 + $0x188] sm:$0xff]  ;;  %v254_v26 = vld [vmem:[%s2481_s29 + $0x190] sm:$0xff] }
  0x38   : > { %251 = vst [vmem:[%s2486_s5 + $0xc0] sm:$0xff] %v250_v24  ;;  %253 = vst [vmem:[%s2486_s5 + $0xc8] sm:$0xff] %v252_v25  ;;  %v256_v27 = vld [vmem:[%s2481_s29 + $0x198] sm:$0xff]  ;;  %v258_v28 = vld [vmem:[%s2481_s29 + $0x1c0] sm:$0xff] }
  0x39   : > { %255 = vst [vmem:[%s2486_s5 + $0xd0] sm:$0xff] %v254_v26  ;;  %v260_v29 = vld [vmem:[%s2481_s29 + $0x1c8] sm:$0xff]  ;;  %257 = vst [vmem:[%s2486_s5 + $0xd8] sm:$0xff] %v256_v27  ;;  %v262_v30 = vld [vmem:[%s2481_s29 + $0x1d0] sm:$0xff] }
  0x3a   : > { %259 = vst [vmem:[%s2486_s5 + $0xe0] sm:$0xff] %v258_v28  ;;  %261 = vst [vmem:[%s2486_s5 + $0xe8] sm:$0xff] %v260_v29  ;;  %v264_v31 = vld [vmem:[%s2481_s29 + $0x1d8] sm:$0xff] }
  0x3b   : > { %263 = vst [vmem:[%s2486_s5 + $0xf0] sm:$0xff] %v262_v30  ;;  %265 = vst [vmem:[%s2486_s5 + $0xf8] sm:$0xff] %v264_v31 }
  0x3c PF: > { %p1818_p1 = scmp.ge.s32.totalorder %s2334_s21, 1  ;;  %p278_p2 = scmp.lt.s32.totalorder %s2334_s21, 5 }
  0x3e   : > { %p279_p3 = pnand %p1818_p1, %p278_p2 }
  0x3f   : > { %s285_s11 = sand.u32 (!%p279_p3), 1, %s2310_s15   ;;  %s314_s4 = sand.u32 (!%p279_p3), 1, %s2302_s13  }
  0x40   : > { %282 = sbr.rel (%p279_p3) target bundleno = 2155 (0x86b), region = 47  ;;  %s1819_s6 = sshll.u32 (!%p279_p3), %s285_s11, 8 }
  0x41   : > { %s1820_s9 = sshll.u32 (!%p279_p3), %s285_s11, 6  ;;  %s2555_s10 = sshll.u32 (!%p279_p3), %s314_s4, 3 }
  0x42   : > { %p324_p4 = scmp.lt.s32.totalorder (!%p279_p3), %s2322_s18, 1  ;;  %s2564_s5 = scalar_lea.vmem (!%p279_p3), [#allocation4], %s1819_s6 }
  0x43   : > { %s2566_s0 = scalar_lea.vmem (!%p279_p3), [#allocation5], %s1820_s9  ;;  %s3128_s15 = scalar_lea.vmem (!%p279_p3), [#allocation6], %s2555_s10 }
  0x44   : > { %p1824_p5 = scmp.ne.s32.totalorder (!%p279_p3), %s2318_s17, 0 }
  0x45   : > { %s325_s22 = scalar_select %p324_p4, %s2322_s18, 1 }
  0x46   : > { %339 = sbr.rel (%p1824_p5) target bundleno = 77 (0x4d), region = 55 }
  0x47   : > { %s1919_s27 = sshll.u32 %s325_s22, 8 }
  0x48   : > { %s2562_s29 = scalar_lea.vmem %s3124_s1, %s1919_s27 }
  0x4b   : > { %v2336_v32 = vmov 0.0  }
  0x4c   : > { %340 = vst [vmem:[#allocation2] sm:$0xff] %v2336_v32  ;;  %341 = vst [vmem:[#allocation3] sm:$0xff] %v2336_v32 }
  0x4d PF: > { %v2571_v33 = vld [vmem:[%s2562_s29 + $0xe4] ss:$16 sps:$4 sm:$0xff]   ;;  %v2574_v34 = vld [vmem:[%s2562_s29 + $0xe0] ss:$16 sps:$4 sm:$0xff]   ;;  %v2337_v35 = vmov 0   ;;  %s1920_s11 = smul.u32 224, %s2322_s18 }
  0x4e   : > { %577 = vmatprep.mubr.bf16.mxu0 %v2337_v35  ;;  %618 = vmatprep.mubr.bf16.mxu1 %v2337_v35  ;;  %v2580_v36 = vld [vmem:[%s2562_s29 + $0xc4] ss:$16 sps:$4 sm:$0xff]   ;;  %v2584_v37 = vld [vmem:[%s2562_s29 + $0xc0] ss:$16 sps:$4 sm:$0xff]   ;;  %v2591_v39 = vld [vmem:[%s2562_s29 + $0xec] ss:$16 sps:$4 sm:$0xff]  }
  0x4f   : > { %545 = vmatprep.subr.bf16.mxu0 %v2571_v33  ;;  %v2588_v38 = vld [vmem:[%s2562_s29 + $0xa4] ss:$16 sps:$4 sm:$0xff]   ;;  %v2594_v40 = vld [vmem:[%s2562_s29 + $0xe8] ss:$16 sps:$4 sm:$0xff]   ;;  %v2598_v41 = vld [vmem:[%s2562_s29 + $0xa0] ss:$16 sps:$4 sm:$0xff]   ;;  %586 = vmatprep.subr.bf16.mxu1 %v2591_v39  ;;  %s379_s6 = scalar_lea.vmem %s2564_s5, %s1920_s11 [#allocation4] }
  0x50   : > { %546 = vmatpush1.bf16.msra.mxu0 %v2574_v34  ;;  %v2603_v42 = vld [vmem:[%s2562_s29 + $0x84] ss:$16 sps:$4 sm:$0xff]   ;;  %587 = vmatpush1.bf16.msra.mxu1 %v2594_v40  ;;  %v2607_v43 = vld [vmem:[%s2562_s29 + $0xcc] ss:$16 sps:$4 sm:$0xff]   ;;  %v2610_v44 = vld [vmem:[%s2562_s29 + $0xc8] ss:$16 sps:$4 sm:$0xff]  }
  0x51   : > { %547 = vmatprep.subr.bf16.mxu0 %v2580_v36  ;;  %588 = vmatprep.subr.bf16.mxu1 %v2607_v43  ;;  %v2615_v45 = vld [vmem:[%s2562_s29 + $0x80] ss:$16 sps:$4 sm:$0xff]   ;;  %v2618_v46 = vld [vmem:[%s2562_s29 + $0x64] ss:$16 sps:$4 sm:$0xff]   ;;  %v2621_v47 = vld [vmem:[%s2562_s29 + $0xac] ss:$16 sps:$4 sm:$0xff]  }
  0x52   : > { %v2626_v48 = vld [vmem:[%s2562_s29 + $0xa8] ss:$16 sps:$4 sm:$0xff]   ;;  %v2630_v49 = vld [vmem:[%s2562_s29 + $0x8c] ss:$16 sps:$4 sm:$0xff]   ;;  %v2634_v50 = vld [vmem:[%s2562_s29 + $0x60] ss:$16 sps:$4 sm:$0xff]  }
  0x53   : > { %v2638_v51 = vld [vmem:[%s2562_s29 + $0x44] ss:$16 sps:$4 sm:$0xff]   ;;  %v2642_v52 = vld [vmem:[%s2562_s29 + $0x88] ss:$16 sps:$4 sm:$0xff]   ;;  %v2646_v53 = vld [vmem:[%s2562_s29 + $0x6c] ss:$16 sps:$4 sm:$0xff]  }
  0x54   : > { %548 = vmatpush1.bf16.msra.mxu0 %v2584_v37  ;;  %589 = vmatpush1.bf16.msra.mxu1 %v2610_v44  ;;  %v2649_v54 = vld [vmem:[%s2562_s29 + $0x40] ss:$16 sps:$4 sm:$0xff]   ;;  %v2653_v55 = vld [vmem:[%s2562_s29 + $0x24] ss:$16 sps:$4 sm:$0xff]   ;;  %v2658_v56 = vld [vmem:[%s2562_s29 + $0x68] ss:$16 sps:$4 sm:$0xff]  }
  0x55   : > { %549 = vmatprep.subr.bf16.mxu0 %v2588_v38  ;;  %590 = vmatprep.subr.bf16.mxu1 %v2621_v47  ;;  %v2662_v57 = vld [vmem:[%s2562_s29 + $0x4c] ss:$16 sps:$4 sm:$0xff]   ;;  %v2666_v58 = vld [vmem:[%s2562_s29 + $0x20] ss:$16 sps:$4 sm:$0xff]   ;;  %v2670_v59 = vld [vmem:[%s2562_s29 + $0x4] ss:$16 sps:$4 sm:$0xff]  }
  0x56   : > { %v2674_v60 = vld [vmem:[%s2562_s29 + $0x48] ss:$16 sps:$4 sm:$0xff]   ;;  %v2678_v61 = vld [vmem:[%s2562_s29 + $0x2c] ss:$16 sps:$4 sm:$0xff]   ;;  %v2682_v62 = vld [vmem:[%s2562_s29] ss:$16 sps:$4 sm:$0xff]  }
  0x57   : > { %v374_v63 = vld [vmem:[#allocation2] sm:$0xff]  ;;  %v2687_v0 = vld [vmem:[%s2562_s29 + $0x28] ss:$16 sps:$4 sm:$0xff]   ;;  %v2691_v1 = vld [vmem:[%s2562_s29 + $0xc] ss:$16 sps:$4 sm:$0xff]   ;;  %s1862_s9 = smul.u32 56, %s2322_s18 }
  0x58   : > { %550 = vmatpush1.bf16.msra.mxu0 %v2598_v41  ;;  %591 = vmatpush1.bf16.msra.mxu1 %v2626_v48  ;;  %v384_v2 = vpack.c.bf16 %v374_v63, %v374_v63  ;;  %v2696_v3 = vld [vmem:[%s2562_s29 + $0x8] ss:$16 sps:$4 sm:$0xff]   ;;  %v380_v4 = vld [vmem:[%s379_s6] sm:$0xff]  ;;  %v382_v19 = vld [vmem:[%s379_s6 + $0x10] sm:$0xff]  ;;  %s659_s27 = smul.u32 6, %s2322_s18  ;;  %s2779_s25 = ssub.s32 1, %s2322_s18 }
  0x59   : > { %551 = vmatprep.subr.bf16.mxu0 %v2603_v42  ;;  %592 = vmatprep.subr.bf16.mxu1 %v2630_v49  ;;  %v381_v6 = vld [vmem:[%s379_s6 + $0x8] sm:$0xff]  ;;  %v383_v16 = vld [vmem:[%s379_s6 + $0x18] sm:$0xff]  ;;  %s656_s22 = scalar_lea.vmem %s2566_s0, %s1862_s9 [#allocation5]  ;;  %p1909_p7 = scmp.ne.s32.totalorder %s2318_s17, 1 }
  0x5a   : > { %v375_v30 = vld [vmem:[#allocation3] sm:$0xff]  ;;  %s2782_s28 = sadd.s32 %s659_s27, %s2779_s25  ;;  %s783_s27 = smul.u32 5, %s2322_s18 }
  0x5b   : > { %s1921_s11 = sshll.u32 %s2782_s28, 5  ;;  %s1868_s9 = sshll.u32 %s2782_s28, 3 }
  0x5c   : > { %552 = vmatpush1.bf16.msra.mxu0 %v2615_v45  ;;  %593 = vmatpush1.bf16.msra.mxu1 %v2642_v52  ;;  %s663_s6 = scalar_lea.vmem %s2564_s5, %s1921_s11 [#allocation4]  ;;  %s1869_s28 = sshll.u32 %s2779_s25, 1 }
  0x5d   : > { %553 = vmatprep.subr.bf16.mxu0 %v2618_v46  ;;  %594 = vmatprep.subr.bf16.mxu1 %v2646_v53  ;;  %s2828_s11 = sadd.s32 %s1869_s28, %s783_s27  ;;  %s906_s28 = smul.u32 3, %s2779_s25 }
  0x60   : > { %554 = vmatpush1.bf16.msra.mxu0 %v2634_v50  ;;  %595 = vmatpush1.bf16.msra.mxu1 %v2658_v56 }
  0x61   : > { %555 = vmatprep.subr.bf16.mxu0 %v2638_v51  ;;  %596 = vmatprep.subr.bf16.mxu1 %v2662_v57 }
  0x64   : > { %556 = vmatpush1.bf16.msra.mxu0 %v2649_v54  ;;  %597 = vmatpush1.bf16.msra.mxu1 %v2674_v60 }
  0x65   : > { %557 = vmatprep.subr.bf16.mxu0 %v2653_v55  ;;  %598 = vmatprep.subr.bf16.mxu1 %v2678_v61 }
  0x68   : > { %558 = vmatpush1.bf16.msra.mxu0 %v2666_v58  ;;  %599 = vmatpush1.bf16.msra.mxu1 %v2687_v0 }
  0x69   : > { %559 = vmatprep.subr.bf16.mxu0 %v2670_v59  ;;  %600 = vmatprep.subr.bf16.mxu1 %v2691_v1 }
  0x6c   : > { %560 = vmatpush1.bf16.msra.mxu0 %v2682_v62  ;;  %601 = vmatpush1.bf16.msra.mxu1 %v2696_v3 }
  0x6d   : > { %669 = vmatprep.subr.bf16.mxu0 %v2571_v33  ;;  %710 = vmatprep.subr.bf16.mxu1 %v2591_v39 }
  0x6f   : > { %578 = vmatmul.mubr.bf16.vlgmr.msra.gmra.mxu0 %v384_v2  ;;  %619 = vmatmul.mubr.bf16.vlgmr.msra.gmra.mxu1 %v384_v2 }
  0x70   : > { %670 = vmatpush1.bf16.msra.mxu0 %v2574_v34  ;;  %701 = vmatprep.mubr.bf16.mxu0 %v2337_v35 }
  0x71   : > { %671 = vmatprep.subr.bf16.mxu0 %v2580_v36  ;;  %711 = vmatpush1.bf16.msra.mxu1 %v2594_v40 }
  0x72   : > { %712 = vmatprep.subr.bf16.mxu1 %v2607_v43  ;;  %742 = vmatprep.mubr.bf16.mxu1 %v2337_v35 }
  0x74   : > { %672 = vmatpush1.bf16.msra.mxu0 %v2584_v37 }
  0x75   : > { %673 = vmatprep.subr.bf16.mxu0 %v2588_v38  ;;  %713 = vmatpush1.bf16.msra.mxu1 %v2610_v44 }
  0x76   : > { %714 = vmatprep.subr.bf16.mxu1 %v2621_v47 }
  0x78   : > { %674 = vmatpush1.bf16.msra.mxu0 %v2598_v41 }
  0x79   : > { %675 = vmatprep.subr.bf16.mxu0 %v2603_v42  ;;  %715 = vmatpush1.bf16.msra.mxu1 %v2626_v48 }
  0x7a   : > { %716 = vmatprep.subr.bf16.mxu1 %v2630_v49 }
  0x7c   : > { %676 = vmatpush1.bf16.msra.mxu0 %v2615_v45 }
  0x7d   : > { %677 = vmatprep.subr.bf16.mxu0 %v2618_v46  ;;  %717 = vmatpush1.bf16.msra.mxu1 %v2642_v52 }
  0x7e   : > { %718 = vmatprep.subr.bf16.mxu1 %v2646_v53 }
  0x80   : > { %678 = vmatpush1.bf16.msra.mxu0 %v2634_v50 }
  0x81   : > { %679 = vmatprep.subr.bf16.mxu0 %v2638_v51  ;;  %719 = vmatpush1.bf16.msra.mxu1 %v2658_v56 }
  0x82   : > { %720 = vmatprep.subr.bf16.mxu1 %v2662_v57 }
  0x84   : > { %680 = vmatpush1.bf16.msra.mxu0 %v2649_v54 }
  0x85   : > { %681 = vmatprep.subr.bf16.mxu0 %v2653_v55  ;;  %721 = vmatpush1.bf16.msra.mxu1 %v2674_v60 }
  0x86   : > { %722 = vmatprep.subr.bf16.mxu1 %v2678_v61 }
  0x88   : > { %682 = vmatpush1.bf16.msra.mxu0 %v2666_v58 }
  0x89   : > { %683 = vmatprep.subr.bf16.mxu0 %v2670_v59  ;;  %723 = vmatpush1.bf16.msra.mxu1 %v2687_v0 }
  0x8a   : > { %724 = vmatprep.subr.bf16.mxu1 %v2691_v1 }
  0x8c   : > { %684 = vmatpush1.bf16.msra.mxu0 %v2682_v62 }
  0x8d   : > { %793 = vmatprep.subr.bf16.mxu0 %v2571_v33  ;;  %725 = vmatpush1.bf16.msra.mxu1 %v2696_v3 }
  0x8e   : > { %834 = vmatprep.subr.bf16.mxu1 %v2591_v39 }
 0x12f   : > { %v579_v5 = vpop.f32.mrf.mxu0  ;;  %v620_v13 = vpop.f32.mrf.mxu1 }
 0x130   : > { %v627_v7 = vadd.f32 %v579_v5, %v380_v4  ;;  %v629_v21 = vadd.f32 %v620_v13, %v382_v19 }
 0x131   : > { %v581_v8 = vpop.f32.mrf.mxu0  ;;  %v622_v15 = vpop.f32.mrf.mxu1 }
 0x132   : > { %v1859_v9 = vmul.f32 -1.442695, %v627_v7  ;;  %v628_v10 = vadd.f32 %v581_v8, %v381_v6  ;;  %v630_v20 = vadd.f32 %v622_v15, %v383_v16 }
 0x133   : > { %v583_v11 = vpop.f32.mrf.mxu0  ;;  %v624_v17 = vpop.f32.mrf.mxu1 }
 0x134   : > { %2066 = vpow2.f32 %v1859_v9  ;;  %v1860_v12 = vmul.f32 -1.442695, %v628_v10  ;;  %v1861_v22 = vmul.f32 -1.442695, %v630_v20  ;;  %v664_v9 = vld [vmem:[%s663_s6] sm:$0xff] }
 0x135   : > { %v584_v14 = vpop.f32.mrf.mxu0  ;;  %v625_v18 = vpop.f32.mrf.mxu1 }
 0x136   : > { %2068 = vpow2.f32 %v1860_v12  ;;  %v665_v12 = vld [vmem:[%s663_s6 + $0x8] sm:$0xff] }
 0x137   : > { %2070 = vtanh.f32 %v629_v21 }
 0x138   : > { %2072 = vpow2.f32 %v1861_v22 }
 0x141   : > { %v2067_v23 = vpop.eup %2066 }
 0x142   : > { %v634_v24 = vadd.f32 1.0, %v2067_v23  ;;  %v667_v23 = vld [vmem:[%s663_s6 + $0x18] sm:$0xff] }
 0x143   : > { %v2069_v25 = vpop.eup %2068 }
 0x144   : > { %2074 = vrcp.f32 %v634_v24  ;;  %v640_v26 = vadd.f32 1.0, %v2069_v25  ;;  %v2071_v27 = vpop.eup %2070  ;;  %v666_v25 = vld [vmem:[%s663_s6 + $0x10] sm:$0xff]  ;;  %s1922_s6 = sshll.u32 %s2828_s11, 5 }
 0x145   : > { %v2073_v28 = vpop.eup %2072 }
 0x146   : > { %2076 = vrcp.f32 %v640_v26  ;;  %v647_v32 = vadd.f32 1.0, %v2073_v28 }
 0x148   : > { %2078 = vrcp.f32 %v647_v32 }
 0x151   : > { %v2075_v29 = vpop.eup %2074 }
 0x152   : > { %v651_v2 = vmul.f32 %v2075_v29, %v2071_v27 }
 0x153   : > { %v2077_v31 = vpop.eup %2076 }
 0x154   : > { %v650_v63 = vmul.f32 %v2077_v31, %v375_v30 }
 0x155   : > { %v2079_v5 = vpop.eup %2078 }
 0x156   : > { %v2738_v4 = vadd.f32 %v651_v2, %v650_v63 }
 0x158   : > { %2080 = vtanh.f32 %v2738_v4 }
 0x165   : > { %v2081_v6 = vpop.eup %2080 }
 0x166   : > { %v654_v7 = vmul.f32 %v2081_v6, %v2079_v5 }
 0x168   : > { %657 = vst [vmem:[%s656_s22] sm:$0xff] %v654_v7  ;;  %v668_v8 = vpack.c.bf16 %v654_v7, %v654_v7  ;;  %s780_s22 = scalar_lea.vmem %s2566_s0, %s1868_s9 [#allocation5]  ;;  %s787_s9 = scalar_lea.vmem %s2564_s5, %s1922_s6 [#allocation4] }
 0x16a   : > { %702 = vmatmul.mubr.bf16.vlgmr.msra.gmra.mxu0 %v668_v8  ;;  %743 = vmatmul.mubr.bf16.vlgmr.msra.gmra.mxu1 %v668_v8 }
 0x16b   : > { %794 = vmatpush1.bf16.msra.mxu0 %v2574_v34  ;;  %835 = vmatpush1.bf16.msra.mxu1 %v2594_v40 }
 0x16c   : > { %795 = vmatprep.subr.bf16.mxu0 %v2580_v36  ;;  %836 = vmatprep.subr.bf16.mxu1 %v2607_v43 }
 0x16d   : > { %825 = vmatprep.mubr.bf16.mxu0 %v2337_v35  ;;  %866 = vmatprep.mubr.bf16.mxu1 %v2337_v35 }
 0x16f   : > { %796 = vmatpush1.bf16.msra.mxu0 %v2584_v37  ;;  %837 = vmatpush1.bf16.msra.mxu1 %v2610_v44 }
 0x170   : > { %797 = vmatprep.subr.bf16.mxu0 %v2588_v38  ;;  %838 = vmatprep.subr.bf16.mxu1 %v2621_v47 }
 0x173   : > { %798 = vmatpush1.bf16.msra.mxu0 %v2598_v41  ;;  %839 = vmatpush1.bf16.msra.mxu1 %v2626_v48 }
 0x174   : > { %799 = vmatprep.subr.bf16.mxu0 %v2603_v42  ;;  %840 = vmatprep.subr.bf16.mxu1 %v2630_v49 }
 0x177   : > { %800 = vmatpush1.bf16.msra.mxu0 %v2615_v45  ;;  %841 = vmatpush1.bf16.msra.mxu1 %v2642_v52 }
 0x178   : > { %801 = vmatprep.subr.bf16.mxu0 %v2618_v46  ;;  %842 = vmatprep.subr.bf16.mxu1 %v2646_v53 }
 0x17b   : > { %802 = vmatpush1.bf16.msra.mxu0 %v2634_v50  ;;  %843 = vmatpush1.bf16.msra.mxu1 %v2658_v56 }
 0x17c   : > { %803 = vmatprep.subr.bf16.mxu0 %v2638_v51  ;;  %844 = vmatprep.subr.bf16.mxu1 %v2662_v57 }
 0x17f   : > { %804 = vmatpush1.bf16.msra.mxu0 %v2649_v54  ;;  %845 = vmatpush1.bf16.msra.mxu1 %v2674_v60 }
 0x180   : > { %805 = vmatprep.subr.bf16.mxu0 %v2653_v55  ;;  %846 = vmatprep.subr.bf16.mxu1 %v2678_v61 }
 0x183   : > { %806 = vmatpush1.bf16.msra.mxu0 %v2666_v58  ;;  %847 = vmatpush1.bf16.msra.mxu1 %v2687_v0 }
 0x184   : > { %807 = vmatprep.subr.bf16.mxu0 %v2670_v59  ;;  %848 = vmatprep.subr.bf16.mxu1 %v2691_v1 }
 0x187   : > { %808 = vmatpush1.bf16.msra.mxu0 %v2682_v62  ;;  %849 = vmatpush1.bf16.msra.mxu1 %v2696_v3 }
 0x188   : > { %917 = vmatprep.subr.bf16.mxu0 %v2571_v33  ;;  %958 = vmatprep.subr.bf16.mxu1 %v2591_v39 }
 0x22a   : > { %v703_v10 = vpop.f32.mrf.mxu0  ;;  %v744_v11 = vpop.f32.mrf.mxu1 }
 0x22b   : > { %v751_v13 = vadd.f32 %v703_v10, %v664_v9  ;;  %v753_v28 = vadd.f32 %v744_v11, %v666_v25 }
 0x22c   : > { %v705_v14 = vpop.f32.mrf.mxu0  ;;  %v746_v15 = vpop.f32.mrf.mxu1 }
 0x22d   : > { %v1865_v16 = vmul.f32 -1.442695, %v751_v13  ;;  %v752_v17 = vadd.f32 %v705_v14, %v665_v12  ;;  %v754_v24 = vadd.f32 %v746_v15, %v667_v23 }
 0x22e   : > { %v707_v18 = vpop.f32.mrf.mxu0  ;;  %v748_v19 = vpop.f32.mrf.mxu1 }
 0x22f   : > { %2082 = vpow2.f32 %v1865_v16  ;;  %v1866_v20 = vmul.f32 -1.442695, %v752_v17  ;;  %v1867_v26 = vmul.f32 -1.442695, %v754_v24  ;;  %v789_v16 = vld [vmem:[%s787_s9 + $0x8] sm:$0xff] }
 0x230   : > { %v708_v21 = vpop.f32.mrf.mxu0  ;;  %v749_v22 = vpop.f32.mrf.mxu1 }
 0x231   : > { %2084 = vpow2.f32 %v1866_v20 }
 0x232   : > { %2086 = vpow2.f32 %v1867_v26 }
 0x23c   : > { %v2083_v27 = vpop.eup %2082 }
 0x23d   : > { %v758_v29 = vadd.f32 1.0, %v2083_v27  ;;  %v791_v27 = vld [vmem:[%s787_s9 + $0x18] sm:$0xff] }
 0x23e   : > { %v2085_v30 = vpop.eup %2084 }
 0x23f   : > { %2088 = vrcp.f32 %v758_v29  ;;  %v764_v31 = vadd.f32 1.0, %v2085_v30  ;;  %v2087_v32 = vpop.eup %2086  ;;  %v790_v29 = vld [vmem:[%s787_s9 + $0x10] sm:$0xff] }
 0x240   : > { %2090 = vtanh.f32 %v753_v28  ;;  %v771_v6 = vadd.f32 1.0, %v2087_v32 }
 0x241   : > { %2092 = vrcp.f32 %v764_v31 }
 0x242   : > { %2094 = vrcp.f32 %v771_v6 }
 0x24c   : > { %v2089_v63 = vpop.eup %2088 }
 0x24d   : > { %v2091_v2 = vpop.eup %2090 }
 0x24e   : > { %v2093_v5 = vpop.eup %2092  ;;  %v775_v7 = vmul.f32 %v2091_v2, %v2089_v63 }
 0x24f   : > { %v774_v8 = vmul.f32 %v2093_v5, %v2738_v4  ;;  %v2095_v10 = vpop.eup %2094  ;;  %v788_v4 = vld [vmem:[%s787_s9] sm:$0xff] }
 0x251   : > { %v2787_v9 = vadd.f32 %v775_v7, %v774_v8 }
 0x253   : > { %2096 = vtanh.f32 %v2787_v9 }
 0x260   : > { %v2097_v11 = vpop.eup %2096 }
 0x261   : > { %v778_v12 = vmul.f32 %v2097_v11, %v2095_v10 }
 0x263   : > { %781 = vst [vmem:[%s780_s22] sm:$0xff] %v778_v12  ;;  %v792_v13 = vpack.c.bf16 %v778_v12, %v778_v12  ;;  %s1875_s22 = sshll.u32 %s2828_s11, 3  ;;  %s1876_s11 = sshll.u32 %s2322_s18, 2 }
 0x264   : > { %s904_s27 = scalar_lea.vmem %s2566_s0, %s1875_s22 [#allocation5]  ;;  %s2874_s6 = sadd.s32 %s1876_s11, %s906_s28 }
 0x265   : > { %826 = vmatmul.mubr.bf16.vlgmr.msra.gmra.mxu0 %v792_v13  ;;  %867 = vmatmul.mubr.bf16.vlgmr.msra.gmra.mxu1 %v792_v13  ;;  %s1923_s9 = sshll.u32 %s2874_s6, 5  ;;  %s1031_s11 = smul.u32 3, %s2322_s18 }
 0x266   : > { %918 = vmatpush1.bf16.msra.mxu0 %v2574_v34  ;;  %959 = vmatpush1.bf16.msra.mxu1 %v2594_v40  ;;  %s911_s22 = scalar_lea.vmem %s2564_s5, %s1923_s9 [#allocation4] }
 0x267   : > { %919 = vmatprep.subr.bf16.mxu0 %v2580_v36  ;;  %960 = vmatprep.subr.bf16.mxu1 %v2607_v43 }
 0x268   : > { %949 = vmatprep.mubr.bf16.mxu0 %v2337_v35  ;;  %990 = vmatprep.mubr.bf16.mxu1 %v2337_v35 }
 0x26a   : > { %920 = vmatpush1.bf16.msra.mxu0 %v2584_v37  ;;  %961 = vmatpush1.bf16.msra.mxu1 %v2610_v44 }
 0x26b   : > { %921 = vmatprep.subr.bf16.mxu0 %v2588_v38  ;;  %962 = vmatprep.subr.bf16.mxu1 %v2621_v47 }
 0x26e   : > { %922 = vmatpush1.bf16.msra.mxu0 %v2598_v41  ;;  %963 = vmatpush1.bf16.msra.mxu1 %v2626_v48 }
 0x26f   : > { %923 = vmatprep.subr.bf16.mxu0 %v2603_v42  ;;  %964 = vmatprep.subr.bf16.mxu1 %v2630_v49 }
 0x272   : > { %924 = vmatpush1.bf16.msra.mxu0 %v2615_v45  ;;  %965 = vmatpush1.bf16.msra.mxu1 %v2642_v52 }
 0x273   : > { %925 = vmatprep.subr.bf16.mxu0 %v2618_v46  ;;  %966 = vmatprep.subr.bf16.mxu1 %v2646_v53 }
 0x276   : > { %926 = vmatpush1.bf16.msra.mxu0 %v2634_v50  ;;  %967 = vmatpush1.bf16.msra.mxu1 %v2658_v56 }
 0x277   : > { %927 = vmatprep.subr.bf16.mxu0 %v2638_v51  ;;  %968 = vmatprep.subr.bf16.mxu1 %v2662_v57 }
 0x27a   : > { %928 = vmatpush1.bf16.msra.mxu0 %v2649_v54  ;;  %969 = vmatpush1.bf16.msra.mxu1 %v2674_v60 }
 0x27b   : > { %929 = vmatprep.subr.bf16.mxu0 %v2653_v55  ;;  %970 = vmatprep.subr.bf16.mxu1 %v2678_v61 }
 0x27e   : > { %930 = vmatpush1.bf16.msra.mxu0 %v2666_v58  ;;  %971 = vmatpush1.bf16.msra.mxu1 %v2687_v0 }
 0x27f   : > { %931 = vmatprep.subr.bf16.mxu0 %v2670_v59  ;;  %972 = vmatprep.subr.bf16.mxu1 %v2691_v1 }
 0x282   : > { %932 = vmatpush1.bf16.msra.mxu0 %v2682_v62  ;;  %973 = vmatpush1.bf16.msra.mxu1 %v2696_v3 }
 0x283   : > { %1041 = vmatprep.subr.bf16.mxu0 %v2571_v33  ;;  %1082 = vmatprep.subr.bf16.mxu1 %v2591_v39 }
 0x325   : > { %v827_v14 = vpop.f32.mrf.mxu0  ;;  %v868_v15 = vpop.f32.mrf.mxu1 }
 0x326   : > { %v875_v17 = vadd.f32 %v827_v14, %v788_v4  ;;  %v877_v32 = vadd.f32 %v868_v15, %v790_v29 }
 0x327   : > { %v829_v18 = vpop.f32.mrf.mxu0  ;;  %v870_v19 = vpop.f32.mrf.mxu1 }
 0x328   : > { %v1872_v20 = vmul.f32 -1.442695, %v875_v17  ;;  %v876_v21 = vadd.f32 %v829_v18, %v789_v16  ;;  %v878_v28 = vadd.f32 %v870_v19, %v791_v27 }
 0x329   : > { %v831_v22 = vpop.f32.mrf.mxu0  ;;  %v872_v23 = vpop.f32.mrf.mxu1 }
 0x32a   : > { %2098 = vpow2.f32 %v1872_v20  ;;  %v1873_v24 = vmul.f32 -1.442695, %v876_v21  ;;  %v1874_v30 = vmul.f32 -1.442695, %v878_v28  ;;  %v913_v20 = vld [vmem:[%s911_s22 + $0x8] sm:$0xff] }
 0x32b   : > { %v832_v25 = vpop.f32.mrf.mxu0  ;;  %v873_v26 = vpop.f32.mrf.mxu1 }
 0x32c   : > { %2100 = vpow2.f32 %v1873_v24 }
 0x32d   : > { %2102 = vpow2.f32 %v1874_v30 }
 0x337   : > { %v2099_v31 = vpop.eup %2098 }
 0x338   : > { %v882_v63 = vadd.f32 1.0, %v2099_v31  ;;  %v915_v31 = vld [vmem:[%s911_s22 + $0x18] sm:$0xff] }
 0x339   : > { %v2101_v2 = vpop.eup %2100 }
 0x33a   : > { %2104 = vrcp.f32 %v882_v63  ;;  %v888_v5 = vadd.f32 1.0, %v2101_v2  ;;  %v2103_v6 = vpop.eup %2102  ;;  %v914_v63 = vld [vmem:[%s911_s22 + $0x10] sm:$0xff] }
 0x33b   : > { %2106 = vtanh.f32 %v877_v32  ;;  %v895_v11 = vadd.f32 1.0, %v2103_v6 }
 0x33c   : > { %2108 = vrcp.f32 %v888_v5 }
 0x33d   : > { %2110 = vrcp.f32 %v895_v11 }
 0x347   : > { %v2105_v7 = vpop.eup %2104 }
 0x348   : > { %v2107_v8 = vpop.eup %2106 }
 0x349   : > { %v2109_v10 = vpop.eup %2108  ;;  %v899_v12 = vmul.f32 %v2107_v8, %v2105_v7 }
 0x34a   : > { %v898_v13 = vmul.f32 %v2109_v10, %v2787_v9  ;;  %v2111_v14 = vpop.eup %2110  ;;  %v912_v9 = vld [vmem:[%s911_s22] sm:$0xff] }
 0x34c   : > { %v2833_v4 = vadd.f32 %v899_v12, %v898_v13 }
 0x34e   : > { %2112 = vtanh.f32 %v2833_v4 }
 0x35b   : > { %v2113_v15 = vpop.eup %2112 }
 0x35c   : > { %v902_v16 = vmul.f32 %v2113_v15, %v2111_v14 }
 0x35e   : > { %905 = vst [vmem:[%s904_s27] sm:$0xff] %v902_v16  ;;  %v916_v17 = vpack.c.bf16 %v902_v16, %v902_v16  ;;  %s1882_s27 = sshll.u32 %s2874_s6, 3  ;;  %s1883_s6 = sshll.u32 %s2779_s25, 2 }
 0x35f   : > { %s1028_s28 = scalar_lea.vmem %s2566_s0, %s1882_s27 [#allocation5]  ;;  %s2920_s9 = sadd.s32 %s1883_s6, %s1031_s11 }
 0x360   : > { %950 = vmatmul.mubr.bf16.vlgmr.msra.gmra.mxu0 %v916_v17  ;;  %991 = vmatmul.mubr.bf16.vlgmr.msra.gmra.mxu1 %v916_v17  ;;  %s1924_s22 = sshll.u32 %s2920_s9, 5  ;;  %s1154_s6 = smul.u32 5, %s2779_s25 }
 0x361   : > { %1042 = vmatpush1.bf16.msra.mxu0 %v2574_v34  ;;  %1083 = vmatpush1.bf16.msra.mxu1 %v2594_v40  ;;  %s1035_s27 = scalar_lea.vmem %s2564_s5, %s1924_s22 [#allocation4] }
 0x362   : > { %1043 = vmatprep.subr.bf16.mxu0 %v2580_v36  ;;  %1084 = vmatprep.subr.bf16.mxu1 %v2607_v43 }
 0x363   : > { %1073 = vmatprep.mubr.bf16.mxu0 %v2337_v35  ;;  %1114 = vmatprep.mubr.bf16.mxu1 %v2337_v35 }
 0x365   : > { %1044 = vmatpush1.bf16.msra.mxu0 %v2584_v37  ;;  %1085 = vmatpush1.bf16.msra.mxu1 %v2610_v44 }
 0x366   : > { %1045 = vmatprep.subr.bf16.mxu0 %v2588_v38  ;;  %1086 = vmatprep.subr.bf16.mxu1 %v2621_v47 }
 0x369   : > { %1046 = vmatpush1.bf16.msra.mxu0 %v2598_v41  ;;  %1087 = vmatpush1.bf16.msra.mxu1 %v2626_v48 }
 0x36a   : > { %1047 = vmatprep.subr.bf16.mxu0 %v2603_v42  ;;  %1088 = vmatprep.subr.bf16.mxu1 %v2630_v49 }
 0x36d   : > { %1048 = vmatpush1.bf16.msra.mxu0 %v2615_v45  ;;  %1089 = vmatpush1.bf16.msra.mxu1 %v2642_v52 }
 0x36e   : > { %1049 = vmatprep.subr.bf16.mxu0 %v2618_v46  ;;  %1090 = vmatprep.subr.bf16.mxu1 %v2646_v53 }
 0x371   : > { %1050 = vmatpush1.bf16.msra.mxu0 %v2634_v50  ;;  %1091 = vmatpush1.bf16.msra.mxu1 %v2658_v56 }
 0x372   : > { %1051 = vmatprep.subr.bf16.mxu0 %v2638_v51  ;;  %1092 = vmatprep.subr.bf16.mxu1 %v2662_v57 }
 0x375   : > { %1052 = vmatpush1.bf16.msra.mxu0 %v2649_v54  ;;  %1093 = vmatpush1.bf16.msra.mxu1 %v2674_v60 }
 0x376   : > { %1053 = vmatprep.subr.bf16.mxu0 %v2653_v55  ;;  %1094 = vmatprep.subr.bf16.mxu1 %v2678_v61 }
 0x379   : > { %1054 = vmatpush1.bf16.msra.mxu0 %v2666_v58  ;;  %1095 = vmatpush1.bf16.msra.mxu1 %v2687_v0 }
 0x37a   : > { %1055 = vmatprep.subr.bf16.mxu0 %v2670_v59  ;;  %1096 = vmatprep.subr.bf16.mxu1 %v2691_v1 }
 0x37d   : > { %1056 = vmatpush1.bf16.msra.mxu0 %v2682_v62  ;;  %1097 = vmatpush1.bf16.msra.mxu1 %v2696_v3 }
 0x37e   : > { %1165 = vmatprep.subr.bf16.mxu0 %v2571_v33  ;;  %1206 = vmatprep.subr.bf16.mxu1 %v2591_v39 }
 0x420   : > { %v951_v18 = vpop.f32.mrf.mxu0  ;;  %v992_v19 = vpop.f32.mrf.mxu1 }
 0x421   : > { %v999_v21 = vadd.f32 %v951_v18, %v912_v9  ;;  %v1001_v6 = vadd.f32 %v992_v19, %v914_v63 }
 0x422   : > { %v953_v22 = vpop.f32.mrf.mxu0  ;;  %v994_v23 = vpop.f32.mrf.mxu1 }
 0x423   : > { %v1879_v24 = vmul.f32 -1.442695, %v999_v21  ;;  %v1000_v25 = vadd.f32 %v953_v22, %v913_v20  ;;  %v1002_v32 = vadd.f32 %v994_v23, %v915_v31 }
 0x424   : > { %v955_v26 = vpop.f32.mrf.mxu0  ;;  %v996_v27 = vpop.f32.mrf.mxu1 }
 0x425   : > { %2114 = vpow2.f32 %v1879_v24  ;;  %v1880_v28 = vmul.f32 -1.442695, %v1000_v25  ;;  %v1881_v2 = vmul.f32 -1.442695, %v1002_v32  ;;  %v1039_v25 = vld [vmem:[%s1035_s27 + $0x18] sm:$0xff]  ;;  %v1038_v27 = vld [vmem:[%s1035_s27 + $0x10] sm:$0xff] }
 0x426   : > { %v956_v29 = vpop.f32.mrf.mxu0  ;;  %v997_v30 = vpop.f32.mrf.mxu1 }
 0x427   : > { %2116 = vpow2.f32 %v1880_v28 }
 0x428   : > { %2118 = vpow2.f32 %v1881_v2 }
 0x432   : > { %v2115_v5 = vpop.eup %2114 }
 0x433   : > { %v1006_v7 = vadd.f32 1.0, %v2115_v5 }
 0x434   : > { %v2117_v8 = vpop.eup %2116 }
 0x435   : > { %2120 = vrcp.f32 %v1006_v7  ;;  %v1012_v10 = vadd.f32 1.0, %v2117_v8  ;;  %v2119_v11 = vpop.eup %2118 }
 0x436   : > { %2122 = vtanh.f32 %v1001_v6  ;;  %v1019_v15 = vadd.f32 1.0, %v2119_v11 }
 0x437   : > { %2124 = vrcp.f32 %v1012_v10 }
 0x438   : > { %2126 = vrcp.f32 %v1019_v15 }
 0x442   : > { %v2121_v12 = vpop.eup %2120 }
 0x443   : > { %v2123_v13 = vpop.eup %2122 }
 0x444   : > { %v2125_v14 = vpop.eup %2124  ;;  %v1023_v16 = vmul.f32 %v2123_v13, %v2121_v12 }
 0x445   : > { %v1022_v17 = vmul.f32 %v2125_v14, %v2833_v4  ;;  %v2127_v18 = vpop.eup %2126 }
 0x447   : > { %v2879_v9 = vadd.f32 %v1023_v16, %v1022_v17  ;;  %v2931_v17 = vld [vmem:[%s2562_s29 + $0xe0] ss:$16 sps:$4 sm:$0xff]  }
 0x449   : > { %2128 = vtanh.f32 %v2879_v9 }
 0x456   : > { %v2129_v19 = vpop.eup %2128 }
 0x457   : > { %v1026_v20 = vmul.f32 %v2129_v19, %v2127_v18  ;;  %v2939_v18 = vld [vmem:[%s2562_s29 + $0xc4] ss:$16 sps:$4 sm:$0xff]   ;;  %v2946_v19 = vld [vmem:[%s2562_s29 + $0xc0] ss:$16 sps:$4 sm:$0xff]  }
 0x459   : > { %1029 = vst [vmem:[%s1028_s28] sm:$0xff] %v1026_v20  ;;  %v1040_v21 = vpack.c.bf16 %v1026_v20, %v1026_v20  ;;  %s1889_s28 = sshll.u32 %s2920_s9, 3  ;;  %v2951_v20 = vld [vmem:[%s2562_s29 + $0xa4] ss:$16 sps:$4 sm:$0xff]   ;;  %s1890_s9 = sshll.u32 %s2322_s18, 1 }
 0x45a   : > { %s1152_s11 = scalar_lea.vmem %s2566_s0, %s1889_s28 [#allocation5]  ;;  %s2990_s22 = sadd.s32 %s1890_s9, %s1154_s6 }
 0x45b   : > { %1074 = vmatmul.mubr.bf16.vlgmr.msra.gmra.mxu0 %v1040_v21  ;;  %1115 = vmatmul.mubr.bf16.vlgmr.msra.gmra.mxu1 %v1040_v21  ;;  %v2956_v21 = vld [vmem:[%s2562_s29 + $0xa0] ss:$16 sps:$4 sm:$0xff]   ;;  %s1278_s9 = smul.u32 6, %s2779_s25 }
 0x45c   : > { %1166 = vmatpush1.bf16.msra.mxu0 %v2574_v34  ;;  %1207 = vmatpush1.bf16.msra.mxu1 %v2594_v40  ;;  %v1036_v34 = vld [vmem:[%s1035_s27] sm:$0xff] }
 0x45d   : > { %1167 = vmatprep.subr.bf16.mxu0 %v2580_v36  ;;  %1208 = vmatprep.subr.bf16.mxu1 %v2607_v43 }
 0x45e   : > { %1197 = vmatprep.mubr.bf16.mxu0 %v2337_v35  ;;  %1238 = vmatprep.mubr.bf16.mxu1 %v2337_v35 }
 0x460   : > { %1168 = vmatpush1.bf16.msra.mxu0 %v2584_v37  ;;  %1209 = vmatpush1.bf16.msra.mxu1 %v2610_v44 }
 0x461   : > { %1169 = vmatprep.subr.bf16.mxu0 %v2588_v38  ;;  %1210 = vmatprep.subr.bf16.mxu1 %v2621_v47  ;;  %v1037_v38 = vld [vmem:[%s1035_s27 + $0x8] sm:$0xff]  ;;  %s1925_s27 = sshll.u32 %s2990_s22, 5 }
 0x462   : > { %s1159_s28 = scalar_lea.vmem %s2564_s5, %s1925_s27 [#allocation4] }
 0x464   : > { %1170 = vmatpush1.bf16.msra.mxu0 %v2598_v41  ;;  %1211 = vmatpush1.bf16.msra.mxu1 %v2626_v48 }
 0x465   : > { %1171 = vmatprep.subr.bf16.mxu0 %v2603_v42  ;;  %1212 = vmatprep.subr.bf16.mxu1 %v2630_v49 }
 0x468   : > { %1172 = vmatpush1.bf16.msra.mxu0 %v2615_v45  ;;  %1213 = vmatpush1.bf16.msra.mxu1 %v2642_v52 }
 0x469   : > { %1173 = vmatprep.subr.bf16.mxu0 %v2618_v46  ;;  %1214 = vmatprep.subr.bf16.mxu1 %v2646_v53 }
 0x46c   : > { %1174 = vmatpush1.bf16.msra.mxu0 %v2634_v50  ;;  %1215 = vmatpush1.bf16.msra.mxu1 %v2658_v56 }
 0x46d   : > { %1175 = vmatprep.subr.bf16.mxu0 %v2638_v51  ;;  %1216 = vmatprep.subr.bf16.mxu1 %v2662_v57 }
 0x470   : > { %1176 = vmatpush1.bf16.msra.mxu0 %v2649_v54  ;;  %1217 = vmatpush1.bf16.msra.mxu1 %v2674_v60 }
 0x471   : > { %1177 = vmatprep.subr.bf16.mxu0 %v2653_v55  ;;  %1218 = vmatprep.subr.bf16.mxu1 %v2678_v61 }
 0x474   : > { %1178 = vmatpush1.bf16.msra.mxu0 %v2666_v58  ;;  %1219 = vmatpush1.bf16.msra.mxu1 %v2687_v0 }
 0x475   : > { %1179 = vmatprep.subr.bf16.mxu0 %v2670_v59  ;;  %1220 = vmatprep.subr.bf16.mxu1 %v2691_v1 }
 0x478   : > { %1180 = vmatpush1.bf16.msra.mxu0 %v2682_v62  ;;  %1221 = vmatpush1.bf16.msra.mxu1 %v2696_v3 }
 0x479   : > { %1288 = vmatprep.subr.bf16.mxu0 %v2571_v33  ;;  %1329 = vmatprep.subr.bf16.mxu1 %v2591_v39 }
 0x51b   : > { %v1075_v36 = vpop.f32.mrf.mxu0  ;;  %v1116_v37 = vpop.f32.mrf.mxu1 }
 0x51c   : > { %v1123_v40 = vadd.f32 %v1075_v36, %v1036_v34  ;;  %v1125_v30 = vadd.f32 %v1116_v37, %v1038_v27 }
 0x51d   : > { %v1077_v41 = vpop.f32.mrf.mxu0  ;;  %v1118_v42 = vpop.f32.mrf.mxu1 }
 0x51e   : > { %v1886_v46 = vmul.f32 -1.442695, %v1123_v40  ;;  %v1124_v4 = vadd.f32 %v1077_v41, %v1037_v38  ;;  %v1126_v26 = vadd.f32 %v1118_v42, %v1039_v25 }
 0x51f   : > { %v1079_v22 = vpop.f32.mrf.mxu0  ;;  %v1120_v33 = vpop.f32.mrf.mxu1 }
 0x520   : > { %2130 = vpow2.f32 %v1886_v46  ;;  %v1887_v39 = vmul.f32 -1.442695, %v1124_v4  ;;  %v1888_v28 = vmul.f32 -1.442695, %v1126_v26 }
 0x521   : > { %v1080_v23 = vpop.f32.mrf.mxu0  ;;  %v1121_v24 = vpop.f32.mrf.mxu1 }
 0x522   : > { %2132 = vpow2.f32 %v1887_v39 }
 0x523   : > { %2134 = vpow2.f32 %v1888_v28  ;;  %v2204_v28 = vld [vmem:[%s2562_s29 + $0xcc] ss:$16 sps:$4 sm:$0xff]  }
 0x52d   : > { %v2131_v29 = vpop.eup %2130 }
 0x52e   : > { %v1130_v31 = vadd.f32 1.0, %v2131_v29  ;;  %v2205_v29 = vld [vmem:[%s2562_s29 + $0xc8] ss:$16 sps:$4 sm:$0xff]  }
 0x52f   : > { %v2133_v32 = vpop.eup %2132 }
 0x530   : > { %2136 = vrcp.f32 %v1130_v31  ;;  %v1136_v63 = vadd.f32 1.0, %v2133_v32  ;;  %v2135_v2 = vpop.eup %2134  ;;  %v2207_v31 = vld [vmem:[%s2562_s29 + $0xa8] ss:$16 sps:$4 sm:$0xff]   ;;  %v2209_v32 = vld [vmem:[%s2562_s29 + $0x80] ss:$16 sps:$4 sm:$0xff]  }
 0x531   : > { %2138 = vtanh.f32 %v1125_v30  ;;  %v1143_v8 = vadd.f32 1.0, %v2135_v2  ;;  %v2206_v30 = vld [vmem:[%s2562_s29 + $0xac] ss:$16 sps:$4 sm:$0xff]  }
 0x532   : > { %2140 = vrcp.f32 %v1136_v63  ;;  %v2210_v63 = vld [vmem:[%s2562_s29 + $0x88] ss:$16 sps:$4 sm:$0xff]   ;;  %v2211_v2 = vld [vmem:[%s2562_s29 + $0x6c] ss:$16 sps:$4 sm:$0xff]  }
 0x533   : > { %2142 = vrcp.f32 %v1143_v8  ;;  %v2215_v8 = vld [vmem:[%s2562_s29 + $0x4c] ss:$16 sps:$4 sm:$0xff]  }
 0x53d   : > { %v2137_v5 = vpop.eup %2136 }
 0x53e   : > { %v2139_v6 = vpop.eup %2138 }
 0x53f   : > { %v2141_v7 = vpop.eup %2140  ;;  %v1147_v10 = vmul.f32 %v2139_v6, %v2137_v5  ;;  %v2212_v5 = vld [vmem:[%s2562_s29 + $0x60] ss:$16 sps:$4 sm:$0xff]   ;;  %v2213_v6 = vld [vmem:[%s2562_s29 + $0x68] ss:$16 sps:$4 sm:$0xff]  }
 0x540   : > { %v1146_v11 = vmul.f32 %v2141_v7, %v2879_v9  ;;  %v2143_v13 = vpop.eup %2142  ;;  %v2935_v9 = vld [vmem:[%s2562_s29 + $0xe8] ss:$16 sps:$4 sm:$0xff]   ;;  %v2214_v7 = vld [vmem:[%s2562_s29 + $0x44] ss:$16 sps:$4 sm:$0xff]  }
 0x542   : > { %v2925_v12 = vadd.f32 %v1147_v10, %v1146_v11  ;;  %v2216_v10 = vld [vmem:[%s2562_s29 + $0x40] ss:$16 sps:$4 sm:$0xff]   ;;  %v2217_v11 = vld [vmem:[%s2562_s29 + $0x48] ss:$16 sps:$4 sm:$0xff]  }
 0x544   : > { %2144 = vtanh.f32 %v2925_v12 }
 0x551   : > { %v2145_v14 = vpop.eup %2144 }
 0x552   : > { %v1150_v15 = vmul.f32 %v2145_v14, %v2143_v13  ;;  %v2219_v13 = vld [vmem:[%s2562_s29 + $0x2c] ss:$16 sps:$4 sm:$0xff]   ;;  %v2220_v14 = vld [vmem:[%s2562_s29 + $0x20] ss:$16 sps:$4 sm:$0xff]  }
 0x554   : > { %1153 = vst [vmem:[%s1152_s11] sm:$0xff] %v1150_v15  ;;  %v1164_v16 = vpack.c.bf16 %v1150_v15, %v1150_v15  ;;  %s1896_s11 = sshll.u32 %s2990_s22, 3  ;;  %v2221_v15 = vld [vmem:[%s2562_s29 + $0x28] ss:$16 sps:$4 sm:$0xff]   ;;  %s3034_s22 = sadd.s32 %s2322_s18, %s1278_s9 }
 0x555   : > { %s1276_s6 = scalar_lea.vmem %s2566_s0, %s1896_s11 [#allocation5]  ;;  %s1926_s27 = sshll.u32 %s3034_s22, 5 }
 0x556   : > { %1198 = vmatmul.mubr.bf16.vlgmr.msra.gmra.mxu0 %v1164_v16  ;;  %1239 = vmatmul.mubr.bf16.vlgmr.msra.gmra.mxu1 %v1164_v16  ;;  %v2222_v16 = vld [vmem:[%s2562_s29 + $0x4] ss:$16 sps:$4 sm:$0xff]  }
 0x557   : > { %1289 = vmatpush1.bf16.msra.mxu0 %v2931_v17  ;;  %1330 = vmatpush1.bf16.msra.mxu1 %v2935_v9 }
 0x558   : > { %1290 = vmatprep.subr.bf16.mxu0 %v2939_v18  ;;  %1331 = vmatprep.subr.bf16.mxu1 %v2607_v43  ;;  %v2961_v43 = vld [vmem:[%s2562_s29 + $0x84] ss:$16 sps:$4 sm:$0xff]  }
 0x559   : > { %1320 = vmatprep.mubr.bf16.mxu0 %v2337_v35  ;;  %1361 = vmatprep.mubr.bf16.mxu1 %v2337_v35 }
 0x55b   : > { %1291 = vmatpush1.bf16.msra.mxu0 %v2946_v19  ;;  %1332 = vmatpush1.bf16.msra.mxu1 %v2610_v44  ;;  %v2968_v44 = vld [vmem:[%s2562_s29 + $0x64] ss:$16 sps:$4 sm:$0xff]  }
 0x55c   : > { %1292 = vmatprep.subr.bf16.mxu0 %v2951_v20  ;;  %1333 = vmatprep.subr.bf16.mxu1 %v2621_v47  ;;  %v2203_v47 = vld [vmem:[%s2562_s29 + $0xec] ss:$16 sps:$4 sm:$0xff]  }
 0x55f   : > { %1293 = vmatpush1.bf16.msra.mxu0 %v2956_v21  ;;  %1334 = vmatpush1.bf16.msra.mxu1 %v2626_v48  ;;  %v1160_v48 = vld [vmem:[%s1159_s28] sm:$0xff] }
 0x560   : > { %1294 = vmatprep.subr.bf16.mxu0 %v2961_v43  ;;  %1335 = vmatprep.subr.bf16.mxu1 %v2630_v49 }
 0x563   : > { %1295 = vmatpush1.bf16.msra.mxu0 %v2615_v45  ;;  %1336 = vmatpush1.bf16.msra.mxu1 %v2642_v52  ;;  %v2202_v45 = vld [vmem:[%s2562_s29 + $0xe4] ss:$16 sps:$4 sm:$0xff]  }
 0x564   : > { %1296 = vmatprep.subr.bf16.mxu0 %v2968_v44  ;;  %1337 = vmatprep.subr.bf16.mxu1 %v2646_v53 }
 0x567   : > { %1297 = vmatpush1.bf16.msra.mxu0 %v2634_v50  ;;  %1338 = vmatpush1.bf16.msra.mxu1 %v2658_v56 }
 0x568   : > { %1298 = vmatprep.subr.bf16.mxu0 %v2638_v51  ;;  %1339 = vmatprep.subr.bf16.mxu1 %v2662_v57  ;;  %v1161_v51 = vld [vmem:[%s1159_s28 + $0x8] sm:$0xff] }
 0x56b   : > { %1299 = vmatpush1.bf16.msra.mxu0 %v2649_v54  ;;  %1340 = vmatpush1.bf16.msra.mxu1 %v2674_v60 }
 0x56c   : > { %1300 = vmatprep.subr.bf16.mxu0 %v2653_v55  ;;  %1341 = vmatprep.subr.bf16.mxu1 %v2678_v61 }
 0x56f   : > { %1301 = vmatpush1.bf16.msra.mxu0 %v2666_v58  ;;  %1342 = vmatpush1.bf16.msra.mxu1 %v2687_v0 }
 0x570   : > { %1302 = vmatprep.subr.bf16.mxu0 %v2670_v59  ;;  %1343 = vmatprep.subr.bf16.mxu1 %v2691_v1  ;;  %v1162_v1 = vld [vmem:[%s1159_s28 + $0x10] sm:$0xff] }
 0x573   : > { %1303 = vmatpush1.bf16.msra.mxu0 %v2682_v62  ;;  %1344 = vmatpush1.bf16.msra.mxu1 %v2696_v3  ;;  %v1163_v62 = vld [vmem:[%s1159_s28 + $0x18] sm:$0xff]  ;;  %s1282_s28 = scalar_lea.vmem %s2564_s5, %s1926_s27 [#allocation4] }
 0x574   : > { %1410 = vmatprep.subr.bf16.mxu0 %v2202_v45  ;;  %1451 = vmatprep.subr.bf16.mxu1 %v2203_v47 }
 0x616   : > { %v1199_v49 = vpop.f32.mrf.mxu0  ;;  %v1240_v50 = vpop.f32.mrf.mxu1 }
 0x617   : > { %v1247_v52 = vadd.f32 %v1199_v49, %v1160_v48  ;;  %v1249_v36 = vadd.f32 %v1240_v50, %v1162_v1 }
 0x618   : > { %v1201_v53 = vpop.f32.mrf.mxu0  ;;  %v1242_v54 = vpop.f32.mrf.mxu1 }
 0x619   : > { %v1893_v55 = vmul.f32 -1.442695, %v1247_v52  ;;  %v1248_v56 = vadd.f32 %v1201_v53, %v1161_v51  ;;  %v1250_v0 = vadd.f32 %v1242_v54, %v1163_v62 }
 0x61a   : > { %v1203_v57 = vpop.f32.mrf.mxu0  ;;  %v1244_v58 = vpop.f32.mrf.mxu1 }
 0x61b   : > { %2146 = vpow2.f32 %v1893_v55  ;;  %v1894_v59 = vmul.f32 -1.442695, %v1248_v56  ;;  %v1895_v3 = vmul.f32 -1.442695, %v1250_v0  ;;  %v1286_v55 = vld [vmem:[%s1282_s28 + $0x18] sm:$0xff]  ;;  %v1285_v57 = vld [vmem:[%s1282_s28 + $0x10] sm:$0xff] }
 0x61c   : > { %v1204_v60 = vpop.f32.mrf.mxu0  ;;  %v1245_v61 = vpop.f32.mrf.mxu1 }
 0x61d   : > { %2148 = vpow2.f32 %v1894_v59 }
 0x61e   : > { %2150 = vpow2.f32 %v1895_v3 }
 0x628   : > { %v2147_v34 = vpop.eup %2146 }
 0x629   : > { %v1254_v37 = vadd.f32 1.0, %v2147_v34 }
 0x62a   : > { %v2149_v38 = vpop.eup %2148 }
 0x62b   : > { %2152 = vrcp.f32 %v1254_v37  ;;  %v1260_v40 = vadd.f32 1.0, %v2149_v38  ;;  %v2151_v41 = vpop.eup %2150 }
 0x62c   : > { %2154 = vtanh.f32 %v1249_v36  ;;  %v1267_v22 = vadd.f32 1.0, %v2151_v41 }
 0x62d   : > { %2156 = vrcp.f32 %v1260_v40 }
 0x62e   : > { %2158 = vrcp.f32 %v1267_v22 }
 0x638   : > { %v2153_v42 = vpop.eup %2152 }
 0x639   : > { %v2155_v46 = vpop.eup %2154 }
 0x63a   : > { %v2157_v4 = vpop.eup %2156  ;;  %v1271_v33 = vmul.f32 %v2155_v46, %v2153_v42 }
 0x63b   : > { %v1270_v39 = vmul.f32 %v2157_v4, %v2925_v12  ;;  %v2159_v24 = vpop.eup %2158  ;;  %v2218_v12 = vld [vmem:[%s2562_s29 + $0x24] ss:$16 sps:$4 sm:$0xff]  }
 0x63d   : > { %v2995_v23 = vadd.f32 %v1271_v33, %v1270_v39 }
 0x63f   : > { %2160 = vtanh.f32 %v2995_v23 }
 0x64c   : > { %v2161_v25 = vpop.eup %2160 }
 0x64d   : > { %v1274_v26 = vmul.f32 %v2161_v25, %v2159_v24 }
 0x64f   : > { %1277 = vst [vmem:[%s1276_s6] sm:$0xff] %v1274_v26  ;;  %v1287_v27 = vpack.c.bf16 %v1274_v26, %v1274_v26  ;;  %s1927_s6 = smul.u32 224, %s2779_s25 }
 0x651   : > { %1321 = vmatmul.mubr.bf16.vlgmr.msra.gmra.mxu0 %v1287_v27  ;;  %1362 = vmatmul.mubr.bf16.vlgmr.msra.gmra.mxu1 %v1287_v27  ;;  %s1404_s9 = scalar_lea.vmem %s2564_s5, %s1927_s6 [#allocation4]  ;;  %s1908_s5 = smul.u32 56, %s2779_s25 }
 0x652   : > { %1411 = vmatpush1.bf16.msra.mxu0 %v2931_v17  ;;  %1452 = vmatpush1.bf16.msra.mxu1 %v2935_v9  ;;  %v2223_v17 = vld [vmem:[%s2562_s29 + $0xc] ss:$16 sps:$4 sm:$0xff]   ;;  %v2224_v9 = vld [vmem:[%s2562_s29] ss:$16 sps:$4 sm:$0xff]  }
 0x653   : > { %1412 = vmatprep.subr.bf16.mxu0 %v2939_v18  ;;  %1453 = vmatprep.subr.bf16.mxu1 %v2204_v28  ;;  %v2225_v18 = vld [vmem:[%s2562_s29 + $0x8] ss:$16 sps:$4 sm:$0xff]   ;;  %v1405_v33 = vld [vmem:[%s1404_s9] sm:$0xff] }
 0x654   : > { %1442 = vmatprep.mubr.bf16.mxu0 %v2337_v35  ;;  %1483 = vmatprep.mubr.bf16.mxu1 %v2337_v35  ;;  %v2208_v35 = vld [vmem:[%s2562_s29 + $0x8c] ss:$16 sps:$4 sm:$0xff]   ;;  %s1902_s29 = sshll.u32 %s3034_s22, 3  ;;  %s1521_s22 = scalar_lea.vmem %s2566_s0, %s1908_s5 [#allocation5] }
 0x655   : > { %s1399_s11 = scalar_lea.vmem %s2566_s0, %s1902_s29 [#allocation5]  ;;  %v1406_v25 = vld [vmem:[%s1404_s9 + $0x8] sm:$0xff] }
 0x656   : > { %1413 = vmatpush1.bf16.msra.mxu0 %v2946_v19  ;;  %1454 = vmatpush1.bf16.msra.mxu1 %v2205_v29  ;;  %v1283_v19 = vld [vmem:[%s1282_s28] sm:$0xff] }
 0x657   : > { %1414 = vmatprep.subr.bf16.mxu0 %v2951_v20  ;;  %1455 = vmatprep.subr.bf16.mxu1 %v2206_v30 }
 0x65a   : > { %1415 = vmatpush1.bf16.msra.mxu0 %v2956_v21  ;;  %1456 = vmatpush1.bf16.msra.mxu1 %v2207_v31 }
 0x65b   : > { %1416 = vmatprep.subr.bf16.mxu0 %v2961_v43  ;;  %1457 = vmatprep.subr.bf16.mxu1 %v2208_v35  ;;  %v1284_v43 = vld [vmem:[%s1282_s28 + $0x8] sm:$0xff] }
 0x65e   : > { %1417 = vmatpush1.bf16.msra.mxu0 %v2209_v32  ;;  %1458 = vmatpush1.bf16.msra.mxu1 %v2210_v63 }
 0x65f   : > { %1418 = vmatprep.subr.bf16.mxu0 %v2968_v44  ;;  %1459 = vmatprep.subr.bf16.mxu1 %v2211_v2  ;;  %v1408_v2 = vld [vmem:[%s1404_s9 + $0x18] sm:$0xff] }
 0x662   : > { %1419 = vmatpush1.bf16.msra.mxu0 %v2212_v5  ;;  %1460 = vmatpush1.bf16.msra.mxu1 %v2213_v6  ;;  %v1407_v6 = vld [vmem:[%s1404_s9 + $0x10] sm:$0xff] }
 0x663   : > { %1420 = vmatprep.subr.bf16.mxu0 %v2214_v7  ;;  %1461 = vmatprep.subr.bf16.mxu1 %v2215_v8 }
 0x666   : > { %1421 = vmatpush1.bf16.msra.mxu0 %v2216_v10  ;;  %1462 = vmatpush1.bf16.msra.mxu1 %v2217_v11 }
 0x667   : > { %1422 = vmatprep.subr.bf16.mxu0 %v2218_v12  ;;  %1463 = vmatprep.subr.bf16.mxu1 %v2219_v13 }
 0x66a   : > { %1423 = vmatpush1.bf16.msra.mxu0 %v2220_v14  ;;  %1464 = vmatpush1.bf16.msra.mxu1 %v2221_v15 }
 0x66b   : > { %1424 = vmatprep.subr.bf16.mxu0 %v2222_v16  ;;  %1465 = vmatprep.subr.bf16.mxu1 %v2223_v17 }
 0x66e   : > { %1425 = vmatpush1.bf16.msra.mxu0 %v2224_v9  ;;  %1466 = vmatpush1.bf16.msra.mxu1 %v2225_v18 }
 0x711   : > { %v1322_v20 = vpop.f32.mrf.mxu0  ;;  %v1363_v21 = vpop.f32.mrf.mxu1 }
 0x712   : > { %v1370_v44 = vadd.f32 %v1322_v20, %v1283_v19  ;;  %v1372_v60 = vadd.f32 %v1363_v21, %v1285_v57 }
 0x713   : > { %v1324_v45 = vpop.f32.mrf.mxu0  ;;  %v1365_v47 = vpop.f32.mrf.mxu1 }
 0x714   : > { %v1899_v48 = vmul.f32 -1.442695, %v1370_v44  ;;  %v1371_v49 = vadd.f32 %v1324_v45, %v1284_v43  ;;  %v1373_v56 = vadd.f32 %v1365_v47, %v1286_v55 }
 0x715   : > { %v1326_v50 = vpop.f32.mrf.mxu0  ;;  %v1367_v51 = vpop.f32.mrf.mxu1 }
 0x716   : > { %2162 = vpow2.f32 %v1899_v48  ;;  %v1900_v52 = vmul.f32 -1.442695, %v1371_v49  ;;  %v1901_v58 = vmul.f32 -1.442695, %v1373_v56 }
 0x717   : > { %v1327_v53 = vpop.f32.mrf.mxu0  ;;  %v1368_v54 = vpop.f32.mrf.mxu1 }
 0x718   : > { %2164 = vpow2.f32 %v1900_v52 }
 0x719   : > { %2166 = vpow2.f32 %v1901_v58 }
 0x723   : > { %v2163_v59 = vpop.eup %2162 }
 0x724   : > { %v1377_v61 = vadd.f32 1.0, %v2163_v59 }
 0x725   : > { %v2165_v62 = vpop.eup %2164 }
 0x726   : > { %2168 = vrcp.f32 %v1377_v61  ;;  %v1383_v0 = vadd.f32 1.0, %v2165_v62  ;;  %v2167_v1 = vpop.eup %2166 }
 0x727   : > { %2170 = vtanh.f32 %v1372_v60  ;;  %v1390_v37 = vadd.f32 1.0, %v2167_v1 }
 0x728   : > { %2172 = vrcp.f32 %v1383_v0 }
 0x729   : > { %2174 = vrcp.f32 %v1390_v37 }
 0x733   : > { %v2169_v3 = vpop.eup %2168 }
 0x734   : > { %v2171_v34 = vpop.eup %2170 }
 0x735   : > { %v2173_v36 = vpop.eup %2172  ;;  %v1394_v38 = vmul.f32 %v2171_v34, %v2169_v3 }
 0x736   : > { %v1393_v40 = vmul.f32 %v2173_v36, %v2995_v23  ;;  %v2175_v42 = vpop.eup %2174 }
 0x738   : > { %v1395_v41 = vadd.f32 %v1394_v38, %v1393_v40 }
 0x73a   : > { %2176 = vtanh.f32 %v1395_v41 }
 0x747   : > { %v2177_v46 = vpop.eup %2176 }
 0x748   : > { %v1397_v4 = vmul.f32 %v2177_v46, %v2175_v42 }
 0x74a   : > { %1400 = vst [vmem:[%s1399_s11] sm:$0xff] %v1397_v4  ;;  %v1409_v22 = vpack.c.bf16 %v1397_v4, %v1397_v4 }
 0x74c   : > { %1443 = vmatmul.mubr.bf16.vlgmr.msra.gmra.mxu0 %v1409_v22  ;;  %1484 = vmatmul.mubr.bf16.vlgmr.msra.gmra.mxu1 %v1409_v22 }
 0x80c   : > { %v1444_v39 = vpop.f32.mrf.mxu0  ;;  %v1485_v24 = vpop.f32.mrf.mxu1 }
 0x80d   : > { %v1492_v26 = vadd.f32 %v1444_v39, %v1405_v33  ;;  %v1494_v10 = vadd.f32 %v1485_v24, %v1407_v6 }
 0x80e   : > { %v1446_v23 = vpop.f32.mrf.mxu0  ;;  %v1487_v27 = vpop.f32.mrf.mxu1 }
 0x80f   : > { %v1905_v28 = vmul.f32 -1.442695, %v1492_v26  ;;  %v1493_v29 = vadd.f32 %v1446_v23, %v1406_v25  ;;  %v1495_v5 = vadd.f32 %v1487_v27, %v1408_v2 }
 0x810   : > { %v1448_v30 = vpop.f32.mrf.mxu0  ;;  %v1489_v31 = vpop.f32.mrf.mxu1 }
 0x811   : > { %2178 = vpow2.f32 %v1905_v28  ;;  %v1906_v35 = vmul.f32 -1.442695, %v1493_v29  ;;  %v1907_v7 = vmul.f32 -1.442695, %v1495_v5 }
 0x812   : > { %v1449_v32 = vpop.f32.mrf.mxu0  ;;  %v1490_v63 = vpop.f32.mrf.mxu1 }
 0x813   : > { %2180 = vpow2.f32 %v1906_v35 }
 0x814   : > { %2182 = vpow2.f32 %v1907_v7 }
 0x81e   : > { %v2179_v8 = vpop.eup %2178 }
 0x81f   : > { %v1499_v11 = vadd.f32 1.0, %v2179_v8 }
 0x820   : > { %v2181_v12 = vpop.eup %2180 }
 0x821   : > { %2184 = vrcp.f32 %v1499_v11  ;;  %v1505_v13 = vadd.f32 1.0, %v2181_v12  ;;  %v2183_v14 = vpop.eup %2182 }
 0x822   : > { %2186 = vtanh.f32 %v1494_v10  ;;  %v1512_v9 = vadd.f32 1.0, %v2183_v14 }
 0x823   : > { %2188 = vrcp.f32 %v1505_v13 }
 0x824   : > { %2190 = vrcp.f32 %v1512_v9 }
 0x82e   : > { %v2185_v15 = vpop.eup %2184 }
 0x82f   : > { %v2187_v16 = vpop.eup %2186 }
 0x830   : > { %v2189_v17 = vpop.eup %2188  ;;  %v1516_v18 = vmul.f32 %v2187_v16, %v2185_v15 }
 0x831   : > { %v1515_v19 = vmul.f32 %v2189_v17, %v1395_v41  ;;  %v2191_v21 = vpop.eup %2190 }
 0x833   : > { %v1517_v20 = vadd.f32 %v1516_v18, %v1515_v19 }
 0x835   : > { %2192 = vtanh.f32 %v1517_v20  ;;  %1524 = vst [vmem:[#allocation3] sm:$0xff] %v1517_v20 }
 0x841   : > { %1528 = sbr.rel (%p1909_p7) target bundleno = 2119 (0x847), region = 59 }
 0x842   : > { %v2193_v43 = vpop.eup %2192 }
 0x843   : > { %v1519_v44 = vmul.f32 %v2193_v43, %v2191_v21 }
 0x845   : > { %1522 = vst [vmem:[%s1521_s22] sm:$0xff] %v1519_v44  ;;  %1523 = vst [vmem:[#allocation2] sm:$0xff] %v1519_v44 }
 0x846   : > { %1529 = vst [vmem:[%s3128_s15] sm:$0xff] %v1519_v44 }
 0x847 PF: > { %s3050_s27 = scalar_lea.sflag [#allocation7], %s314_s4  ;;  %1541 = sbr.rel (!%p2444_p6) target bundleno = 2132 (0x854), region = 63 }
 0x848   : > { %s1543_s28 = smul.u32 (%p2444_p6), %s2318_s17, %s2779_s25  ;;  %s1544_s29 = ssub.s32 (%p2444_p6), 1, %s2318_s17 }
 0x849   : > { %s1545_s4 = smul.u32 (%p2444_p6), %s2322_s18, %s1544_s29 }
 0x84b   : > { %s1546_s11 = sadd.s32 (%p2444_p6), %s1545_s4, %s1543_s28 }
 0x84c   : > { %s1928_s26 = sshll.u32 %s1546_s11, 4 }
 0x84d   : > { %v1594_v45 = vld [vmem:[%s2566_s0] sm:$0xff]  ;;  %v1596_v47 = vld [vmem:[%s2566_s0 + $0x8] sm:$0xff]  ;;  %v1598_v48 = vld [vmem:[%s2566_s0 + $0x10] sm:$0xff]  ;;  %s1549_s6 = sadd.s32 %s2322_s18, %s1928_s26 }
 0x84e   : > { %v1600_v49 = vld [vmem:[%s2566_s0 + $0x18] sm:$0xff]  ;;  %v1602_v50 = vld [vmem:[%s2566_s0 + $0x20] sm:$0xff]  ;;  %v1604_v51 = vld [vmem:[%s2566_s0 + $0x28] sm:$0xff]  ;;  %s1914_s9 = sshll.u32 %s1549_s6, 3 }
 0x84f   : > { %v1606_v52 = vld [vmem:[%s2566_s0 + $0x30] sm:$0xff]  ;;  %v1608_v53 = vld [vmem:[%s2566_s0 + $0x38] sm:$0xff]  ;;  %s1551_s15 = scalar_lea.vmem %s3125_s2, %s1914_s9 }
 0x850   : > { %1595 = vst [vmem:[%s1551_s15] sm:$0xff] %v1594_v45  ;;  %1597 = vst [vmem:[%s1551_s15 + $0x10] sm:$0xff] %v1596_v47 }
 0x851   : > { %1599 = vst [vmem:[%s1551_s15 + $0x20] sm:$0xff] %v1598_v48  ;;  %1601 = vst [vmem:[%s1551_s15 + $0x30] sm:$0xff] %v1600_v49 }
 0x852   : > { %1603 = vst [vmem:[%s1551_s15 + $0x40] sm:$0xff] %v1602_v50  ;;  %1605 = vst [vmem:[%s1551_s15 + $0x50] sm:$0xff] %v1604_v51 }
 0x853   : > { %1607 = vst [vmem:[%s1551_s15 + $0x60] sm:$0xff] %v1606_v52  ;;  %1609 = vst [vmem:[%s1551_s15 + $0x70] sm:$0xff] %v1608_v53 }
 0x854 PF: > { %s1915_s17 = sshll.u32 %s2322_s18, 7  ;;  %s3138_s25 = scalar_lea.vmem [#allocation6], %s2555_s10 }
 0x855   : > { %s1622_s0 = sshll.u32 %s3138_s25, 4  ;;  %s1620_s4 = scalar_lea.hbm %s3126_s3, %s1915_s17  ;;  %s1623_s0 = int_to_ptr.vmem [resolvable:$true] %s1622_s0 }
 0x856   : > { %s2226_s11 = scalar_lea.vmem %s1623_s0, 128  ;;  %s2338_s26 = smov [#allocation6]  }
 0x857   : > { %p2227_p6 = scmp.ne.s32.totalorder %s1623_s0, %s2226_s11  ;;  %s2230_s6 = sshll.u32 %s2338_s26, 4  ;;  %s2231_s6 = int_to_ptr.vmem [resolvable:$false] %s2230_s6 }
 0x858   : > { %s2232_s15 = scalar_lea.vmem %s2231_s6, 256  ;;  %p2233_p10 = scmp.lt.s32.totalorder %s1623_s0, %s2231_s6 }
 0x859   : > { %p2228_p8 = pnand %p2227_p6, %p2462_p11  ;;  %p2234_p12 = scmp.lt.s32.totalorder %s2232_s15, %s2226_s11 }
 0x85b   : > { %p2229_p9 = pneg %p2228_p8  ;;  %p2235_p0 = por %p2234_p12, %p2233_p10 }
 0x85d   : > { %p2236_p1 = pnand %p2235_p0, %p2229_p9 }
 0x85f   : > { %2239 = shalt.err (!%p2236_p1)
}
 0x860   : > { %s2240_s18 = scalar_lea.hbm %s1620_s4, 128  ;;  %s2244_s5 = scalar_lea.hbm %s3126_s3, 256 }
 0x861   : > { %p2241_p2 = scmp.ne.s32.totalorder %s1620_s4, %s2240_s18  ;;  %p2245_p5 = scmp.lt.s32.totalorder %s1620_s4, %s3126_s3 }
 0x862   : > { %p2246_p7 = scmp.lt.s32.totalorder %s2244_s5, %s2240_s18 }
 0x863   : > { %p2242_p3 = pnand %p2241_p2, %p2462_p11 }
 0x864   : > { %p2247_p6 = por %p2246_p7, %p2245_p5 }
 0x865   : > { %p2243_p4 = pneg %p2242_p3 }
 0x867   : > { %p2248_p8 = pnand %p2247_p6, %p2243_p4 }
 0x869   : > { %2251 = shalt.err (!%p2248_p8)
}
 0x86a   : > { %1929 = dma.vmem_to_hbm [thread:$0]  (%p2462_p11), %s1623_s0, 128, %s1620_s4, %s3050_s27  }
 0x86b PF: > { %p1935_p9 = scmp.ge.s32.totalorder %s2334_s21, 2  ;;  %s1641_s25 = sand.u32 1, %s2298_s12  }
 0x86c   : > { %s1642_s28 = scalar_lea.sflag [#allocation7], %s1641_s25 }
 0x86d   : > { %p1932_p10 = pnand %p1935_p9, %p2468_p13 }
 0x86f   : > { %p1933_p12 = pneg %p1932_p10 }
 0x871   : > { %2293 = dma.done.wait (%p1933_p12), %s1642_s28, 128  }
 0x872   : > { %2295 = vsyncadd (%p1933_p12), %s1642_s28, 4294967168  ;;  %s17_s21 = sadd.s32 1, %s2334_s21   ;;  %s3139_s23 = sld [smem:[#allocation9_spill]] }
 0x873   : > { %p14_p0 = scmp.ge.s32.totalorder %s17_s21, 6   ;;  %s3140_s12 = smov %s2302_s13 }
 0x874   : > { %s3141_s13 = smov %s2306_s14  ;;  %s3142_s14 = smov %s2455_s30 }
 0x875   : > { %s3143_s15 = smov %s2314_s16  ;;  %s3144_s16 = smov %s2458_s7 }
 0x876   : > { %s3145_s17 = smov %s2326_s19  ;;  %s3146_s18 = smov %s2330_s20 }
 0x877   : > { %s3147_s19 = smov %s3150_s24  ;;  %16 = sbr.rel (!%p14_p0) target bundleno = 8 (0x8), region = 168 }
 0x878   : > { %s3148_s20 = smov %s3139_s23 }
 0x87c   :  { %1647 = vsyncpa [#allocation7], 1 }
 0x87d   :  { %1649 = vsyncpa [#allocation7 + $0x1], 1 }

// kernel: foundation_lstm_forward.6
= control target key start
LH: loop header
LB: loop body
LE: loop exit
PB: predicated region body
PF: predicated region fallthrough
CT: control target
= control target key end

     0   :  { %s1606_s12 = smov 0   ;;  %s2246_s0 = inlined_call_operand.vmem [shape: f32[16,8,256], index: 0, kind: input, shape index: {}]   ;;  %s2247_s1 = inlined_call_operand.vmem [shape: bf16[256,1024], index: 1, kind: input, shape index: {}]   ;;  %s2248_s2 = inlined_call_operand.vmem [shape: f32[1,1024], index: 2, kind: input, shape index: {}]   ;;  %s2249_s3 = inlined_call_operand.vmem [shape: f32[16,8,1024], index: 3, kind: output, shape index: {}]  }
   0x1 LB: > { %s1427_s13 = sadd.s32 4294967295, %s1584_s12   ;;  %p1431_p0 = scmp.ge.s32.totalorder %s1584_s12, 1  ;;  %s1584_s12 = sphi %s1606_s12, %s13_s12  }
   0x2   : > { %p139_p1 = scmp.lt.s32.totalorder %s1584_s12, 3 }
   0x4   : > { %p140_p2 = pnand %p1431_p0, %p139_p1 }
   0x5   : > { %s1432_s11 = sshll.u32 (!%p140_p2), %s1427_s13, 3 }
   0x6   : > { %143 = sbr.rel (%p140_p2) target bundleno = 369 (0x171), region = 32  ;;  %p166_p3 = scmp.lt.s32.totalorder (!%p140_p2), %s1432_s11, 15 }
   0xb   : > { %v259_v0 = vld [vmem:[%s2247_s1 + $0x1c0] sm:$0xff]  ;;  %v260_v2 = vld [vmem:[%s2247_s1 + $0x1c8] sm:$0xff]  ;;  %s2251_s11 = smov (!%p166_p3, %s1432_s11), 15 }
   0xc   : > { %v263_v1 = vld [vmem:[%s2247_s1 + $0x1e0] sm:$0xff]  ;;  %v264_v4 = vld [vmem:[%s2247_s1 + $0x1e8] sm:$0xff]  ;;  %s1568_s10 = sshll.u32 %s2251_s11, 4  ;;  %s1569_s4 = sshll.u32 %s2251_s11, 6 }
   0xd   : > { %v1495_v3 = vcombine.high %v259_v0, %v263_v1  ;;  %v1494_v5 = vcombine.low %v259_v0, %v263_v1  ;;  %v251_v6 = vld [vmem:[%s2247_s1 + $0x180] sm:$0xff]  ;;  %v1497_v8 = vcombine.high %v260_v2, %v264_v4  ;;  %v1496_v9 = vcombine.low %v260_v2, %v264_v4  ;;  %v252_v11 = vld [vmem:[%s2247_s1 + $0x188] sm:$0xff]  ;;  %s1698_s20 = scalar_lea.vmem %s2246_s0, %s1568_s10  ;;  %s2094_s7 = scalar_lea.vmem %s2249_s3, %s1569_s4 }
   0xe   : > { %v255_v7 = vld [vmem:[%s2247_s1 + $0x1a0] sm:$0xff]  ;;  %v256_v12 = vld [vmem:[%s2247_s1 + $0x1a8] sm:$0xff]  ;;  %v182_v54 = vld [vmem:[%s1698_s20 + $0x18] sm:$0xff] }
   0xf   : > { %v1487_v10 = vcombine.high %v251_v6, %v255_v7  ;;  %v243_v13 = vld [vmem:[%s2247_s1 + $0x140] sm:$0xff]  ;;  %1013 = vmatprep.subr.bf16.mxu0 %v1495_v3  ;;  %v1489_v14 = vcombine.high %v252_v11, %v256_v12  ;;  %v244_v16 = vld [vmem:[%s2247_s1 + $0x148] sm:$0xff]  ;;  %1086 = vmatprep.subr.bf16.mxu1 %v1497_v8  ;;  %v1486_v18 = vcombine.low %v251_v6, %v255_v7 }
  0x10   : > { %v247_v15 = vld [vmem:[%s2247_s1 + $0x160] sm:$0xff]  ;;  %v248_v17 = vld [vmem:[%s2247_s1 + $0x168] sm:$0xff]  ;;  %1014 = vmatpush1.bf16.msra.mxu0 %v1494_v5  ;;  %1087 = vmatpush1.bf16.msra.mxu1 %v1496_v9  ;;  %v1488_v19 = vcombine.low %v252_v11, %v256_v12 }
  0x11   : > { %1015 = vmatprep.subr.bf16.mxu0 %v1487_v10  ;;  %v1479_v20 = vcombine.high %v243_v13, %v247_v15  ;;  %1088 = vmatprep.subr.bf16.mxu1 %v1489_v14  ;;  %v1481_v21 = vcombine.high %v244_v16, %v248_v17  ;;  %v235_v22 = vld [vmem:[%s2247_s1 + $0x100] sm:$0xff]  ;;  %v236_v24 = vld [vmem:[%s2247_s1 + $0x108] sm:$0xff]  ;;  %v1478_v26 = vcombine.low %v243_v13, %v247_v15 }
  0x12   : > { %v239_v23 = vld [vmem:[%s2247_s1 + $0x120] sm:$0xff]  ;;  %v240_v25 = vld [vmem:[%s2247_s1 + $0x128] sm:$0xff]  ;;  %v1480_v27 = vcombine.low %v244_v16, %v248_v17 }
  0x13   : > { %v1471_v28 = vcombine.high %v235_v22, %v239_v23  ;;  %v1473_v29 = vcombine.high %v236_v24, %v240_v25  ;;  %v227_v30 = vld [vmem:[%s2247_s1 + $0xc0] sm:$0xff]  ;;  %v228_v32 = vld [vmem:[%s2247_s1 + $0xc8] sm:$0xff]  ;;  %v1470_v34 = vcombine.low %v235_v22, %v239_v23  ;;  %v1472_v35 = vcombine.low %v236_v24, %v240_v25 }
  0x14   : > { %1016 = vmatpush1.bf16.msra.mxu0 %v1486_v18  ;;  %1089 = vmatpush1.bf16.msra.mxu1 %v1488_v19  ;;  %v231_v31 = vld [vmem:[%s2247_s1 + $0xe0] sm:$0xff]  ;;  %v232_v33 = vld [vmem:[%s2247_s1 + $0xe8] sm:$0xff] }
  0x15   : > { %1017 = vmatprep.subr.bf16.mxu0 %v1479_v20  ;;  %1090 = vmatprep.subr.bf16.mxu1 %v1481_v21  ;;  %v1463_v36 = vcombine.high %v227_v30, %v231_v31  ;;  %v1465_v37 = vcombine.high %v228_v32, %v232_v33  ;;  %v219_v38 = vld [vmem:[%s2247_s1 + $0x80] sm:$0xff]  ;;  %v220_v40 = vld [vmem:[%s2247_s1 + $0x88] sm:$0xff]  ;;  %v1462_v42 = vcombine.low %v227_v30, %v231_v31 }
  0x16   : > { %v223_v39 = vld [vmem:[%s2247_s1 + $0xa0] sm:$0xff]  ;;  %v224_v41 = vld [vmem:[%s2247_s1 + $0xa8] sm:$0xff]  ;;  %v1464_v43 = vcombine.low %v228_v32, %v232_v33 }
  0x17   : > { %v1455_v44 = vcombine.high %v219_v38, %v223_v39  ;;  %v1457_v45 = vcombine.high %v220_v40, %v224_v41  ;;  %v211_v46 = vld [vmem:[%s2247_s1 + $0x40] sm:$0xff]  ;;  %v212_v48 = vld [vmem:[%s2247_s1 + $0x48] sm:$0xff]  ;;  %v1454_v50 = vcombine.low %v219_v38, %v223_v39  ;;  %v1456_v51 = vcombine.low %v220_v40, %v224_v41 }
  0x18   : > { %1018 = vmatpush1.bf16.msra.mxu0 %v1478_v26  ;;  %1091 = vmatpush1.bf16.msra.mxu1 %v1480_v27  ;;  %v215_v47 = vld [vmem:[%s2247_s1 + $0x60] sm:$0xff]  ;;  %v216_v49 = vld [vmem:[%s2247_s1 + $0x68] sm:$0xff] }
  0x19   : > { %1019 = vmatprep.subr.bf16.mxu0 %v1471_v28  ;;  %1092 = vmatprep.subr.bf16.mxu1 %v1473_v29  ;;  %v1447_v52 = vcombine.high %v211_v46, %v215_v47  ;;  %v180_v53 = vld [vmem:[%s1698_s20 + $0x8] sm:$0xff]  ;;  %v1449_v55 = vcombine.high %v212_v48, %v216_v49  ;;  %v203_v56 = vld [vmem:[%s2247_s1] sm:$0xff]  ;;  %v1446_v61 = vcombine.low %v211_v46, %v215_v47 }
  0x1a   : > { %v207_v57 = vld [vmem:[%s2247_s1 + $0x20] sm:$0xff]  ;;  %v1714_v58 = vpack.c.bf16 %v182_v54, %v180_v53  ;;  %v204_v59 = vld [vmem:[%s2247_s1 + $0x8] sm:$0xff]  ;;  %v1448_v62 = vcombine.low %v212_v48, %v216_v49 }
  0x1b   : > { %v208_v60 = vld [vmem:[%s2247_s1 + $0x28] sm:$0xff]  ;;  %v1439_v63 = vcombine.high %v203_v56, %v207_v57  ;;  %v323_v1 = vld [vmem:[%s2247_s1 + $0x3c0] sm:$0xff]  ;;  %v1438_v5 = vcombine.low %v203_v56, %v207_v57 }
  0x1c   : > { %1020 = vmatpush1.bf16.msra.mxu0 %v1470_v34  ;;  %1093 = vmatpush1.bf16.msra.mxu1 %v1472_v35  ;;  %v1441_v0 = vcombine.high %v204_v59, %v208_v60  ;;  %v327_v2 = vld [vmem:[%s2247_s1 + $0x3e0] sm:$0xff]  ;;  %v324_v3 = vld [vmem:[%s2247_s1 + $0x3c8] sm:$0xff]  ;;  %v1440_v6 = vcombine.low %v204_v59, %v208_v60 }
  0x1d   : > { %1021 = vmatprep.subr.bf16.mxu0 %v1463_v36  ;;  %1094 = vmatprep.subr.bf16.mxu1 %v1465_v37  ;;  %v328_v4 = vld [vmem:[%s2247_s1 + $0x3e8] sm:$0xff]  ;;  %v1559_v7 = vcombine.high %v323_v1, %v327_v2  ;;  %v315_v9 = vld [vmem:[%s2247_s1 + $0x380] sm:$0xff]  ;;  %v1558_v13 = vcombine.low %v323_v1, %v327_v2  ;;  %v261_v2 = vld [vmem:[%s2247_s1 + $0x1d0] sm:$0xff] }
  0x1e   : > { %1045 = vmatprep.mubr.bf16.mxu0 %v1714_v58  ;;  %1118 = vmatprep.mubr.bf16.mxu1 %v1714_v58  ;;  %v1561_v8 = vcombine.high %v324_v3, %v328_v4  ;;  %v319_v10 = vld [vmem:[%s2247_s1 + $0x3a0] sm:$0xff]  ;;  %v316_v11 = vld [vmem:[%s2247_s1 + $0x388] sm:$0xff]  ;;  %v1560_v14 = vcombine.low %v324_v3, %v328_v4  ;;  %v265_v3 = vld [vmem:[%s2247_s1 + $0x1f0] sm:$0xff] }
  0x1f   : > { %v320_v12 = vld [vmem:[%s2247_s1 + $0x3a8] sm:$0xff]  ;;  %v1551_v15 = vcombine.high %v315_v9, %v319_v10  ;;  %v307_v17 = vld [vmem:[%s2247_s1 + $0x340] sm:$0xff]  ;;  %v1550_v21 = vcombine.low %v315_v9, %v319_v10  ;;  %v262_v4 = vld [vmem:[%s2247_s1 + $0x1d8] sm:$0xff]  ;;  %v1499_v10 = vcombine.high %v261_v2, %v265_v3 }
  0x20   : > { %1022 = vmatpush1.bf16.msra.mxu0 %v1462_v42  ;;  %1095 = vmatpush1.bf16.msra.mxu1 %v1464_v43  ;;  %v1553_v16 = vcombine.high %v316_v11, %v320_v12  ;;  %v311_v18 = vld [vmem:[%s2247_s1 + $0x360] sm:$0xff]  ;;  %v308_v19 = vld [vmem:[%s2247_s1 + $0x348] sm:$0xff]  ;;  %v1552_v22 = vcombine.low %v316_v11, %v320_v12  ;;  %v253_v12 = vld [vmem:[%s2247_s1 + $0x190] sm:$0xff] }
  0x21   : > { %1023 = vmatprep.subr.bf16.mxu0 %v1455_v44  ;;  %1096 = vmatprep.subr.bf16.mxu1 %v1457_v45  ;;  %v312_v20 = vld [vmem:[%s2247_s1 + $0x368] sm:$0xff]  ;;  %v1543_v23 = vcombine.high %v307_v17, %v311_v18  ;;  %v299_v25 = vld [vmem:[%s2247_s1 + $0x300] sm:$0xff]  ;;  %v1542_v29 = vcombine.low %v307_v17, %v311_v18  ;;  %v186_v18 = vld [vmem:[%s1698_s20 + $0x38] sm:$0xff] }
  0x22   : > { %v1545_v24 = vcombine.high %v308_v19, %v312_v20  ;;  %v303_v26 = vld [vmem:[%s2247_s1 + $0x320] sm:$0xff]  ;;  %v300_v27 = vld [vmem:[%s2247_s1 + $0x308] sm:$0xff]  ;;  %v1544_v30 = vcombine.low %v308_v19, %v312_v20  ;;  %v1498_v19 = vcombine.low %v261_v2, %v265_v3 }
  0x23   : > { %v304_v28 = vld [vmem:[%s2247_s1 + $0x328] sm:$0xff]  ;;  %v1535_v31 = vcombine.high %v299_v25, %v303_v26  ;;  %v291_v33 = vld [vmem:[%s2247_s1 + $0x2c0] sm:$0xff]  ;;  %v1534_v37 = vcombine.low %v299_v25, %v303_v26  ;;  %v246_v26 = vld [vmem:[%s2247_s1 + $0x158] sm:$0xff] }
  0x24   : > { %1024 = vmatpush1.bf16.msra.mxu0 %v1454_v50  ;;  %1097 = vmatpush1.bf16.msra.mxu1 %v1456_v51  ;;  %v1537_v32 = vcombine.high %v300_v27, %v304_v28  ;;  %v295_v34 = vld [vmem:[%s2247_s1 + $0x2e0] sm:$0xff]  ;;  %v292_v35 = vld [vmem:[%s2247_s1 + $0x2c8] sm:$0xff]  ;;  %v1536_v38 = vcombine.low %v300_v27, %v304_v28  ;;  %v250_v27 = vld [vmem:[%s2247_s1 + $0x178] sm:$0xff] }
  0x25   : > { %1025 = vmatprep.subr.bf16.mxu0 %v1447_v52  ;;  %1098 = vmatprep.subr.bf16.mxu1 %v1449_v55  ;;  %v296_v36 = vld [vmem:[%s2247_s1 + $0x2e8] sm:$0xff]  ;;  %v1527_v39 = vcombine.high %v291_v33, %v295_v34  ;;  %v283_v41 = vld [vmem:[%s2247_s1 + $0x280] sm:$0xff]  ;;  %v1526_v45 = vcombine.low %v291_v33, %v295_v34  ;;  %v1485_v33 = vcombine.high %v246_v26, %v250_v27  ;;  %v237_v34 = vld [vmem:[%s2247_s1 + $0x110] sm:$0xff] }
  0x26   : > { %v1529_v40 = vcombine.high %v292_v35, %v296_v36  ;;  %v287_v42 = vld [vmem:[%s2247_s1 + $0x2a0] sm:$0xff]  ;;  %v284_v43 = vld [vmem:[%s2247_s1 + $0x288] sm:$0xff]  ;;  %v1528_v46 = vcombine.low %v292_v35, %v296_v36  ;;  %v241_v35 = vld [vmem:[%s2247_s1 + $0x130] sm:$0xff] }
  0x27   : > { %v288_v44 = vld [vmem:[%s2247_s1 + $0x2a8] sm:$0xff]  ;;  %v1519_v47 = vcombine.high %v283_v41, %v287_v42  ;;  %v275_v49 = vld [vmem:[%s2247_s1 + $0x240] sm:$0xff]  ;;  %v1518_v53 = vcombine.low %v283_v41, %v287_v42  ;;  %v238_v36 = vld [vmem:[%s2247_s1 + $0x118] sm:$0xff]  ;;  %v1484_v42 = vcombine.low %v246_v26, %v250_v27 }
  0x28   : > { %1026 = vmatpush1.bf16.msra.mxu0 %v1446_v61  ;;  %1099 = vmatpush1.bf16.msra.mxu1 %v1448_v62  ;;  %v1521_v48 = vcombine.high %v284_v43, %v288_v44  ;;  %v279_v50 = vld [vmem:[%s2247_s1 + $0x260] sm:$0xff]  ;;  %v276_v51 = vld [vmem:[%s2247_s1 + $0x248] sm:$0xff]  ;;  %v1520_v54 = vcombine.low %v284_v43, %v288_v44  ;;  %v1475_v43 = vcombine.high %v237_v34, %v241_v35  ;;  %v325_v26 = vld [vmem:[%s2247_s1 + $0x3d0] sm:$0xff] }
  0x29   : > { %1027 = vmatprep.subr.bf16.mxu0 %v1439_v63  ;;  %1100 = vmatprep.subr.bf16.mxu1 %v1441_v0  ;;  %v280_v52 = vld [vmem:[%s2247_s1 + $0x268] sm:$0xff]  ;;  %v1511_v55 = vcombine.high %v275_v49, %v279_v50  ;;  %v267_v57 = vld [vmem:[%s2247_s1 + $0x200] sm:$0xff]  ;;  %v1510_v62 = vcombine.low %v275_v49, %v279_v50  ;;  %v234_v49 = vld [vmem:[%s2247_s1 + $0xf8] sm:$0xff]  ;;  %v1474_v50 = vcombine.low %v237_v34, %v241_v35 }
  0x2a   : > { %v1513_v56 = vcombine.high %v276_v51, %v280_v52  ;;  %v271_v59 = vld [vmem:[%s2247_s1 + $0x220] sm:$0xff]  ;;  %v268_v60 = vld [vmem:[%s2247_s1 + $0x208] sm:$0xff]  ;;  %v1512_v63 = vcombine.low %v276_v51, %v280_v52  ;;  %v189_v52 = vld [vmem:[%s1698_s20 + $0x50] sm:$0xff] }
  0x2b   : > { %v272_v61 = vld [vmem:[%s2247_s1 + $0x228] sm:$0xff]  ;;  %v1503_v0 = vcombine.high %v267_v57, %v271_v59  ;;  %v187_v51 = vld [vmem:[%s1698_s20 + $0x40] sm:$0xff]  ;;  %v329_v27 = vld [vmem:[%s2247_s1 + $0x3f0] sm:$0xff] }
  0x2c   : > { %1028 = vmatpush1.bf16.msra.mxu0 %v1438_v5  ;;  %1101 = vmatpush1.bf16.msra.mxu1 %v1440_v6  ;;  %v1505_v1 = vcombine.high %v268_v60, %v272_v61  ;;  %v266_v5 = vld [vmem:[%s2247_s1 + $0x1f8] sm:$0xff]  ;;  %v1502_v6 = vcombine.low %v267_v57, %v271_v59  ;;  %v1504_v9 = vcombine.low %v268_v60, %v272_v61  ;;  %v184_v17 = vld [vmem:[%s1698_s20 + $0x28] sm:$0xff]  ;;  %v225_v57 = vld [vmem:[%s2247_s1 + $0xb0] sm:$0xff] }
  0x2d   : > { %1029 = vmatprep.subr.bf16.mxu0 %v1559_v7  ;;  %1102 = vmatprep.subr.bf16.mxu1 %v1561_v8  ;;  %v179_v7 = vld [vmem:[%s1698_s20] sm:$0xff]  ;;  %v181_v8 = vld [vmem:[%s1698_s20 + $0x10] sm:$0xff]  ;;  %v1501_v11 = vcombine.high %v262_v4, %v266_v5  ;;  %v1500_v20 = vcombine.low %v262_v4, %v266_v5  ;;  %v1856_v25 = vpack.c.bf16 %v186_v18, %v184_v17  ;;  %v222_v59 = vld [vmem:[%s2247_s1 + $0x98] sm:$0xff] }
  0x2e   : > { %v226_v60 = vld [vmem:[%s2247_s1 + $0xb8] sm:$0xff]  ;;  %v1918_v61 = vpack.c.bf16 %v189_v52, %v187_v51  ;;  %v213_v4 = vld [vmem:[%s2247_s1 + $0x50] sm:$0xff] }
  0x2f   : > { %v1461_v3 = vcombine.high %v222_v59, %v226_v60  ;;  %v217_v5 = vld [vmem:[%s2247_s1 + $0x70] sm:$0xff]  ;;  %v206_v18 = vld [vmem:[%s2247_s1 + $0x18] sm:$0xff] }
  0x30   : > { %1030 = vmatpush2.bf16.msra.mxu0 %v1558_v13  ;;  %1103 = vmatpush2.bf16.msra.mxu1 %v1560_v14  ;;  %v257_v13 = vld [vmem:[%s2247_s1 + $0x1b0] sm:$0xff]  ;;  %v254_v14 = vld [vmem:[%s2247_s1 + $0x198] sm:$0xff] }
  0x31   : > { %1031 = vmatprep.subr.bf16.mxu0 %v1551_v15  ;;  %1104 = vmatprep.subr.bf16.mxu1 %v1553_v16  ;;  %v1843_v15 = vpack.c.bf16 %v181_v8, %v179_v7  ;;  %v258_v16 = vld [vmem:[%s2247_s1 + $0x1b8] sm:$0xff]  ;;  %v1490_v28 = vcombine.low %v253_v12, %v257_v13  ;;  %v209_v17 = vld [vmem:[%s2247_s1 + $0x30] sm:$0xff] }
  0x32   : > { %v214_v7 = vld [vmem:[%s2247_s1 + $0x58] sm:$0xff]  ;;  %v317_v34 = vld [vmem:[%s2247_s1 + $0x390] sm:$0xff] }
  0x33   : > { %v218_v8 = vld [vmem:[%s2247_s1 + $0x78] sm:$0xff]  ;;  %v321_v35 = vld [vmem:[%s2247_s1 + $0x3b0] sm:$0xff] }
  0x34   : > { %1032 = vmatpush2.bf16.msra.mxu0 %v1550_v21  ;;  %1105 = vmatpush2.bf16.msra.mxu1 %v1552_v22  ;;  %v1491_v21 = vcombine.high %v253_v12, %v257_v13  ;;  %v1493_v22 = vcombine.high %v254_v14, %v258_v16  ;;  %v1460_v12 = vcombine.low %v222_v59, %v226_v60  ;;  %v301_v51 = vld [vmem:[%s2247_s1 + $0x310] sm:$0xff] }
  0x35   : > { %1033 = vmatprep.subr.bf16.mxu0 %v1543_v23  ;;  %1106 = vmatprep.subr.bf16.mxu1 %v1545_v24  ;;  %v245_v23 = vld [vmem:[%s2247_s1 + $0x150] sm:$0xff]  ;;  %v1451_v13 = vcombine.high %v213_v4, %v217_v5 }
  0x36   : > { %v249_v24 = vld [vmem:[%s2247_s1 + $0x170] sm:$0xff] }
  0x37   : > { %v1482_v41 = vcombine.low %v245_v23, %v249_v24  ;;  %v305_v52 = vld [vmem:[%s2247_s1 + $0x330] sm:$0xff] }
  0x38   : > { %1034 = vmatpush2.bf16.msra.mxu0 %v1542_v29  ;;  %1107 = vmatpush2.bf16.msra.mxu1 %v1544_v30  ;;  %v183_v29 = vld [vmem:[%s1698_s20 + $0x20] sm:$0xff]  ;;  %v185_v30 = vld [vmem:[%s1698_s20 + $0x30] sm:$0xff] }
  0x39   : > { %1035 = vmatprep.subr.bf16.mxu0 %v1535_v31  ;;  %1108 = vmatprep.subr.bf16.mxu1 %v1537_v32  ;;  %v1492_v31 = vcombine.low %v254_v14, %v258_v16  ;;  %v1483_v32 = vcombine.high %v245_v23, %v249_v24  ;;  %v1453_v14 = vcombine.high %v214_v7, %v218_v8  ;;  %v205_v16 = vld [vmem:[%s2247_s1 + $0x10] sm:$0xff] }
  0x3a   : > { %v1443_v23 = vcombine.high %v205_v16, %v209_v17  ;;  %v293_v60 = vld [vmem:[%s2247_s1 + $0x2d0] sm:$0xff] }
  0x3c   : > { %1036 = vmatpush2.bf16.msra.mxu0 %v1534_v37  ;;  %1109 = vmatpush2.bf16.msra.mxu1 %v1536_v38  ;;  %v242_v37 = vld [vmem:[%s2247_s1 + $0x138] sm:$0xff]  ;;  %v1882_v38 = vpack.c.bf16 %v185_v30, %v183_v29  ;;  %v1442_v30 = vcombine.low %v205_v16, %v209_v17  ;;  %v281_v16 = vld [vmem:[%s2247_s1 + $0x270] sm:$0xff] }
  0x3d   : > { %1037 = vmatprep.subr.bf16.mxu0 %v1527_v39  ;;  %1110 = vmatprep.subr.bf16.mxu1 %v1529_v40  ;;  %v188_v39 = vld [vmem:[%s1698_s20 + $0x48] sm:$0xff]  ;;  %v190_v40 = vld [vmem:[%s1698_s20 + $0x58] sm:$0xff]  ;;  %v1477_v44 = vcombine.high %v238_v36, %v242_v37 }
  0x3e   : > { %v330_v29 = vld [vmem:[%s2247_s1 + $0x3f8] sm:$0xff] }
  0x3f   : > { %v278_v17 = vld [vmem:[%s2247_s1 + $0x258] sm:$0xff] }
  0x40   : > { %1038 = vmatpush2.bf16.msra.mxu0 %v1526_v45  ;;  %1111 = vmatpush2.bf16.msra.mxu1 %v1528_v46  ;;  %v229_v45 = vld [vmem:[%s2247_s1 + $0xd0] sm:$0xff] }
  0x41   : > { %1039 = vmatprep.subr.bf16.mxu0 %v1519_v47  ;;  %1112 = vmatprep.subr.bf16.mxu1 %v1521_v48  ;;  %v233_v46 = vld [vmem:[%s2247_s1 + $0xf0] sm:$0xff]  ;;  %v1892_v47 = vpack.c.bf16 %v190_v40, %v188_v39  ;;  %v230_v48 = vld [vmem:[%s2247_s1 + $0xd8] sm:$0xff]  ;;  %v1562_v39 = vcombine.low %v325_v26, %v329_v27 }
  0x44   : > { %1040 = vmatpush2.bf16.msra.mxu0 %v1518_v53  ;;  %1113 = vmatpush2.bf16.msra.mxu1 %v1520_v54  ;;  %v1476_v53 = vcombine.low %v238_v36, %v242_v37  ;;  %v1467_v54 = vcombine.high %v229_v45, %v233_v46  ;;  %v318_v36 = vld [vmem:[%s2247_s1 + $0x398] sm:$0xff] }
  0x45   : > { %1041 = vmatprep.subr.bf16.mxu0 %v1511_v55  ;;  %1114 = vmatprep.subr.bf16.mxu1 %v1513_v56  ;;  %v1469_v55 = vcombine.high %v230_v48, %v234_v49  ;;  %v221_v56 = vld [vmem:[%s2247_s1 + $0x90] sm:$0xff]  ;;  %v322_v37 = vld [vmem:[%s2247_s1 + $0x3b8] sm:$0xff] }
  0x46   : > { %v1459_v2 = vcombine.high %v221_v56, %v225_v57 }
  0x48   : > { %1042 = vmatpush2.bf16.msra.mxu0 %v1510_v62  ;;  %1115 = vmatpush2.bf16.msra.mxu1 %v1512_v63  ;;  %v192_v62 = vld [vmem:[%s1698_s20 + $0x68] sm:$0xff]  ;;  %v194_v63 = vld [vmem:[%s1698_s20 + $0x78] sm:$0xff] }
  0x49   : > { %1043 = vmatprep.subr.bf16.mxu0 %v1503_v0  ;;  %1116 = vmatprep.subr.bf16.mxu1 %v1505_v1  ;;  %v1466_v0 = vcombine.low %v229_v45, %v233_v46  ;;  %v1468_v1 = vcombine.low %v230_v48, %v234_v49  ;;  %v314_v45 = vld [vmem:[%s2247_s1 + $0x378] sm:$0xff]  ;;  %v1554_v46 = vcombine.low %v317_v34, %v321_v35 }
  0x4a   : > { %v1556_v48 = vcombine.low %v318_v36, %v322_v37 }
  0x4c   : > { %1044 = vmatpush2.bf16.msra.mxu0 %v1502_v6  ;;  %1117 = vmatpush2.bf16.msra.mxu1 %v1504_v9  ;;  %v1928_v6 = vpack.c.bf16 %v194_v63, %v192_v62  ;;  %v1458_v9 = vcombine.low %v221_v56, %v225_v57  ;;  %v1539_v57 = vcombine.high %v301_v51, %v305_v52  ;;  %v297_v62 = vld [vmem:[%s2247_s1 + $0x2f0] sm:$0xff]  ;;  %v294_v63 = vld [vmem:[%s2247_s1 + $0x2d8] sm:$0xff] }
  0x4d   : > { %1159 = vmatprep.subr.bf16.mxu0 %v1499_v10  ;;  %1232 = vmatprep.subr.bf16.mxu1 %v1501_v11  ;;  %v191_v10 = vld [vmem:[%s1698_s20 + $0x60] sm:$0xff]  ;;  %v193_v11 = vld [vmem:[%s1698_s20 + $0x70] sm:$0xff] }
  0x4f   : > { %1046 = vmatmul.mubr.bf16.vlgmr.msra.gmra.mxu0 %v1843_v15  ;;  %1119 = vmatmul.mubr.bf16.vlgmr.msra.gmra.mxu1 %v1843_v15 }
  0x50   : > { %1160 = vmatpush1.bf16.msra.mxu0 %v1498_v19  ;;  %1233 = vmatpush1.bf16.msra.mxu1 %v1500_v20  ;;  %v210_v19 = vld [vmem:[%s2247_s1 + $0x38] sm:$0xff]  ;;  %v1954_v20 = vpack.c.bf16 %v193_v11, %v191_v10  ;;  %v1530_v10 = vcombine.low %v293_v60, %v297_v62 }
  0x51   : > { %1161 = vmatprep.subr.bf16.mxu0 %v1491_v21  ;;  %1234 = vmatprep.subr.bf16.mxu1 %v1493_v22  ;;  %v1450_v21 = vcombine.low %v213_v4, %v217_v5  ;;  %v1452_v22 = vcombine.low %v214_v7, %v218_v8  ;;  %v1445_v24 = vcombine.high %v206_v18, %v210_v19  ;;  %v285_v5 = vld [vmem:[%s2247_s1 + $0x290] sm:$0xff]  ;;  %v286_v8 = vld [vmem:[%s2247_s1 + $0x298] sm:$0xff] }
  0x52   : > { %1055 = vmatprep.mubr.bf16.mxu0 %v1856_v25  ;;  %1128 = vmatprep.mubr.bf16.mxu1 %v1856_v25  ;;  %v289_v7 = vld [vmem:[%s2247_s1 + $0x2b0] sm:$0xff] }
  0x54   : > { %1162 = vmatpush1.bf16.msra.mxu0 %v1490_v28  ;;  %1235 = vmatpush1.bf16.msra.mxu1 %v1492_v31  ;;  %v326_v28 = vld [vmem:[%s2247_s1 + $0x3d8] sm:$0xff]  ;;  %v1444_v31 = vcombine.low %v206_v18, %v210_v19  ;;  %v1522_v19 = vcombine.low %v285_v5, %v289_v7 }
  0x55   : > { %1163 = vmatprep.subr.bf16.mxu0 %v1483_v32  ;;  %1236 = vmatprep.subr.bf16.mxu1 %v1485_v33  ;;  %v1563_v32 = vcombine.high %v325_v26, %v329_v27  ;;  %v1565_v33 = vcombine.high %v326_v28, %v330_v29  ;;  %v1564_v40 = vcombine.low %v326_v28, %v330_v29  ;;  %v282_v18 = vld [vmem:[%s2247_s1 + $0x278] sm:$0xff]  ;;  %v273_v26 = vld [vmem:[%s2247_s1 + $0x230] sm:$0xff] }
  0x56   : > { %v270_v27 = vld [vmem:[%s2247_s1 + $0x218] sm:$0xff] }
  0x57   : > { %1056 = vmatmul.mubr.bf16.gmra.mxu0 %v1882_v38  ;;  %1129 = vmatmul.mubr.bf16.gmra.mxu1 %v1882_v38  ;;  %v274_v28 = vld [vmem:[%s2247_s1 + $0x238] sm:$0xff] }
  0x58   : > { %1164 = vmatpush1.bf16.msra.mxu0 %v1482_v41  ;;  %1237 = vmatpush1.bf16.msra.mxu1 %v1484_v42  ;;  %v1555_v41 = vcombine.high %v317_v34, %v321_v35  ;;  %v1557_v42 = vcombine.high %v318_v36, %v322_v37  ;;  %v1508_v34 = vcombine.low %v270_v27, %v274_v28 }
  0x59   : > { %1165 = vmatprep.subr.bf16.mxu0 %v1475_v43  ;;  %1238 = vmatprep.subr.bf16.mxu1 %v1477_v44  ;;  %v309_v43 = vld [vmem:[%s2247_s1 + $0x350] sm:$0xff] }
  0x5a   : > { %1065 = vmatprep.mubr.bf16.mxu0 %v1892_v47  ;;  %1138 = vmatprep.mubr.bf16.mxu1 %v1892_v47  ;;  %v313_v44 = vld [vmem:[%s2247_s1 + $0x370] sm:$0xff] }
  0x5b   : > { %v1547_v49 = vcombine.high %v309_v43, %v313_v44 }
  0x5c   : > { %1166 = vmatpush1.bf16.msra.mxu0 %v1474_v50  ;;  %1239 = vmatpush1.bf16.msra.mxu1 %v1476_v53  ;;  %v302_v53 = vld [vmem:[%s2247_s1 + $0x318] sm:$0xff] }
  0x5d   : > { %1167 = vmatprep.subr.bf16.mxu0 %v1467_v54  ;;  %1240 = vmatprep.subr.bf16.mxu1 %v1469_v55  ;;  %v306_v54 = vld [vmem:[%s2247_s1 + $0x338] sm:$0xff]  ;;  %v1546_v55 = vcombine.low %v309_v43, %v313_v44 }
  0x5e   : > { %v1541_v59 = vcombine.high %v302_v53, %v306_v54 }
  0x5f   : > { %1066 = vmatmul.mubr.bf16.gmra.mxu0 %v1918_v61  ;;  %1139 = vmatmul.mubr.bf16.gmra.mxu1 %v1918_v61 }
  0x60   : > { %1168 = vmatpush1.bf16.msra.mxu0 %v1466_v0  ;;  %1241 = vmatpush1.bf16.msra.mxu1 %v1468_v1  ;;  %v298_v0 = vld [vmem:[%s2247_s1 + $0x2f8] sm:$0xff]  ;;  %v1538_v1 = vcombine.low %v301_v51, %v305_v52 }
  0x61   : > { %1169 = vmatprep.subr.bf16.mxu0 %v1459_v2  ;;  %1242 = vmatprep.subr.bf16.mxu1 %v1461_v3  ;;  %v1540_v2 = vcombine.low %v302_v53, %v306_v54  ;;  %v1531_v3 = vcombine.high %v293_v60, %v297_v62  ;;  %v1533_v4 = vcombine.high %v294_v63, %v298_v0 }
  0x62   : > { %1075 = vmatprep.mubr.bf16.mxu0 %v1928_v6  ;;  %1148 = vmatprep.mubr.bf16.mxu1 %v1928_v6  ;;  %v1532_v11 = vcombine.low %v294_v63, %v298_v0 }
  0x64   : > { %1170 = vmatpush1.bf16.msra.mxu0 %v1458_v9  ;;  %1243 = vmatpush1.bf16.msra.mxu1 %v1460_v12  ;;  %v290_v9 = vld [vmem:[%s2247_s1 + $0x2b8] sm:$0xff]  ;;  %v1523_v12 = vcombine.high %v285_v5, %v289_v7 }
  0x65   : > { %1171 = vmatprep.subr.bf16.mxu0 %v1451_v13  ;;  %1244 = vmatprep.subr.bf16.mxu1 %v1453_v14  ;;  %v1525_v13 = vcombine.high %v286_v8, %v290_v9  ;;  %v277_v14 = vld [vmem:[%s2247_s1 + $0x250] sm:$0xff] }
  0x66   : > { %v1514_v29 = vcombine.low %v277_v14, %v281_v16 }
  0x67   : > { %1076 = vmatmul.mubr.bf16.gmra.mxu0 %v1954_v20  ;;  %1149 = vmatmul.mubr.bf16.gmra.mxu1 %v1954_v20 }
  0x68   : > { %1172 = vmatpush1.bf16.msra.mxu0 %v1450_v21  ;;  %1245 = vmatpush1.bf16.msra.mxu1 %v1452_v22  ;;  %v1524_v21 = vcombine.low %v286_v8, %v290_v9  ;;  %v1515_v22 = vcombine.high %v277_v14, %v281_v16 }
  0x69   : > { %1173 = vmatprep.subr.bf16.mxu0 %v1443_v23  ;;  %1246 = vmatprep.subr.bf16.mxu1 %v1445_v24  ;;  %v1517_v23 = vcombine.high %v278_v17, %v282_v18  ;;  %v269_v24 = vld [vmem:[%s2247_s1 + $0x210] sm:$0xff] }
  0x6a   : > { %1191 = vmatprep.mubr.bf16.mxu0 %v1714_v58  ;;  %1264 = vmatprep.mubr.bf16.mxu1 %v1714_v58  ;;  %v310_v58 = vld [vmem:[%s2247_s1 + $0x358] sm:$0xff] }
  0x6b   : > { %v1549_v50 = vcombine.high %v310_v58, %v314_v45  ;;  %v1548_v56 = vcombine.low %v310_v58, %v314_v45 }
  0x6c   : > { %1174 = vmatpush1.bf16.msra.mxu0 %v1442_v30  ;;  %1247 = vmatpush1.bf16.msra.mxu1 %v1444_v31  ;;  %v1516_v30 = vcombine.low %v278_v17, %v282_v18  ;;  %v1507_v31 = vcombine.high %v269_v24, %v273_v26 }
  0x6d   : > { %1175 = vmatprep.subr.bf16.mxu0 %v1563_v32  ;;  %1248 = vmatprep.subr.bf16.mxu1 %v1565_v33  ;;  %v1509_v32 = vcombine.high %v270_v27, %v274_v28  ;;  %v1506_v33 = vcombine.low %v269_v24, %v273_v26 }
  0x70   : > { %1176 = vmatpush2.bf16.msra.mxu0 %v1562_v39  ;;  %1249 = vmatpush2.bf16.msra.mxu1 %v1564_v40 }
  0x71   : > { %1177 = vmatprep.subr.bf16.mxu0 %v1555_v41  ;;  %1250 = vmatprep.subr.bf16.mxu1 %v1557_v42 }
  0x74   : > { %1178 = vmatpush2.bf16.msra.mxu0 %v1554_v46  ;;  %1251 = vmatpush2.bf16.msra.mxu1 %v1556_v48 }
  0x75   : > { %1179 = vmatprep.subr.bf16.mxu0 %v1547_v49  ;;  %1252 = vmatprep.subr.bf16.mxu1 %v1549_v50 }
  0x78   : > { %1180 = vmatpush2.bf16.msra.mxu0 %v1546_v55  ;;  %1253 = vmatpush2.bf16.msra.mxu1 %v1548_v56 }
  0x79   : > { %1181 = vmatprep.subr.bf16.mxu0 %v1539_v57  ;;  %1254 = vmatprep.subr.bf16.mxu1 %v1541_v59 }
  0x7c   : > { %1182 = vmatpush2.bf16.msra.mxu0 %v1538_v1  ;;  %1255 = vmatpush2.bf16.msra.mxu1 %v1540_v2 }
  0x7d   : > { %1183 = vmatprep.subr.bf16.mxu0 %v1531_v3  ;;  %1256 = vmatprep.subr.bf16.mxu1 %v1533_v4 }
  0x80   : > { %1184 = vmatpush2.bf16.msra.mxu0 %v1530_v10  ;;  %1257 = vmatpush2.bf16.msra.mxu1 %v1532_v11 }
  0x81   : > { %1185 = vmatprep.subr.bf16.mxu0 %v1523_v12  ;;  %1258 = vmatprep.subr.bf16.mxu1 %v1525_v13 }
  0x84   : > { %1186 = vmatpush2.bf16.msra.mxu0 %v1522_v19  ;;  %1259 = vmatpush2.bf16.msra.mxu1 %v1524_v21 }
  0x85   : > { %1187 = vmatprep.subr.bf16.mxu0 %v1515_v22  ;;  %1260 = vmatprep.subr.bf16.mxu1 %v1517_v23 }
  0x88   : > { %1188 = vmatpush2.bf16.msra.mxu0 %v1514_v29  ;;  %1261 = vmatpush2.bf16.msra.mxu1 %v1516_v30 }
  0x89   : > { %1189 = vmatprep.subr.bf16.mxu0 %v1507_v31  ;;  %1262 = vmatprep.subr.bf16.mxu1 %v1509_v32 }
  0x8c   : > { %1190 = vmatpush2.bf16.msra.mxu0 %v1506_v33  ;;  %1263 = vmatpush2.bf16.msra.mxu1 %v1508_v34 }
  0x8f   : > { %1192 = vmatmul.mubr.bf16.vlgmr.msra.gmra.mxu0 %v1843_v15  ;;  %1265 = vmatmul.mubr.bf16.vlgmr.msra.gmra.mxu1 %v1843_v15  ;;  %v333_v15 = vlaneseq }
  0x90   : > { %1201 = vmatprep.mubr.bf16.mxu0 %v1856_v25  ;;  %1274 = vmatprep.mubr.bf16.mxu1 %v1856_v25 }
  0x91   : > { %v2070_v25 = vshrl.u32 %v333_v15, 7 }
  0x93   : > { %v339_v35 = vsub.s32 1, %v2070_v25 }
  0x97   : > { %1202 = vmatmul.mubr.bf16.gmra.mxu0 %v1882_v38  ;;  %1275 = vmatmul.mubr.bf16.gmra.mxu1 %v1882_v38  ;;  %v335_v38 = vsub.s32 0, %v2070_v25 }
  0x98   : > { %1211 = vmatprep.mubr.bf16.mxu0 %v1892_v47  ;;  %1284 = vmatprep.mubr.bf16.mxu1 %v1892_v47  ;;  %v2076_v47 = vld [vmem:[%s2248_s2] sm:$0xff] }
  0x99   : > { %v2083_v36 = vrot.slane %v2076_v47, %v335_v38  ;;  %v2089_v37 = vrot.slane %v2076_v47, %v339_v35 }
  0x9f   : > { %1212 = vmatmul.mubr.bf16.gmra.mxu0 %v1918_v61  ;;  %1285 = vmatmul.mubr.bf16.gmra.mxu1 %v1918_v61  ;;  %v343_v61 = vsub.s32 2, %v2070_v25 }
  0xa0   : > { %1221 = vmatprep.mubr.bf16.mxu0 %v1928_v6  ;;  %1294 = vmatprep.mubr.bf16.mxu1 %v1928_v6  ;;  %v347_v6 = vsub.s32 3, %v2070_v25 }
  0xa2   : > { %v2097_v40 = vrot.slane %v2076_v47, %v347_v6 }
  0xa7   : > { %1222 = vmatmul.mubr.bf16.gmra.mxu0 %v1954_v20  ;;  %1295 = vmatmul.mubr.bf16.gmra.mxu1 %v1954_v20  ;;  %v2086_v20 = vrot.slane %v2076_v47, %v343_v61 }
 0x10f   : > { %v1047_v39 = vpop.f32.mrf.mxu0  ;;  %v1120_v42 = vpop.f32.mrf.mxu1 }
 0x110   : > { %v1048_v41 = vadd.f32 %v1047_v39, %v2083_v36  ;;  %v1121_v43 = vadd.f32 %v1120_v42, %v2086_v20 }
 0x111   : > { %v1049_v44 = vpop.f32.mrf.mxu0  ;;  %v1122_v45 = vpop.f32.mrf.mxu1 }
 0x112   : > { %1305 = vst [vmem:[%s2094_s7] sm:$0xff] %v1048_v41  ;;  %v1050_v58 = vadd.f32 %v1049_v44, %v2089_v37  ;;  %1307 = vst [vmem:[%s2094_s7 + $0x10] sm:$0xff] %v1121_v43  ;;  %v1123_v46 = vadd.f32 %v1122_v45, %v2097_v40  ;;  %v351_v45 = vsub.s32 4, %v2070_v25 }
 0x113   : > { %v1051_v48 = vpop.f32.mrf.mxu0  ;;  %v1124_v50 = vpop.f32.mrf.mxu1 }
 0x114   : > { %1306 = vst [vmem:[%s2094_s7 + $0x8] sm:$0xff] %v1050_v58  ;;  %v1052_v49 = vadd.f32 %v1051_v48, %v2083_v36  ;;  %1308 = vst [vmem:[%s2094_s7 + $0x18] sm:$0xff] %v1123_v46  ;;  %v1125_v51 = vadd.f32 %v1124_v50, %v2086_v20  ;;  %v355_v46 = vsub.s32 5, %v2070_v25  ;;  %v2168_v48 = vrot.slane %v2076_v47, %v351_v45 }
 0x115   : > { %v1053_v52 = vpop.f32.mrf.mxu0  ;;  %v1126_v54 = vpop.f32.mrf.mxu1 }
 0x116   : > { %1313 = vst [vmem:[%s2094_s7 + $0x40] sm:$0xff] %v1052_v49  ;;  %v1054_v53 = vadd.f32 %v1053_v52, %v2089_v37  ;;  %1315 = vst [vmem:[%s2094_s7 + $0x50] sm:$0xff] %v1125_v51  ;;  %v1127_v55 = vadd.f32 %v1126_v54, %v2097_v40 }
 0x117   : > { %v1057_v56 = vpop.f32.mrf.mxu0  ;;  %v1130_v59 = vpop.f32.mrf.mxu1 }
 0x118   : > { %1314 = vst [vmem:[%s2094_s7 + $0x48] sm:$0xff] %v1054_v53  ;;  %v1058_v57 = vadd.f32 %v1057_v56, %v2083_v36  ;;  %1316 = vst [vmem:[%s2094_s7 + $0x58] sm:$0xff] %v1127_v55  ;;  %v1131_v60 = vadd.f32 %v1130_v59, %v2086_v20 }
 0x119   : > { %v1059_v62 = vpop.f32.mrf.mxu0  ;;  %v1132_v0 = vpop.f32.mrf.mxu1 }
 0x11a   : > { %1321 = vst [vmem:[%s2094_s7 + $0x80] sm:$0xff] %v1058_v57  ;;  %v1060_v63 = vadd.f32 %v1059_v62, %v2089_v37  ;;  %1323 = vst [vmem:[%s2094_s7 + $0x90] sm:$0xff] %v1131_v60  ;;  %v1133_v1 = vadd.f32 %v1132_v0, %v2097_v40 }
 0x11b   : > { %v1061_v2 = vpop.f32.mrf.mxu0  ;;  %v1134_v4 = vpop.f32.mrf.mxu1 }
 0x11c   : > { %1322 = vst [vmem:[%s2094_s7 + $0x88] sm:$0xff] %v1060_v63  ;;  %v1062_v3 = vadd.f32 %v1061_v2, %v2083_v36  ;;  %1324 = vst [vmem:[%s2094_s7 + $0x98] sm:$0xff] %v1133_v1  ;;  %v1135_v5 = vadd.f32 %v1134_v4, %v2086_v20 }
 0x11d   : > { %v1063_v7 = vpop.f32.mrf.mxu0  ;;  %v1136_v9 = vpop.f32.mrf.mxu1 }
 0x11e   : > { %1329 = vst [vmem:[%s2094_s7 + $0xc0] sm:$0xff] %v1062_v3  ;;  %v1064_v8 = vadd.f32 %v1063_v7, %v2089_v37  ;;  %1331 = vst [vmem:[%s2094_s7 + $0xd0] sm:$0xff] %v1135_v5  ;;  %v1137_v10 = vadd.f32 %v1136_v9, %v2097_v40 }
 0x11f   : > { %v1067_v11 = vpop.f32.mrf.mxu0  ;;  %v1140_v13 = vpop.f32.mrf.mxu1 }
 0x120   : > { %1330 = vst [vmem:[%s2094_s7 + $0xc8] sm:$0xff] %v1064_v8  ;;  %v1068_v12 = vadd.f32 %v1067_v11, %v2083_v36  ;;  %1332 = vst [vmem:[%s2094_s7 + $0xd8] sm:$0xff] %v1137_v10  ;;  %v1141_v14 = vadd.f32 %v1140_v13, %v2086_v20 }
 0x121   : > { %v1069_v16 = vpop.f32.mrf.mxu0  ;;  %v1142_v18 = vpop.f32.mrf.mxu1 }
 0x122   : > { %1337 = vst [vmem:[%s2094_s7 + $0x100] sm:$0xff] %v1068_v12  ;;  %v1070_v17 = vadd.f32 %v1069_v16, %v2089_v37  ;;  %1339 = vst [vmem:[%s2094_s7 + $0x110] sm:$0xff] %v1141_v14  ;;  %v1143_v19 = vadd.f32 %v1142_v18, %v2097_v40 }
 0x123   : > { %v1071_v21 = vpop.f32.mrf.mxu0  ;;  %v1144_v23 = vpop.f32.mrf.mxu1 }
 0x124   : > { %1338 = vst [vmem:[%s2094_s7 + $0x108] sm:$0xff] %v1070_v17  ;;  %v1072_v22 = vadd.f32 %v1071_v21, %v2083_v36  ;;  %1340 = vst [vmem:[%s2094_s7 + $0x118] sm:$0xff] %v1143_v19  ;;  %v1145_v24 = vadd.f32 %v1144_v23, %v2086_v20 }
 0x125   : > { %v1073_v26 = vpop.f32.mrf.mxu0  ;;  %v1146_v28 = vpop.f32.mrf.mxu1 }
 0x126   : > { %1345 = vst [vmem:[%s2094_s7 + $0x140] sm:$0xff] %v1072_v22  ;;  %v1074_v27 = vadd.f32 %v1073_v26, %v2089_v37  ;;  %1347 = vst [vmem:[%s2094_s7 + $0x150] sm:$0xff] %v1145_v24  ;;  %v1147_v29 = vadd.f32 %v1146_v28, %v2097_v40 }
 0x127   : > { %v1077_v30 = vpop.f32.mrf.mxu0  ;;  %v1150_v32 = vpop.f32.mrf.mxu1 }
 0x128   : > { %1346 = vst [vmem:[%s2094_s7 + $0x148] sm:$0xff] %v1074_v27  ;;  %v1078_v31 = vadd.f32 %v1077_v30, %v2083_v36  ;;  %1348 = vst [vmem:[%s2094_s7 + $0x158] sm:$0xff] %v1147_v29  ;;  %v1151_v33 = vadd.f32 %v1150_v32, %v2086_v20 }
 0x129   : > { %v1079_v34 = vpop.f32.mrf.mxu0  ;;  %v1152_v38 = vpop.f32.mrf.mxu1 }
 0x12a   : > { %1353 = vst [vmem:[%s2094_s7 + $0x180] sm:$0xff] %v1078_v31  ;;  %v1080_v15 = vadd.f32 %v1079_v34, %v2089_v37  ;;  %1355 = vst [vmem:[%s2094_s7 + $0x190] sm:$0xff] %v1151_v33  ;;  %v1153_v61 = vadd.f32 %v1152_v38, %v2097_v40 }
 0x12b   : > { %v1081_v35 = vpop.f32.mrf.mxu0  ;;  %v1154_v39 = vpop.f32.mrf.mxu1 }
 0x12c   : > { %1354 = vst [vmem:[%s2094_s7 + $0x188] sm:$0xff] %v1080_v15  ;;  %v1082_v6 = vadd.f32 %v1081_v35, %v2083_v36  ;;  %1356 = vst [vmem:[%s2094_s7 + $0x198] sm:$0xff] %v1153_v61  ;;  %v1155_v41 = vadd.f32 %v1154_v39, %v2086_v20  ;;  %v359_v36 = vsub.s32 6, %v2070_v25  ;;  %v363_v20 = vsub.s32 7, %v2070_v25 }
 0x12d   : > { %v1083_v42 = vpop.f32.mrf.mxu0  ;;  %v1156_v44 = vpop.f32.mrf.mxu1 }
 0x12e   : > { %1361 = vst [vmem:[%s2094_s7 + $0x1c0] sm:$0xff] %v1082_v6  ;;  %v1084_v43 = vadd.f32 %v1083_v42, %v2089_v37  ;;  %1363 = vst [vmem:[%s2094_s7 + $0x1d0] sm:$0xff] %v1155_v41  ;;  %v1157_v58 = vadd.f32 %v1156_v44, %v2097_v40  ;;  %v2171_v37 = vrot.slane %v2076_v47, %v359_v36 }
 0x12f   : > { %v2174_v40 = vrot.slane %v2076_v47, %v355_v46  ;;  %v2177_v50 = vrot.slane %v2076_v47, %v363_v20 }
 0x130   : > { %1362 = vst [vmem:[%s2094_s7 + $0x1c8] sm:$0xff] %v1084_v43  ;;  %1364 = vst [vmem:[%s2094_s7 + $0x1d8] sm:$0xff] %v1157_v58 }
 0x14f   : > { %v1193_v49 = vpop.f32.mrf.mxu0  ;;  %v1266_v52 = vpop.f32.mrf.mxu1 }
 0x150   : > { %v1194_v51 = vadd.f32 %v1193_v49, %v2168_v48  ;;  %v1267_v25 = vadd.f32 %v1266_v52, %v2171_v37 }
 0x151   : > { %v1195_v53 = vpop.f32.mrf.mxu0  ;;  %v1268_v55 = vpop.f32.mrf.mxu1 }
 0x152   : > { %1309 = vst [vmem:[%s2094_s7 + $0x20] sm:$0xff] %v1194_v51  ;;  %v1196_v54 = vadd.f32 %v1195_v53, %v2174_v40  ;;  %1311 = vst [vmem:[%s2094_s7 + $0x30] sm:$0xff] %v1267_v25  ;;  %v1269_v56 = vadd.f32 %v1268_v55, %v2177_v50 }
 0x153   : > { %v1197_v57 = vpop.f32.mrf.mxu0  ;;  %v1270_v59 = vpop.f32.mrf.mxu1 }
 0x154   : > { %1310 = vst [vmem:[%s2094_s7 + $0x28] sm:$0xff] %v1196_v54  ;;  %v1198_v47 = vadd.f32 %v1197_v57, %v2168_v48  ;;  %1312 = vst [vmem:[%s2094_s7 + $0x38] sm:$0xff] %v1269_v56  ;;  %v1271_v60 = vadd.f32 %v1270_v59, %v2171_v37 }
 0x155   : > { %v1199_v62 = vpop.f32.mrf.mxu0  ;;  %v1272_v0 = vpop.f32.mrf.mxu1 }
 0x156   : > { %1317 = vst [vmem:[%s2094_s7 + $0x60] sm:$0xff] %v1198_v47  ;;  %v1200_v63 = vadd.f32 %v1199_v62, %v2174_v40  ;;  %1319 = vst [vmem:[%s2094_s7 + $0x70] sm:$0xff] %v1271_v60  ;;  %v1273_v1 = vadd.f32 %v1272_v0, %v2177_v50 }
 0x157   : > { %v1203_v2 = vpop.f32.mrf.mxu0  ;;  %v1276_v4 = vpop.f32.mrf.mxu1 }
 0x158   : > { %1318 = vst [vmem:[%s2094_s7 + $0x68] sm:$0xff] %v1200_v63  ;;  %v1204_v3 = vadd.f32 %v1203_v2, %v2168_v48  ;;  %1320 = vst [vmem:[%s2094_s7 + $0x78] sm:$0xff] %v1273_v1  ;;  %v1277_v5 = vadd.f32 %v1276_v4, %v2171_v37 }
 0x159   : > { %v1205_v7 = vpop.f32.mrf.mxu0  ;;  %v1278_v9 = vpop.f32.mrf.mxu1 }
 0x15a   : > { %1325 = vst [vmem:[%s2094_s7 + $0xa0] sm:$0xff] %v1204_v3  ;;  %v1206_v8 = vadd.f32 %v1205_v7, %v2174_v40  ;;  %1327 = vst [vmem:[%s2094_s7 + $0xb0] sm:$0xff] %v1277_v5  ;;  %v1279_v10 = vadd.f32 %v1278_v9, %v2177_v50 }
 0x15b   : > { %v1207_v11 = vpop.f32.mrf.mxu0  ;;  %v1280_v13 = vpop.f32.mrf.mxu1 }
 0x15c   : > { %1326 = vst [vmem:[%s2094_s7 + $0xa8] sm:$0xff] %v1206_v8  ;;  %v1208_v12 = vadd.f32 %v1207_v11, %v2168_v48  ;;  %1328 = vst [vmem:[%s2094_s7 + $0xb8] sm:$0xff] %v1279_v10  ;;  %v1281_v14 = vadd.f32 %v1280_v13, %v2171_v37 }
 0x15d   : > { %v1209_v16 = vpop.f32.mrf.mxu0  ;;  %v1282_v18 = vpop.f32.mrf.mxu1 }
 0x15e   : > { %1333 = vst [vmem:[%s2094_s7 + $0xe0] sm:$0xff] %v1208_v12  ;;  %v1210_v17 = vadd.f32 %v1209_v16, %v2174_v40  ;;  %1335 = vst [vmem:[%s2094_s7 + $0xf0] sm:$0xff] %v1281_v14  ;;  %v1283_v19 = vadd.f32 %v1282_v18, %v2177_v50 }
 0x15f   : > { %v1213_v21 = vpop.f32.mrf.mxu0  ;;  %v1286_v23 = vpop.f32.mrf.mxu1 }
 0x160   : > { %1334 = vst [vmem:[%s2094_s7 + $0xe8] sm:$0xff] %v1210_v17  ;;  %v1214_v22 = vadd.f32 %v1213_v21, %v2168_v48  ;;  %1336 = vst [vmem:[%s2094_s7 + $0xf8] sm:$0xff] %v1283_v19  ;;  %v1287_v24 = vadd.f32 %v1286_v23, %v2171_v37 }
 0x161   : > { %v1215_v26 = vpop.f32.mrf.mxu0  ;;  %v1288_v28 = vpop.f32.mrf.mxu1 }
 0x162   : > { %1341 = vst [vmem:[%s2094_s7 + $0x120] sm:$0xff] %v1214_v22  ;;  %v1216_v27 = vadd.f32 %v1215_v26, %v2174_v40  ;;  %1343 = vst [vmem:[%s2094_s7 + $0x130] sm:$0xff] %v1287_v24  ;;  %v1289_v29 = vadd.f32 %v1288_v28, %v2177_v50 }
 0x163   : > { %v1217_v30 = vpop.f32.mrf.mxu0  ;;  %v1290_v32 = vpop.f32.mrf.mxu1 }
 0x164   : > { %1342 = vst [vmem:[%s2094_s7 + $0x128] sm:$0xff] %v1216_v27  ;;  %v1218_v31 = vadd.f32 %v1217_v30, %v2168_v48  ;;  %1344 = vst [vmem:[%s2094_s7 + $0x138] sm:$0xff] %v1289_v29  ;;  %v1291_v33 = vadd.f32 %v1290_v32, %v2171_v37 }
 0x165   : > { %v1219_v34 = vpop.f32.mrf.mxu0  ;;  %v1292_v38 = vpop.f32.mrf.mxu1 }
 0x166   : > { %1349 = vst [vmem:[%s2094_s7 + $0x160] sm:$0xff] %v1218_v31  ;;  %v1220_v15 = vadd.f32 %v1219_v34, %v2174_v40  ;;  %1351 = vst [vmem:[%s2094_s7 + $0x170] sm:$0xff] %v1291_v33  ;;  %v1293_v61 = vadd.f32 %v1292_v38, %v2177_v50 }
 0x167   : > { %v1223_v35 = vpop.f32.mrf.mxu0  ;;  %v1296_v39 = vpop.f32.mrf.mxu1 }
 0x168   : > { %1350 = vst [vmem:[%s2094_s7 + $0x168] sm:$0xff] %v1220_v15  ;;  %v1224_v6 = vadd.f32 %v1223_v35, %v2168_v48  ;;  %1352 = vst [vmem:[%s2094_s7 + $0x178] sm:$0xff] %v1293_v61  ;;  %v1297_v41 = vadd.f32 %v1296_v39, %v2171_v37 }
 0x169   : > { %v1225_v42 = vpop.f32.mrf.mxu0  ;;  %v1298_v44 = vpop.f32.mrf.mxu1 }
 0x16a   : > { %1357 = vst [vmem:[%s2094_s7 + $0x1a0] sm:$0xff] %v1224_v6  ;;  %v1226_v43 = vadd.f32 %v1225_v42, %v2174_v40  ;;  %1359 = vst [vmem:[%s2094_s7 + $0x1b0] sm:$0xff] %v1297_v41  ;;  %v1299_v58 = vadd.f32 %v1298_v44, %v2177_v50 }
 0x16b   : > { %v1227_v45 = vpop.f32.mrf.mxu0  ;;  %v1300_v46 = vpop.f32.mrf.mxu1 }
 0x16c   : > { %1358 = vst [vmem:[%s2094_s7 + $0x1a8] sm:$0xff] %v1226_v43  ;;  %v1228_v36 = vadd.f32 %v1227_v45, %v2168_v48  ;;  %1360 = vst [vmem:[%s2094_s7 + $0x1b8] sm:$0xff] %v1299_v58  ;;  %v1301_v20 = vadd.f32 %v1300_v46, %v2171_v37 }
 0x16d   : > { %v1229_v49 = vpop.f32.mrf.mxu0  ;;  %v1302_v52 = vpop.f32.mrf.mxu1 }
 0x16e   : > { %1365 = vst [vmem:[%s2094_s7 + $0x1e0] sm:$0xff] %v1228_v36  ;;  %v1230_v51 = vadd.f32 %v1229_v49, %v2174_v40  ;;  %1367 = vst [vmem:[%s2094_s7 + $0x1f0] sm:$0xff] %v1301_v20  ;;  %v1303_v25 = vadd.f32 %v1302_v52, %v2177_v50 }
 0x170   : > { %1366 = vst [vmem:[%s2094_s7 + $0x1e8] sm:$0xff] %v1230_v51  ;;  %1368 = vst [vmem:[%s2094_s7 + $0x1f8] sm:$0xff] %v1303_v25 }
 0x171 PF: > { %s13_s12 = sadd.s32 1, %s1584_s12  }
 0x172   : > { %p10_p4 = scmp.ge.s32.totalorder %s13_s12, 4  }
 0x174   :  { %12 = sbr.rel (!%p10_p4) target bundleno = 1 (0x1), region = 62 }

// kernel: foundation_lstm_forward.4
= control target key start
LH: loop header
LB: loop body
LE: loop exit
PB: predicated region body
PF: predicated region fallthrough
CT: control target
= control target key end

     0   :  { %s1871_s18 = smov 0   ;;  %s2723_s0 = inlined_call_operand.vmem [shape: f32[16,8,256], index: 0, kind: input, shape index: {}]   ;;  %s2724_s1 = inlined_call_operand.vmem [shape: f32[1,1,256], index: 1, kind: input, shape index: {}]   ;;  %s2725_s2 = inlined_call_operand.vmem [shape: f32[1,1,256], index: 2, kind: input, shape index: {}]   ;;  %s2726_s3 = inlined_call_operand.vmem [shape: bf16[256,1024], index: 3, kind: input, shape index: {}]   ;;  %s2727_s4 = inlined_call_operand.vmem [shape: f32[1,1024], index: 4, kind: input, shape index: {}]   ;;  %s2728_s5 = inlined_call_operand.vmem [shape: f32[16,8,1024], index: 5, kind: output, shape index: {}]  }
   0x1 LB: > { %s1666_s19 = sadd.s32 4294967295, %s1839_s18   ;;  %p1670_p0 = scmp.ge.s32.totalorder %s1839_s18, 1  ;;  %s1839_s18 = sphi %s1871_s18, %s15_s18  }
   0x2   : > { %p189_p1 = scmp.lt.s32.totalorder %s1839_s18, 3 }
   0x4   : > { %p190_p2 = pnand %p1670_p0, %p189_p1 }
   0x5   : > { %s1671_s20 = sshll.u32 (!%p190_p2), %s1666_s19, 3 }
   0x6   : > { %193 = sbr.rel (%p190_p2) target bundleno = 622 (0x26e), region = 40  ;;  %p220_p3 = scmp.lt.s32.totalorder (!%p190_p2), %s1671_s20, 15 }
   0xb   : > { %s2730_s20 = smov (!%p220_p3, %s1671_s20), 15  ;;  %v498_v24 = vld [vmem:[%s2726_s3 + $0x1c0] sm:$0xff]  ;;  %v499_v26 = vld [vmem:[%s2726_s3 + $0x1c8] sm:$0xff] }
   0xc   : > { %s1807_s21 = sshll.u32 %s2730_s20, 4  ;;  %v502_v25 = vld [vmem:[%s2726_s3 + $0x1e0] sm:$0xff]  ;;  %v503_v28 = vld [vmem:[%s2726_s3 + $0x1e8] sm:$0xff]  ;;  %s1808_s9 = sshll.u32 %s2730_s20, 6 }
   0xd   : > { %s224_s24 = scalar_lea.vmem %s2723_s0, %s1807_s21  ;;  %v1734_v27 = vcombine.high %v498_v24, %v502_v25  ;;  %v1733_v29 = vcombine.low %v498_v24, %v502_v25  ;;  %v490_v30 = vld [vmem:[%s2726_s3 + $0x180] sm:$0xff]  ;;  %v1736_v32 = vcombine.high %v499_v26, %v503_v28  ;;  %v1735_v33 = vcombine.low %v499_v26, %v503_v28  ;;  %v491_v35 = vld [vmem:[%s2726_s3 + $0x188] sm:$0xff]  ;;  %s2574_s12 = scalar_lea.vmem %s2728_s5, %s1808_s9 }
   0xe   : > { %v1885_v0 = vld [vmem:[%s224_s24] sm:$0xff]  ;;  %v1887_v1 = vld [vmem:[%s224_s24 + $0x8] sm:$0xff]  ;;  %v1895_v5 = vld [vmem:[%s224_s24 + $0x10] sm:$0xff] }
   0xf   : > { %v1889_v2 = vld [vmem:[%s224_s24 + $0x20] sm:$0xff]  ;;  %v249_v3 = vadd.f32 %v1887_v1, %v1885_v0  ;;  %v1893_v4 = vld [vmem:[%s224_s24 + $0x28] sm:$0xff]  ;;  %v1897_v6 = vld [vmem:[%s224_s24 + $0x18] sm:$0xff]  ;;  %1252 = vmatprep.subr.bf16.mxu0 %v1734_v27  ;;  %1325 = vmatprep.subr.bf16.mxu1 %v1736_v32 }
  0x10   : > { %v255_v7 = vadd.f32 %v1893_v4, %v1889_v2  ;;  %v1901_v8 = vld [vmem:[%s224_s24 + $0x30] sm:$0xff]  ;;  %v1903_v9 = vld [vmem:[%s224_s24 + $0x38] sm:$0xff]  ;;  %v252_v10 = vadd.f32 %v1897_v6, %v1895_v5  ;;  %v1909_v12 = vld [vmem:[%s224_s24 + $0x40] sm:$0xff]  ;;  %1253 = vmatpush1.bf16.msra.mxu0 %v1733_v29  ;;  %1326 = vmatpush1.bf16.msra.mxu1 %v1735_v33 }
  0x11   : > { %250 = vadd.xlane.f32.xlu0 %v249_v3  ;;  %v258_v11 = vadd.f32 %v1903_v9, %v1901_v8  ;;  %v1911_v13 = vld [vmem:[%s224_s24 + $0x48] sm:$0xff]  ;;  %v1913_v14 = vld [vmem:[%s224_s24 + $0x50] sm:$0xff]  ;;  %v1915_v15 = vld [vmem:[%s224_s24 + $0x58] sm:$0xff] }
  0x12   : > { %256 = vadd.xlane.f32.xlu1 %v255_v7  ;;  %v261_v16 = vadd.f32 %v1911_v13, %v1909_v12  ;;  %v264_v17 = vadd.f32 %v1915_v15, %v1913_v14  ;;  %v1921_v18 = vld [vmem:[%s224_s24 + $0x60] sm:$0xff]  ;;  %v1923_v19 = vld [vmem:[%s224_s24 + $0x68] sm:$0xff]  ;;  %v1925_v20 = vld [vmem:[%s224_s24 + $0x70] sm:$0xff] }
  0x13   : > { %v1927_v21 = vld [vmem:[%s224_s24 + $0x78] sm:$0xff]  ;;  %v267_v22 = vadd.f32 %v1923_v19, %v1921_v18  ;;  %v494_v31 = vld [vmem:[%s2726_s3 + $0x1a0] sm:$0xff]  ;;  %v495_v36 = vld [vmem:[%s2726_s3 + $0x1a8] sm:$0xff] }
  0x14   : > { %v270_v23 = vadd.f32 %v1927_v21, %v1925_v20  ;;  %v1726_v34 = vcombine.high %v490_v30, %v494_v31  ;;  %v482_v37 = vld [vmem:[%s2726_s3 + $0x140] sm:$0xff]  ;;  %v1728_v38 = vcombine.high %v491_v35, %v495_v36  ;;  %v483_v40 = vld [vmem:[%s2726_s3 + $0x148] sm:$0xff]  ;;  %v1725_v42 = vcombine.low %v490_v30, %v494_v31 }
  0x15   : > { %253 = vadd.xlane.f32.xlu0 %v252_v10  ;;  %v486_v39 = vld [vmem:[%s2726_s3 + $0x160] sm:$0xff]  ;;  %v487_v41 = vld [vmem:[%s2726_s3 + $0x168] sm:$0xff]  ;;  %v1727_v43 = vcombine.low %v491_v35, %v495_v36 }
  0x16   : > { %259 = vadd.xlane.f32.xlu1 %v258_v11  ;;  %1254 = vmatprep.subr.bf16.mxu0 %v1726_v34  ;;  %v1718_v44 = vcombine.high %v482_v37, %v486_v39  ;;  %v1720_v45 = vcombine.high %v483_v40, %v487_v41  ;;  %v474_v46 = vld [vmem:[%s2726_s3 + $0x100] sm:$0xff]  ;;  %v475_v48 = vld [vmem:[%s2726_s3 + $0x108] sm:$0xff]  ;;  %v1717_v50 = vcombine.low %v482_v37, %v486_v39 }
  0x17   : > { %1327 = vmatprep.subr.bf16.mxu1 %v1728_v38  ;;  %v478_v47 = vld [vmem:[%s2726_s3 + $0x120] sm:$0xff]  ;;  %v479_v49 = vld [vmem:[%s2726_s3 + $0x128] sm:$0xff]  ;;  %1255 = vmatpush1.bf16.msra.mxu0 %v1725_v42  ;;  %v1719_v51 = vcombine.low %v483_v40, %v487_v41 }
  0x18   : > { %1328 = vmatpush1.bf16.msra.mxu1 %v1727_v43  ;;  %1256 = vmatprep.subr.bf16.mxu0 %v1718_v44  ;;  %v1710_v52 = vcombine.high %v474_v46, %v478_v47  ;;  %v1712_v53 = vcombine.high %v475_v48, %v479_v49  ;;  %v466_v54 = vld [vmem:[%s2726_s3 + $0xc0] sm:$0xff]  ;;  %v467_v56 = vld [vmem:[%s2726_s3 + $0xc8] sm:$0xff]  ;;  %v1709_v58 = vcombine.low %v474_v46, %v478_v47 }
  0x19   : > { %262 = vadd.xlane.f32.xlu0 %v261_v16  ;;  %1329 = vmatprep.subr.bf16.mxu1 %v1720_v45  ;;  %v470_v55 = vld [vmem:[%s2726_s3 + $0xe0] sm:$0xff]  ;;  %v471_v57 = vld [vmem:[%s2726_s3 + $0xe8] sm:$0xff]  ;;  %v1711_v59 = vcombine.low %v475_v48, %v479_v49 }
  0x1a   : > { %265 = vadd.xlane.f32.xlu1 %v264_v17  ;;  %v1702_v60 = vcombine.high %v466_v54, %v470_v55  ;;  %v1704_v61 = vcombine.high %v467_v56, %v471_v57  ;;  %v458_v62 = vld [vmem:[%s2726_s3 + $0x80] sm:$0xff]  ;;  %v459_v3 = vld [vmem:[%s2726_s3 + $0x88] sm:$0xff]  ;;  %v1701_v10 = vcombine.low %v466_v54, %v470_v55  ;;  %v1703_v11 = vcombine.low %v467_v56, %v471_v57 }
  0x1b   : > { %1257 = vmatpush1.bf16.msra.mxu0 %v1717_v50  ;;  %v462_v63 = vld [vmem:[%s2726_s3 + $0xa0] sm:$0xff]  ;;  %v463_v7 = vld [vmem:[%s2726_s3 + $0xa8] sm:$0xff] }
  0x1c   : > { %1330 = vmatpush1.bf16.msra.mxu1 %v1719_v51  ;;  %1258 = vmatprep.subr.bf16.mxu0 %v1710_v52  ;;  %v1694_v16 = vcombine.high %v458_v62, %v462_v63  ;;  %v1696_v17 = vcombine.high %v459_v3, %v463_v7  ;;  %v451_v24 = vld [vmem:[%s2726_s3 + $0x48] sm:$0xff]  ;;  %v1693_v26 = vcombine.low %v458_v62, %v462_v63  ;;  %v442_v30 = vld [vmem:[%s2726_s3] sm:$0xff] }
  0x1d   : > { %268 = vadd.xlane.f32.xlu0 %v267_v22  ;;  %1331 = vmatprep.subr.bf16.mxu1 %v1712_v53  ;;  %v450_v22 = vld [vmem:[%s2726_s3 + $0x40] sm:$0xff]  ;;  %v455_v25 = vld [vmem:[%s2726_s3 + $0x68] sm:$0xff]  ;;  %v1695_v27 = vcombine.low %v459_v3, %v463_v7 }
  0x1e   : > { %271 = vadd.xlane.f32.xlu1 %v270_v23  ;;  %v454_v23 = vld [vmem:[%s2726_s3 + $0x60] sm:$0xff]  ;;  %v1688_v29 = vcombine.high %v451_v24, %v455_v25  ;;  %v443_v32 = vld [vmem:[%s2726_s3 + $0x8] sm:$0xff]  ;;  %v1687_v35 = vcombine.low %v451_v24, %v455_v25 }
  0x1f   : > { %1259 = vmatpush1.bf16.msra.mxu0 %v1709_v58  ;;  %v1686_v28 = vcombine.high %v450_v22, %v454_v23  ;;  %v446_v31 = vld [vmem:[%s2726_s3 + $0x20] sm:$0xff]  ;;  %v447_v33 = vld [vmem:[%s2726_s3 + $0x28] sm:$0xff]  ;;  %v1685_v34 = vcombine.low %v450_v22, %v454_v23 }
  0x20   : > { %1332 = vmatpush1.bf16.msra.mxu1 %v1711_v59  ;;  %1260 = vmatprep.subr.bf16.mxu0 %v1702_v60  ;;  %v1678_v36 = vcombine.high %v442_v30, %v446_v31  ;;  %v1680_v37 = vcombine.high %v443_v32, %v447_v33  ;;  %v562_v38 = vld [vmem:[%s2726_s3 + $0x3c0] sm:$0xff]  ;;  %v563_v40 = vld [vmem:[%s2726_s3 + $0x3c8] sm:$0xff]  ;;  %v1677_v42 = vcombine.low %v442_v30, %v446_v31 }
  0x21   : > { %1333 = vmatprep.subr.bf16.mxu1 %v1704_v61  ;;  %v566_v39 = vld [vmem:[%s2726_s3 + $0x3e0] sm:$0xff]  ;;  %v567_v41 = vld [vmem:[%s2726_s3 + $0x3e8] sm:$0xff]  ;;  %v1679_v43 = vcombine.low %v443_v32, %v447_v33 }
  0x22   : > { %v1798_v44 = vcombine.high %v562_v38, %v566_v39  ;;  %v1800_v45 = vcombine.high %v563_v40, %v567_v41  ;;  %v1797_v46 = vcombine.low %v562_v38, %v566_v39  ;;  %v1799_v47 = vcombine.low %v563_v40, %v567_v41  ;;  %v555_v40 = vld [vmem:[%s2726_s3 + $0x388] sm:$0xff] }
  0x23   : > { %1261 = vmatpush1.bf16.msra.mxu0 %v1701_v10 }
  0x24   : > { %1334 = vmatpush1.bf16.msra.mxu1 %v1703_v11  ;;  %1262 = vmatprep.subr.bf16.mxu0 %v1694_v16 }
  0x25   : > { %1335 = vmatprep.subr.bf16.mxu1 %v1696_v17 }
  0x27   : > { %1263 = vmatpush1.bf16.msra.mxu0 %v1693_v26 }
  0x28   : > { %1336 = vmatpush1.bf16.msra.mxu1 %v1695_v27  ;;  %1264 = vmatprep.subr.bf16.mxu0 %v1686_v28 }
  0x29   : > { %1337 = vmatprep.subr.bf16.mxu1 %v1688_v29 }
  0x2b   : > { %1265 = vmatpush1.bf16.msra.mxu0 %v1685_v34 }
  0x2c   : > { %1338 = vmatpush1.bf16.msra.mxu1 %v1687_v35  ;;  %1266 = vmatprep.subr.bf16.mxu0 %v1678_v36 }
  0x2d   : > { %1339 = vmatprep.subr.bf16.mxu1 %v1680_v37 }
  0x2f   : > { %1267 = vmatpush1.bf16.msra.mxu0 %v1677_v42 }
  0x30   : > { %1340 = vmatpush1.bf16.msra.mxu1 %v1679_v43  ;;  %1268 = vmatprep.subr.bf16.mxu0 %v1798_v44  ;;  %v559_v43 = vld [vmem:[%s2726_s3 + $0x3a8] sm:$0xff] }
  0x31   : > { %1341 = vmatprep.subr.bf16.mxu1 %v1800_v45  ;;  %v1792_v44 = vcombine.high %v555_v40, %v559_v43 }
  0x33   : > { %1269 = vmatpush2.bf16.msra.mxu0 %v1797_v46  ;;  %v1791_v46 = vcombine.low %v555_v40, %v559_v43  ;;  %v507_v43 = vld [vmem:[%s2726_s3 + $0x208] sm:$0xff] }
  0x34   : > { %1342 = vmatpush2.bf16.msra.mxu1 %v1799_v47 }
  0x35   : > { %1343 = vmatprep.subr.bf16.mxu1 %v1792_v44  ;;  %v511_v44 = vld [vmem:[%s2726_s3 + $0x228] sm:$0xff] }
  0x38   : > { %1344 = vmatpush2.bf16.msra.mxu1 %v1791_v46 }
  0x9a   : > { %v251_v48 = vpop.xlane.xlu0 %250 }
  0x9b   : > { %v274_v49 = vmul.f32 0.00390625, %v251_v48  ;;  %v257_v50 = vpop.xlane.xlu1 %256  ;;  %v546_v48 = vld [vmem:[%s2726_s3 + $0x340] sm:$0xff] }
  0x9c   : > { %v276_v51 = vmul.f32 0.00390625, %v257_v50  ;;  %v547_v50 = vld [vmem:[%s2726_s3 + $0x348] sm:$0xff] }
  0x9d   : > { %v2042_v52 = vsub.f32 %v1885_v0, %v274_v49  ;;  %v2045_v53 = vsub.f32 %v1887_v1, %v274_v49  ;;  %v550_v49 = vld [vmem:[%s2726_s3 + $0x360] sm:$0xff] }
  0x9e   : > { %v2048_v54 = vsub.f32 %v1889_v2, %v276_v51  ;;  %v2051_v55 = vsub.f32 %v1893_v4, %v276_v51  ;;  %v254_v56 = vpop.xlane.xlu0 %253  ;;  %v1782_v51 = vcombine.high %v546_v48, %v550_v49 }
  0x9f   : > { %v275_v57 = vmul.f32 0.00390625, %v254_v56  ;;  %v260_v58 = vpop.xlane.xlu1 %259  ;;  %v298_v59 = vmul.f32 %v2042_v52, %v2042_v52  ;;  %v299_v60 = vmul.f32 %v2045_v53, %v2045_v53  ;;  %v551_v56 = vld [vmem:[%s2726_s3 + $0x368] sm:$0xff] }
  0xa0   : > { %v277_v0 = vmul.f32 0.00390625, %v260_v58  ;;  %v302_v1 = vmul.f32 %v2048_v54, %v2048_v54  ;;  %v303_v2 = vmul.f32 %v2051_v55, %v2051_v55  ;;  %v1781_v58 = vcombine.low %v546_v48, %v550_v49  ;;  %v2208_v48 = vld [vmem:[%s2726_s3 + $0x1d0] sm:$0xff] }
  0xa1   : > { %v2062_v61 = vsub.f32 %v1895_v5, %v275_v57  ;;  %v2065_v4 = vsub.f32 %v1897_v6, %v275_v57  ;;  %v314_v62 = vadd.f32 %v299_v60, %v298_v59  ;;  %v1784_v57 = vcombine.high %v547_v50, %v551_v56  ;;  %v538_v60 = vld [vmem:[%s2726_s3 + $0x300] sm:$0xff]  ;;  %v2213_v49 = vld [vmem:[%s2726_s3 + $0x1f0] sm:$0xff] }
  0xa2   : > { %v2068_v63 = vsub.f32 %v1901_v8, %v277_v0  ;;  %v2071_v3 = vsub.f32 %v1903_v9, %v277_v0  ;;  %v263_v7 = vpop.xlane.xlu0 %262  ;;  %v320_v16 = vadd.f32 %v303_v2, %v302_v1  ;;  %v1783_v59 = vcombine.low %v547_v50, %v551_v56  ;;  %v542_v0 = vld [vmem:[%s2726_s3 + $0x320] sm:$0xff]  ;;  %v539_v1 = vld [vmem:[%s2726_s3 + $0x308] sm:$0xff]  ;;  %v2218_v50 = vld [vmem:[%s2726_s3 + $0x1d8] sm:$0xff] }
  0xa3   : > { %v278_v10 = vmul.f32 0.00390625, %v263_v7  ;;  %315 = vadd.xlane.f32.xlu0 %v314_v62  ;;  %v266_v11 = vpop.xlane.xlu1 %265  ;;  %v300_v17 = vmul.f32 %v2062_v61, %v2062_v61  ;;  %v301_v5 = vmul.f32 %v2065_v4, %v2065_v4  ;;  %1345 = vmatprep.subr.bf16.mxu1 %v1784_v57  ;;  %v1774_v2 = vcombine.high %v538_v60, %v542_v0  ;;  %v543_v62 = vld [vmem:[%s2726_s3 + $0x328] sm:$0xff]  ;;  %v2225_v56 = vld [vmem:[%s2726_s3 + $0x1f8] sm:$0xff] }
  0xa4   : > { %v279_v6 = vmul.f32 0.00390625, %v266_v11  ;;  %v304_v22 = vmul.f32 %v2068_v63, %v2068_v63  ;;  %v305_v8 = vmul.f32 %v2071_v3, %v2071_v3  ;;  %1346 = vmatpush2.bf16.msra.mxu1 %v1783_v59  ;;  %v1776_v7 = vcombine.high %v539_v1, %v543_v62 }
  0xa5   : > { %v2082_v9 = vsub.f32 %v1909_v12, %v278_v10  ;;  %v2085_v23 = vsub.f32 %v1911_v13, %v278_v10  ;;  %v317_v24 = vadd.f32 %v301_v5, %v300_v17  ;;  %v1773_v10 = vcombine.low %v538_v60, %v542_v0  ;;  %v534_v17 = vld [vmem:[%s2726_s3 + $0x2e0] sm:$0xff]  ;;  %v531_v5 = vld [vmem:[%s2726_s3 + $0x2c8] sm:$0xff] }
  0xa6   : > { %v2088_v25 = vsub.f32 %v1913_v14, %v279_v6  ;;  %v2091_v26 = vsub.f32 %v1915_v15, %v279_v6  ;;  %v269_v27 = vpop.xlane.xlu0 %268  ;;  %v323_v30 = vadd.f32 %v305_v8, %v304_v22  ;;  %v1775_v11 = vcombine.low %v539_v1, %v543_v62  ;;  %1347 = vmatprep.subr.bf16.mxu1 %v1776_v7  ;;  %v535_v22 = vld [vmem:[%s2726_s3 + $0x2e8] sm:$0xff] }
  0xa7   : > { %v280_v28 = vmul.f32 0.00390625, %v269_v27  ;;  %321 = vadd.xlane.f32.xlu0 %v320_v16  ;;  %318 = vadd.xlane.f32.xlu1 %v317_v24  ;;  %v272_v29 = vpop.xlane.xlu1 %271  ;;  %v306_v12 = vmul.f32 %v2082_v9, %v2082_v9  ;;  %v307_v13 = vmul.f32 %v2085_v23, %v2085_v23  ;;  %v530_v16 = vld [vmem:[%s2726_s3 + $0x2c0] sm:$0xff]  ;;  %v1768_v8 = vcombine.high %v531_v5, %v535_v22 }
  0xa8   : > { %v281_v31 = vmul.f32 0.00390625, %v272_v29  ;;  %v308_v14 = vmul.f32 %v2088_v25, %v2088_v25  ;;  %v309_v15 = vmul.f32 %v2091_v26, %v2091_v26  ;;  %1348 = vmatpush2.bf16.msra.mxu1 %v1775_v11  ;;  %v1766_v6 = vcombine.high %v530_v16, %v534_v17  ;;  %v526_v29 = vld [vmem:[%s2726_s3 + $0x2a0] sm:$0xff] }
  0xa9   : > { %v2102_v32 = vsub.f32 %v1921_v18, %v280_v28  ;;  %v2105_v33 = vsub.f32 %v1923_v19, %v280_v28  ;;  %v326_v34 = vadd.f32 %v307_v13, %v306_v12  ;;  %v1765_v24 = vcombine.low %v530_v16, %v534_v17  ;;  %1349 = vmatprep.subr.bf16.mxu1 %v1768_v8  ;;  %v522_v28 = vld [vmem:[%s2726_s3 + $0x280] sm:$0xff]  ;;  %v527_v13 = vld [vmem:[%s2726_s3 + $0x2a8] sm:$0xff] }
  0xaa   : > { %v2108_v35 = vsub.f32 %v1925_v20, %v281_v31  ;;  %v2111_v36 = vsub.f32 %v1927_v21, %v281_v31  ;;  %v329_v37 = vadd.f32 %v309_v15, %v308_v14  ;;  %v554_v20 = vld [vmem:[%s2726_s3 + $0x380] sm:$0xff]  ;;  %v1767_v27 = vcombine.low %v531_v5, %v535_v22 }
  0xab   : > { %324 = vadd.xlane.f32.xlu1 %v323_v30  ;;  %327 = vadd.xlane.f32.xlu0 %v326_v34  ;;  %v310_v38 = vmul.f32 %v2102_v32, %v2102_v32  ;;  %v311_v18 = vmul.f32 %v2105_v33, %v2105_v33  ;;  %v558_v21 = vld [vmem:[%s2726_s3 + $0x3a0] sm:$0xff]  ;;  %v523_v30 = vld [vmem:[%s2726_s3 + $0x288] sm:$0xff]  ;;  %v1758_v12 = vcombine.high %v522_v28, %v526_v29  ;;  %v380_v11 = vlaneseq }
  0xac   : > { %v312_v19 = vmul.f32 %v2108_v35, %v2108_v35  ;;  %v313_v39 = vmul.f32 %v2111_v36, %v2111_v36  ;;  %v1790_v42 = vcombine.high %v554_v20, %v558_v21  ;;  %v1789_v45 = vcombine.low %v554_v20, %v558_v21  ;;  %1350 = vmatpush2.bf16.msra.mxu1 %v1767_v27  ;;  %v514_v34 = vld [vmem:[%s2726_s3 + $0x240] sm:$0xff] }
  0xad   : > { %v332_v41 = vadd.f32 %v311_v18, %v310_v38  ;;  %v1760_v31 = vcombine.high %v523_v30, %v527_v13  ;;  %v1757_v14 = vcombine.low %v522_v28, %v526_v29  ;;  %v1759_v15 = vcombine.low %v523_v30, %v527_v13  ;;  %v515_v38 = vld [vmem:[%s2726_s3 + $0x248] sm:$0xff]  ;;  %v506_v20 = vld [vmem:[%s2726_s3 + $0x200] sm:$0xff] }
  0xae   : > { %v335_v47 = vadd.f32 %v313_v39, %v312_v19  ;;  %1270 = vmatprep.subr.bf16.mxu0 %v1790_v42  ;;  %v519_v19 = vld [vmem:[%s2726_s3 + $0x268] sm:$0xff]  ;;  %v510_v21 = vld [vmem:[%s2726_s3 + $0x220] sm:$0xff]  ;;  %v1737_v57 = vcombine.low %v2208_v48, %v2213_v49  ;;  %v1740_v59 = vcombine.high %v2218_v50, %v2225_v56 }
  0xaf   : > { %330 = vadd.xlane.f32.xlu1 %v329_v37  ;;  %333 = vadd.xlane.f32.xlu0 %v332_v41  ;;  %v518_v37 = vld [vmem:[%s2726_s3 + $0x260] sm:$0xff]  ;;  %v1752_v40 = vcombine.high %v515_v38, %v519_v19  ;;  %v1751_v41 = vcombine.low %v515_v38, %v519_v19  ;;  %v1742_v42 = vcombine.high %v506_v20, %v510_v21 }
  0xb0   : > { %1271 = vmatpush2.bf16.msra.mxu0 %v1789_v45  ;;  %1351 = vmatprep.subr.bf16.mxu1 %v1760_v31  ;;  %v1750_v18 = vcombine.high %v514_v34, %v518_v37  ;;  %v1749_v39 = vcombine.low %v514_v34, %v518_v37  ;;  %v1744_v45 = vcombine.high %v507_v43, %v511_v44  ;;  %v378_v34 = vld [vmem:[%s2724_s1] sm:$0x3] }
  0xb1   : > { %1272 = vmatprep.subr.bf16.mxu0 %v1782_v51  ;;  %1352 = vmatpush2.bf16.msra.mxu1 %v1759_v15  ;;  %v1741_v46 = vcombine.low %v506_v20, %v510_v21  ;;  %v1738_v51 = vcombine.high %v2208_v48, %v2213_v49  ;;  %v406_v20 = vld [vmem:[%s2725_s2] sm:$0x3]  ;;  %v476_v49 = vld [vmem:[%s2726_s3 + $0x110] sm:$0xff] }
  0xb2   : > { %1353 = vmatprep.subr.bf16.mxu1 %v1752_v40 }
  0xb3   : > { %336 = vadd.xlane.f32.xlu1 %v335_v47  ;;  %v1743_v47 = vcombine.low %v507_v43, %v511_v44 }
  0xb4   : > { %1273 = vmatpush2.bf16.msra.mxu0 %v1781_v58  ;;  %v1739_v58 = vcombine.low %v2218_v50, %v2225_v56 }
  0xb5   : > { %1274 = vmatprep.subr.bf16.mxu0 %v1774_v2  ;;  %1354 = vmatpush2.bf16.msra.mxu1 %v1751_v41 }
  0xb6   : > { %1355 = vmatprep.subr.bf16.mxu1 %v1744_v45 }
  0xb8   : > { %1275 = vmatpush2.bf16.msra.mxu0 %v1773_v10 }
  0xb9   : > { %1276 = vmatprep.subr.bf16.mxu0 %v1766_v6  ;;  %1356 = vmatpush2.bf16.msra.mxu1 %v1743_v47 }
  0xba   : > { %1471 = vmatprep.subr.bf16.mxu1 %v1740_v59 }
  0xbc   : > { %1277 = vmatpush2.bf16.msra.mxu0 %v1765_v24  ;;  %v2233_v24 = vshrl.u32 %v380_v11, 7 }
  0xbd   : > { %1278 = vmatprep.subr.bf16.mxu0 %v1758_v12 }
  0xbe   : > { %v2236_v31 = vsub.s32 1, %v2233_v24 }
  0xc0   : > { %1279 = vmatpush2.bf16.msra.mxu0 %v1757_v14  ;;  %v2239_v14 = vsub.s32 0, %v2233_v24  ;;  %v2256_v43 = vrot.slane %v406_v20, %v2236_v31 }
  0xc1   : > { %1280 = vmatprep.subr.bf16.mxu0 %v1750_v18 }
  0xc2   : > { %v2251_v21 = vrot.slane %v378_v34, %v2239_v14  ;;  %v2261_v47 = vrot.slane %v406_v20, %v2239_v14 }
  0xc4   : > { %1281 = vmatpush2.bf16.msra.mxu0 %v1749_v39  ;;  %v2245_v39 = vrot.slane %v378_v34, %v2236_v31 }
  0xc5   : > { %1282 = vmatprep.subr.bf16.mxu0 %v1742_v42 }
  0xc8   : > { %1283 = vmatpush2.bf16.msra.mxu0 %v1741_v46 }
  0xc9   : > { %1398 = vmatprep.subr.bf16.mxu0 %v1738_v51 }
 0x12c   : > { %v316_v60 = vpop.xlane.xlu0 %315 }
 0x12d   : > { %v338_v0 = vmul.f32 0.00390625, %v316_v60 }
 0x12f   : > { %v346_v1 = vadd.f32 1e-05, %v338_v0 }
 0x130   : > { %v319_v2 = vpop.xlane.xlu1 %318  ;;  %v322_v62 = vpop.xlane.xlu0 %321 }
 0x131   : > { %1817 = vrsqrt.f32 %v346_v1  ;;  %v339_v7 = vmul.f32 0.00390625, %v319_v2  ;;  %v340_v10 = vmul.f32 0.00390625, %v322_v62 }
 0x133   : > { %v347_v16 = vadd.f32 1e-05, %v339_v7  ;;  %v348_v17 = vadd.f32 1e-05, %v340_v10  ;;  %v492_v10 = vld [vmem:[%s2726_s3 + $0x190] sm:$0xff] }
 0x134   : > { %v325_v5 = vpop.xlane.xlu1 %324  ;;  %v328_v6 = vpop.xlane.xlu0 %327 }
 0x135   : > { %1819 = vrsqrt.f32 %v347_v16  ;;  %v341_v22 = vmul.f32 0.00390625, %v325_v5  ;;  %v342_v8 = vmul.f32 0.00390625, %v328_v6  ;;  %v496_v16 = vld [vmem:[%s2726_s3 + $0x1b0] sm:$0xff]  ;;  %v497_v5 = vld [vmem:[%s2726_s3 + $0x1b8] sm:$0xff] }
 0x136   : > { %1821 = vrsqrt.f32 %v348_v17  ;;  %v493_v17 = vld [vmem:[%s2726_s3 + $0x198] sm:$0xff] }
 0x137   : > { %v349_v27 = vadd.f32 1e-05, %v341_v22  ;;  %v350_v28 = vadd.f32 1e-05, %v342_v8 }
 0x138   : > { %v331_v29 = vpop.xlane.xlu1 %330  ;;  %v334_v30 = vpop.xlane.xlu0 %333 }
 0x139   : > { %1823 = vrsqrt.f32 %v349_v27  ;;  %v343_v12 = vmul.f32 0.00390625, %v331_v29  ;;  %v344_v13 = vmul.f32 0.00390625, %v334_v30  ;;  %v2301_v29 = vld [vmem:[%s2726_s3 + $0x170] sm:$0xff] }
 0x13a   : > { %1825 = vrsqrt.f32 %v350_v28  ;;  %v2296_v28 = vld [vmem:[%s2726_s3 + $0x150] sm:$0xff] }
 0x13b   : > { %v351_v15 = vadd.f32 1e-05, %v343_v12  ;;  %v352_v19 = vadd.f32 1e-05, %v344_v13  ;;  %v1730_v12 = vcombine.high %v492_v10, %v496_v16  ;;  %v1732_v13 = vcombine.high %v493_v17, %v497_v5 }
 0x13c   : > { %v337_v37 = vpop.xlane.xlu1 %336  ;;  %v1722_v20 = vcombine.high %v2296_v28, %v2301_v29 }
 0x13d   : > { %1827 = vrsqrt.f32 %v351_v15  ;;  %v345_v38 = vmul.f32 0.00390625, %v337_v37 }
 0x13e   : > { %v1818_v18 = vpop.eup %1817 }
 0x13f   : > { %v353_v40 = vadd.f32 1e-05, %v345_v38  ;;  %v363_v41 = vmul.f32 %v1818_v18, %v2045_v53  ;;  %v362_v42 = vmul.f32 %v1818_v18, %v2042_v52  ;;  %v485_v38 = vld [vmem:[%s2726_s3 + $0x158] sm:$0xff] }
 0x141   : > { %1829 = vrsqrt.f32 %v353_v40  ;;  %v391_v45 = vmul.f32 %v2245_v39, %v363_v41  ;;  %v390_v46 = vmul.f32 %v2251_v21, %v362_v42 }
 0x142   : > { %v1820_v44 = vpop.eup %1819  ;;  %1831 = vrsqrt.f32 %v352_v19  ;;  %v1731_v19 = vcombine.low %v493_v17, %v497_v5 }
 0x143   : > { %v1822_v51 = vpop.eup %1821  ;;  %v365_v59 = vmul.f32 %v1820_v44, %v2065_v4  ;;  %v364_v53 = vmul.f32 %v1820_v44, %v2062_v61  ;;  %v419_v2 = vadd.f32 %v2256_v43, %v391_v45  ;;  %v418_v62 = vadd.f32 %v2261_v47, %v390_v46 }
 0x144   : > { %v367_v52 = vmul.f32 %v1822_v51, %v2051_v55  ;;  %v366_v22 = vmul.f32 %v1822_v51, %v2048_v54  ;;  %v1729_v54 = vcombine.low %v492_v10, %v496_v16 }
 0x145   : > { %v393_v60 = vmul.f32 %v2245_v39, %v365_v59  ;;  %v392_v0 = vmul.f32 %v2251_v21, %v364_v53 }
 0x146   : > { %v1824_v1 = vpop.eup %1823  ;;  %v395_v7 = vmul.f32 %v2245_v39, %v367_v52  ;;  %v394_v40 = vmul.f32 %v2251_v21, %v366_v22  ;;  %v1721_v52 = vcombine.low %v2296_v28, %v2301_v29  ;;  %v460_v29 = vld [vmem:[%s2726_s3 + $0x90] sm:$0xff] }
 0x147   : > { %v1826_v4 = vpop.eup %1825  ;;  %v421_v61 = vadd.f32 %v2256_v43, %v393_v60  ;;  %v420_v55 = vadd.f32 %v2261_v47, %v392_v0  ;;  %v369_v11 = vmul.f32 %v1824_v1, %v2071_v3  ;;  %v368_v6 = vmul.f32 %v1824_v1, %v2068_v63  ;;  %v468_v1 = vld [vmem:[%s2726_s3 + $0xd0] sm:$0xff] }
 0x148   : > { %v371_v63 = vmul.f32 %v1826_v4, %v2085_v23  ;;  %v423_v34 = vadd.f32 %v2256_v43, %v395_v7  ;;  %v489_v23 = vld [vmem:[%s2726_s3 + $0x178] sm:$0xff]  ;;  %v422_v50 = vadd.f32 %v2261_v47, %v394_v40  ;;  %v370_v59 = vmul.f32 %v1826_v4, %v2082_v9  ;;  %v472_v9 = vld [vmem:[%s2726_s3 + $0xf0] sm:$0xff] }
 0x149   : > { %v2288_v8 = vpack.c.bf16 %v421_v61, %v419_v2  ;;  %v2290_v27 = vpack.c.bf16 %v420_v55, %v418_v62  ;;  %v397_v3 = vmul.f32 %v2245_v39, %v369_v11  ;;  %v396_v15 = vmul.f32 %v2251_v21, %v368_v6  ;;  %v473_v62 = vld [vmem:[%s2726_s3 + $0xf8] sm:$0xff] }
 0x14a   : > { %v1828_v30 = vpop.eup %1827  ;;  %v1724_v45 = vcombine.high %v485_v38, %v489_v23  ;;  %v1723_v60 = vcombine.low %v485_v38, %v489_v23  ;;  %v398_v16 = vmul.f32 %v2251_v21, %v370_v59  ;;  %v1706_v6 = vcombine.high %v468_v1, %v472_v9  ;;  %v452_v38 = vld [vmem:[%s2726_s3 + $0x50] sm:$0xff] }
 0x14b   : > { %1284 = vmatprep.mubr.bf16.mxu0 %v2288_v8  ;;  %1357 = vmatprep.mubr.bf16.mxu1 %v2288_v8  ;;  %v425_v37 = vadd.f32 %v2256_v43, %v397_v3  ;;  %v373_v18 = vmul.f32 %v1828_v30, %v2091_v26  ;;  %v399_v26 = vmul.f32 %v2245_v39, %v371_v63 }
 0x14c   : > { %1285 = vmatmul.mubr.bf16.vlgmr.msra.gmra.mxu0 %v2290_v27  ;;  %1358 = vmatmul.mubr.bf16.vlgmr.msra.gmra.mxu1 %v2290_v27  ;;  %v424_v46 = vadd.f32 %v2261_v47, %v396_v15  ;;  %v372_v51 = vmul.f32 %v1828_v30, %v2088_v25  ;;  %v477_v25 = vld [vmem:[%s2726_s3 + $0x118] sm:$0xff]  ;;  %v426_v63 = vadd.f32 %v2261_v47, %v398_v16 }
 0x14d   : > { %1399 = vmatpush1.bf16.msra.mxu0 %v1737_v57  ;;  %1472 = vmatpush1.bf16.msra.mxu1 %v1739_v58  ;;  %v2327_v41 = vpack.c.bf16 %v425_v37, %v423_v34  ;;  %v401_v42 = vmul.f32 %v2245_v39, %v373_v18  ;;  %v480_v57 = vld [vmem:[%s2726_s3 + $0x130] sm:$0xff]  ;;  %v481_v58 = vld [vmem:[%s2726_s3 + $0x138] sm:$0xff]  ;;  %v427_v0 = vadd.f32 %v2256_v43, %v399_v26 }
 0x14e   : > { %v1830_v44 = vpop.eup %1829  ;;  %1400 = vmatprep.subr.bf16.mxu0 %v1730_v12  ;;  %1473 = vmatprep.subr.bf16.mxu1 %v1732_v13  ;;  %v2357_v2 = vpack.c.bf16 %v424_v46, %v422_v50  ;;  %v400_v7 = vmul.f32 %v2251_v21, %v372_v51  ;;  %v1713_v4 = vcombine.low %v476_v49, %v480_v57  ;;  %v445_v50 = vld [vmem:[%s2726_s3 + $0x18] sm:$0xff] }
 0x14f   : > { %v1832_v48 = vpop.eup %1831  ;;  %1294 = vmatprep.mubr.bf16.mxu0 %v2327_v41  ;;  %1367 = vmatprep.mubr.bf16.mxu1 %v2327_v41  ;;  %v429_v56 = vadd.f32 %v2256_v43, %v401_v42  ;;  %v377_v53 = vmul.f32 %v1830_v44, %v2111_v36  ;;  %v469_v36 = vld [vmem:[%s2726_s3 + $0xd8] sm:$0xff]  ;;  %v1714_v61 = vcombine.high %v476_v49, %v480_v57  ;;  %v448_v49 = vld [vmem:[%s2726_s3 + $0x30] sm:$0xff] }
 0x150   : > { %v375_v10 = vmul.f32 %v1832_v48, %v2105_v33  ;;  %v1716_v55 = vcombine.high %v477_v25, %v481_v58  ;;  %v1715_v5 = vcombine.low %v477_v25, %v481_v58  ;;  %v1708_v22 = vcombine.high %v469_v36, %v473_v62 }
 0x151   : > { %1401 = vmatpush1.bf16.msra.mxu0 %v1729_v54  ;;  %1474 = vmatpush1.bf16.msra.mxu1 %v1731_v19  ;;  %v2372_v11 = vpack.c.bf16 %v429_v56, %v427_v0  ;;  %v405_v17 = vmul.f32 %v2245_v39, %v377_v53  ;;  %v428_v33 = vadd.f32 %v2261_v47, %v400_v7  ;;  %v464_v54 = vld [vmem:[%s2726_s3 + $0xb0] sm:$0xff]  ;;  %v449_v56 = vld [vmem:[%s2726_s3 + $0x38] sm:$0xff] }
 0x152   : > { %1402 = vmatprep.subr.bf16.mxu0 %v1722_v20  ;;  %1475 = vmatprep.subr.bf16.mxu1 %v1724_v45  ;;  %v403_v3 = vmul.f32 %v2245_v39, %v375_v10  ;;  %v376_v28 = vmul.f32 %v1830_v44, %v2108_v35  ;;  %v461_v39 = vld [vmem:[%s2726_s3 + $0x98] sm:$0xff]  ;;  %v374_v12 = vmul.f32 %v1832_v48, %v2102_v32  ;;  %v456_v32 = vld [vmem:[%s2726_s3 + $0x70] sm:$0xff] }
 0x153   : > { %v433_v30 = vadd.f32 %v2256_v43, %v405_v17  ;;  %v465_v35 = vld [vmem:[%s2726_s3 + $0xb8] sm:$0xff]  ;;  %v1705_v13 = vcombine.low %v468_v1, %v472_v9  ;;  %v1707_v15 = vcombine.low %v469_v36, %v473_v62  ;;  %v2396_v34 = vpack.c.bf16 %v428_v33, %v426_v63  ;;  %v444_v48 = vld [vmem:[%s2726_s3 + $0x10] sm:$0xff] }
 0x154   : > { %1295 = vmatmul.mubr.bf16.gmra.mxu0 %v2357_v2  ;;  %1368 = vmatmul.mubr.bf16.gmra.mxu1 %v2357_v2  ;;  %v431_v37 = vadd.f32 %v2256_v43, %v403_v3  ;;  %v404_v23 = vmul.f32 %v2251_v21, %v376_v28  ;;  %v1698_v18 = vcombine.high %v460_v29, %v464_v54  ;;  %v453_v20 = vld [vmem:[%s2726_s3 + $0x58] sm:$0xff]  ;;  %v556_v7 = vld [vmem:[%s2726_s3 + $0x390] sm:$0xff] }
 0x155   : > { %1403 = vmatpush1.bf16.msra.mxu0 %v1721_v52  ;;  %1476 = vmatpush1.bf16.msra.mxu1 %v1723_v60  ;;  %v1700_v19 = vcombine.high %v461_v39, %v465_v35  ;;  %v457_v43 = vld [vmem:[%s2726_s3 + $0x78] sm:$0xff]  ;;  %v402_v26 = vmul.f32 %v2251_v21, %v374_v12  ;;  %v1697_v42 = vcombine.low %v460_v29, %v464_v54  ;;  %v568_v52 = vld [vmem:[%s2726_s3 + $0x3f0] sm:$0xff] }
 0x156   : > { %1304 = vmatprep.mubr.bf16.mxu0 %v2372_v11  ;;  %1377 = vmatprep.mubr.bf16.mxu1 %v2372_v11  ;;  %v2414_v40 = vpack.c.bf16 %v433_v30, %v431_v37  ;;  %v1699_v44 = vcombine.low %v461_v39, %v465_v35  ;;  %v1690_v45 = vcombine.high %v452_v38, %v456_v32  ;;  %v565_v60 = vld [vmem:[%s2726_s3 + $0x3d8] sm:$0xff]  ;;  %v560_v10 = vld [vmem:[%s2726_s3 + $0x3b0] sm:$0xff] }
 0x157   : > { %1404 = vmatprep.subr.bf16.mxu0 %v1714_v61  ;;  %1477 = vmatprep.subr.bf16.mxu1 %v1716_v55  ;;  %v1692_v46 = vcombine.high %v453_v20, %v457_v43  ;;  %v432_v51 = vadd.f32 %v2261_v47, %v404_v23  ;;  %v430_v21 = vadd.f32 %v2261_v47, %v402_v26  ;;  %v564_v47 = vld [vmem:[%s2726_s3 + $0x3d0] sm:$0xff]  ;;  %v569_v0 = vld [vmem:[%s2726_s3 + $0x3f8] sm:$0xff] }
 0x158   : > { %v1689_v57 = vcombine.low %v452_v38, %v456_v32  ;;  %v1691_v25 = vcombine.low %v453_v20, %v457_v43  ;;  %v1682_v59 = vcombine.high %v444_v48, %v448_v49  ;;  %v1684_v53 = vcombine.high %v445_v50, %v449_v56  ;;  %v553_v33 = vld [vmem:[%s2726_s3 + $0x378] sm:$0xff]  ;;  %v540_v30 = vld [vmem:[%s2726_s3 + $0x310] sm:$0xff] }
 0x159   : > { %1405 = vmatpush1.bf16.msra.mxu0 %v1713_v4  ;;  %1478 = vmatpush1.bf16.msra.mxu1 %v1715_v5  ;;  %v2433_v58 = vpack.c.bf16 %v432_v51, %v430_v21  ;;  %v1681_v1 = vcombine.low %v444_v48, %v448_v49  ;;  %v1683_v9 = vcombine.low %v445_v50, %v449_v56  ;;  %v557_v4 = vld [vmem:[%s2726_s3 + $0x398] sm:$0xff]  ;;  %v548_v5 = vld [vmem:[%s2726_s3 + $0x350] sm:$0xff] }
 0x15a   : > { %1406 = vmatprep.subr.bf16.mxu0 %v1706_v6  ;;  %1479 = vmatprep.subr.bf16.mxu1 %v1708_v22  ;;  %v1802_v36 = vcombine.high %v564_v47, %v568_v52  ;;  %v1804_v62 = vcombine.high %v565_v60, %v569_v0  ;;  %v1801_v61 = vcombine.low %v564_v47, %v568_v52  ;;  %v552_v6 = vld [vmem:[%s2726_s3 + $0x370] sm:$0xff]  ;;  %v549_v22 = vld [vmem:[%s2726_s3 + $0x358] sm:$0xff] }
 0x15b   : > { %v1803_v55 = vcombine.low %v565_v60, %v569_v0  ;;  %v1794_v16 = vcombine.high %v556_v7, %v560_v10  ;;  %v1793_v3 = vcombine.low %v556_v7, %v560_v10  ;;  %v1786_v29 = vcombine.high %v548_v5, %v552_v6  ;;  %v544_v54 = vld [vmem:[%s2726_s3 + $0x330] sm:$0xff]  ;;  %v541_v39 = vld [vmem:[%s2726_s3 + $0x318] sm:$0xff] }
 0x15c   : > { %1305 = vmatmul.mubr.bf16.gmra.mxu0 %v2396_v34  ;;  %1378 = vmatmul.mubr.bf16.gmra.mxu1 %v2396_v34  ;;  %v1788_v63 = vcombine.high %v549_v22, %v553_v33  ;;  %v545_v35 = vld [vmem:[%s2726_s3 + $0x338] sm:$0xff]  ;;  %v1785_v12 = vcombine.low %v548_v5, %v552_v6  ;;  %v532_v38 = vld [vmem:[%s2726_s3 + $0x2d0] sm:$0xff]  ;;  %v1777_v32 = vcombine.low %v540_v30, %v544_v54 }
 0x15d   : > { %1407 = vmatpush1.bf16.msra.mxu0 %v1705_v13  ;;  %1480 = vmatpush1.bf16.msra.mxu1 %v1707_v15  ;;  %v1787_v13 = vcombine.low %v549_v22, %v553_v33  ;;  %v1778_v15 = vcombine.high %v540_v30, %v544_v54  ;;  %v1780_v37 = vcombine.high %v541_v39, %v545_v35  ;;  %v536_v23 = vld [vmem:[%s2726_s3 + $0x2f0] sm:$0xff] }
 0x15e   : > { %1314 = vmatprep.mubr.bf16.mxu0 %v2414_v40  ;;  %1387 = vmatprep.mubr.bf16.mxu1 %v2414_v40  ;;  %v1779_v20 = vcombine.low %v541_v39, %v545_v35  ;;  %v1770_v43 = vcombine.high %v532_v38, %v536_v23  ;;  %v1769_v51 = vcombine.low %v532_v38, %v536_v23  ;;  %v516_v50 = vld [vmem:[%s2726_s3 + $0x250] sm:$0xff] }
 0x15f   : > { %1408 = vmatprep.subr.bf16.mxu0 %v1698_v18  ;;  %1481 = vmatprep.subr.bf16.mxu1 %v1700_v19  ;;  %v533_v18 = vld [vmem:[%s2726_s3 + $0x2d8] sm:$0xff]  ;;  %v520_v56 = vld [vmem:[%s2726_s3 + $0x270] sm:$0xff] }
 0x160   : > { %v537_v19 = vld [vmem:[%s2726_s3 + $0x2f8] sm:$0xff]  ;;  %v508_v60 = vld [vmem:[%s2726_s3 + $0x210] sm:$0xff] }
 0x161   : > { %1409 = vmatpush1.bf16.msra.mxu0 %v1697_v42  ;;  %1482 = vmatpush1.bf16.msra.mxu1 %v1699_v44  ;;  %v1772_v26 = vcombine.high %v533_v18, %v537_v19  ;;  %v524_v42 = vld [vmem:[%s2726_s3 + $0x290] sm:$0xff]  ;;  %v1771_v48 = vcombine.low %v533_v18, %v537_v19 }
 0x162   : > { %1410 = vmatprep.subr.bf16.mxu0 %v1690_v45  ;;  %1483 = vmatprep.subr.bf16.mxu1 %v1692_v46  ;;  %v528_v44 = vld [vmem:[%s2726_s3 + $0x2b0] sm:$0xff]  ;;  %v525_v45 = vld [vmem:[%s2726_s3 + $0x298] sm:$0xff] }
 0x163   : > { %v529_v46 = vld [vmem:[%s2726_s3 + $0x2b8] sm:$0xff]  ;;  %v1762_v21 = vcombine.high %v524_v42, %v528_v44  ;;  %v1761_v47 = vcombine.low %v524_v42, %v528_v44  ;;  %v512_v0 = vld [vmem:[%s2726_s3 + $0x230] sm:$0xff] }
 0x164   : > { %1315 = vmatmul.mubr.bf16.gmra.mxu0 %v2433_v58  ;;  %1388 = vmatmul.mubr.bf16.gmra.mxu1 %v2433_v58  ;;  %v1764_v49 = vcombine.high %v525_v45, %v529_v46  ;;  %v1746_v7 = vcombine.high %v508_v60, %v512_v0 }
 0x165   : > { %1411 = vmatpush1.bf16.msra.mxu0 %v1689_v57  ;;  %1484 = vmatpush1.bf16.msra.mxu1 %v1691_v25  ;;  %v517_v57 = vld [vmem:[%s2726_s3 + $0x258] sm:$0xff] }
 0x166   : > { %1430 = vmatprep.mubr.bf16.mxu0 %v2288_v8  ;;  %1503 = vmatprep.mubr.bf16.mxu1 %v2288_v8  ;;  %v561_v8 = vld [vmem:[%s2726_s3 + $0x3b8] sm:$0xff] }
 0x167   : > { %1412 = vmatprep.subr.bf16.mxu0 %v1682_v59  ;;  %1485 = vmatprep.subr.bf16.mxu1 %v1684_v53  ;;  %v1796_v17 = vcombine.high %v557_v4, %v561_v8  ;;  %v1795_v28 = vcombine.low %v557_v4, %v561_v8  ;;  %v521_v25 = vld [vmem:[%s2726_s3 + $0x278] sm:$0xff]  ;;  %v1763_v59 = vcombine.low %v525_v45, %v529_v46 }
 0x168   : > { %v1754_v53 = vcombine.high %v516_v50, %v520_v56  ;;  %v1756_v52 = vcombine.high %v517_v57, %v521_v25  ;;  %v1745_v4 = vcombine.low %v508_v60, %v512_v0 }
 0x169   : > { %1413 = vmatpush1.bf16.msra.mxu0 %v1681_v1  ;;  %1486 = vmatpush1.bf16.msra.mxu1 %v1683_v9  ;;  %v509_v1 = vld [vmem:[%s2726_s3 + $0x218] sm:$0xff] }
 0x16a   : > { %1414 = vmatprep.subr.bf16.mxu0 %v1802_v36  ;;  %1487 = vmatprep.subr.bf16.mxu1 %v1804_v62  ;;  %v513_v9 = vld [vmem:[%s2726_s3 + $0x238] sm:$0xff]  ;;  %v1753_v36 = vcombine.low %v516_v50, %v520_v56  ;;  %v1755_v62 = vcombine.low %v517_v57, %v521_v25 }
 0x16b   : > { %v1748_v10 = vcombine.high %v509_v1, %v513_v9  ;;  %v1747_v8 = vcombine.low %v509_v1, %v513_v9 }
 0x16d   : > { %1415 = vmatpush2.bf16.msra.mxu0 %v1801_v61  ;;  %1488 = vmatpush2.bf16.msra.mxu1 %v1803_v55 }
 0x16e   : > { %1416 = vmatprep.subr.bf16.mxu0 %v1794_v16  ;;  %1489 = vmatprep.subr.bf16.mxu1 %v1796_v17 }
 0x171   : > { %1417 = vmatpush2.bf16.msra.mxu0 %v1793_v3  ;;  %1490 = vmatpush2.bf16.msra.mxu1 %v1795_v28 }
 0x172   : > { %1418 = vmatprep.subr.bf16.mxu0 %v1786_v29  ;;  %1491 = vmatprep.subr.bf16.mxu1 %v1788_v63 }
 0x175   : > { %1419 = vmatpush2.bf16.msra.mxu0 %v1785_v12  ;;  %1492 = vmatpush2.bf16.msra.mxu1 %v1787_v13 }
 0x176   : > { %1420 = vmatprep.subr.bf16.mxu0 %v1778_v15  ;;  %1493 = vmatprep.subr.bf16.mxu1 %v1780_v37 }
 0x179   : > { %1421 = vmatpush2.bf16.msra.mxu0 %v1777_v32  ;;  %1494 = vmatpush2.bf16.msra.mxu1 %v1779_v20 }
 0x17a   : > { %1422 = vmatprep.subr.bf16.mxu0 %v1770_v43  ;;  %1495 = vmatprep.subr.bf16.mxu1 %v1772_v26 }
 0x17d   : > { %1423 = vmatpush2.bf16.msra.mxu0 %v1769_v51  ;;  %1496 = vmatpush2.bf16.msra.mxu1 %v1771_v48 }
 0x17e   : > { %1424 = vmatprep.subr.bf16.mxu0 %v1762_v21  ;;  %1497 = vmatprep.subr.bf16.mxu1 %v1764_v49 }
 0x181   : > { %1425 = vmatpush2.bf16.msra.mxu0 %v1761_v47  ;;  %1498 = vmatpush2.bf16.msra.mxu1 %v1763_v59 }
 0x182   : > { %1426 = vmatprep.subr.bf16.mxu0 %v1754_v53  ;;  %1499 = vmatprep.subr.bf16.mxu1 %v1756_v52 }
 0x185   : > { %1427 = vmatpush2.bf16.msra.mxu0 %v1753_v36  ;;  %1500 = vmatpush2.bf16.msra.mxu1 %v1755_v62 }
 0x186   : > { %1428 = vmatprep.subr.bf16.mxu0 %v1746_v7  ;;  %1501 = vmatprep.subr.bf16.mxu1 %v1748_v10 }
 0x189   : > { %1429 = vmatpush2.bf16.msra.mxu0 %v1745_v4  ;;  %1502 = vmatpush2.bf16.msra.mxu1 %v1747_v8 }
 0x18c   : > { %1431 = vmatmul.mubr.bf16.vlgmr.msra.gmra.mxu0 %v2290_v27  ;;  %1504 = vmatmul.mubr.bf16.vlgmr.msra.gmra.mxu1 %v2290_v27  ;;  %v582_v27 = vsub.s32 2, %v2233_v24 }
 0x18d   : > { %1440 = vmatprep.mubr.bf16.mxu0 %v2327_v41  ;;  %1513 = vmatprep.mubr.bf16.mxu1 %v2327_v41  ;;  %v2553_v41 = vld [vmem:[%s2727_s4] sm:$0xff] }
 0x194   : > { %1441 = vmatmul.mubr.bf16.gmra.mxu0 %v2357_v2  ;;  %1514 = vmatmul.mubr.bf16.gmra.mxu1 %v2357_v2  ;;  %v586_v2 = vsub.s32 3, %v2233_v24 }
 0x195   : > { %1450 = vmatprep.mubr.bf16.mxu0 %v2372_v11  ;;  %1523 = vmatprep.mubr.bf16.mxu1 %v2372_v11  ;;  %v2559_v11 = vrot.slane %v2553_v41, %v2239_v14 }
 0x19c   : > { %1451 = vmatmul.mubr.bf16.gmra.mxu0 %v2396_v34  ;;  %1524 = vmatmul.mubr.bf16.gmra.mxu1 %v2396_v34  ;;  %v2562_v34 = vrot.slane %v2553_v41, %v582_v27 }
 0x19d   : > { %1460 = vmatprep.mubr.bf16.mxu0 %v2414_v40  ;;  %1533 = vmatprep.mubr.bf16.mxu1 %v2414_v40  ;;  %v2566_v40 = vrot.slane %v2553_v41, %v2236_v31 }
 0x1a4   : > { %1461 = vmatmul.mubr.bf16.gmra.mxu0 %v2433_v58  ;;  %1534 = vmatmul.mubr.bf16.gmra.mxu1 %v2433_v58  ;;  %v2569_v58 = vrot.slane %v2553_v41, %v586_v2 }
 0x20c   : > { %v1286_v14 = vpop.f32.mrf.mxu0  ;;  %v1359_v61 = vpop.f32.mrf.mxu1 }
 0x20d   : > { %v1287_v55 = vadd.f32 %v1286_v14, %v2559_v11  ;;  %v1360_v31 = vadd.f32 %v1359_v61, %v2562_v34 }
 0x20e   : > { %v1288_v16 = vpop.f32.mrf.mxu0  ;;  %v1361_v17 = vpop.f32.mrf.mxu1 }
 0x20f   : > { %1544 = vst [vmem:[%s2574_s12] sm:$0xff] %v1287_v55  ;;  %1546 = vst [vmem:[%s2574_s12 + $0x10] sm:$0xff] %v1360_v31  ;;  %v1289_v5 = vadd.f32 %v1288_v16, %v2566_v40  ;;  %v1362_v6 = vadd.f32 %v1361_v17, %v2569_v58 }
 0x210   : > { %v1290_v22 = vpop.f32.mrf.mxu0  ;;  %v1363_v33 = vpop.f32.mrf.mxu1 }
 0x211   : > { %1545 = vst [vmem:[%s2574_s12 + $0x8] sm:$0xff] %v1289_v5  ;;  %1547 = vst [vmem:[%s2574_s12 + $0x18] sm:$0xff] %v1362_v6  ;;  %v1291_v3 = vadd.f32 %v1290_v22, %v2559_v11  ;;  %v1364_v28 = vadd.f32 %v1363_v33, %v2562_v34  ;;  %v590_v5 = vsub.s32 4, %v2233_v24  ;;  %v598_v6 = vsub.s32 6, %v2233_v24 }
 0x212   : > { %v1292_v29 = vpop.f32.mrf.mxu0  ;;  %v1365_v63 = vpop.f32.mrf.mxu1 }
 0x213   : > { %1552 = vst [vmem:[%s2574_s12 + $0x40] sm:$0xff] %v1291_v3  ;;  %1554 = vst [vmem:[%s2574_s12 + $0x50] sm:$0xff] %v1364_v28  ;;  %v1293_v30 = vadd.f32 %v1292_v29, %v2566_v40  ;;  %v1366_v54 = vadd.f32 %v1365_v63, %v2569_v58  ;;  %v2645_v22 = vrot.slane %v2553_v41, %v590_v5 }
 0x214   : > { %v1296_v39 = vpop.f32.mrf.mxu0  ;;  %v1369_v35 = vpop.f32.mrf.mxu1 }
 0x215   : > { %1553 = vst [vmem:[%s2574_s12 + $0x48] sm:$0xff] %v1293_v30  ;;  %1555 = vst [vmem:[%s2574_s12 + $0x58] sm:$0xff] %v1366_v54  ;;  %v1297_v12 = vadd.f32 %v1296_v39, %v2559_v11  ;;  %v1370_v13 = vadd.f32 %v1369_v35, %v2562_v34 }
 0x216   : > { %v1298_v15 = vpop.f32.mrf.mxu0  ;;  %v1371_v37 = vpop.f32.mrf.mxu1 }
 0x217   : > { %1560 = vst [vmem:[%s2574_s12 + $0x80] sm:$0xff] %v1297_v12  ;;  %1562 = vst [vmem:[%s2574_s12 + $0x90] sm:$0xff] %v1370_v13  ;;  %v1299_v38 = vadd.f32 %v1298_v15, %v2566_v40  ;;  %v1372_v23 = vadd.f32 %v1371_v37, %v2569_v58 }
 0x218   : > { %v1300_v18 = vpop.f32.mrf.mxu0  ;;  %v1373_v19 = vpop.f32.mrf.mxu1 }
 0x219   : > { %1561 = vst [vmem:[%s2574_s12 + $0x88] sm:$0xff] %v1299_v38  ;;  %1563 = vst [vmem:[%s2574_s12 + $0x98] sm:$0xff] %v1372_v23  ;;  %v1301_v32 = vadd.f32 %v1300_v18, %v2559_v11  ;;  %v1374_v20 = vadd.f32 %v1373_v19, %v2562_v34 }
 0x21a   : > { %v1302_v43 = vpop.f32.mrf.mxu0  ;;  %v1375_v26 = vpop.f32.mrf.mxu1 }
 0x21b   : > { %1568 = vst [vmem:[%s2574_s12 + $0xc0] sm:$0xff] %v1301_v32  ;;  %1570 = vst [vmem:[%s2574_s12 + $0xd0] sm:$0xff] %v1374_v20  ;;  %v1303_v42 = vadd.f32 %v1302_v43, %v2566_v40  ;;  %v1376_v44 = vadd.f32 %v1375_v26, %v2569_v58 }
 0x21c   : > { %v1306_v45 = vpop.f32.mrf.mxu0  ;;  %v1379_v46 = vpop.f32.mrf.mxu1 }
 0x21d   : > { %1569 = vst [vmem:[%s2574_s12 + $0xc8] sm:$0xff] %v1303_v42  ;;  %1571 = vst [vmem:[%s2574_s12 + $0xd8] sm:$0xff] %v1376_v44  ;;  %v1307_v51 = vadd.f32 %v1306_v45, %v2559_v11  ;;  %v1380_v48 = vadd.f32 %v1379_v46, %v2562_v34 }
 0x21e   : > { %v1308_v21 = vpop.f32.mrf.mxu0  ;;  %v1381_v49 = vpop.f32.mrf.mxu1 }
 0x21f   : > { %1576 = vst [vmem:[%s2574_s12 + $0x100] sm:$0xff] %v1307_v51  ;;  %1578 = vst [vmem:[%s2574_s12 + $0x110] sm:$0xff] %v1380_v48  ;;  %v1309_v50 = vadd.f32 %v1308_v21, %v2566_v40  ;;  %v1382_v56 = vadd.f32 %v1381_v49, %v2569_v58 }
 0x220   : > { %v1310_v57 = vpop.f32.mrf.mxu0  ;;  %v1383_v25 = vpop.f32.mrf.mxu1 }
 0x221   : > { %1577 = vst [vmem:[%s2574_s12 + $0x108] sm:$0xff] %v1309_v50  ;;  %1579 = vst [vmem:[%s2574_s12 + $0x118] sm:$0xff] %v1382_v56  ;;  %v1311_v47 = vadd.f32 %v1310_v57, %v2559_v11  ;;  %v1384_v59 = vadd.f32 %v1383_v25, %v2562_v34 }
 0x222   : > { %v1312_v53 = vpop.f32.mrf.mxu0  ;;  %v1385_v52 = vpop.f32.mrf.mxu1 }
 0x223   : > { %1584 = vst [vmem:[%s2574_s12 + $0x140] sm:$0xff] %v1311_v47  ;;  %1586 = vst [vmem:[%s2574_s12 + $0x150] sm:$0xff] %v1384_v59  ;;  %v1313_v60 = vadd.f32 %v1312_v53, %v2566_v40  ;;  %v1386_v0 = vadd.f32 %v1385_v52, %v2569_v58 }
 0x224   : > { %v1316_v1 = vpop.f32.mrf.mxu0  ;;  %v1389_v9 = vpop.f32.mrf.mxu1 }
 0x225   : > { %1585 = vst [vmem:[%s2574_s12 + $0x148] sm:$0xff] %v1313_v60  ;;  %1587 = vst [vmem:[%s2574_s12 + $0x158] sm:$0xff] %v1386_v0  ;;  %v1317_v36 = vadd.f32 %v1316_v1, %v2559_v11  ;;  %v1390_v62 = vadd.f32 %v1389_v9, %v2562_v34 }
 0x226   : > { %v1318_v7 = vpop.f32.mrf.mxu0  ;;  %v1391_v10 = vpop.f32.mrf.mxu1 }
 0x227   : > { %1592 = vst [vmem:[%s2574_s12 + $0x180] sm:$0xff] %v1317_v36  ;;  %1594 = vst [vmem:[%s2574_s12 + $0x190] sm:$0xff] %v1390_v62  ;;  %v1319_v4 = vadd.f32 %v1318_v7, %v2566_v40  ;;  %v1392_v8 = vadd.f32 %v1391_v10, %v2569_v58 }
 0x228   : > { %v1320_v27 = vpop.f32.mrf.mxu0  ;;  %v1393_v2 = vpop.f32.mrf.mxu1 }
 0x229   : > { %1593 = vst [vmem:[%s2574_s12 + $0x188] sm:$0xff] %v1319_v4  ;;  %1595 = vst [vmem:[%s2574_s12 + $0x198] sm:$0xff] %v1392_v8  ;;  %v1321_v14 = vadd.f32 %v1320_v27, %v2559_v11  ;;  %v1394_v61 = vadd.f32 %v1393_v2, %v2562_v34  ;;  %v594_v11 = vsub.s32 5, %v2233_v24  ;;  %v602_v34 = vsub.s32 7, %v2233_v24 }
 0x22a   : > { %v1322_v55 = vpop.f32.mrf.mxu0  ;;  %v1395_v31 = vpop.f32.mrf.mxu1 }
 0x22b   : > { %1600 = vst [vmem:[%s2574_s12 + $0x1c0] sm:$0xff] %v1321_v14  ;;  %1602 = vst [vmem:[%s2574_s12 + $0x1d0] sm:$0xff] %v1394_v61  ;;  %v1323_v16 = vadd.f32 %v1322_v55, %v2566_v40  ;;  %v1396_v17 = vadd.f32 %v1395_v31, %v2569_v58  ;;  %v2648_v40 = vrot.slane %v2553_v41, %v598_v6 }
 0x22c   : > { %v2651_v58 = vrot.slane %v2553_v41, %v594_v11  ;;  %v2654_v33 = vrot.slane %v2553_v41, %v602_v34 }
 0x22d   : > { %1601 = vst [vmem:[%s2574_s12 + $0x1c8] sm:$0xff] %v1323_v16  ;;  %1603 = vst [vmem:[%s2574_s12 + $0x1d8] sm:$0xff] %v1396_v17 }
 0x24c   : > { %v1432_v3 = vpop.f32.mrf.mxu0  ;;  %v1505_v28 = vpop.f32.mrf.mxu1 }
 0x24d   : > { %v1433_v29 = vadd.f32 %v1432_v3, %v2645_v22  ;;  %v1506_v24 = vadd.f32 %v1505_v28, %v2648_v40 }
 0x24e   : > { %v1434_v63 = vpop.f32.mrf.mxu0  ;;  %v1507_v30 = vpop.f32.mrf.mxu1 }
 0x24f   : > { %1548 = vst [vmem:[%s2574_s12 + $0x20] sm:$0xff] %v1433_v29  ;;  %1550 = vst [vmem:[%s2574_s12 + $0x30] sm:$0xff] %v1506_v24  ;;  %v1435_v54 = vadd.f32 %v1434_v63, %v2651_v58  ;;  %v1508_v39 = vadd.f32 %v1507_v30, %v2654_v33 }
 0x250   : > { %v1436_v41 = vpop.f32.mrf.mxu0  ;;  %v1509_v35 = vpop.f32.mrf.mxu1 }
 0x251   : > { %1549 = vst [vmem:[%s2574_s12 + $0x28] sm:$0xff] %v1435_v54  ;;  %1551 = vst [vmem:[%s2574_s12 + $0x38] sm:$0xff] %v1508_v39  ;;  %v1437_v12 = vadd.f32 %v1436_v41, %v2645_v22  ;;  %v1510_v13 = vadd.f32 %v1509_v35, %v2648_v40 }
 0x252   : > { %v1438_v15 = vpop.f32.mrf.mxu0  ;;  %v1511_v37 = vpop.f32.mrf.mxu1 }
 0x253   : > { %1556 = vst [vmem:[%s2574_s12 + $0x60] sm:$0xff] %v1437_v12  ;;  %1558 = vst [vmem:[%s2574_s12 + $0x70] sm:$0xff] %v1510_v13  ;;  %v1439_v38 = vadd.f32 %v1438_v15, %v2651_v58  ;;  %v1512_v23 = vadd.f32 %v1511_v37, %v2654_v33 }
 0x254   : > { %v1442_v18 = vpop.f32.mrf.mxu0  ;;  %v1515_v19 = vpop.f32.mrf.mxu1 }
 0x255   : > { %1557 = vst [vmem:[%s2574_s12 + $0x68] sm:$0xff] %v1439_v38  ;;  %1559 = vst [vmem:[%s2574_s12 + $0x78] sm:$0xff] %v1512_v23  ;;  %v1443_v32 = vadd.f32 %v1442_v18, %v2645_v22  ;;  %v1516_v20 = vadd.f32 %v1515_v19, %v2648_v40 }
 0x256   : > { %v1444_v43 = vpop.f32.mrf.mxu0  ;;  %v1517_v26 = vpop.f32.mrf.mxu1 }
 0x257   : > { %1564 = vst [vmem:[%s2574_s12 + $0xa0] sm:$0xff] %v1443_v32  ;;  %1566 = vst [vmem:[%s2574_s12 + $0xb0] sm:$0xff] %v1516_v20  ;;  %v1445_v42 = vadd.f32 %v1444_v43, %v2651_v58  ;;  %v1518_v44 = vadd.f32 %v1517_v26, %v2654_v33 }
 0x258   : > { %v1446_v45 = vpop.f32.mrf.mxu0  ;;  %v1519_v46 = vpop.f32.mrf.mxu1 }
 0x259   : > { %1565 = vst [vmem:[%s2574_s12 + $0xa8] sm:$0xff] %v1445_v42  ;;  %1567 = vst [vmem:[%s2574_s12 + $0xb8] sm:$0xff] %v1518_v44  ;;  %v1447_v51 = vadd.f32 %v1446_v45, %v2645_v22  ;;  %v1520_v48 = vadd.f32 %v1519_v46, %v2648_v40 }
 0x25a   : > { %v1448_v21 = vpop.f32.mrf.mxu0  ;;  %v1521_v49 = vpop.f32.mrf.mxu1 }
 0x25b   : > { %1572 = vst [vmem:[%s2574_s12 + $0xe0] sm:$0xff] %v1447_v51  ;;  %1574 = vst [vmem:[%s2574_s12 + $0xf0] sm:$0xff] %v1520_v48  ;;  %v1449_v50 = vadd.f32 %v1448_v21, %v2651_v58  ;;  %v1522_v56 = vadd.f32 %v1521_v49, %v2654_v33 }
 0x25c   : > { %v1452_v57 = vpop.f32.mrf.mxu0  ;;  %v1525_v25 = vpop.f32.mrf.mxu1 }
 0x25d   : > { %1573 = vst [vmem:[%s2574_s12 + $0xe8] sm:$0xff] %v1449_v50  ;;  %1575 = vst [vmem:[%s2574_s12 + $0xf8] sm:$0xff] %v1522_v56  ;;  %v1453_v47 = vadd.f32 %v1452_v57, %v2645_v22  ;;  %v1526_v59 = vadd.f32 %v1525_v25, %v2648_v40 }
 0x25e   : > { %v1454_v53 = vpop.f32.mrf.mxu0  ;;  %v1527_v52 = vpop.f32.mrf.mxu1 }
 0x25f   : > { %1580 = vst [vmem:[%s2574_s12 + $0x120] sm:$0xff] %v1453_v47  ;;  %1582 = vst [vmem:[%s2574_s12 + $0x130] sm:$0xff] %v1526_v59  ;;  %v1455_v60 = vadd.f32 %v1454_v53, %v2651_v58  ;;  %v1528_v0 = vadd.f32 %v1527_v52, %v2654_v33 }
 0x260   : > { %v1456_v1 = vpop.f32.mrf.mxu0  ;;  %v1529_v9 = vpop.f32.mrf.mxu1 }
 0x261   : > { %1581 = vst [vmem:[%s2574_s12 + $0x128] sm:$0xff] %v1455_v60  ;;  %1583 = vst [vmem:[%s2574_s12 + $0x138] sm:$0xff] %v1528_v0  ;;  %v1457_v36 = vadd.f32 %v1456_v1, %v2645_v22  ;;  %v1530_v62 = vadd.f32 %v1529_v9, %v2648_v40 }
 0x262   : > { %v1458_v7 = vpop.f32.mrf.mxu0  ;;  %v1531_v10 = vpop.f32.mrf.mxu1 }
 0x263   : > { %1588 = vst [vmem:[%s2574_s12 + $0x160] sm:$0xff] %v1457_v36  ;;  %1590 = vst [vmem:[%s2574_s12 + $0x170] sm:$0xff] %v1530_v62  ;;  %v1459_v4 = vadd.f32 %v1458_v7, %v2651_v58  ;;  %v1532_v8 = vadd.f32 %v1531_v10, %v2654_v33 }
 0x264   : > { %v1462_v27 = vpop.f32.mrf.mxu0  ;;  %v1535_v2 = vpop.f32.mrf.mxu1 }
 0x265   : > { %1589 = vst [vmem:[%s2574_s12 + $0x168] sm:$0xff] %v1459_v4  ;;  %1591 = vst [vmem:[%s2574_s12 + $0x178] sm:$0xff] %v1532_v8  ;;  %v1463_v14 = vadd.f32 %v1462_v27, %v2645_v22  ;;  %v1536_v61 = vadd.f32 %v1535_v2, %v2648_v40 }
 0x266   : > { %v1464_v55 = vpop.f32.mrf.mxu0  ;;  %v1537_v31 = vpop.f32.mrf.mxu1 }
 0x267   : > { %1596 = vst [vmem:[%s2574_s12 + $0x1a0] sm:$0xff] %v1463_v14  ;;  %1598 = vst [vmem:[%s2574_s12 + $0x1b0] sm:$0xff] %v1536_v61  ;;  %v1465_v16 = vadd.f32 %v1464_v55, %v2651_v58  ;;  %v1538_v17 = vadd.f32 %v1537_v31, %v2654_v33 }
 0x268   : > { %v1466_v5 = vpop.f32.mrf.mxu0  ;;  %v1539_v6 = vpop.f32.mrf.mxu1 }
 0x269   : > { %1597 = vst [vmem:[%s2574_s12 + $0x1a8] sm:$0xff] %v1465_v16  ;;  %1599 = vst [vmem:[%s2574_s12 + $0x1b8] sm:$0xff] %v1538_v17  ;;  %v1467_v11 = vadd.f32 %v1466_v5, %v2645_v22  ;;  %v1540_v34 = vadd.f32 %v1539_v6, %v2648_v40 }
 0x26a   : > { %v1468_v3 = vpop.f32.mrf.mxu0  ;;  %v1541_v28 = vpop.f32.mrf.mxu1 }
 0x26b   : > { %1604 = vst [vmem:[%s2574_s12 + $0x1e0] sm:$0xff] %v1467_v11  ;;  %1606 = vst [vmem:[%s2574_s12 + $0x1f0] sm:$0xff] %v1540_v34  ;;  %v1469_v29 = vadd.f32 %v1468_v3, %v2651_v58  ;;  %v1542_v24 = vadd.f32 %v1541_v28, %v2654_v33 }
 0x26d   : > { %1605 = vst [vmem:[%s2574_s12 + $0x1e8] sm:$0xff] %v1469_v29  ;;  %1607 = vst [vmem:[%s2574_s12 + $0x1f8] sm:$0xff] %v1542_v24 }
 0x26e PF: > { %s15_s18 = sadd.s32 1, %s1839_s18  }
 0x26f   : > { %p12_p4 = scmp.ge.s32.totalorder %s15_s18, 4  }
 0x271   :  { %14 = sbr.rel (!%p12_p4) target bundleno = 1 (0x1), region = 70 }

// kernel: foundation_lstm_forward.7
= control target key start
LH: loop header
LB: loop body
LE: loop exit
PB: predicated region body
PF: predicated region fallthrough
CT: control target
= control target key end

     0   :  { %s2985_s0 = inlined_call_operand.vmem [shape: f32[16,8,1024], index: 0, kind: input, shape index: {}]   ;;  %s2986_s1 = inlined_call_operand.vmem [shape: bf16[2,128,512], index: 1, kind: input, shape index: {}]   ;;  %s2987_s2 = inlined_call_operand.hbm [shape: f32[16,8,256], index: 2, kind: output, shape index: {0}]   ;;  %s2988_s3 = inlined_call_operand.vmem [shape: f32[8,256], index: 3, kind: output, shape index: {1}]  }
   0x1   :  { %2989 = sst [smem:[#allocation8_spill]] %s2985_s0 }
   0x2   :  { %2990 = sst [smem:[#allocation9_spill]] %s2986_s1 }
   0x3   :  { %9 = vsyncpa [#allocation6], 0 }
   0x4   :  { %11 = vsyncpa [#allocation6 + $0x1], 0  ;;  %s2270_s12 = smov 0   ;;  %s2272_s13 = smov 0  }
   0x5   :  { %s2274_s14 = smov 0   ;;  %s2276_s15 = smov 0  }
   0x6   :  { %s2278_s16 = smov 0   ;;  %s2280_s17 = smov 0  }
   0x7   :  { %s2282_s18 = smov 0   ;;  %s2284_s19 = smov 0  }
   0x8 LB: > { %s1748_s20 = sadd.s32 4294967295, %s2242_s19   ;;  %s26_s21 = sadd.s32 1, %s2234_s17  ;;  %s2242_s19 = sphi %s2284_s19, %s17_s19   ;;  %s2238_s18 = sphi %s2282_s18, %s3001_s18   ;;  %s2234_s17 = sphi %s2280_s17, %s3000_s17   ;;  %s2230_s16 = sphi %s2278_s16, %s2999_s16   ;;  %s2226_s15 = sphi %s2276_s15, %s2998_s15   ;;  %s2222_s14 = sphi %s2274_s14, %s2997_s14   ;;  %s2218_s13 = sphi %s2272_s13, %s2996_s13   ;;  %s2214_s12 = sphi %s2270_s12, %s2995_s12  }
   0x9   : > { %s29_s22 = sadd.s32 1, %s2238_s18  ;;  %p27_p0 = scmp.ge.s32.totalorder %s26_s21, 2 }
   0xa   : > { %s33_s23 = ssub.s32 1, %s2238_s18  ;;  %s35_s25 = ssub.s32 1, %s2234_s17 }
   0xb   : > { %s34_s24 = smul.u32 %s2234_s17, %s33_s23  ;;  %s3003_s21 = smov (%p27_p0, %s26_s21), 0 }
   0xc   : > { %s3005_s22 = smov (!%p27_p0, %s29_s22), %s2238_s18  ;;  %s1749_s26 = sadd.s32 4294967294, %s2242_s19  }
   0xd   : > { %s36_s27 = smul.u32 %s2238_s18, %s35_s25  ;;  %p31_p1 = scmp.ge.s32.totalorder %s3005_s22, 2 }
   0xe   : > { %s40_s28 = ssub.s32 1, %s3003_s21  ;;  %p55_p2 = scmp.ne.s32.totalorder %s2222_s14, %s2218_s13 }
   0xf   : > { %s37_s29 = sadd.s32 %s36_s27, %s34_s24  ;;  %s3007_s22 = smov (%p31_p1, %s3005_s22), 0 }
  0x10   : > { %p56_p3 = scmp.eq.s32.totalorder %s2242_s19, 0  ;;  %p123_p4 = scmp.eq.s32.totalorder %s1748_s20, 3 }
  0x11   : > { %s38_s30 = ssub.s32 1, %s3007_s22  ;;  %s41_s4 = smul.u32 %s40_s28, %s3007_s22 }
  0x12   : > { %s39_s5 = smul.u32 %s38_s30, %s3003_s21  ;;  %s44_s6 = ssub.s32 %s2238_s18, %s3007_s22 }
  0x13   : > { %p57_p5 = por %p56_p3, %p55_p2  ;;  %p2332_p6 = por %p123_p4, %p55_p2 }
  0x14   : > { %s42_s8 = sadd.s32 %s41_s4, %s39_s5  ;;  %p128_p7 = scmp.ne.s32.totalorder %s2218_s13, %s2214_s12 }
  0x15   : > { %s43_s9 = ssub.s32 %s37_s29, %s42_s8  ;;  %p129_p8 = scmp.eq.s32.totalorder %s1749_s26, 3 }
  0x16   : > { %s45_s10 = sor.u32 %s44_s6, %s43_s9  ;;  %s48_s11 = sadd.s32 1, %s2222_s14 }
  0x17   : > { %p46_p9 = scmp.eq.s32.totalorder %s45_s10, 0  ;;  %p2339_p10 = por %p129_p8, %p128_p7 }
  0x18   : > { %p1751_p11 = scmp.ge.s32.totalorder %s2242_s19, 4 }
  0x19   : > { %s2344_s20 = scalar_select %p46_p9, %s2222_s14, %s48_s11  }
  0x1a   : > { %171 = sbr.rel (%p1751_p11) target bundleno = 57 (0x39), region = 16 }
  0x1f   : > { %174 = sbr.rel (!%p57_p5) target bundleno = 57 (0x39), region = 20  ;;  %s176_s24 = sand.u32 (%p57_p5), 1, %s2222_s14  }
  0x20   : > { %s1754_s25 = sshll.u32 (%p57_p5), %s2238_s18, 2  ;;  %s1752_s27 = sshll.u32 (%p57_p5), %s176_s24, 8 }
  0x21   : > { %s1855_s28 = sshll.u32 (%p57_p5), %s37_s29, 6  ;;  %s2993_s0 = sld [smem:[#allocation8_spill]] (%p57_p5) }
  0x22   : > { %s187_s26 = sadd.s32 (%p57_p5), %s1855_s28, %s1754_s25  ;;  %s2357_s29 = scalar_lea.vmem (%p57_p5), [#allocation4], %s1752_s27 }
  0x23   : > { %s1756_s30 = sshll.u32 (%p57_p5), %s187_s26, 3 }
  0x27   : > { %s2352_s6 = scalar_lea.vmem %s2993_s0, %s1756_s30 }
  0x28   : > { %v202_v0 = vld [vmem:[%s2352_s6] sm:$0xff]  ;;  %v204_v1 = vld [vmem:[%s2352_s6 + $0x8] sm:$0xff]  ;;  %v206_v2 = vld [vmem:[%s2352_s6 + $0x10] sm:$0xff] }
  0x29   : > { %203 = vst [vmem:[%s2357_s29] sm:$0xff] %v202_v0  ;;  %205 = vst [vmem:[%s2357_s29 + $0x8] sm:$0xff] %v204_v1  ;;  %v208_v3 = vld [vmem:[%s2352_s6 + $0x18] sm:$0xff]  ;;  %v210_v4 = vld [vmem:[%s2352_s6 + $0x40] sm:$0xff] }
  0x2a   : > { %207 = vst [vmem:[%s2357_s29 + $0x10] sm:$0xff] %v206_v2  ;;  %v212_v5 = vld [vmem:[%s2352_s6 + $0x48] sm:$0xff]  ;;  %209 = vst [vmem:[%s2357_s29 + $0x18] sm:$0xff] %v208_v3  ;;  %v214_v6 = vld [vmem:[%s2352_s6 + $0x50] sm:$0xff] }
  0x2b   : > { %211 = vst [vmem:[%s2357_s29 + $0x20] sm:$0xff] %v210_v4  ;;  %213 = vst [vmem:[%s2357_s29 + $0x28] sm:$0xff] %v212_v5  ;;  %v216_v7 = vld [vmem:[%s2352_s6 + $0x58] sm:$0xff]  ;;  %v218_v8 = vld [vmem:[%s2352_s6 + $0x80] sm:$0xff] }
  0x2c   : > { %215 = vst [vmem:[%s2357_s29 + $0x30] sm:$0xff] %v214_v6  ;;  %217 = vst [vmem:[%s2357_s29 + $0x38] sm:$0xff] %v216_v7  ;;  %v220_v9 = vld [vmem:[%s2352_s6 + $0x88] sm:$0xff]  ;;  %v222_v10 = vld [vmem:[%s2352_s6 + $0x90] sm:$0xff] }
  0x2d   : > { %219 = vst [vmem:[%s2357_s29 + $0x40] sm:$0xff] %v218_v8  ;;  %v224_v11 = vld [vmem:[%s2352_s6 + $0x98] sm:$0xff]  ;;  %221 = vst [vmem:[%s2357_s29 + $0x48] sm:$0xff] %v220_v9  ;;  %v226_v12 = vld [vmem:[%s2352_s6 + $0xc0] sm:$0xff] }
  0x2e   : > { %223 = vst [vmem:[%s2357_s29 + $0x50] sm:$0xff] %v222_v10  ;;  %225 = vst [vmem:[%s2357_s29 + $0x58] sm:$0xff] %v224_v11  ;;  %v228_v13 = vld [vmem:[%s2352_s6 + $0xc8] sm:$0xff]  ;;  %v230_v14 = vld [vmem:[%s2352_s6 + $0xd0] sm:$0xff] }
  0x2f   : > { %227 = vst [vmem:[%s2357_s29 + $0x60] sm:$0xff] %v226_v12  ;;  %229 = vst [vmem:[%s2357_s29 + $0x68] sm:$0xff] %v228_v13  ;;  %v232_v15 = vld [vmem:[%s2352_s6 + $0xd8] sm:$0xff]  ;;  %v234_v16 = vld [vmem:[%s2352_s6 + $0x100] sm:$0xff] }
  0x30   : > { %231 = vst [vmem:[%s2357_s29 + $0x70] sm:$0xff] %v230_v14  ;;  %v236_v17 = vld [vmem:[%s2352_s6 + $0x108] sm:$0xff]  ;;  %233 = vst [vmem:[%s2357_s29 + $0x78] sm:$0xff] %v232_v15  ;;  %v238_v18 = vld [vmem:[%s2352_s6 + $0x110] sm:$0xff] }
  0x31   : > { %235 = vst [vmem:[%s2357_s29 + $0x80] sm:$0xff] %v234_v16  ;;  %237 = vst [vmem:[%s2357_s29 + $0x88] sm:$0xff] %v236_v17  ;;  %v240_v19 = vld [vmem:[%s2352_s6 + $0x118] sm:$0xff]  ;;  %v242_v20 = vld [vmem:[%s2352_s6 + $0x140] sm:$0xff] }
  0x32   : > { %239 = vst [vmem:[%s2357_s29 + $0x90] sm:$0xff] %v238_v18  ;;  %241 = vst [vmem:[%s2357_s29 + $0x98] sm:$0xff] %v240_v19  ;;  %v244_v21 = vld [vmem:[%s2352_s6 + $0x148] sm:$0xff]  ;;  %v246_v22 = vld [vmem:[%s2352_s6 + $0x150] sm:$0xff] }
  0x33   : > { %243 = vst [vmem:[%s2357_s29 + $0xa0] sm:$0xff] %v242_v20  ;;  %v248_v23 = vld [vmem:[%s2352_s6 + $0x158] sm:$0xff]  ;;  %245 = vst [vmem:[%s2357_s29 + $0xa8] sm:$0xff] %v244_v21  ;;  %v250_v24 = vld [vmem:[%s2352_s6 + $0x180] sm:$0xff] }
  0x34   : > { %247 = vst [vmem:[%s2357_s29 + $0xb0] sm:$0xff] %v246_v22  ;;  %249 = vst [vmem:[%s2357_s29 + $0xb8] sm:$0xff] %v248_v23  ;;  %v252_v25 = vld [vmem:[%s2352_s6 + $0x188] sm:$0xff]  ;;  %v254_v26 = vld [vmem:[%s2352_s6 + $0x190] sm:$0xff] }
  0x35   : > { %251 = vst [vmem:[%s2357_s29 + $0xc0] sm:$0xff] %v250_v24  ;;  %253 = vst [vmem:[%s2357_s29 + $0xc8] sm:$0xff] %v252_v25  ;;  %v256_v27 = vld [vmem:[%s2352_s6 + $0x198] sm:$0xff]  ;;  %v258_v28 = vld [vmem:[%s2352_s6 + $0x1c0] sm:$0xff] }
  0x36   : > { %255 = vst [vmem:[%s2357_s29 + $0xd0] sm:$0xff] %v254_v26  ;;  %v260_v29 = vld [vmem:[%s2352_s6 + $0x1c8] sm:$0xff]  ;;  %257 = vst [vmem:[%s2357_s29 + $0xd8] sm:$0xff] %v256_v27  ;;  %v262_v30 = vld [vmem:[%s2352_s6 + $0x1d0] sm:$0xff] }
  0x37   : > { %259 = vst [vmem:[%s2357_s29 + $0xe0] sm:$0xff] %v258_v28  ;;  %261 = vst [vmem:[%s2357_s29 + $0xe8] sm:$0xff] %v260_v29  ;;  %v264_v31 = vld [vmem:[%s2352_s6 + $0x1d8] sm:$0xff] }
  0x38   : > { %263 = vst [vmem:[%s2357_s29 + $0xf0] sm:$0xff] %v262_v30  ;;  %265 = vst [vmem:[%s2357_s29 + $0xf8] sm:$0xff] %v264_v31 }
  0x39 PF: > { %p1757_p12 = scmp.ge.s32.totalorder %s2242_s19, 1  ;;  %p278_p13 = scmp.lt.s32.totalorder %s2242_s19, 5 }
  0x3b   : > { %p279_p0 = pnand %p1757_p12, %p278_p13 }
  0x3c   : > { %s2423_s8 = sand.u32 (!%p279_p0), 1, %s2218_s13   ;;  %p324_p1 = scmp.lt.s32.totalorder (!%p279_p0), %s2230_s16, 1 }
  0x3d   : > { %282 = sbr.rel (%p279_p0) target bundleno = 2145 (0x861), region = 47  ;;  %s1758_s9 = sshll.u32 (!%p279_p0), %s2423_s8, 8 }
  0x3e   : > { %s1759_s10 = sshll.u32 (!%p279_p0), %s2423_s8, 6  ;;  %s2994_s1 = sld [smem:[#allocation9_spill]] (!%p279_p0) }
  0x3f   : > { %s2439_s6 = scalar_lea.vmem (!%p279_p0), [#allocation4], %s1758_s9  ;;  %s2441_s29 = scalar_lea.vmem (!%p279_p0), [#allocation5], %s1759_s10 }
  0x40   : > { %p1763_p2 = scmp.ne.s32.totalorder (!%p279_p0), %s2226_s15, 0 }
  0x42   : > { %s325_s11 = scalar_select %p324_p1, %s2230_s16, 1 }
  0x43   : > { %343 = sbr.rel (%p1763_p2) target bundleno = 74 (0x4a), region = 55 }
  0x44   : > { %s1856_s24 = sshll.u32 %s325_s11, 8  ;;  %s1762_s25 = sshll.u32 %s325_s11, 3 }
  0x45   : > { %s2432_s26 = scalar_lea.vmem %s2994_s1, %s1856_s24  ;;  %s2437_s5 = scalar_lea.vmem %s2988_s3, %s1762_s25 }
  0x48   : > { %v2244_v32 = vmov 0.0  }
  0x49   : > { %344 = vst [vmem:[#allocation2] sm:$0xff] %v2244_v32  ;;  %345 = vst [vmem:[#allocation3] sm:$0xff] %v2244_v32 }
  0x4a PF: > { %v2445_v33 = vld [vmem:[%s2432_s26 + $0xe4] ss:$16 sps:$4 sm:$0xff]   ;;  %v2448_v34 = vld [vmem:[%s2432_s26 + $0xe0] ss:$16 sps:$4 sm:$0xff]   ;;  %v2245_v35 = vmov 0   ;;  %s1857_s9 = smul.u32 224, %s2230_s16 }
  0x4b   : > { %581 = vmatprep.mubr.bf16.mxu0 %v2245_v35  ;;  %622 = vmatprep.mubr.bf16.mxu1 %v2245_v35  ;;  %v2454_v36 = vld [vmem:[%s2432_s26 + $0xc4] ss:$16 sps:$4 sm:$0xff]   ;;  %v2458_v37 = vld [vmem:[%s2432_s26 + $0xc0] ss:$16 sps:$4 sm:$0xff]   ;;  %v2465_v39 = vld [vmem:[%s2432_s26 + $0xec] ss:$16 sps:$4 sm:$0xff]  }
  0x4c   : > { %549 = vmatprep.subr.bf16.mxu0 %v2445_v33  ;;  %v2462_v38 = vld [vmem:[%s2432_s26 + $0xa4] ss:$16 sps:$4 sm:$0xff]   ;;  %v2468_v40 = vld [vmem:[%s2432_s26 + $0xe8] ss:$16 sps:$4 sm:$0xff]   ;;  %v2472_v41 = vld [vmem:[%s2432_s26 + $0xa0] ss:$16 sps:$4 sm:$0xff]   ;;  %590 = vmatprep.subr.bf16.mxu1 %v2465_v39  ;;  %s383_s10 = scalar_lea.vmem %s2439_s6, %s1857_s9 [#allocation4] }
  0x4d   : > { %550 = vmatpush1.bf16.msra.mxu0 %v2448_v34  ;;  %v2477_v42 = vld [vmem:[%s2432_s26 + $0x84] ss:$16 sps:$4 sm:$0xff]   ;;  %591 = vmatpush1.bf16.msra.mxu1 %v2468_v40  ;;  %v2481_v43 = vld [vmem:[%s2432_s26 + $0xcc] ss:$16 sps:$4 sm:$0xff]   ;;  %v2484_v44 = vld [vmem:[%s2432_s26 + $0xc8] ss:$16 sps:$4 sm:$0xff]  }
  0x4e   : > { %551 = vmatprep.subr.bf16.mxu0 %v2454_v36  ;;  %592 = vmatprep.subr.bf16.mxu1 %v2481_v43  ;;  %v2489_v45 = vld [vmem:[%s2432_s26 + $0x80] ss:$16 sps:$4 sm:$0xff]   ;;  %v2492_v46 = vld [vmem:[%s2432_s26 + $0x64] ss:$16 sps:$4 sm:$0xff]   ;;  %v2495_v47 = vld [vmem:[%s2432_s26 + $0xac] ss:$16 sps:$4 sm:$0xff]  }
  0x4f   : > { %v2500_v48 = vld [vmem:[%s2432_s26 + $0xa8] ss:$16 sps:$4 sm:$0xff]   ;;  %v2504_v49 = vld [vmem:[%s2432_s26 + $0x8c] ss:$16 sps:$4 sm:$0xff]   ;;  %v2508_v50 = vld [vmem:[%s2432_s26 + $0x60] ss:$16 sps:$4 sm:$0xff]  }
  0x50   : > { %v2512_v51 = vld [vmem:[%s2432_s26 + $0x44] ss:$16 sps:$4 sm:$0xff]   ;;  %v2516_v52 = vld [vmem:[%s2432_s26 + $0x88] ss:$16 sps:$4 sm:$0xff]   ;;  %v2520_v53 = vld [vmem:[%s2432_s26 + $0x6c] ss:$16 sps:$4 sm:$0xff]  }
  0x51   : > { %552 = vmatpush1.bf16.msra.mxu0 %v2458_v37  ;;  %593 = vmatpush1.bf16.msra.mxu1 %v2484_v44  ;;  %v2523_v54 = vld [vmem:[%s2432_s26 + $0x40] ss:$16 sps:$4 sm:$0xff]   ;;  %v2527_v55 = vld [vmem:[%s2432_s26 + $0x24] ss:$16 sps:$4 sm:$0xff]   ;;  %v2532_v56 = vld [vmem:[%s2432_s26 + $0x68] ss:$16 sps:$4 sm:$0xff]  }
  0x52   : > { %553 = vmatprep.subr.bf16.mxu0 %v2462_v38  ;;  %594 = vmatprep.subr.bf16.mxu1 %v2495_v47  ;;  %v2536_v57 = vld [vmem:[%s2432_s26 + $0x4c] ss:$16 sps:$4 sm:$0xff]   ;;  %v2540_v58 = vld [vmem:[%s2432_s26 + $0x20] ss:$16 sps:$4 sm:$0xff]   ;;  %v2544_v59 = vld [vmem:[%s2432_s26 + $0x4] ss:$16 sps:$4 sm:$0xff]  }
  0x53   : > { %v2548_v60 = vld [vmem:[%s2432_s26 + $0x48] ss:$16 sps:$4 sm:$0xff]   ;;  %v2552_v61 = vld [vmem:[%s2432_s26 + $0x2c] ss:$16 sps:$4 sm:$0xff]   ;;  %v2556_v62 = vld [vmem:[%s2432_s26] ss:$16 sps:$4 sm:$0xff]  }
  0x54   : > { %v378_v63 = vld [vmem:[#allocation2] sm:$0xff]  ;;  %v2561_v0 = vld [vmem:[%s2432_s26 + $0x28] ss:$16 sps:$4 sm:$0xff]   ;;  %v2565_v1 = vld [vmem:[%s2432_s26 + $0xc] ss:$16 sps:$4 sm:$0xff]   ;;  %s1801_s11 = smul.u32 56, %s2230_s16 }
  0x55   : > { %554 = vmatpush1.bf16.msra.mxu0 %v2472_v41  ;;  %595 = vmatpush1.bf16.msra.mxu1 %v2500_v48  ;;  %v388_v2 = vpack.c.bf16 %v378_v63, %v378_v63  ;;  %v2570_v3 = vld [vmem:[%s2432_s26 + $0x8] ss:$16 sps:$4 sm:$0xff]   ;;  %v384_v4 = vld [vmem:[%s383_s10] sm:$0xff]  ;;  %v386_v19 = vld [vmem:[%s383_s10 + $0x10] sm:$0xff]  ;;  %s663_s25 = smul.u32 6, %s2230_s16  ;;  %s2653_s27 = ssub.s32 1, %s2230_s16 }
  0x56   : > { %555 = vmatprep.subr.bf16.mxu0 %v2477_v42  ;;  %596 = vmatprep.subr.bf16.mxu1 %v2504_v49  ;;  %v385_v6 = vld [vmem:[%s383_s10 + $0x8] sm:$0xff]  ;;  %v387_v16 = vld [vmem:[%s383_s10 + $0x18] sm:$0xff]  ;;  %s660_s24 = scalar_lea.vmem %s2441_s29, %s1801_s11 [#allocation5]  ;;  %s787_s11 = smul.u32 5, %s2230_s16 }
  0x57   : > { %v379_v30 = vld [vmem:[#allocation3] sm:$0xff]  ;;  %s2656_s28 = sadd.s32 %s663_s25, %s2653_s27  ;;  %p1848_p3 = scmp.ne.s32.totalorder %s2226_s15, 1 }
  0x58   : > { %s1858_s30 = sshll.u32 %s2656_s28, 5  ;;  %s1807_s9 = sshll.u32 %s2656_s28, 3 }
  0x59   : > { %556 = vmatpush1.bf16.msra.mxu0 %v2489_v45  ;;  %597 = vmatpush1.bf16.msra.mxu1 %v2516_v52  ;;  %s667_s4 = scalar_lea.vmem %s2439_s6, %s1858_s30 [#allocation4]  ;;  %s784_s10 = scalar_lea.vmem %s2441_s29, %s1807_s9 [#allocation5] }
  0x5a   : > { %557 = vmatprep.subr.bf16.mxu0 %v2492_v46  ;;  %598 = vmatprep.subr.bf16.mxu1 %v2520_v53 }
  0x5d   : > { %558 = vmatpush1.bf16.msra.mxu0 %v2508_v50  ;;  %599 = vmatpush1.bf16.msra.mxu1 %v2532_v56 }
  0x5e   : > { %559 = vmatprep.subr.bf16.mxu0 %v2512_v51  ;;  %600 = vmatprep.subr.bf16.mxu1 %v2536_v57 }
  0x61   : > { %560 = vmatpush1.bf16.msra.mxu0 %v2523_v54  ;;  %601 = vmatpush1.bf16.msra.mxu1 %v2548_v60 }
  0x62   : > { %561 = vmatprep.subr.bf16.mxu0 %v2527_v55  ;;  %602 = vmatprep.subr.bf16.mxu1 %v2552_v61 }
  0x65   : > { %562 = vmatpush1.bf16.msra.mxu0 %v2540_v58  ;;  %603 = vmatpush1.bf16.msra.mxu1 %v2561_v0 }
  0x66   : > { %563 = vmatprep.subr.bf16.mxu0 %v2544_v59  ;;  %604 = vmatprep.subr.bf16.mxu1 %v2565_v1 }
  0x69   : > { %564 = vmatpush1.bf16.msra.mxu0 %v2556_v62  ;;  %605 = vmatpush1.bf16.msra.mxu1 %v2570_v3 }
  0x6a   : > { %673 = vmatprep.subr.bf16.mxu0 %v2445_v33  ;;  %714 = vmatprep.subr.bf16.mxu1 %v2465_v39 }
  0x6c   : > { %582 = vmatmul.mubr.bf16.vlgmr.msra.gmra.mxu0 %v388_v2  ;;  %623 = vmatmul.mubr.bf16.vlgmr.msra.gmra.mxu1 %v388_v2 }
  0x6d   : > { %674 = vmatpush1.bf16.msra.mxu0 %v2448_v34  ;;  %705 = vmatprep.mubr.bf16.mxu0 %v2245_v35 }
  0x6e   : > { %675 = vmatprep.subr.bf16.mxu0 %v2454_v36  ;;  %715 = vmatpush1.bf16.msra.mxu1 %v2468_v40 }
  0x6f   : > { %716 = vmatprep.subr.bf16.mxu1 %v2481_v43  ;;  %746 = vmatprep.mubr.bf16.mxu1 %v2245_v35 }
  0x71   : > { %676 = vmatpush1.bf16.msra.mxu0 %v2458_v37 }
  0x72   : > { %677 = vmatprep.subr.bf16.mxu0 %v2462_v38  ;;  %717 = vmatpush1.bf16.msra.mxu1 %v2484_v44 }
  0x73   : > { %718 = vmatprep.subr.bf16.mxu1 %v2495_v47 }
  0x75   : > { %678 = vmatpush1.bf16.msra.mxu0 %v2472_v41 }
  0x76   : > { %679 = vmatprep.subr.bf16.mxu0 %v2477_v42  ;;  %719 = vmatpush1.bf16.msra.mxu1 %v2500_v48 }
  0x77   : > { %720 = vmatprep.subr.bf16.mxu1 %v2504_v49 }
  0x79   : > { %680 = vmatpush1.bf16.msra.mxu0 %v2489_v45 }
  0x7a   : > { %681 = vmatprep.subr.bf16.mxu0 %v2492_v46  ;;  %721 = vmatpush1.bf16.msra.mxu1 %v2516_v52 }
  0x7b   : > { %722 = vmatprep.subr.bf16.mxu1 %v2520_v53 }
  0x7d   : > { %682 = vmatpush1.bf16.msra.mxu0 %v2508_v50 }
  0x7e   : > { %683 = vmatprep.subr.bf16.mxu0 %v2512_v51  ;;  %723 = vmatpush1.bf16.msra.mxu1 %v2532_v56 }
  0x7f   : > { %724 = vmatprep.subr.bf16.mxu1 %v2536_v57 }
  0x81   : > { %684 = vmatpush1.bf16.msra.mxu0 %v2523_v54 }
  0x82   : > { %685 = vmatprep.subr.bf16.mxu0 %v2527_v55  ;;  %725 = vmatpush1.bf16.msra.mxu1 %v2548_v60 }
  0x83   : > { %726 = vmatprep.subr.bf16.mxu1 %v2552_v61 }
  0x85   : > { %686 = vmatpush1.bf16.msra.mxu0 %v2540_v58 }
  0x86   : > { %687 = vmatprep.subr.bf16.mxu0 %v2544_v59  ;;  %727 = vmatpush1.bf16.msra.mxu1 %v2561_v0 }
  0x87   : > { %728 = vmatprep.subr.bf16.mxu1 %v2565_v1 }
  0x89   : > { %688 = vmatpush1.bf16.msra.mxu0 %v2556_v62 }
  0x8a   : > { %797 = vmatprep.subr.bf16.mxu0 %v2445_v33  ;;  %729 = vmatpush1.bf16.msra.mxu1 %v2570_v3 }
  0x8b   : > { %838 = vmatprep.subr.bf16.mxu1 %v2465_v39 }
 0x12c   : > { %v583_v5 = vpop.f32.mrf.mxu0  ;;  %v624_v13 = vpop.f32.mrf.mxu1 }
 0x12d   : > { %v631_v7 = vadd.f32 %v583_v5, %v384_v4  ;;  %v633_v21 = vadd.f32 %v624_v13, %v386_v19 }
 0x12e   : > { %v585_v8 = vpop.f32.mrf.mxu0  ;;  %v626_v15 = vpop.f32.mrf.mxu1 }
 0x12f   : > { %v1798_v9 = vmul.f32 -1.442695, %v631_v7  ;;  %v632_v10 = vadd.f32 %v585_v8, %v385_v6  ;;  %v634_v20 = vadd.f32 %v626_v15, %v387_v16 }
 0x130   : > { %v587_v11 = vpop.f32.mrf.mxu0  ;;  %v628_v17 = vpop.f32.mrf.mxu1 }
 0x131   : > { %1990 = vpow2.f32 %v1798_v9  ;;  %v1799_v12 = vmul.f32 -1.442695, %v632_v10  ;;  %v1800_v22 = vmul.f32 -1.442695, %v634_v20  ;;  %v668_v9 = vld [vmem:[%s667_s4] sm:$0xff] }
 0x132   : > { %v588_v14 = vpop.f32.mrf.mxu0  ;;  %v629_v18 = vpop.f32.mrf.mxu1 }
 0x133   : > { %1992 = vpow2.f32 %v1799_v12  ;;  %v669_v12 = vld [vmem:[%s667_s4 + $0x8] sm:$0xff] }
 0x134   : > { %1994 = vtanh.f32 %v633_v21 }
 0x135   : > { %1996 = vpow2.f32 %v1800_v22 }
 0x13e   : > { %v1991_v23 = vpop.eup %1990 }
 0x13f   : > { %v638_v24 = vadd.f32 1.0, %v1991_v23  ;;  %v671_v23 = vld [vmem:[%s667_s4 + $0x18] sm:$0xff] }
 0x140   : > { %v1993_v25 = vpop.eup %1992 }
 0x141   : > { %1998 = vrcp.f32 %v638_v24  ;;  %v644_v26 = vadd.f32 1.0, %v1993_v25  ;;  %v1995_v27 = vpop.eup %1994  ;;  %v670_v25 = vld [vmem:[%s667_s4 + $0x10] sm:$0xff] }
 0x142   : > { %v1997_v28 = vpop.eup %1996 }
 0x143   : > { %2000 = vrcp.f32 %v644_v26  ;;  %v651_v32 = vadd.f32 1.0, %v1997_v28 }
 0x145   : > { %2002 = vrcp.f32 %v651_v32 }
 0x14e   : > { %v1999_v29 = vpop.eup %1998 }
 0x14f   : > { %v655_v2 = vmul.f32 %v1999_v29, %v1995_v27 }
 0x150   : > { %v2001_v31 = vpop.eup %2000 }
 0x151   : > { %v654_v63 = vmul.f32 %v2001_v31, %v379_v30 }
 0x152   : > { %v2003_v5 = vpop.eup %2002 }
 0x153   : > { %v2612_v4 = vadd.f32 %v655_v2, %v654_v63 }
 0x155   : > { %2004 = vtanh.f32 %v2612_v4 }
 0x162   : > { %v2005_v6 = vpop.eup %2004 }
 0x163   : > { %v658_v7 = vmul.f32 %v2005_v6, %v2003_v5 }
 0x165   : > { %661 = vst [vmem:[%s660_s24] sm:$0xff] %v658_v7  ;;  %v672_v8 = vpack.c.bf16 %v658_v7, %v658_v7  ;;  %s1808_s24 = sshll.u32 %s2653_s27, 1 }
 0x166   : > { %s2702_s25 = sadd.s32 %s1808_s24, %s787_s11  ;;  %s1815_s11 = sshll.u32 %s2230_s16, 2 }
 0x167   : > { %706 = vmatmul.mubr.bf16.vlgmr.msra.gmra.mxu0 %v672_v8  ;;  %747 = vmatmul.mubr.bf16.vlgmr.msra.gmra.mxu1 %v672_v8  ;;  %s1859_s28 = sshll.u32 %s2702_s25, 5  ;;  %s1814_s4 = sshll.u32 %s2702_s25, 3 }
 0x168   : > { %798 = vmatpush1.bf16.msra.mxu0 %v2448_v34  ;;  %839 = vmatpush1.bf16.msra.mxu1 %v2468_v40  ;;  %s791_s30 = scalar_lea.vmem %s2439_s6, %s1859_s28 [#allocation4]  ;;  %s908_s9 = scalar_lea.vmem %s2441_s29, %s1814_s4 [#allocation5] }
 0x169   : > { %799 = vmatprep.subr.bf16.mxu0 %v2454_v36  ;;  %840 = vmatprep.subr.bf16.mxu1 %v2481_v43 }
 0x16a   : > { %829 = vmatprep.mubr.bf16.mxu0 %v2245_v35  ;;  %870 = vmatprep.mubr.bf16.mxu1 %v2245_v35 }
 0x16c   : > { %800 = vmatpush1.bf16.msra.mxu0 %v2458_v37  ;;  %841 = vmatpush1.bf16.msra.mxu1 %v2484_v44 }
 0x16d   : > { %801 = vmatprep.subr.bf16.mxu0 %v2462_v38  ;;  %842 = vmatprep.subr.bf16.mxu1 %v2495_v47 }
 0x170   : > { %802 = vmatpush1.bf16.msra.mxu0 %v2472_v41  ;;  %843 = vmatpush1.bf16.msra.mxu1 %v2500_v48 }
 0x171   : > { %803 = vmatprep.subr.bf16.mxu0 %v2477_v42  ;;  %844 = vmatprep.subr.bf16.mxu1 %v2504_v49 }
 0x174   : > { %804 = vmatpush1.bf16.msra.mxu0 %v2489_v45  ;;  %845 = vmatpush1.bf16.msra.mxu1 %v2516_v52 }
 0x175   : > { %805 = vmatprep.subr.bf16.mxu0 %v2492_v46  ;;  %846 = vmatprep.subr.bf16.mxu1 %v2520_v53 }
 0x178   : > { %806 = vmatpush1.bf16.msra.mxu0 %v2508_v50  ;;  %847 = vmatpush1.bf16.msra.mxu1 %v2532_v56 }
 0x179   : > { %807 = vmatprep.subr.bf16.mxu0 %v2512_v51  ;;  %848 = vmatprep.subr.bf16.mxu1 %v2536_v57 }
 0x17c   : > { %808 = vmatpush1.bf16.msra.mxu0 %v2523_v54  ;;  %849 = vmatpush1.bf16.msra.mxu1 %v2548_v60 }
 0x17d   : > { %809 = vmatprep.subr.bf16.mxu0 %v2527_v55  ;;  %850 = vmatprep.subr.bf16.mxu1 %v2552_v61 }
 0x180   : > { %810 = vmatpush1.bf16.msra.mxu0 %v2540_v58  ;;  %851 = vmatpush1.bf16.msra.mxu1 %v2561_v0 }
 0x181   : > { %811 = vmatprep.subr.bf16.mxu0 %v2544_v59  ;;  %852 = vmatprep.subr.bf16.mxu1 %v2565_v1 }
 0x184   : > { %812 = vmatpush1.bf16.msra.mxu0 %v2556_v62  ;;  %853 = vmatpush1.bf16.msra.mxu1 %v2570_v3 }
 0x185   : > { %921 = vmatprep.subr.bf16.mxu0 %v2445_v33  ;;  %962 = vmatprep.subr.bf16.mxu1 %v2465_v39 }
 0x227   : > { %v707_v10 = vpop.f32.mrf.mxu0  ;;  %v748_v11 = vpop.f32.mrf.mxu1 }
 0x228   : > { %v755_v13 = vadd.f32 %v707_v10, %v668_v9  ;;  %v757_v28 = vadd.f32 %v748_v11, %v670_v25 }
 0x229   : > { %v709_v14 = vpop.f32.mrf.mxu0  ;;  %v750_v15 = vpop.f32.mrf.mxu1 }
 0x22a   : > { %v1804_v16 = vmul.f32 -1.442695, %v755_v13  ;;  %v756_v17 = vadd.f32 %v709_v14, %v669_v12  ;;  %v758_v24 = vadd.f32 %v750_v15, %v671_v23 }
 0x22b   : > { %v711_v18 = vpop.f32.mrf.mxu0  ;;  %v752_v19 = vpop.f32.mrf.mxu1 }
 0x22c   : > { %2006 = vpow2.f32 %v1804_v16  ;;  %v1805_v20 = vmul.f32 -1.442695, %v756_v17  ;;  %v1806_v26 = vmul.f32 -1.442695, %v758_v24  ;;  %v793_v16 = vld [vmem:[%s791_s30 + $0x8] sm:$0xff] }
 0x22d   : > { %v712_v21 = vpop.f32.mrf.mxu0  ;;  %v753_v22 = vpop.f32.mrf.mxu1 }
 0x22e   : > { %2008 = vpow2.f32 %v1805_v20 }
 0x22f   : > { %2010 = vpow2.f32 %v1806_v26 }
 0x239   : > { %v2007_v27 = vpop.eup %2006 }
 0x23a   : > { %v762_v29 = vadd.f32 1.0, %v2007_v27  ;;  %v795_v27 = vld [vmem:[%s791_s30 + $0x18] sm:$0xff] }
 0x23b   : > { %v2009_v30 = vpop.eup %2008 }
 0x23c   : > { %2012 = vrcp.f32 %v762_v29  ;;  %v768_v31 = vadd.f32 1.0, %v2009_v30  ;;  %v2011_v32 = vpop.eup %2010  ;;  %v794_v29 = vld [vmem:[%s791_s30 + $0x10] sm:$0xff] }
 0x23d   : > { %2014 = vtanh.f32 %v757_v28  ;;  %v775_v6 = vadd.f32 1.0, %v2011_v32 }
 0x23e   : > { %2016 = vrcp.f32 %v768_v31 }
 0x23f   : > { %2018 = vrcp.f32 %v775_v6 }
 0x249   : > { %v2013_v63 = vpop.eup %2012 }
 0x24a   : > { %v2015_v2 = vpop.eup %2014 }
 0x24b   : > { %v2017_v5 = vpop.eup %2016  ;;  %v779_v7 = vmul.f32 %v2015_v2, %v2013_v63 }
 0x24c   : > { %v778_v8 = vmul.f32 %v2017_v5, %v2612_v4  ;;  %v2019_v10 = vpop.eup %2018  ;;  %v792_v4 = vld [vmem:[%s791_s30] sm:$0xff] }
 0x24e   : > { %v2661_v9 = vadd.f32 %v779_v7, %v778_v8 }
 0x250   : > { %2020 = vtanh.f32 %v2661_v9 }
 0x25d   : > { %v2021_v11 = vpop.eup %2020 }
 0x25e   : > { %v782_v12 = vmul.f32 %v2021_v11, %v2019_v10 }
 0x260   : > { %785 = vst [vmem:[%s784_s10] sm:$0xff] %v782_v12  ;;  %v796_v13 = vpack.c.bf16 %v782_v12, %v782_v12  ;;  %s910_s10 = smul.u32 3, %s2653_s27 }
 0x262   : > { %830 = vmatmul.mubr.bf16.vlgmr.msra.gmra.mxu0 %v796_v13  ;;  %871 = vmatmul.mubr.bf16.vlgmr.msra.gmra.mxu1 %v796_v13  ;;  %s2748_s24 = sadd.s32 %s1815_s11, %s910_s10  ;;  %s1822_s10 = sshll.u32 %s2653_s27, 2 }
 0x263   : > { %922 = vmatpush1.bf16.msra.mxu0 %v2448_v34  ;;  %963 = vmatpush1.bf16.msra.mxu1 %v2468_v40  ;;  %s1860_s25 = sshll.u32 %s2748_s24, 5  ;;  %s1821_s30 = sshll.u32 %s2748_s24, 3 }
 0x264   : > { %923 = vmatprep.subr.bf16.mxu0 %v2454_v36  ;;  %964 = vmatprep.subr.bf16.mxu1 %v2481_v43  ;;  %s915_s28 = scalar_lea.vmem %s2439_s6, %s1860_s25 [#allocation4]  ;;  %s1032_s4 = scalar_lea.vmem %s2441_s29, %s1821_s30 [#allocation5] }
 0x265   : > { %953 = vmatprep.mubr.bf16.mxu0 %v2245_v35  ;;  %994 = vmatprep.mubr.bf16.mxu1 %v2245_v35 }
 0x267   : > { %924 = vmatpush1.bf16.msra.mxu0 %v2458_v37  ;;  %965 = vmatpush1.bf16.msra.mxu1 %v2484_v44 }
 0x268   : > { %925 = vmatprep.subr.bf16.mxu0 %v2462_v38  ;;  %966 = vmatprep.subr.bf16.mxu1 %v2495_v47 }
 0x26b   : > { %926 = vmatpush1.bf16.msra.mxu0 %v2472_v41  ;;  %967 = vmatpush1.bf16.msra.mxu1 %v2500_v48 }
 0x26c   : > { %927 = vmatprep.subr.bf16.mxu0 %v2477_v42  ;;  %968 = vmatprep.subr.bf16.mxu1 %v2504_v49 }
 0x26f   : > { %928 = vmatpush1.bf16.msra.mxu0 %v2489_v45  ;;  %969 = vmatpush1.bf16.msra.mxu1 %v2516_v52 }
 0x270   : > { %929 = vmatprep.subr.bf16.mxu0 %v2492_v46  ;;  %970 = vmatprep.subr.bf16.mxu1 %v2520_v53 }
 0x273   : > { %930 = vmatpush1.bf16.msra.mxu0 %v2508_v50  ;;  %971 = vmatpush1.bf16.msra.mxu1 %v2532_v56 }
 0x274   : > { %931 = vmatprep.subr.bf16.mxu0 %v2512_v51  ;;  %972 = vmatprep.subr.bf16.mxu1 %v2536_v57 }
 0x277   : > { %932 = vmatpush1.bf16.msra.mxu0 %v2523_v54  ;;  %973 = vmatpush1.bf16.msra.mxu1 %v2548_v60 }
 0x278   : > { %933 = vmatprep.subr.bf16.mxu0 %v2527_v55  ;;  %974 = vmatprep.subr.bf16.mxu1 %v2552_v61 }
 0x27b   : > { %934 = vmatpush1.bf16.msra.mxu0 %v2540_v58  ;;  %975 = vmatpush1.bf16.msra.mxu1 %v2561_v0 }
 0x27c   : > { %935 = vmatprep.subr.bf16.mxu0 %v2544_v59  ;;  %976 = vmatprep.subr.bf16.mxu1 %v2565_v1 }
 0x27f   : > { %936 = vmatpush1.bf16.msra.mxu0 %v2556_v62  ;;  %977 = vmatpush1.bf16.msra.mxu1 %v2570_v3 }
 0x280   : > { %1045 = vmatprep.subr.bf16.mxu0 %v2445_v33  ;;  %1086 = vmatprep.subr.bf16.mxu1 %v2465_v39 }
 0x322   : > { %v831_v14 = vpop.f32.mrf.mxu0  ;;  %v872_v15 = vpop.f32.mrf.mxu1 }
 0x323   : > { %v879_v17 = vadd.f32 %v831_v14, %v792_v4  ;;  %v881_v32 = vadd.f32 %v872_v15, %v794_v29 }
 0x324   : > { %v833_v18 = vpop.f32.mrf.mxu0  ;;  %v874_v19 = vpop.f32.mrf.mxu1 }
 0x325   : > { %v1811_v20 = vmul.f32 -1.442695, %v879_v17  ;;  %v880_v21 = vadd.f32 %v833_v18, %v793_v16  ;;  %v882_v28 = vadd.f32 %v874_v19, %v795_v27 }
 0x326   : > { %v835_v22 = vpop.f32.mrf.mxu0  ;;  %v876_v23 = vpop.f32.mrf.mxu1 }
 0x327   : > { %2022 = vpow2.f32 %v1811_v20  ;;  %v1812_v24 = vmul.f32 -1.442695, %v880_v21  ;;  %v1813_v30 = vmul.f32 -1.442695, %v882_v28  ;;  %v917_v20 = vld [vmem:[%s915_s28 + $0x8] sm:$0xff] }
 0x328   : > { %v836_v25 = vpop.f32.mrf.mxu0  ;;  %v877_v26 = vpop.f32.mrf.mxu1 }
 0x329   : > { %2024 = vpow2.f32 %v1812_v24 }
 0x32a   : > { %2026 = vpow2.f32 %v1813_v30 }
 0x334   : > { %v2023_v31 = vpop.eup %2022 }
 0x335   : > { %v886_v63 = vadd.f32 1.0, %v2023_v31  ;;  %v919_v31 = vld [vmem:[%s915_s28 + $0x18] sm:$0xff] }
 0x336   : > { %v2025_v2 = vpop.eup %2024 }
 0x337   : > { %2028 = vrcp.f32 %v886_v63  ;;  %v892_v5 = vadd.f32 1.0, %v2025_v2  ;;  %v2027_v6 = vpop.eup %2026  ;;  %v918_v63 = vld [vmem:[%s915_s28 + $0x10] sm:$0xff] }
 0x338   : > { %2030 = vtanh.f32 %v881_v32  ;;  %v899_v11 = vadd.f32 1.0, %v2027_v6 }
 0x339   : > { %2032 = vrcp.f32 %v892_v5 }
 0x33a   : > { %2034 = vrcp.f32 %v899_v11 }
 0x344   : > { %v2029_v7 = vpop.eup %2028 }
 0x345   : > { %v2031_v8 = vpop.eup %2030 }
 0x346   : > { %v2033_v10 = vpop.eup %2032  ;;  %v903_v12 = vmul.f32 %v2031_v8, %v2029_v7 }
 0x347   : > { %v902_v13 = vmul.f32 %v2033_v10, %v2661_v9  ;;  %v2035_v14 = vpop.eup %2034  ;;  %v916_v9 = vld [vmem:[%s915_s28] sm:$0xff] }
 0x349   : > { %v2707_v4 = vadd.f32 %v903_v12, %v902_v13 }
 0x34b   : > { %2036 = vtanh.f32 %v2707_v4 }
 0x358   : > { %v2037_v15 = vpop.eup %2036 }
 0x359   : > { %v906_v16 = vmul.f32 %v2037_v15, %v2035_v14 }
 0x35b   : > { %909 = vst [vmem:[%s908_s9] sm:$0xff] %v906_v16  ;;  %v920_v17 = vpack.c.bf16 %v906_v16, %v906_v16  ;;  %s1035_s9 = smul.u32 3, %s2230_s16 }
 0x35d   : > { %954 = vmatmul.mubr.bf16.vlgmr.msra.gmra.mxu0 %v920_v17  ;;  %995 = vmatmul.mubr.bf16.vlgmr.msra.gmra.mxu1 %v920_v17  ;;  %s2794_s11 = sadd.s32 %s1822_s10, %s1035_s9  ;;  %s1829_s9 = sshll.u32 %s2230_s16, 1 }
 0x35e   : > { %1046 = vmatpush1.bf16.msra.mxu0 %v2448_v34  ;;  %1087 = vmatpush1.bf16.msra.mxu1 %v2468_v40  ;;  %s1861_s24 = sshll.u32 %s2794_s11, 5  ;;  %s1828_s28 = sshll.u32 %s2794_s11, 3 }
 0x35f   : > { %1047 = vmatprep.subr.bf16.mxu0 %v2454_v36  ;;  %1088 = vmatprep.subr.bf16.mxu1 %v2481_v43  ;;  %s1039_s25 = scalar_lea.vmem %s2439_s6, %s1861_s24 [#allocation4]  ;;  %s1156_s30 = scalar_lea.vmem %s2441_s29, %s1828_s28 [#allocation5] }
 0x360   : > { %1077 = vmatprep.mubr.bf16.mxu0 %v2245_v35  ;;  %1118 = vmatprep.mubr.bf16.mxu1 %v2245_v35 }
 0x362   : > { %1048 = vmatpush1.bf16.msra.mxu0 %v2458_v37  ;;  %1089 = vmatpush1.bf16.msra.mxu1 %v2484_v44 }
 0x363   : > { %1049 = vmatprep.subr.bf16.mxu0 %v2462_v38  ;;  %1090 = vmatprep.subr.bf16.mxu1 %v2495_v47 }
 0x366   : > { %1050 = vmatpush1.bf16.msra.mxu0 %v2472_v41  ;;  %1091 = vmatpush1.bf16.msra.mxu1 %v2500_v48 }
 0x367   : > { %1051 = vmatprep.subr.bf16.mxu0 %v2477_v42  ;;  %1092 = vmatprep.subr.bf16.mxu1 %v2504_v49 }
 0x36a   : > { %1052 = vmatpush1.bf16.msra.mxu0 %v2489_v45  ;;  %1093 = vmatpush1.bf16.msra.mxu1 %v2516_v52 }
 0x36b   : > { %1053 = vmatprep.subr.bf16.mxu0 %v2492_v46  ;;  %1094 = vmatprep.subr.bf16.mxu1 %v2520_v53 }
 0x36e   : > { %1054 = vmatpush1.bf16.msra.mxu0 %v2508_v50  ;;  %1095 = vmatpush1.bf16.msra.mxu1 %v2532_v56 }
 0x36f   : > { %1055 = vmatprep.subr.bf16.mxu0 %v2512_v51  ;;  %1096 = vmatprep.subr.bf16.mxu1 %v2536_v57 }
 0x372   : > { %1056 = vmatpush1.bf16.msra.mxu0 %v2523_v54  ;;  %1097 = vmatpush1.bf16.msra.mxu1 %v2548_v60 }
 0x373   : > { %1057 = vmatprep.subr.bf16.mxu0 %v2527_v55  ;;  %1098 = vmatprep.subr.bf16.mxu1 %v2552_v61 }
 0x376   : > { %1058 = vmatpush1.bf16.msra.mxu0 %v2540_v58  ;;  %1099 = vmatpush1.bf16.msra.mxu1 %v2561_v0 }
 0x377   : > { %1059 = vmatprep.subr.bf16.mxu0 %v2544_v59  ;;  %1100 = vmatprep.subr.bf16.mxu1 %v2565_v1 }
 0x37a   : > { %1060 = vmatpush1.bf16.msra.mxu0 %v2556_v62  ;;  %1101 = vmatpush1.bf16.msra.mxu1 %v2570_v3 }
 0x37b   : > { %1169 = vmatprep.subr.bf16.mxu0 %v2445_v33  ;;  %1210 = vmatprep.subr.bf16.mxu1 %v2465_v39 }
 0x41d   : > { %v955_v18 = vpop.f32.mrf.mxu0  ;;  %v996_v19 = vpop.f32.mrf.mxu1 }
 0x41e   : > { %v1003_v21 = vadd.f32 %v955_v18, %v916_v9  ;;  %v1005_v6 = vadd.f32 %v996_v19, %v918_v63 }
 0x41f   : > { %v957_v22 = vpop.f32.mrf.mxu0  ;;  %v998_v23 = vpop.f32.mrf.mxu1 }
 0x420   : > { %v1818_v24 = vmul.f32 -1.442695, %v1003_v21  ;;  %v1004_v25 = vadd.f32 %v957_v22, %v917_v20  ;;  %v1006_v32 = vadd.f32 %v998_v23, %v919_v31 }
 0x421   : > { %v959_v26 = vpop.f32.mrf.mxu0  ;;  %v1000_v27 = vpop.f32.mrf.mxu1 }
 0x422   : > { %2038 = vpow2.f32 %v1818_v24  ;;  %v1819_v28 = vmul.f32 -1.442695, %v1004_v25  ;;  %v1820_v2 = vmul.f32 -1.442695, %v1006_v32  ;;  %v1043_v25 = vld [vmem:[%s1039_s25 + $0x18] sm:$0xff]  ;;  %v1042_v27 = vld [vmem:[%s1039_s25 + $0x10] sm:$0xff] }
 0x423   : > { %v960_v29 = vpop.f32.mrf.mxu0  ;;  %v1001_v30 = vpop.f32.mrf.mxu1 }
 0x424   : > { %2040 = vpow2.f32 %v1819_v28 }
 0x425   : > { %2042 = vpow2.f32 %v1820_v2 }
 0x42f   : > { %v2039_v5 = vpop.eup %2038 }
 0x430   : > { %v1010_v7 = vadd.f32 1.0, %v2039_v5 }
 0x431   : > { %v2041_v8 = vpop.eup %2040 }
 0x432   : > { %2044 = vrcp.f32 %v1010_v7  ;;  %v1016_v10 = vadd.f32 1.0, %v2041_v8  ;;  %v2043_v11 = vpop.eup %2042 }
 0x433   : > { %2046 = vtanh.f32 %v1005_v6  ;;  %v1023_v15 = vadd.f32 1.0, %v2043_v11 }
 0x434   : > { %2048 = vrcp.f32 %v1016_v10 }
 0x435   : > { %2050 = vrcp.f32 %v1023_v15 }
 0x43f   : > { %v2045_v12 = vpop.eup %2044 }
 0x440   : > { %v2047_v13 = vpop.eup %2046 }
 0x441   : > { %v2049_v14 = vpop.eup %2048  ;;  %v1027_v16 = vmul.f32 %v2047_v13, %v2045_v12 }
 0x442   : > { %v1026_v17 = vmul.f32 %v2049_v14, %v2707_v4  ;;  %v2051_v18 = vpop.eup %2050 }
 0x444   : > { %v2753_v9 = vadd.f32 %v1027_v16, %v1026_v17  ;;  %v2805_v17 = vld [vmem:[%s2432_s26 + $0xe0] ss:$16 sps:$4 sm:$0xff]  }
 0x446   : > { %2052 = vtanh.f32 %v2753_v9 }
 0x453   : > { %v2053_v19 = vpop.eup %2052 }
 0x454   : > { %v1030_v20 = vmul.f32 %v2053_v19, %v2051_v18  ;;  %v2813_v18 = vld [vmem:[%s2432_s26 + $0xc4] ss:$16 sps:$4 sm:$0xff]   ;;  %v2820_v19 = vld [vmem:[%s2432_s26 + $0xc0] ss:$16 sps:$4 sm:$0xff]  }
 0x456   : > { %1033 = vst [vmem:[%s1032_s4] sm:$0xff] %v1030_v20  ;;  %v1044_v21 = vpack.c.bf16 %v1030_v20, %v1030_v20  ;;  %v2825_v20 = vld [vmem:[%s2432_s26 + $0xa4] ss:$16 sps:$4 sm:$0xff]   ;;  %s1158_s4 = smul.u32 5, %s2653_s27 }
 0x458   : > { %1078 = vmatmul.mubr.bf16.vlgmr.msra.gmra.mxu0 %v1044_v21  ;;  %1119 = vmatmul.mubr.bf16.vlgmr.msra.gmra.mxu1 %v1044_v21  ;;  %v2830_v21 = vld [vmem:[%s2432_s26 + $0xa0] ss:$16 sps:$4 sm:$0xff]   ;;  %s2864_s10 = sadd.s32 %s1829_s9, %s1158_s4 }
 0x459   : > { %1170 = vmatpush1.bf16.msra.mxu0 %v2448_v34  ;;  %1211 = vmatpush1.bf16.msra.mxu1 %v2468_v40  ;;  %v1040_v34 = vld [vmem:[%s1039_s25] sm:$0xff]  ;;  %s1862_s11 = sshll.u32 %s2864_s10, 5 }
 0x45a   : > { %1171 = vmatprep.subr.bf16.mxu0 %v2454_v36  ;;  %1212 = vmatprep.subr.bf16.mxu1 %v2481_v43  ;;  %s1163_s24 = scalar_lea.vmem %s2439_s6, %s1862_s11 [#allocation4] }
 0x45b   : > { %1201 = vmatprep.mubr.bf16.mxu0 %v2245_v35  ;;  %1242 = vmatprep.mubr.bf16.mxu1 %v2245_v35 }
 0x45d   : > { %1172 = vmatpush1.bf16.msra.mxu0 %v2458_v37  ;;  %1213 = vmatpush1.bf16.msra.mxu1 %v2484_v44 }
 0x45e   : > { %1173 = vmatprep.subr.bf16.mxu0 %v2462_v38  ;;  %1214 = vmatprep.subr.bf16.mxu1 %v2495_v47  ;;  %v1041_v38 = vld [vmem:[%s1039_s25 + $0x8] sm:$0xff]  ;;  %s1835_s25 = sshll.u32 %s2864_s10, 3 }
 0x45f   : > { %s1280_s28 = scalar_lea.vmem %s2441_s29, %s1835_s25 [#allocation5] }
 0x461   : > { %1174 = vmatpush1.bf16.msra.mxu0 %v2472_v41  ;;  %1215 = vmatpush1.bf16.msra.mxu1 %v2500_v48 }
 0x462   : > { %1175 = vmatprep.subr.bf16.mxu0 %v2477_v42  ;;  %1216 = vmatprep.subr.bf16.mxu1 %v2504_v49 }
 0x465   : > { %1176 = vmatpush1.bf16.msra.mxu0 %v2489_v45  ;;  %1217 = vmatpush1.bf16.msra.mxu1 %v2516_v52 }
 0x466   : > { %1177 = vmatprep.subr.bf16.mxu0 %v2492_v46  ;;  %1218 = vmatprep.subr.bf16.mxu1 %v2520_v53 }
 0x469   : > { %1178 = vmatpush1.bf16.msra.mxu0 %v2508_v50  ;;  %1219 = vmatpush1.bf16.msra.mxu1 %v2532_v56 }
 0x46a   : > { %1179 = vmatprep.subr.bf16.mxu0 %v2512_v51  ;;  %1220 = vmatprep.subr.bf16.mxu1 %v2536_v57 }
 0x46d   : > { %1180 = vmatpush1.bf16.msra.mxu0 %v2523_v54  ;;  %1221 = vmatpush1.bf16.msra.mxu1 %v2548_v60 }
 0x46e   : > { %1181 = vmatprep.subr.bf16.mxu0 %v2527_v55  ;;  %1222 = vmatprep.subr.bf16.mxu1 %v2552_v61 }
 0x471   : > { %1182 = vmatpush1.bf16.msra.mxu0 %v2540_v58  ;;  %1223 = vmatpush1.bf16.msra.mxu1 %v2561_v0 }
 0x472   : > { %1183 = vmatprep.subr.bf16.mxu0 %v2544_v59  ;;  %1224 = vmatprep.subr.bf16.mxu1 %v2565_v1 }
 0x475   : > { %1184 = vmatpush1.bf16.msra.mxu0 %v2556_v62  ;;  %1225 = vmatpush1.bf16.msra.mxu1 %v2570_v3 }
 0x476   : > { %1292 = vmatprep.subr.bf16.mxu0 %v2445_v33  ;;  %1333 = vmatprep.subr.bf16.mxu1 %v2465_v39 }
 0x518   : > { %v1079_v36 = vpop.f32.mrf.mxu0  ;;  %v1120_v37 = vpop.f32.mrf.mxu1 }
 0x519   : > { %v1127_v40 = vadd.f32 %v1079_v36, %v1040_v34  ;;  %v1129_v30 = vadd.f32 %v1120_v37, %v1042_v27 }
 0x51a   : > { %v1081_v41 = vpop.f32.mrf.mxu0  ;;  %v1122_v42 = vpop.f32.mrf.mxu1 }
 0x51b   : > { %v1825_v46 = vmul.f32 -1.442695, %v1127_v40  ;;  %v1128_v4 = vadd.f32 %v1081_v41, %v1041_v38  ;;  %v1130_v26 = vadd.f32 %v1122_v42, %v1043_v25 }
 0x51c   : > { %v1083_v22 = vpop.f32.mrf.mxu0  ;;  %v1124_v33 = vpop.f32.mrf.mxu1 }
 0x51d   : > { %2054 = vpow2.f32 %v1825_v46  ;;  %v1826_v39 = vmul.f32 -1.442695, %v1128_v4  ;;  %v1827_v28 = vmul.f32 -1.442695, %v1130_v26 }
 0x51e   : > { %v1084_v23 = vpop.f32.mrf.mxu0  ;;  %v1125_v24 = vpop.f32.mrf.mxu1 }
 0x51f   : > { %2056 = vpow2.f32 %v1826_v39 }
 0x520   : > { %2058 = vpow2.f32 %v1827_v28  ;;  %v2128_v28 = vld [vmem:[%s2432_s26 + $0xcc] ss:$16 sps:$4 sm:$0xff]  }
 0x52a   : > { %v2055_v29 = vpop.eup %2054 }
 0x52b   : > { %v1134_v31 = vadd.f32 1.0, %v2055_v29  ;;  %v2129_v29 = vld [vmem:[%s2432_s26 + $0xc8] ss:$16 sps:$4 sm:$0xff]  }
 0x52c   : > { %v2057_v32 = vpop.eup %2056 }
 0x52d   : > { %2060 = vrcp.f32 %v1134_v31  ;;  %v1140_v63 = vadd.f32 1.0, %v2057_v32  ;;  %v2059_v2 = vpop.eup %2058  ;;  %v2131_v31 = vld [vmem:[%s2432_s26 + $0xa8] ss:$16 sps:$4 sm:$0xff]   ;;  %v2133_v32 = vld [vmem:[%s2432_s26 + $0x80] ss:$16 sps:$4 sm:$0xff]  }
 0x52e   : > { %2062 = vtanh.f32 %v1129_v30  ;;  %v1147_v8 = vadd.f32 1.0, %v2059_v2  ;;  %v2130_v30 = vld [vmem:[%s2432_s26 + $0xac] ss:$16 sps:$4 sm:$0xff]  }
 0x52f   : > { %2064 = vrcp.f32 %v1140_v63  ;;  %v2134_v63 = vld [vmem:[%s2432_s26 + $0x88] ss:$16 sps:$4 sm:$0xff]   ;;  %v2135_v2 = vld [vmem:[%s2432_s26 + $0x6c] ss:$16 sps:$4 sm:$0xff]  }
 0x530   : > { %2066 = vrcp.f32 %v1147_v8  ;;  %v2139_v8 = vld [vmem:[%s2432_s26 + $0x4c] ss:$16 sps:$4 sm:$0xff]  }
 0x53a   : > { %v2061_v5 = vpop.eup %2060 }
 0x53b   : > { %v2063_v6 = vpop.eup %2062 }
 0x53c   : > { %v2065_v7 = vpop.eup %2064  ;;  %v1151_v10 = vmul.f32 %v2063_v6, %v2061_v5  ;;  %v2136_v5 = vld [vmem:[%s2432_s26 + $0x60] ss:$16 sps:$4 sm:$0xff]   ;;  %v2137_v6 = vld [vmem:[%s2432_s26 + $0x68] ss:$16 sps:$4 sm:$0xff]  }
 0x53d   : > { %v1150_v11 = vmul.f32 %v2065_v7, %v2753_v9  ;;  %v2067_v13 = vpop.eup %2066  ;;  %v2809_v9 = vld [vmem:[%s2432_s26 + $0xe8] ss:$16 sps:$4 sm:$0xff]   ;;  %v2138_v7 = vld [vmem:[%s2432_s26 + $0x44] ss:$16 sps:$4 sm:$0xff]  }
 0x53f   : > { %v2799_v12 = vadd.f32 %v1151_v10, %v1150_v11  ;;  %v2140_v10 = vld [vmem:[%s2432_s26 + $0x40] ss:$16 sps:$4 sm:$0xff]   ;;  %v2141_v11 = vld [vmem:[%s2432_s26 + $0x48] ss:$16 sps:$4 sm:$0xff]  }
 0x541   : > { %2068 = vtanh.f32 %v2799_v12 }
 0x54e   : > { %v2069_v14 = vpop.eup %2068 }
 0x54f   : > { %v1154_v15 = vmul.f32 %v2069_v14, %v2067_v13  ;;  %v2143_v13 = vld [vmem:[%s2432_s26 + $0x2c] ss:$16 sps:$4 sm:$0xff]   ;;  %v2144_v14 = vld [vmem:[%s2432_s26 + $0x20] ss:$16 sps:$4 sm:$0xff]  }
 0x551   : > { %1157 = vst [vmem:[%s1156_s30] sm:$0xff] %v1154_v15  ;;  %v1168_v16 = vpack.c.bf16 %v1154_v15, %v1154_v15  ;;  %v2145_v15 = vld [vmem:[%s2432_s26 + $0x28] ss:$16 sps:$4 sm:$0xff]   ;;  %s1282_s30 = smul.u32 6, %s2653_s27 }
 0x553   : > { %1202 = vmatmul.mubr.bf16.vlgmr.msra.gmra.mxu0 %v1168_v16  ;;  %1243 = vmatmul.mubr.bf16.vlgmr.msra.gmra.mxu1 %v1168_v16  ;;  %v2146_v16 = vld [vmem:[%s2432_s26 + $0x4] ss:$16 sps:$4 sm:$0xff]   ;;  %s2908_s4 = sadd.s32 %s2230_s16, %s1282_s30 }
 0x554   : > { %1293 = vmatpush1.bf16.msra.mxu0 %v2805_v17  ;;  %1334 = vmatpush1.bf16.msra.mxu1 %v2809_v9  ;;  %s1863_s9 = sshll.u32 %s2908_s4, 5 }
 0x555   : > { %1294 = vmatprep.subr.bf16.mxu0 %v2813_v18  ;;  %1335 = vmatprep.subr.bf16.mxu1 %v2481_v43  ;;  %v2835_v43 = vld [vmem:[%s2432_s26 + $0x84] ss:$16 sps:$4 sm:$0xff]   ;;  %s1286_s10 = scalar_lea.vmem %s2439_s6, %s1863_s9 [#allocation4] }
 0x556   : > { %1324 = vmatprep.mubr.bf16.mxu0 %v2245_v35  ;;  %1365 = vmatprep.mubr.bf16.mxu1 %v2245_v35 }
 0x558   : > { %1295 = vmatpush1.bf16.msra.mxu0 %v2820_v19  ;;  %1336 = vmatpush1.bf16.msra.mxu1 %v2484_v44  ;;  %v2842_v44 = vld [vmem:[%s2432_s26 + $0x64] ss:$16 sps:$4 sm:$0xff]  }
 0x559   : > { %1296 = vmatprep.subr.bf16.mxu0 %v2825_v20  ;;  %1337 = vmatprep.subr.bf16.mxu1 %v2495_v47  ;;  %v2127_v47 = vld [vmem:[%s2432_s26 + $0xec] ss:$16 sps:$4 sm:$0xff]  }
 0x55c   : > { %1297 = vmatpush1.bf16.msra.mxu0 %v2830_v21  ;;  %1338 = vmatpush1.bf16.msra.mxu1 %v2500_v48  ;;  %v1164_v48 = vld [vmem:[%s1163_s24] sm:$0xff] }
 0x55d   : > { %1298 = vmatprep.subr.bf16.mxu0 %v2835_v43  ;;  %1339 = vmatprep.subr.bf16.mxu1 %v2504_v49 }
 0x560   : > { %1299 = vmatpush1.bf16.msra.mxu0 %v2489_v45  ;;  %1340 = vmatpush1.bf16.msra.mxu1 %v2516_v52  ;;  %v2126_v45 = vld [vmem:[%s2432_s26 + $0xe4] ss:$16 sps:$4 sm:$0xff]  }
 0x561   : > { %1300 = vmatprep.subr.bf16.mxu0 %v2842_v44  ;;  %1341 = vmatprep.subr.bf16.mxu1 %v2520_v53 }
 0x564   : > { %1301 = vmatpush1.bf16.msra.mxu0 %v2508_v50  ;;  %1342 = vmatpush1.bf16.msra.mxu1 %v2532_v56 }
 0x565   : > { %1302 = vmatprep.subr.bf16.mxu0 %v2512_v51  ;;  %1343 = vmatprep.subr.bf16.mxu1 %v2536_v57  ;;  %v1165_v51 = vld [vmem:[%s1163_s24 + $0x8] sm:$0xff] }
 0x568   : > { %1303 = vmatpush1.bf16.msra.mxu0 %v2523_v54  ;;  %1344 = vmatpush1.bf16.msra.mxu1 %v2548_v60 }
 0x569   : > { %1304 = vmatprep.subr.bf16.mxu0 %v2527_v55  ;;  %1345 = vmatprep.subr.bf16.mxu1 %v2552_v61 }
 0x56c   : > { %1305 = vmatpush1.bf16.msra.mxu0 %v2540_v58  ;;  %1346 = vmatpush1.bf16.msra.mxu1 %v2561_v0 }
 0x56d   : > { %1306 = vmatprep.subr.bf16.mxu0 %v2544_v59  ;;  %1347 = vmatprep.subr.bf16.mxu1 %v2565_v1  ;;  %v1166_v1 = vld [vmem:[%s1163_s24 + $0x10] sm:$0xff] }
 0x570   : > { %1307 = vmatpush1.bf16.msra.mxu0 %v2556_v62  ;;  %1348 = vmatpush1.bf16.msra.mxu1 %v2570_v3  ;;  %v1167_v62 = vld [vmem:[%s1163_s24 + $0x18] sm:$0xff]  ;;  %s1864_s24 = smul.u32 224, %s2653_s27 }
 0x571   : > { %1414 = vmatprep.subr.bf16.mxu0 %v2126_v45  ;;  %1455 = vmatprep.subr.bf16.mxu1 %v2127_v47 }
 0x572   : > { %s1408_s25 = scalar_lea.vmem %s2439_s6, %s1864_s24 [#allocation4]  ;;  %s1847_s6 = smul.u32 56, %s2653_s27 }
 0x613   : > { %v1203_v49 = vpop.f32.mrf.mxu0  ;;  %v1244_v50 = vpop.f32.mrf.mxu1 }
 0x614   : > { %v1251_v52 = vadd.f32 %v1203_v49, %v1164_v48  ;;  %v1253_v36 = vadd.f32 %v1244_v50, %v1166_v1 }
 0x615   : > { %v1205_v53 = vpop.f32.mrf.mxu0  ;;  %v1246_v54 = vpop.f32.mrf.mxu1 }
 0x616   : > { %v1832_v55 = vmul.f32 -1.442695, %v1251_v52  ;;  %v1252_v56 = vadd.f32 %v1205_v53, %v1165_v51  ;;  %v1254_v0 = vadd.f32 %v1246_v54, %v1167_v62 }
 0x617   : > { %v1207_v57 = vpop.f32.mrf.mxu0  ;;  %v1248_v58 = vpop.f32.mrf.mxu1 }
 0x618   : > { %2070 = vpow2.f32 %v1832_v55  ;;  %v1833_v59 = vmul.f32 -1.442695, %v1252_v56  ;;  %v1834_v3 = vmul.f32 -1.442695, %v1254_v0  ;;  %v1290_v55 = vld [vmem:[%s1286_s10 + $0x18] sm:$0xff]  ;;  %v1289_v57 = vld [vmem:[%s1286_s10 + $0x10] sm:$0xff] }
 0x619   : > { %v1208_v60 = vpop.f32.mrf.mxu0  ;;  %v1249_v61 = vpop.f32.mrf.mxu1 }
 0x61a   : > { %2072 = vpow2.f32 %v1833_v59 }
 0x61b   : > { %2074 = vpow2.f32 %v1834_v3 }
 0x625   : > { %v2071_v34 = vpop.eup %2070 }
 0x626   : > { %v1258_v37 = vadd.f32 1.0, %v2071_v34 }
 0x627   : > { %v2073_v38 = vpop.eup %2072 }
 0x628   : > { %2076 = vrcp.f32 %v1258_v37  ;;  %v1264_v40 = vadd.f32 1.0, %v2073_v38  ;;  %v2075_v41 = vpop.eup %2074 }
 0x629   : > { %2078 = vtanh.f32 %v1253_v36  ;;  %v1271_v22 = vadd.f32 1.0, %v2075_v41 }
 0x62a   : > { %2080 = vrcp.f32 %v1264_v40 }
 0x62b   : > { %2082 = vrcp.f32 %v1271_v22 }
 0x635   : > { %v2077_v42 = vpop.eup %2076 }
 0x636   : > { %v2079_v46 = vpop.eup %2078 }
 0x637   : > { %v2081_v4 = vpop.eup %2080  ;;  %v1275_v33 = vmul.f32 %v2079_v46, %v2077_v42 }
 0x638   : > { %v1274_v39 = vmul.f32 %v2081_v4, %v2799_v12  ;;  %v2083_v24 = vpop.eup %2082  ;;  %v2142_v12 = vld [vmem:[%s2432_s26 + $0x24] ss:$16 sps:$4 sm:$0xff]  }
 0x63a   : > { %v2869_v23 = vadd.f32 %v1275_v33, %v1274_v39  ;;  %v1409_v33 = vld [vmem:[%s1408_s25] sm:$0xff] }
 0x63c   : > { %2084 = vtanh.f32 %v2869_v23 }
 0x649   : > { %v2085_v25 = vpop.eup %2084 }
 0x64a   : > { %v1278_v26 = vmul.f32 %v2085_v25, %v2083_v24  ;;  %v1410_v25 = vld [vmem:[%s1408_s25 + $0x8] sm:$0xff] }
 0x64c   : > { %1281 = vst [vmem:[%s1280_s28] sm:$0xff] %v1278_v26  ;;  %v1291_v27 = vpack.c.bf16 %v1278_v26, %v1278_v26  ;;  %s1525_s28 = scalar_lea.vmem %s2441_s29, %s1847_s6 [#allocation5] }
 0x64e   : > { %1325 = vmatmul.mubr.bf16.vlgmr.msra.gmra.mxu0 %v1291_v27  ;;  %1366 = vmatmul.mubr.bf16.vlgmr.msra.gmra.mxu1 %v1291_v27 }
 0x64f   : > { %1415 = vmatpush1.bf16.msra.mxu0 %v2805_v17  ;;  %1456 = vmatpush1.bf16.msra.mxu1 %v2809_v9  ;;  %v2147_v17 = vld [vmem:[%s2432_s26 + $0xc] ss:$16 sps:$4 sm:$0xff]   ;;  %v2148_v9 = vld [vmem:[%s2432_s26] ss:$16 sps:$4 sm:$0xff]  }
 0x650   : > { %1416 = vmatprep.subr.bf16.mxu0 %v2813_v18  ;;  %1457 = vmatprep.subr.bf16.mxu1 %v2128_v28  ;;  %v2149_v18 = vld [vmem:[%s2432_s26 + $0x8] ss:$16 sps:$4 sm:$0xff]  }
 0x651   : > { %1446 = vmatprep.mubr.bf16.mxu0 %v2245_v35  ;;  %1487 = vmatprep.mubr.bf16.mxu1 %v2245_v35  ;;  %v2132_v35 = vld [vmem:[%s2432_s26 + $0x8c] ss:$16 sps:$4 sm:$0xff]   ;;  %s1841_s26 = sshll.u32 %s2908_s4, 3 }
 0x652   : > { %s1403_s11 = scalar_lea.vmem %s2441_s29, %s1841_s26 [#allocation5] }
 0x653   : > { %1417 = vmatpush1.bf16.msra.mxu0 %v2820_v19  ;;  %1458 = vmatpush1.bf16.msra.mxu1 %v2129_v29  ;;  %v1287_v19 = vld [vmem:[%s1286_s10] sm:$0xff] }
 0x654   : > { %1418 = vmatprep.subr.bf16.mxu0 %v2825_v20  ;;  %1459 = vmatprep.subr.bf16.mxu1 %v2130_v30 }
 0x657   : > { %1419 = vmatpush1.bf16.msra.mxu0 %v2830_v21  ;;  %1460 = vmatpush1.bf16.msra.mxu1 %v2131_v31 }
 0x658   : > { %1420 = vmatprep.subr.bf16.mxu0 %v2835_v43  ;;  %1461 = vmatprep.subr.bf16.mxu1 %v2132_v35  ;;  %v1288_v43 = vld [vmem:[%s1286_s10 + $0x8] sm:$0xff] }
 0x65b   : > { %1421 = vmatpush1.bf16.msra.mxu0 %v2133_v32  ;;  %1462 = vmatpush1.bf16.msra.mxu1 %v2134_v63 }
 0x65c   : > { %1422 = vmatprep.subr.bf16.mxu0 %v2842_v44  ;;  %1463 = vmatprep.subr.bf16.mxu1 %v2135_v2  ;;  %v1412_v2 = vld [vmem:[%s1408_s25 + $0x18] sm:$0xff] }
 0x65f   : > { %1423 = vmatpush1.bf16.msra.mxu0 %v2136_v5  ;;  %1464 = vmatpush1.bf16.msra.mxu1 %v2137_v6  ;;  %v1411_v6 = vld [vmem:[%s1408_s25 + $0x10] sm:$0xff] }
 0x660   : > { %1424 = vmatprep.subr.bf16.mxu0 %v2138_v7  ;;  %1465 = vmatprep.subr.bf16.mxu1 %v2139_v8 }
 0x663   : > { %1425 = vmatpush1.bf16.msra.mxu0 %v2140_v10  ;;  %1466 = vmatpush1.bf16.msra.mxu1 %v2141_v11 }
 0x664   : > { %1426 = vmatprep.subr.bf16.mxu0 %v2142_v12  ;;  %1467 = vmatprep.subr.bf16.mxu1 %v2143_v13 }
 0x667   : > { %1427 = vmatpush1.bf16.msra.mxu0 %v2144_v14  ;;  %1468 = vmatpush1.bf16.msra.mxu1 %v2145_v15 }
 0x668   : > { %1428 = vmatprep.subr.bf16.mxu0 %v2146_v16  ;;  %1469 = vmatprep.subr.bf16.mxu1 %v2147_v17 }
 0x66b   : > { %1429 = vmatpush1.bf16.msra.mxu0 %v2148_v9  ;;  %1470 = vmatpush1.bf16.msra.mxu1 %v2149_v18 }
 0x70e   : > { %v1326_v20 = vpop.f32.mrf.mxu0  ;;  %v1367_v21 = vpop.f32.mrf.mxu1 }
 0x70f   : > { %v1374_v44 = vadd.f32 %v1326_v20, %v1287_v19  ;;  %v1376_v60 = vadd.f32 %v1367_v21, %v1289_v57 }
 0x710   : > { %v1328_v45 = vpop.f32.mrf.mxu0  ;;  %v1369_v47 = vpop.f32.mrf.mxu1 }
 0x711   : > { %v1838_v48 = vmul.f32 -1.442695, %v1374_v44  ;;  %v1375_v49 = vadd.f32 %v1328_v45, %v1288_v43  ;;  %v1377_v56 = vadd.f32 %v1369_v47, %v1290_v55 }
 0x712   : > { %v1330_v50 = vpop.f32.mrf.mxu0  ;;  %v1371_v51 = vpop.f32.mrf.mxu1 }
 0x713   : > { %2086 = vpow2.f32 %v1838_v48  ;;  %v1839_v52 = vmul.f32 -1.442695, %v1375_v49  ;;  %v1840_v58 = vmul.f32 -1.442695, %v1377_v56 }
 0x714   : > { %v1331_v53 = vpop.f32.mrf.mxu0  ;;  %v1372_v54 = vpop.f32.mrf.mxu1 }
 0x715   : > { %2088 = vpow2.f32 %v1839_v52 }
 0x716   : > { %2090 = vpow2.f32 %v1840_v58 }
 0x720   : > { %v2087_v59 = vpop.eup %2086 }
 0x721   : > { %v1381_v61 = vadd.f32 1.0, %v2087_v59 }
 0x722   : > { %v2089_v62 = vpop.eup %2088 }
 0x723   : > { %2092 = vrcp.f32 %v1381_v61  ;;  %v1387_v0 = vadd.f32 1.0, %v2089_v62  ;;  %v2091_v1 = vpop.eup %2090 }
 0x724   : > { %2094 = vtanh.f32 %v1376_v60  ;;  %v1394_v37 = vadd.f32 1.0, %v2091_v1 }
 0x725   : > { %2096 = vrcp.f32 %v1387_v0 }
 0x726   : > { %2098 = vrcp.f32 %v1394_v37 }
 0x730   : > { %v2093_v3 = vpop.eup %2092 }
 0x731   : > { %v2095_v34 = vpop.eup %2094 }
 0x732   : > { %v2097_v36 = vpop.eup %2096  ;;  %v1398_v38 = vmul.f32 %v2095_v34, %v2093_v3 }
 0x733   : > { %v1397_v40 = vmul.f32 %v2097_v36, %v2869_v23  ;;  %v2099_v42 = vpop.eup %2098 }
 0x735   : > { %v1399_v41 = vadd.f32 %v1398_v38, %v1397_v40 }
 0x737   : > { %2100 = vtanh.f32 %v1399_v41 }
 0x744   : > { %v2101_v46 = vpop.eup %2100 }
 0x745   : > { %v1401_v4 = vmul.f32 %v2101_v46, %v2099_v42 }
 0x747   : > { %1404 = vst [vmem:[%s1403_s11] sm:$0xff] %v1401_v4  ;;  %v1413_v22 = vpack.c.bf16 %v1401_v4, %v1401_v4 }
 0x749   : > { %1447 = vmatmul.mubr.bf16.vlgmr.msra.gmra.mxu0 %v1413_v22  ;;  %1488 = vmatmul.mubr.bf16.vlgmr.msra.gmra.mxu1 %v1413_v22 }
 0x809   : > { %v1448_v39 = vpop.f32.mrf.mxu0  ;;  %v1489_v24 = vpop.f32.mrf.mxu1 }
 0x80a   : > { %v1496_v26 = vadd.f32 %v1448_v39, %v1409_v33  ;;  %v1498_v10 = vadd.f32 %v1489_v24, %v1411_v6 }
 0x80b   : > { %v1450_v23 = vpop.f32.mrf.mxu0  ;;  %v1491_v27 = vpop.f32.mrf.mxu1 }
 0x80c   : > { %v1844_v28 = vmul.f32 -1.442695, %v1496_v26  ;;  %v1497_v29 = vadd.f32 %v1450_v23, %v1410_v25  ;;  %v1499_v5 = vadd.f32 %v1491_v27, %v1412_v2 }
 0x80d   : > { %v1452_v30 = vpop.f32.mrf.mxu0  ;;  %v1493_v31 = vpop.f32.mrf.mxu1 }
 0x80e   : > { %2102 = vpow2.f32 %v1844_v28  ;;  %v1845_v35 = vmul.f32 -1.442695, %v1497_v29  ;;  %v1846_v7 = vmul.f32 -1.442695, %v1499_v5 }
 0x80f   : > { %v1453_v32 = vpop.f32.mrf.mxu0  ;;  %v1494_v63 = vpop.f32.mrf.mxu1 }
 0x810   : > { %2104 = vpow2.f32 %v1845_v35 }
 0x811   : > { %2106 = vpow2.f32 %v1846_v7 }
 0x81b   : > { %v2103_v8 = vpop.eup %2102 }
 0x81c   : > { %v1503_v11 = vadd.f32 1.0, %v2103_v8 }
 0x81d   : > { %v2105_v12 = vpop.eup %2104 }
 0x81e   : > { %2108 = vrcp.f32 %v1503_v11  ;;  %v1509_v13 = vadd.f32 1.0, %v2105_v12  ;;  %v2107_v14 = vpop.eup %2106 }
 0x81f   : > { %2110 = vtanh.f32 %v1498_v10  ;;  %v1516_v9 = vadd.f32 1.0, %v2107_v14 }
 0x820   : > { %2112 = vrcp.f32 %v1509_v13 }
 0x821   : > { %2114 = vrcp.f32 %v1516_v9 }
 0x82b   : > { %v2109_v15 = vpop.eup %2108 }
 0x82c   : > { %v2111_v16 = vpop.eup %2110 }
 0x82d   : > { %v2113_v17 = vpop.eup %2112  ;;  %v1520_v18 = vmul.f32 %v2111_v16, %v2109_v15 }
 0x82e   : > { %v1519_v19 = vmul.f32 %v2113_v17, %v1399_v41  ;;  %v2115_v21 = vpop.eup %2114 }
 0x830   : > { %v1521_v20 = vadd.f32 %v1520_v18, %v1519_v19 }
 0x832   : > { %2116 = vtanh.f32 %v1521_v20  ;;  %1528 = vst [vmem:[#allocation3] sm:$0xff] %v1521_v20 }
 0x83e   : > { %1532 = sbr.rel (%p1848_p3) target bundleno = 2116 (0x844), region = 59 }
 0x83f   : > { %v2117_v43 = vpop.eup %2116 }
 0x840   : > { %v1523_v44 = vmul.f32 %v2117_v43, %v2115_v21 }
 0x842   : > { %1526 = vst [vmem:[%s1525_s28] sm:$0xff] %v1523_v44  ;;  %1527 = vst [vmem:[#allocation2] sm:$0xff] %v1523_v44 }
 0x843   : > { %1533 = vst [vmem:[%s2437_s5] sm:$0xff] %v1523_v44 }
 0x844 PF: > { %s1547_s30 = smul.u32 %s2226_s15, %s2653_s27  ;;  %s1548_s4 = ssub.s32 1, %s2226_s15 }
 0x845   : > { %s1559_s9 = sshll.u32 %s2441_s29, 4  ;;  %s1549_s10 = smul.u32 %s2230_s16, %s1548_s4  ;;  %s2926_s9 = int_to_ptr.vmem [resolvable:$true] %s1559_s9 }
 0x846   : > { %s1535_s0 = scalar_lea.sflag [#allocation6], %s2423_s8  ;;  %s2150_s1 = scalar_lea.vmem %s2926_s9, 1024 }
 0x847   : > { %s1550_s26 = sadd.s32 %s1549_s10, %s1547_s30  ;;  %p2151_p4 = scmp.ne.s32.totalorder %s2926_s9, %s2150_s1 }
 0x848   : > { %s1865_s5 = sshll.u32 %s1550_s26, 4  ;;  %s2246_s15 = smov [#allocation5]  }
 0x849   : > { %s1556_s11 = sadd.s32 %s2230_s16, %s1865_s5  ;;  %p2152_p5 = pnand %p2151_p4, %p2332_p6 }
 0x84a   : > { %s1852_s24 = sshll.u32 %s1556_s11, 7  ;;  %s2154_s29 = sshll.u32 %s2246_s15, 4  ;;  %s2155_s29 = int_to_ptr.vmem [resolvable:$false] %s2154_s29 }
 0x84b   : > { %s2932_s28 = scalar_lea.hbm %s2987_s2, %s1852_s24  ;;  %p2153_p7 = pneg %p2152_p5 }
 0x84c   : > { %s2156_s27 = scalar_lea.vmem %s2155_s29, 2048  ;;  %p2157_p8 = scmp.lt.s32.totalorder %s2926_s9, %s2155_s29 }
 0x84d   : > { %p2158_p9 = scmp.lt.s32.totalorder %s2156_s27, %s2150_s1 }
 0x84f   : > { %p2159_p11 = por %p2158_p9, %p2157_p8 }
 0x851   : > { %p2160_p12 = pnand %p2159_p11, %p2153_p7 }
 0x853   : > { %2163 = shalt.err (!%p2160_p12)
}
 0x854   : > { %s2164_s16 = scalar_lea.hbm %s2932_s28, 1024  ;;  %s2168_s10 = scalar_lea.hbm %s2987_s2, 4096 }
 0x855   : > { %p2165_p13 = scmp.ne.s32.totalorder %s2932_s28, %s2164_s16  ;;  %p2169_p2 = scmp.lt.s32.totalorder %s2932_s28, %s2987_s2 }
 0x856   : > { %p2170_p3 = scmp.lt.s32.totalorder %s2168_s10, %s2164_s16 }
 0x857   : > { %p2166_p0 = pnand %p2165_p13, %p2332_p6 }
 0x858   : > { %p2171_p4 = por %p2170_p3, %p2169_p2 }
 0x859   : > { %p2167_p1 = pneg %p2166_p0 }
 0x85b   : > { %p2172_p5 = pnand %p2171_p4, %p2167_p1 }
 0x85d   : > { %2175 = shalt.err (!%p2172_p5)
}
 0x85e   : > { %s2247_s1 = smov 128   ;;  %s2248_s11 = smov 256  }
 0x85f   : > { %s2249_s24 = smov 8  }
 0x860   : > { %1866 = dma.vmem_to_hbm [thread:$0]  (%p2332_p6), %s2926_s9, 1024, %s2932_s28, %s1535_s0, %s2247_s1, %s2248_s11, %s2249_s24  }
 0x861 PF: > { %p1872_p7 = scmp.ge.s32.totalorder %s2242_s19, 2  ;;  %s1577_s25 = sand.u32 1, %s2214_s12  }
 0x862   : > { %s1578_s6 = scalar_lea.sflag [#allocation6], %s1577_s25 }
 0x863   : > { %p1869_p8 = pnand %p1872_p7, %p2339_p10 }
 0x865   : > { %p1870_p9 = pneg %p1869_p8 }
 0x867   : > { %2209 = dma.done.wait (%p1870_p9), %s1578_s6, 1024  }
 0x868   : > { %2211 = vsyncadd (%p1870_p9), %s1578_s6, 4294966272  ;;  %s17_s19 = sadd.s32 1, %s2242_s19   ;;  %s2995_s12 = smov %s2218_s13 }
 0x869   : > { %p14_p11 = scmp.ge.s32.totalorder %s17_s19, 6   ;;  %s2996_s13 = smov %s2222_s14 }
 0x86a   : > { %s2997_s14 = smov %s2344_s20  ;;  %s2998_s15 = smov %s2234_s17 }
 0x86b   : > { %s2999_s16 = smov %s2238_s18  ;;  %s3000_s17 = smov %s3003_s21 }
 0x86c   : > { %s3001_s18 = smov %s3007_s22  ;;  %16 = sbr.rel (!%p14_p11) target bundleno = 8 (0x8), region = 130 }
 0x871   :  { %1590 = vsyncpa [#allocation6], 1 }
 0x872   :  { %1592 = vsyncpa [#allocation6 + $0x1], 1 }

</bundles_post_ra>
